<compile_context>
chip_gen: v7x
topology: tpu7x:2x2x1
jax: 0.10.0
libtpu: 0.0.40
codegen_flags: <defaults>
</compile_context>

<pallas_src>
import jax
import jax.numpy as jnp
from jax import lax
from jax.experimental import pallas as pl
from jax.experimental.pallas import tpu as pltpu


def _bmm_h(a, b):
    """Head-batched matmul: (H, M, K) x (H, K, N) -> (H, M, N), f32 accumulate."""
    return lax.dot_general(
        a, b,
        dimension_numbers=(((2,), (1,)), ((0,), (0,))),
        preferred_element_type=jnp.float32)


def _attention_kernel(xq_ref, xkv_ref, wq_ref, wk_ref, wv_ref, wproj_ref,
                      bias_ref, o_ref):
    """One grid step == (batch element b, query tile qi).

    xq_ref   : (tq, C)   bf16  query-token slab for this tile
    xkv_ref  : (N,  C)   bf16  all tokens of batch b (source of K/V)
    wq_ref   : (H, C, D) bf16  Q projection per head (softmax scale pre-folded)
    wk_ref   : (H, C, D) bf16
    wv_ref   : (H, C, D) bf16
    wproj_ref: (H, D, C) bf16  output projection split per head
    bias_ref : (1, C)    f32
    o_ref    : (tq, C)   output dtype
    """
    H, _, D = wq_ref.shape
    tq, C = xq_ref.shape
    N = xkv_ref.shape[0]

    # Broadcast tokens over the head axis; projections are head-batched bf16
    # MXU matmuls with f32 accumulation (same total FLOPs as one (., C)x(C, C)
    # GEMM, but the result lands directly in (H, ., D) layout — no in-kernel
    # reshape/transpose of activations, no per-head concat).
    xq = jnp.broadcast_to(xq_ref[...], (H, tq, C))
    xkv = jnp.broadcast_to(xkv_ref[...], (H, N, C))

    q = _bmm_h(xq, wq_ref[...])            # (H, tq, D) f32 (scale folded in)
    k = _bmm_h(xkv, wk_ref[...])           # (H, N,  D) f32
    v = _bmm_h(xkv, wv_ref[...])           # (H, N,  D) f32

    # Scores: batched over heads, contracting D on both operands (no explicit
    # K transpose feeding the XLU).
    s = lax.dot_general(
        q.astype(jnp.bfloat16), k.astype(jnp.bfloat16),
        dimension_numbers=(((2,), (2,)), ((0,), (0,))),
        preferred_element_type=jnp.float32)                    # (H, tq, N)

    # Numerically-stable softmax, f32 throughout; normalization deferred.
    m = jnp.max(s, axis=-1, keepdims=True)
    p = jnp.exp(s - m)                                         # unnormalized
    denom = jnp.sum(p, axis=-1, keepdims=True)                 # (H, tq, 1)

    ctx = lax.dot_general(
        p.astype(jnp.bfloat16), v.astype(jnp.bfloat16),
        dimension_numbers=(((2,), (1,)), ((0,), (0,))),
        preferred_element_type=jnp.float32)                    # (H, tq, D)
    ctx = ctx * pl.reciprocal(denom, approx=True)              # EUP divide

    # Output projection decomposed per head: y = sum_h ctx_h @ Wproj_h, so no
    # head-concat relayout; the H-axis reduce is a cheap major-dim add.
    y_h = _bmm_h(ctx.astype(jnp.bfloat16), wproj_ref[...])     # (H, tq, C)
    y = jnp.sum(y_h, axis=0) + bias_ref[...]                   # (tq, C) f32
    o_ref[...] = y.astype(o_ref.dtype)


def attention_pallas(x, w_qkv, w_proj, b_proj, *, num_heads, q_tile=128):
    """x: (B, N, C); w_qkv: (3C, C) torch layout; w_proj: (C, C); b_proj: (C,)."""
    B, N, C = x.shape
    assert C % num_heads == 0, "dim should be divisible by num_heads"
    H = num_heads
    D = C // H
    scale = D ** (-0.5)

    # Query tile: fall back to full N when it does not tile evenly (keys are
    # never tiled, so no key-side softmax masking is ever required).
    tq = q_tile if (N % q_tile == 0) else N
    nq = N // tq

    # ---- parameter prep (cached once per module in a real deployment) ------
    # torch Linear: y = x @ W.T; the 3C output axis splits as (3, H, D).
    wqkv_t = w_qkv.T                                            # (C, 3C)

    def per_head(block):                                        # (C, C) -> (H, C, D)
        return jnp.transpose(block.reshape(C, H, D), (1, 0, 2))

    wq = (per_head(wqkv_t[:, 0 * C:1 * C]) * scale).astype(jnp.bfloat16)
    wk = per_head(wqkv_t[:, 1 * C:2 * C]).astype(jnp.bfloat16)
    wv = per_head(wqkv_t[:, 2 * C:3 * C]).astype(jnp.bfloat16)
    wproj_h = w_proj.T.reshape(H, D, C).astype(jnp.bfloat16)    # (H, D, C)
    bias2d = b_proj.reshape(1, C).astype(jnp.float32)
    x_bf = x.astype(jnp.bfloat16)                               # halve x DMA bytes

    def weight_spec(shape):
        return pl.BlockSpec(shape, lambda b, qi, _s=shape: (0,) * len(_s))

    return pl.pallas_call(
        _attention_kernel,
        out_shape=jax.ShapeDtypeStruct((B, N, C), x.dtype),
        grid=(B, nq),
        in_specs=[
            pl.BlockSpec((None, tq, C), lambda b, qi: (b, qi, 0)),  # Q tokens
            pl.BlockSpec((None, N, C), lambda b, qi: (b, 0, 0)),    # K/V tokens
            weight_spec((H, C, D)),     # wq  (grid-invariant -> VMEM resident)
            weight_spec((H, C, D)),     # wk
            weight_spec((H, C, D)),     # wv
            weight_spec((H, D, C)),     # wproj
            weight_spec((1, C)),        # bias
        ],
        out_specs=pl.BlockSpec((None, tq, C), lambda b, qi: (b, qi, 0)),
        compiler_params=pltpu.CompilerParams(
            dimension_semantics=("parallel", "parallel"),
            # Explicit VMEM budget with headroom: safe on v5e/v6e (128 MiB
            # physical) and v7x (64 MiB); bf16 weights keep ViT-B/L well under.
            vmem_limit_bytes=48 * 1024 * 1024),
    )(x_bf, x_bf, wq, wk, wv, wproj_h, bias2d)


def attention_ref(x, w_qkv, w_proj, b_proj, *, num_heads):
    """Pure-JAX f32 reference mirroring the PyTorch forward exactly."""
    B, N, C = x.shape
    D = C // num_heads
    scale = D ** (-0.5)
    qkv = x @ w_qkv.T                                           # (B, N, 3C)
    qkv = qkv.reshape(B, N, 3, num_heads, D)
    qkv = jnp.transpose(qkv, (2, 0, 3, 1, 4))                   # (3, B, H, N, D)
    q, k, v = qkv[0], qkv[1], qkv[2]
    attn = jnp.einsum('bhnd,bhmd->bhnm', q, k) * scale
    attn = jax.nn.softmax(attn, axis=-1)
    out = jnp.einsum('bhnm,bhmd->bhnd', attn, v)                # (B, H, N, D)
    out = jnp.transpose(out, (0, 2, 1, 3)).reshape(B, N, C)
    return out @ w_proj.T + b_proj


if __name__ == "__main__":
    # Small but layout-representative shapes: C multiple of 128 (lane-dense
    # stores), head_dim=64 like ViT, N tiled into two 128-row query tiles.
    B, N, C, num_heads = 2, 256, 256, 4

    key = jax.random.PRNGKey(0)
    kx, kqkv, kproj, kbias = jax.random.split(key, 4)

    x = jax.random.normal(kx, (B, N, C), dtype=jnp.float32)
    # torch Linear weight layout: (out_features, in_features).
    w_qkv = jax.random.normal(kqkv, (3 * C, C), dtype=jnp.float32) * 0.05
    w_proj = jax.random.normal(kproj, (C, C), dtype=jnp.float32) * 0.05
    b_proj = jax.random.normal(kbias, (C,), dtype=jnp.float32) * 0.05

    out = attention_pallas(x, w_qkv, w_proj, b_proj, num_heads=num_heads)
    out = jax.block_until_ready(out)

    ref = attention_ref(x, w_qkv, w_proj, b_proj, num_heads=num_heads)
    assert out.shape == (B, N, C)
    max_err = float(jnp.max(jnp.abs(out - ref)))
    # bf16 MXU operands + approximate reciprocal -> loose-but-meaningful bound.
    assert jnp.allclose(out, ref, atol=3e-2, rtol=3e-2), (
        f"mismatch vs reference (max abs err {max_err})")

    print("KERNEL_OK")
</pallas_src>

<mosaic_0001>
module attributes {stable_mosaic.version = 11 : i64} {
  func.func @_attention_kernel(%arg0: i32, %arg1: i32, %arg2: memref<1x128x256xbf16, #tpu.memory_space<vmem>>, %arg3: memref<1x256x256xbf16, #tpu.memory_space<vmem>>, %arg4: memref<4x256x64xbf16, #tpu.memory_space<vmem>>, %arg5: memref<4x256x64xbf16, #tpu.memory_space<vmem>>, %arg6: memref<4x256x64xbf16, #tpu.memory_space<vmem>>, %arg7: memref<4x64x256xbf16, #tpu.memory_space<vmem>>, %arg8: memref<1x256xf32, #tpu.memory_space<vmem>>, %arg9: memref<1x128x256xf32, #tpu.memory_space<vmem>>) attributes {dimension_semantics = [#tpu.dimension_semantics<parallel>, #tpu.dimension_semantics<parallel>], iteration_bounds = array<i64: 2, 2>, scalar_prefetch = 0 : i64, scratch_operands = 0 : i64, tpu.core_type = #tpu.core_type<tc>, window_params = [{transform_indices = @transform_0, window_bounds = array<i64: 1, 128, 256>}, {transform_indices = @transform_1, window_bounds = array<i64: 1, 256, 256>}, {pipeline_mode = #tpu.pipeline_mode<synchronous>, transform_indices = @transform_2, window_bounds = array<i64: 4, 256, 64>}, {pipeline_mode = #tpu.pipeline_mode<synchronous>, transform_indices = @transform_3, window_bounds = array<i64: 4, 256, 64>}, {pipeline_mode = #tpu.pipeline_mode<synchronous>, transform_indices = @transform_4, window_bounds = array<i64: 4, 256, 64>}, {pipeline_mode = #tpu.pipeline_mode<synchronous>, transform_indices = @transform_5, window_bounds = array<i64: 4, 64, 256>}, {pipeline_mode = #tpu.pipeline_mode<synchronous>, transform_indices = @transform_6, window_bounds = array<i64: 1, 256>}, {transform_indices = @transform_7, window_bounds = array<i64: 1, 128, 256>}]} {
    %c0 = arith.constant 0 : index
    %c0_0 = arith.constant 0 : index
    %c0_1 = arith.constant 0 : index
    %0 = vector.load %arg2[%c0, %c0_0, %c0_1] : memref<1x128x256xbf16, #tpu.memory_space<vmem>>, vector<1x128x256xbf16>
    %1 = vector.shape_cast %0 : vector<1x128x256xbf16> to vector<128x256xbf16>
    %2 = vector.shape_cast %1 : vector<128x256xbf16> to vector<1x128x256xbf16>
    %3 = vector.broadcast %2 : vector<1x128x256xbf16> to vector<4x128x256xbf16>
    %c0_2 = arith.constant 0 : index
    %c0_3 = arith.constant 0 : index
    %c0_4 = arith.constant 0 : index
    %4 = vector.load %arg3[%c0_2, %c0_3, %c0_4] : memref<1x256x256xbf16, #tpu.memory_space<vmem>>, vector<1x256x256xbf16>
    %5 = vector.shape_cast %4 : vector<1x256x256xbf16> to vector<256x256xbf16>
    %6 = vector.shape_cast %5 : vector<256x256xbf16> to vector<1x256x256xbf16>
    %7 = vector.broadcast %6 : vector<1x256x256xbf16> to vector<4x256x256xbf16>
    %c0_5 = arith.constant 0 : index
    %c0_6 = arith.constant 0 : index
    %c0_7 = arith.constant 0 : index
    %8 = vector.load %arg4[%c0_5, %c0_6, %c0_7] : memref<4x256x64xbf16, #tpu.memory_space<vmem>>, vector<4x256x64xbf16>
    %cst = arith.constant dense<0.000000e+00> : vector<4x128x64xf32>
    %9 = tpu.matmul %3, %8, %cst {dimension_numbers = #tpu.dot_dimension_numbers<[2], [1], [1], [2], [0, 0, 0, 1, 1, 2], [0], [0]>} : vector<4x128x256xbf16>, vector<4x256x64xbf16>, vector<4x128x64xf32> -> vector<4x128x64xf32>
    %c0_8 = arith.constant 0 : index
    %c0_9 = arith.constant 0 : index
    %c0_10 = arith.constant 0 : index
    %10 = vector.load %arg5[%c0_8, %c0_9, %c0_10] : memref<4x256x64xbf16, #tpu.memory_space<vmem>>, vector<4x256x64xbf16>
    %cst_11 = arith.constant dense<0.000000e+00> : vector<4x256x64xf32>
    %11 = tpu.matmul %7, %10, %cst_11 {dimension_numbers = #tpu.dot_dimension_numbers<[2], [1], [1], [2], [0, 0, 0, 1, 1, 2], [0], [0]>} : vector<4x256x256xbf16>, vector<4x256x64xbf16>, vector<4x256x64xf32> -> vector<4x256x64xf32>
    %c0_12 = arith.constant 0 : index
    %c0_13 = arith.constant 0 : index
    %c0_14 = arith.constant 0 : index
    %12 = vector.load %arg6[%c0_12, %c0_13, %c0_14] : memref<4x256x64xbf16, #tpu.memory_space<vmem>>, vector<4x256x64xbf16>
    %cst_15 = arith.constant dense<0.000000e+00> : vector<4x256x64xf32>
    %13 = tpu.matmul %7, %12, %cst_15 {dimension_numbers = #tpu.dot_dimension_numbers<[2], [1], [1], [2], [0, 0, 0, 1, 1, 2], [0], [0]>} : vector<4x256x256xbf16>, vector<4x256x64xbf16>, vector<4x256x64xf32> -> vector<4x256x64xf32>
    %14 = arith.truncf %9 : vector<4x128x64xf32> to vector<4x128x64xbf16>
    %15 = arith.truncf %11 : vector<4x256x64xf32> to vector<4x256x64xbf16>
    %cst_16 = arith.constant dense<0.000000e+00> : vector<4x128x256xf32>
    %16 = tpu.matmul %14, %15, %cst_16 {dimension_numbers = #tpu.dot_dimension_numbers<[2], [2], [1], [1], [0, 0, 0, 1, 1, 1], [0], [0]>} : vector<4x128x64xbf16>, vector<4x256x64xbf16>, vector<4x128x256xf32> -> vector<4x128x256xf32>
    %cst_17 = arith.constant dense<0xFF800000> : vector<4x128xf32>
    %17 = vector.multi_reduction <maximumf>, %16, %cst_17 [2] : vector<4x128x256xf32> to vector<4x128xf32>
    %18 = vector.shape_cast %17 : vector<4x128xf32> to vector<4x128x1xf32>
    %19 = vector.broadcast %18 : vector<4x128x1xf32> to vector<4x128x256xf32>
    %20 = arith.subf %16, %19 : vector<4x128x256xf32>
    %21 = math.exp %20 : vector<4x128x256xf32>
    %cst_18 = arith.constant dense<0.000000e+00> : vector<4x128xf32>
    %22 = vector.multi_reduction <add>, %21, %cst_18 [2] : vector<4x128x256xf32> to vector<4x128xf32>
    %23 = vector.shape_cast %22 : vector<4x128xf32> to vector<4x128x1xf32>
    %24 = arith.truncf %21 : vector<4x128x256xf32> to vector<4x128x256xbf16>
    %25 = arith.truncf %13 : vector<4x256x64xf32> to vector<4x256x64xbf16>
    %cst_19 = arith.constant dense<0.000000e+00> : vector<4x128x64xf32>
    %26 = tpu.matmul %24, %25, %cst_19 {dimension_numbers = #tpu.dot_dimension_numbers<[2], [1], [1], [2], [0, 0, 0, 1, 1, 2], [0], [0]>} : vector<4x128x256xbf16>, vector<4x256x64xbf16>, vector<4x128x64xf32> -> vector<4x128x64xf32>
    %27 = tpu.reciprocal %23 {approx = true} : vector<4x128x1xf32> -> vector<4x128x1xf32>
    %28 = vector.broadcast %27 : vector<4x128x1xf32> to vector<4x128x64xf32>
    %29 = arith.mulf %26, %28 : vector<4x128x64xf32>
    %30 = arith.truncf %29 : vector<4x128x64xf32> to vector<4x128x64xbf16>
    %c0_20 = arith.constant 0 : index
    %c0_21 = arith.constant 0 : index
    %c0_22 = arith.constant 0 : index
    %31 = vector.load %arg7[%c0_20, %c0_21, %c0_22] : memref<4x64x256xbf16, #tpu.memory_space<vmem>>, vector<4x64x256xbf16>
    %cst_23 = arith.constant dense<0.000000e+00> : vector<4x128x256xf32>
    %32 = tpu.matmul %30, %31, %cst_23 {dimension_numbers = #tpu.dot_dimension_numbers<[2], [1], [1], [2], [0, 0, 0, 1, 1, 2], [0], [0]>} : vector<4x128x64xbf16>, vector<4x64x256xbf16>, vector<4x128x256xf32> -> vector<4x128x256xf32>
    %cst_24 = arith.constant dense<0.000000e+00> : vector<128x256xf32>
    %33 = vector.multi_reduction <add>, %32, %cst_24 [0] : vector<4x128x256xf32> to vector<128x256xf32>
    %c0_25 = arith.constant 0 : index
    %c0_26 = arith.constant 0 : index
    %34 = vector.load %arg8[%c0_25, %c0_26] : memref<1x256xf32, #tpu.memory_space<vmem>>, vector<1x256xf32>
    %35 = vector.broadcast %34 : vector<1x256xf32> to vector<128x256xf32>
    %36 = arith.addf %33, %35 : vector<128x256xf32>
    %c0_27 = arith.constant 0 : index
    %c0_28 = arith.constant 0 : index
    %c0_29 = arith.constant 0 : index
    %37 = vector.load %arg9[%c0_27, %c0_28, %c0_29] : memref<1x128x256xf32, #tpu.memory_space<vmem>>, vector<1x128x256xf32>
    %38 = vector.shape_cast %37 : vector<1x128x256xf32> to vector<128x256xf32>
    %39 = vector.shape_cast %36 : vector<128x256xf32> to vector<1x128x256xf32>
    tpu.vector_store %arg9[%c0_27, %c0_28, %c0_29], %39 {strides = array<i32>} : memref<1x128x256xf32, #tpu.memory_space<vmem>>, vector<1x128x256xf32>,
    return
  }
  func.func @transform_0(%arg0: i32, %arg1: i32) -> (i32, i32, i32) {
    %c0_i32 = arith.constant 0 : i32
    %c0_i32_0 = arith.constant 0 : i32
    return %arg0, %arg1, %c0_i32 : i32, i32, i32
  }
  func.func @transform_1(%arg0: i32, %arg1: i32) -> (i32, i32, i32) {
    %c0_i32 = arith.constant 0 : i32
    %c0_i32_0 = arith.constant 0 : i32
    %c0_i32_1 = arith.constant 0 : i32
    return %arg0, %c0_i32, %c0_i32_0 : i32, i32, i32
  }
  func.func @transform_2(%arg0: i32, %arg1: i32) -> (i32, i32, i32) {
    %c0_i32 = arith.constant 0 : i32
    %c0_i32_0 = arith.constant 0 : i32
    %c0_i32_1 = arith.constant 0 : i32
    %c0_i32_2 = arith.constant 0 : i32
    return %c0_i32, %c0_i32_0, %c0_i32_1 : i32, i32, i32
  }
  func.func @transform_3(%arg0: i32, %arg1: i32) -> (i32, i32, i32) {
    %c0_i32 = arith.constant 0 : i32
    %c0_i32_0 = arith.constant 0 : i32
    %c0_i32_1 = arith.constant 0 : i32
    %c0_i32_2 = arith.constant 0 : i32
    return %c0_i32, %c0_i32_0, %c0_i32_1 : i32, i32, i32
  }
  func.func @transform_4(%arg0: i32, %arg1: i32) -> (i32, i32, i32) {
    %c0_i32 = arith.constant 0 : i32
    %c0_i32_0 = arith.constant 0 : i32
    %c0_i32_1 = arith.constant 0 : i32
    %c0_i32_2 = arith.constant 0 : i32
    return %c0_i32, %c0_i32_0, %c0_i32_1 : i32, i32, i32
  }
  func.func @transform_5(%arg0: i32, %arg1: i32) -> (i32, i32, i32) {
    %c0_i32 = arith.constant 0 : i32
    %c0_i32_0 = arith.constant 0 : i32
    %c0_i32_1 = arith.constant 0 : i32
    %c0_i32_2 = arith.constant 0 : i32
    return %c0_i32, %c0_i32_0, %c0_i32_1 : i32, i32, i32
  }
  func.func @transform_6(%arg0: i32, %arg1: i32) -> (i32, i32) {
    %c0_i32 = arith.constant 0 : i32
    %c0_i32_0 = arith.constant 0 : i32
    %c0_i32_1 = arith.constant 0 : i32
    return %c0_i32, %c0_i32_0 : i32, i32
  }
  func.func @transform_7(%arg0: i32, %arg1: i32) -> (i32, i32, i32) {
    %c0_i32 = arith.constant 0 : i32
    %c0_i32_0 = arith.constant 0 : i32
    return %arg0, %arg1, %c0_i32 : i32, i32, i32
  }
}

</mosaic_0001>

<bundles_post_ra>
// kernel: tpu_custom_call.1
= control target key start
LH: loop header
LB: loop body
LE: loop exit
PB: predicated region body
PF: predicated region fallthrough
CT: control target
= control target key end

     0   :  { %12 = vsyncpa [#allocation3], 0  ;;  %s13923_s0 = inlined_call_operand.vmem [shape: bf16[2,256,256], index: 0, kind: input, shape index: {}]   ;;  %s13924_s1 = inlined_call_operand.vmem [shape: bf16[2,256,256], index: 1, kind: input, shape index: {}]   ;;  %s13925_s2 = inlined_call_operand.vmem [shape: bf16[4,256,64], index: 2, kind: input, shape index: {}]   ;;  %s13926_s3 = inlined_call_operand.vmem [shape: bf16[4,256,64], index: 3, kind: input, shape index: {}]   ;;  %s13927_s4 = inlined_call_operand.vmem [shape: bf16[4,256,64], index: 4, kind: input, shape index: {}]   ;;  %s13928_s5 = inlined_call_operand.vmem [shape: bf16[4,64,256], index: 5, kind: input, shape index: {}]   ;;  %s13929_s6 = inlined_call_operand.vmem [shape: f32[1,256], index: 6, kind: input, shape index: {}]   ;;  %s13930_s7 = inlined_call_operand.hbm [shape: f32[2,256,256], index: 7, kind: output, shape index: {}]  }
   0x1   :  { %14 = vsyncpa [#allocation3 + $0x1], 0  ;;  %s10134_s24 = smov 0   ;;  %s10136_s25 = smov 0  }
   0x2   :  { %s10138_s26 = smov 0   ;;  %s10140_s27 = smov 0  }
   0x3   :  { %s10142_s28 = smov 0   ;;  %s10144_s29 = smov 0  }
   0x4   :  { %s10146_s30 = smov 0   ;;  %s10148_s8 = smov 0  }
   0x5 LB: > { %14152 = sst [smem:[#allocation5_spill]] %s10084_s30  ;;  %s7139_s9 = sadd.s32 4294967295, %s10088_s8   ;;  %s10088_s8 = sphi %s10148_s8, %s20_s8   ;;  %s10084_s30 = sphi %s10146_s30, %s14710_s30   ;;  %s10080_s29 = sphi %s10144_s29, %s14715_s29   ;;  %s10076_s28 = sphi %s10142_s28, %s14708_s28   ;;  %s10072_s27 = sphi %s10140_s27, %s14714_s27   ;;  %s10068_s26 = sphi %s10138_s26, %s14713_s26   ;;  %s10064_s25 = sphi %s10136_s25, %s14712_s25   ;;  %s10060_s24 = sphi %s10134_s24, %s14711_s24  }
   0x6   : > { %s7140_s10 = sadd.s32 4294967294, %s10088_s8   ;;  %s29_s11 = sadd.s32 1, %s10080_s29 }
   0x7   : > { %p30_p0 = scmp.ge.s32.totalorder %s29_s11, 2  ;;  %s32_s12 = sadd.s32 1, %s10084_s30 }
   0x8   : > { %p210_p1 = scmp.ne.s32.totalorder %s10068_s26, %s10064_s25  ;;  %p211_p2 = scmp.eq.s32.totalorder %s7139_s9, 3 }
   0x9   : > { %s14717_s11 = smov (%p30_p0, %s29_s11), 0  ;;  %s14719_s12 = smov (!%p30_p0, %s32_s12), %s10084_s30 }
   0xa   : > { %14153 = sst [smem:[#allocation6_spill]] %s14717_s11  ;;  %s196_s13 = ssub.s32 %s10080_s29, %s14717_s11 }
   0xb   : > { %p10185_p3 = por %p211_p2, %p210_p1  ;;  %p34_p4 = scmp.ge.s32.totalorder %s14719_s12, 2 }
   0xc   : > { %p216_p5 = scmp.ne.s32.totalorder %s10064_s25, %s10060_s24  ;;  %p217_p6 = scmp.eq.s32.totalorder %s7140_s10, 3 }
   0xd   : > { %p7143_p7 = scmp.ge.s32.totalorder %s10088_s8, 1  ;;  %s14721_s12 = smov (%p34_p4, %s14719_s12), 0 }
   0xe   : > { %14155 = sst [smem:[#allocation7_spill]] %s14721_s12  ;;  %p10194_p8 = por %p217_p6, %p216_p5 }
   0xf   : > { %p272_p9 = scmp.lt.s32.totalorder %s10088_s8, 5  ;;  %s195_s16 = ssub.s32 %s10084_s30, %s14721_s12 }
  0x10   : > { %s200_s17 = sadd.s32 1, %s10068_s26  ;;  %s197_s18 = sor.u32 %s196_s13, %s195_s16 }
  0x11   : > { %p273_p10 = pnand %p7143_p7, %p272_p9  ;;  %p198_p11 = scmp.eq.s32.totalorder %s197_s18, 0 }
  0x13   : > { %s10203_s19 = scalar_select %p198_p11, %s10068_s26, %s200_s17  }
  0x14   : > { %276 = sbr.rel (%p273_p10) target bundleno = 1846 (0x736), region = 48 }
  0x1b   : > { %v9234_v0 = vld [vmem:[%s13925_s2 + $0x40] sm:$0xff]   ;;  %v9238_v4 = vld [vmem:[%s13925_s2 + $0x48] sm:$0xff]   ;;  %v9242_v8 = vld [vmem:[%s13925_s2 + $0x50] sm:$0xff]   ;;  %s7145_s20 = sshll.u32 %s10072_s27, 4  ;;  %p315_p12 = scmp.lt.s32.totalorder %s10076_s28, 1  ;;  %vm3928_vm0 = vcmask 523264  }
  0x1c   : > { %v9235_v1 = vld [vmem:[%s13925_s2 + $0xc0] sm:$0xff]   ;;  %7496 = vmatprep.subr.bf16.mxu0 %v9234_v0  ;;  %v9239_v5 = vld [vmem:[%s13925_s2 + $0xc8] sm:$0xff]   ;;  %v9243_v9 = vld [vmem:[%s13925_s2 + $0xd0] sm:$0xff]   ;;  %p317_p13 = scmp.lt.s32.totalorder %s7145_s20, 31  ;;  %s7490_s18 = sshll.u32 %s10076_s28, 6 }
  0x1d   : > { %v9236_v2 = vld [vmem:[%s13925_s2] sm:$0xff]   ;;  %7560 = vmatprep.subr.bf16.mxu1 %v9235_v1  ;;  %v9240_v6 = vld [vmem:[%s13925_s2 + $0x8] sm:$0xff]   ;;  %v9244_v10 = vld [vmem:[%s13925_s2 + $0x10] sm:$0xff]   ;;  %s10256_s9 = scalar_select %p315_p12, %s10076_s28, 1 }
  0x1e   : > { %v9237_v3 = vld [vmem:[%s13925_s2 + $0x80] sm:$0xff]   ;;  %7497 = vmatpush3.bf16.msra.mxu0 %v9236_v2  ;;  %v9241_v7 = vld [vmem:[%s13925_s2 + $0x88] sm:$0xff]   ;;  %v9245_v11 = vld [vmem:[%s13925_s2 + $0x90] sm:$0xff]   ;;  %s14723_s20 = smov (!%p317_p13, %s7145_s20), 31 }
  0x1f   : > { %7561 = vmatpush3.bf16.msra.mxu1 %v9237_v3  ;;  %7498 = vmatprep.subr.bf16.mxu0 %v9238_v4  ;;  %v9246_v12 = vld [vmem:[%s13925_s2 + $0x58] sm:$0xff]   ;;  %v9250_v16 = vld [vmem:[%s13925_s2 + $0x60] sm:$0xff]   ;;  %s7147_s12 = sshll.u32 %s10256_s9, 6  ;;  %v9254_v20 = vld [vmem:[%s13925_s2 + $0x68] sm:$0xff]   ;;  %s7146_s11 = sshll.u32 %s14723_s20, 1 }
  0x20   : > { %7562 = vmatprep.subr.bf16.mxu1 %v9239_v5  ;;  %v9247_v13 = vld [vmem:[%s13925_s2 + $0xd8] sm:$0xff]   ;;  %v9251_v17 = vld [vmem:[%s13925_s2 + $0xe0] sm:$0xff]   ;;  %v9255_v21 = vld [vmem:[%s13925_s2 + $0xe8] sm:$0xff]   ;;  %s321_s30 = sadd.s32 %s7147_s12, %s7146_s11  ;;  %s7494_s12 = sshll.u32 %s10256_s9, 8 }
  0x21   : > { %v9248_v14 = vld [vmem:[%s13925_s2 + $0x18] sm:$0xff]   ;;  %v9252_v18 = vld [vmem:[%s13925_s2 + $0x20] sm:$0xff]   ;;  %v9256_v22 = vld [vmem:[%s13925_s2 + $0x28] sm:$0xff]   ;;  %s7148_s21 = sshll.u32 %s321_s30, 2  ;;  %s10531_s23 = scalar_lea.vmem %s13924_s1, %s7494_s12 }
  0x22   : > { %7499 = vmatpush3.bf16.msra.mxu0 %v9240_v6  ;;  %v9249_v15 = vld [vmem:[%s13925_s2 + $0x98] sm:$0xff]   ;;  %v9253_v19 = vld [vmem:[%s13925_s2 + $0xa0] sm:$0xff]   ;;  %v9257_v23 = vld [vmem:[%s13925_s2 + $0xa8] sm:$0xff]   ;;  %s10304_s17 = scalar_lea.vmem %s13923_s0, %s7148_s21  ;;  %s311_s20 = sand.u32 1, %s10064_s25  }
  0x23   : > { %7563 = vmatpush3.bf16.msra.mxu1 %v9241_v7  ;;  %7500 = vmatprep.subr.bf16.mxu0 %v9242_v8  ;;  %v9258_v24 = vld [vmem:[%s13925_s2 + $0x70] sm:$0xff]   ;;  %v9262_v28 = vld [vmem:[%s13925_s2 + $0x78] sm:$0xff]   ;;  %v10313_v32 = vld [vmem:[%s10304_s17 + $0x4] ss:$8 sps:$4 sm:$0xff]   ;;  %s7144_s16 = sshll.u32 %s311_s20, 8  ;;  %s7495_s30 = sshll.u32 %s10072_s27, 5 }
  0x24   : > { %7564 = vmatprep.subr.bf16.mxu1 %v9243_v9  ;;  %v9259_v25 = vld [vmem:[%s13925_s2 + $0xf0] sm:$0xff]   ;;  %v9263_v29 = vld [vmem:[%s13925_s2 + $0xf8] sm:$0xff]   ;;  %v10316_v33 = vld [vmem:[%s10304_s17] ss:$8 sps:$4 sm:$0xff]   ;;  %716 = vmatprep.mubr.bf16.mxu0 %v10313_v32  ;;  %s7039_s22 = sadd.s32 %s7495_s30, %s7490_s18  ;;  %s13871_s10 = scalar_lea.sflag [#allocation3], %s311_s20 }
  0x25   : > { %v9260_v26 = vld [vmem:[%s13925_s2 + $0x30] sm:$0xff]   ;;  %v9264_v30 = vld [vmem:[%s13925_s2 + $0x38] sm:$0xff]   ;;  %909 = vmatprep.mubr.bf16.mxu1 %v10313_v32  ;;  %v9269_v34 = vld [vmem:[%s13925_s2 + $0x1c0] sm:$0xff]   ;;  %s7491_s9 = sshll.u32 %s7039_s22, 7 }
  0x26   : > { %7501 = vmatpush3.bf16.msra.mxu0 %v9244_v10  ;;  %v9261_v27 = vld [vmem:[%s13925_s2 + $0xb0] sm:$0xff]   ;;  %v9265_v31 = vld [vmem:[%s13925_s2 + $0xb8] sm:$0xff]   ;;  %v9270_v35 = vld [vmem:[%s13925_s2 + $0x180] sm:$0xff]   ;;  %s13861_s11 = scalar_lea.hbm %s13930_s7, %s7491_s9 }
  0x27   : > { %7565 = vmatpush3.bf16.msra.mxu1 %v9245_v11  ;;  %7502 = vmatprep.subr.bf16.mxu0 %v9246_v12  ;;  %v10329_v36 = vld [vmem:[%s10304_s17 + $0x14] ss:$8 sps:$4 sm:$0xff]   ;;  %v9274_v37 = vld [vmem:[%s13925_s2 + $0x1c8] sm:$0xff]   ;;  %v10340_v39 = vld [vmem:[%s10304_s17 + $0x10] ss:$8 sps:$4 sm:$0xff]  }
  0x28   : > { %7566 = vmatprep.subr.bf16.mxu1 %v9247_v13  ;;  %v9275_v38 = vld [vmem:[%s13925_s2 + $0x188] sm:$0xff]   ;;  %v9279_v41 = vld [vmem:[%s13925_s2 + $0x1d0] sm:$0xff]   ;;  %v9284_v43 = vld [vmem:[%s13925_s2 + $0x1d8] sm:$0xff]  }
  0x29   : > { %v10343_v40 = vld [vmem:[%s10304_s17 + $0x24] ss:$8 sps:$4 sm:$0xff]   ;;  %v9280_v42 = vld [vmem:[%s13925_s2 + $0x190] sm:$0xff]   ;;  %v9285_v44 = vld [vmem:[%s13925_s2 + $0x198] sm:$0xff]  }
  0x2a   : > { %7503 = vmatpush3.bf16.msra.mxu0 %v9248_v14  ;;  %v10362_v45 = vld [vmem:[%s10304_s17 + $0x20] ss:$8 sps:$4 sm:$0xff]   ;;  %v10365_v46 = vld [vmem:[%s10304_s17 + $0x34] ss:$8 sps:$4 sm:$0xff]   ;;  %v10387_v52 = vld [vmem:[%s10304_s17 + $0x30] ss:$8 sps:$4 sm:$0xff]  }
  0x2b   : > { %7567 = vmatpush3.bf16.msra.mxu1 %v9249_v15  ;;  %7504 = vmatprep.subr.bf16.mxu0 %v9250_v16  ;;  %v9289_v47 = vld [vmem:[%s13925_s2 + $0x140] sm:$0xff]   ;;  %v9293_v51 = vld [vmem:[%s13925_s2 + $0x148] sm:$0xff]   ;;  %v9298_v55 = vld [vmem:[%s13925_s2 + $0x150] sm:$0xff]  }
  0x2c   : > { %7568 = vmatprep.subr.bf16.mxu1 %v9251_v17  ;;  %v9290_v48 = vld [vmem:[%s13925_s2 + $0x1e0] sm:$0xff]   ;;  %v9294_v53 = vld [vmem:[%s13925_s2 + $0x108] sm:$0xff]   ;;  %v9300_v57 = vld [vmem:[%s13925_s2 + $0x110] sm:$0xff]  }
  0x2d   : > { %v9291_v49 = vld [vmem:[%s13925_s2 + $0x100] sm:$0xff]   ;;  %v9299_v56 = vld [vmem:[%s13925_s2 + $0x1e8] sm:$0xff]   ;;  %v9302_v59 = vld [vmem:[%s13925_s2 + $0x158] sm:$0xff]  }
  0x2e   : > { %7505 = vmatpush3.bf16.msra.mxu0 %v9252_v18  ;;  %v9292_v50 = vld [vmem:[%s13925_s2 + $0x1a0] sm:$0xff]   ;;  %v9301_v58 = vld [vmem:[%s13925_s2 + $0x1a8] sm:$0xff]   ;;  %v9303_v61 = vld [vmem:[%s13925_s2 + $0x118] sm:$0xff]  }
  0x2f   : > { %7569 = vmatpush3.bf16.msra.mxu1 %v9253_v19  ;;  %7506 = vmatprep.subr.bf16.mxu0 %v9254_v20  ;;  %v10393_v54 = vld [vmem:[%s10304_s17 + $0x44] ss:$8 sps:$4 sm:$0xff]   ;;  %v10415_v60 = vld [vmem:[%s10304_s17 + $0x40] ss:$8 sps:$4 sm:$0xff]   ;;  %v10421_v62 = vld [vmem:[%s10304_s17 + $0x54] ss:$8 sps:$4 sm:$0xff]  }
  0x30   : > { %7570 = vmatprep.subr.bf16.mxu1 %v9255_v21  ;;  %v9307_v63 = vld [vmem:[%s13925_s2 + $0x160] sm:$0xff]   ;;  %v9308_v0 = vld [vmem:[%s13925_s2 + $0x1f0] sm:$0xff]   ;;  %v9311_v3 = vld [vmem:[%s13925_s2 + $0x168] sm:$0xff]  }
  0x31   : > { %v9309_v1 = vld [vmem:[%s13925_s2 + $0x120] sm:$0xff]   ;;  %v9310_v2 = vld [vmem:[%s13925_s2 + $0x1b0] sm:$0xff]   ;;  %v9312_v4 = vld [vmem:[%s13925_s2 + $0x128] sm:$0xff]  }
  0x32   : > { %7507 = vmatpush3.bf16.msra.mxu0 %v9256_v22  ;;  %v10446_v5 = vld [vmem:[%s10304_s17 + $0x50] ss:$8 sps:$4 sm:$0xff]   ;;  %v10455_v8 = vld [vmem:[%s10304_s17 + $0x64] ss:$8 sps:$4 sm:$0xff]   ;;  %v10477_v14 = vld [vmem:[%s10304_s17 + $0x60] ss:$8 sps:$4 sm:$0xff]  }
  0x33   : > { %7571 = vmatpush3.bf16.msra.mxu1 %v9257_v23  ;;  %7508 = vmatprep.subr.bf16.mxu0 %v9258_v24  ;;  %v9316_v6 = vld [vmem:[%s13925_s2 + $0x170] sm:$0xff]   ;;  %v9317_v7 = vld [vmem:[%s13925_s2 + $0x1f8] sm:$0xff]   ;;  %v9322_v12 = vld [vmem:[%s13926_s3 + $0x40] sm:$0xff]  }
  0x34   : > { %7572 = vmatprep.subr.bf16.mxu1 %v9259_v25  ;;  %v9319_v9 = vld [vmem:[%s13925_s2 + $0x1b8] sm:$0xff]   ;;  %v9318_v10 = vld [vmem:[%s13925_s2 + $0x130] sm:$0xff]   ;;  %v9331_v16 = vld [vmem:[%s13926_s3 + $0x140] sm:$0xff]  }
  0x35   : > { %v9320_v11 = vld [vmem:[%s13925_s2 + $0x178] sm:$0xff]   ;;  %v9323_v18 = vld [vmem:[%s13926_s3] sm:$0xff]   ;;  %v9324_v19 = vld [vmem:[%s13926_s3 + $0x48] sm:$0xff]  }
  0x36   : > { %7509 = vmatpush3.bf16.msra.mxu0 %v9260_v26  ;;  %v9321_v13 = vld [vmem:[%s13925_s2 + $0x138] sm:$0xff]   ;;  %v9333_v20 = vld [vmem:[%s13926_s3 + $0x100] sm:$0xff]   ;;  %v9334_v21 = vld [vmem:[%s13926_s3 + $0x148] sm:$0xff]  }
  0x37   : > { %7573 = vmatpush3.bf16.msra.mxu1 %v9261_v27  ;;  %7510 = vmatprep.subr.bf16.mxu0 %v9262_v28  ;;  %v10480_v15 = vld [vmem:[%s10304_s17 + $0x74] ss:$8 sps:$4 sm:$0xff]   ;;  %v10490_v17 = vld [vmem:[%s10304_s17 + $0x70] ss:$8 sps:$4 sm:$0xff]   ;;  %v9325_v22 = vld [vmem:[%s13926_s3 + $0x8] sm:$0xff]   ;;  %s13795_s17 = scalar_lea.vmem [#allocation2], %s7144_s16 }
  0x38   : > { %7574 = vmatprep.subr.bf16.mxu1 %v9263_v29  ;;  %v9326_v23 = vld [vmem:[%s13926_s3 + $0x50] sm:$0xff]   ;;  %v9335_v24 = vld [vmem:[%s13926_s3 + $0x108] sm:$0xff]   ;;  %v9328_v27 = vld [vmem:[%s13926_s3 + $0x58] sm:$0xff]   ;;  %s7042_s21 = sshll.u32 %s13795_s17, 4  ;;  %s13863_s21 = int_to_ptr.vmem [resolvable:$true] %s7042_s21 }
  0x39   : > { %v9337_v25 = vld [vmem:[%s13926_s3 + $0x150] sm:$0xff]   ;;  %v9340_v29 = vld [vmem:[%s13926_s3 + $0x158] sm:$0xff]   ;;  %s9994_s13 = scalar_lea.vmem %s13863_s21, 4096 }
  0x3a   : > { %7511 = vmatpush3.bf16.msra.mxu0 %v9264_v30  ;;  %v9327_v26 = vld [vmem:[%s13926_s3 + $0x10] sm:$0xff]   ;;  %v9329_v30 = vld [vmem:[%s13926_s3 + $0x18] sm:$0xff]   ;;  %p9995_p0 = scmp.ne.s32.totalorder %s13863_s21, %s9994_s13 }
  0x3b   : > { %7575 = vmatpush3.bf16.msra.mxu1 %v9265_v31  ;;  %7624 = vmatprep.subr.bf16.mxu0 %v9289_v47  ;;  %v9339_v28 = vld [vmem:[%s13926_s3 + $0x110] sm:$0xff]   ;;  %v9330_v31 = vld [vmem:[%s13926_s3 + $0x60] sm:$0xff]   ;;  %v9353_v47 = vld [vmem:[%s13926_s3 + $0x138] sm:$0xff]  }
  0x3c   : > { %7688 = vmatprep.subr.bf16.mxu1 %v9269_v34  ;;  %v9332_v34 = vld [vmem:[%s13926_s3 + $0x20] sm:$0xff]   ;;  %p9996_p1 = pnand %p9995_p0, %p10185_p3 }
  0x3d   : > { %717 = vmatmul.mubr.bf16.vlgmr.msra.gmra.mrb[0].mxu0 %v10316_v33 }
  0x3e   : > { %910 = vmatmul.mubr.bf16.vlgmr.msra.gmra.mrb[0].mxu1 %v10316_v33  ;;  %724 = vmatprep.mubr.bf16.mxu0 %v10329_v36  ;;  %p9997_p2 = pneg %p9996_p1 }
  0x3f   : > { %7689 = vmatpush3.bf16.msra.mxu1 %v9270_v35  ;;  %917 = vmatprep.mubr.bf16.mxu1 %v10329_v36  ;;  %v9336_v35 = vld [vmem:[%s13926_s3 + $0x68] sm:$0xff]  }
  0x40   : > { %7690 = vmatprep.subr.bf16.mxu1 %v9274_v37  ;;  %7625 = vmatpush3.bf16.msra.mxu0 %v9291_v49  ;;  %v9346_v37 = vld [vmem:[%s13926_s3 + $0x168] sm:$0xff]   ;;  %v9406_v49 = vld [vmem:[%s13927_s4 + $0x40] sm:$0xff]  }
  0x41   : > { %7626 = vmatprep.subr.bf16.mxu0 %v9293_v51  ;;  %v10634_v51 = vld [vmem:[%s10531_s23] ss:$8 sps:$4 sm:$0xff]  }
  0x43   : > { %7691 = vmatpush3.bf16.msra.mxu1 %v9275_v38  ;;  %v9338_v38 = vld [vmem:[%s13926_s3 + $0x28] sm:$0xff]  }
  0x44   : > { %7692 = vmatprep.subr.bf16.mxu1 %v9279_v41  ;;  %7627 = vmatpush3.bf16.msra.mxu0 %v9294_v53  ;;  %v9349_v41 = vld [vmem:[%s13926_s3 + $0x170] sm:$0xff]  }
  0x45   : > { %725 = vmatmul.mubr.bf16.gmra.mrb[4].mxu0 %v10340_v39  ;;  %7628 = vmatprep.subr.bf16.mxu0 %v9298_v55  ;;  %v10640_v53 = vld [vmem:[%s10531_s23 + $0x14] ss:$8 sps:$4 sm:$0xff]   ;;  %v9408_v55 = vld [vmem:[%s13927_s4] sm:$0xff]  }
  0x46   : > { %918 = vmatmul.mubr.bf16.gmra.mrb[4].mxu1 %v10340_v39  ;;  %732 = vmatprep.mubr.bf16.mxu0 %v10343_v40 }
  0x47   : > { %925 = vmatprep.mubr.bf16.mxu1 %v10343_v40  ;;  %7693 = vmatpush3.bf16.msra.mxu1 %v9280_v42  ;;  %v9344_v42 = vld [vmem:[%s13926_s3 + $0x30] sm:$0xff]  }
  0x48   : > { %7694 = vmatprep.subr.bf16.mxu1 %v9284_v43  ;;  %7629 = vmatpush3.bf16.msra.mxu0 %v9300_v57  ;;  %v9348_v43 = vld [vmem:[%s13926_s3 + $0x78] sm:$0xff]   ;;  %v9366_v57 = vld [vmem:[%s13926_s3 + $0x88] sm:$0xff]  }
  0x49   : > { %7630 = vmatprep.subr.bf16.mxu0 %v9302_v59  ;;  %v10662_v59 = vld [vmem:[%s10531_s23 + $0x10] ss:$8 sps:$4 sm:$0xff]  }
  0x4b   : > { %7695 = vmatpush3.bf16.msra.mxu1 %v9285_v44  ;;  %v9351_v44 = vld [vmem:[%s13926_s3 + $0x130] sm:$0xff]  }
  0x4c   : > { %7696 = vmatprep.subr.bf16.mxu1 %v9290_v48  ;;  %7631 = vmatpush3.bf16.msra.mxu0 %v9303_v61  ;;  %v9357_v48 = vld [vmem:[%s13926_s3 + $0xc0] sm:$0xff]   ;;  %v9414_v61 = vld [vmem:[%s13927_s4 + $0x50] sm:$0xff]  }
  0x4d   : > { %733 = vmatmul.mubr.bf16.gmra.mrb[8].mxu0 %v10362_v45  ;;  %7632 = vmatprep.subr.bf16.mxu0 %v9307_v63  ;;  %v9374_v63 = vld [vmem:[%s13926_s3 + $0x90] sm:$0xff]  }
  0x4e   : > { %926 = vmatmul.mubr.bf16.gmra.mrb[8].mxu1 %v10362_v45  ;;  %740 = vmatprep.mubr.bf16.mxu0 %v10365_v46 }
  0x4f   : > { %933 = vmatprep.mubr.bf16.mxu1 %v10365_v46  ;;  %7697 = vmatpush3.bf16.msra.mxu1 %v9292_v50  ;;  %v10627_v50 = vld [vmem:[%s10531_s23 + $0x4] ss:$8 sps:$4 sm:$0xff]  }
  0x50   : > { %7698 = vmatprep.subr.bf16.mxu1 %v9299_v56  ;;  %7633 = vmatpush3.bf16.msra.mxu0 %v9309_v1  ;;  %v9409_v56 = vld [vmem:[%s13927_s4 + $0x48] sm:$0xff]   ;;  %v9415_v1 = vld [vmem:[%s13927_s4 + $0x10] sm:$0xff]  }
  0x51   : > { %7634 = vmatprep.subr.bf16.mxu0 %v9311_v3  ;;  %v9382_v3 = vld [vmem:[%s13926_s3 + $0x98] sm:$0xff]  }
  0x53   : > { %7699 = vmatpush3.bf16.msra.mxu1 %v9301_v58  ;;  %v9373_v58 = vld [vmem:[%s13926_s3 + $0xd0] sm:$0xff]  }
  0x54   : > { %7700 = vmatprep.subr.bf16.mxu1 %v9308_v0  ;;  %7635 = vmatpush3.bf16.msra.mxu0 %v9312_v4  ;;  %v9381_v0 = vld [vmem:[%s13926_s3 + $0xd8] sm:$0xff]   ;;  %v9389_v4 = vld [vmem:[%s13926_s3 + $0xe0] sm:$0xff]  }
  0x55   : > { %741 = vmatmul.mubr.bf16.gmra.mrb[12].mxu0 %v10387_v52  ;;  %7636 = vmatprep.subr.bf16.mxu0 %v9316_v6  ;;  %v10699_v6 = vld [vmem:[%s10531_s23 + $0x20] ss:$8 sps:$4 sm:$0xff]  }
  0x56   : > { %934 = vmatmul.mubr.bf16.gmra.mrb[12].mxu1 %v10387_v52  ;;  %748 = vmatprep.mubr.bf16.mxu0 %v10393_v54 }
  0x57   : > { %941 = vmatprep.mubr.bf16.mxu1 %v10393_v54  ;;  %7701 = vmatpush3.bf16.msra.mxu1 %v9310_v2  ;;  %v9416_v2 = vld [vmem:[%s13927_s4 + $0x58] sm:$0xff]  }
  0x58   : > { %7702 = vmatprep.subr.bf16.mxu1 %v9317_v7  ;;  %7637 = vmatpush3.bf16.msra.mxu0 %v9318_v10  ;;  %v9422_v7 = vld [vmem:[%s13927_s4 + $0x60] sm:$0xff]   ;;  %v9397_v10 = vld [vmem:[%s13926_s3 + $0xe8] sm:$0xff]  }
  0x59   : > { %7638 = vmatprep.subr.bf16.mxu0 %v9320_v11  ;;  %v9424_v11 = vld [vmem:[%s13927_s4 + $0x20] sm:$0xff]  }
  0x5b   : > { %7703 = vmatpush3.bf16.msra.mxu1 %v9319_v9  ;;  %v9390_v9 = vld [vmem:[%s13926_s3 + $0xa0] sm:$0xff]  }
  0x5c   : > { %7752 = vmatprep.subr.bf16.mxu1 %v9322_v12  ;;  %7639 = vmatpush3.bf16.msra.mxu0 %v9321_v13  ;;  %v9425_v12 = vld [vmem:[%s13927_s4 + $0x68] sm:$0xff]  }
  0x5d   : > { %749 = vmatmul.mubr.bf16.gmra.mrb[16].mxu0 %v10415_v60  ;;  %7976 = vmatprep.subr.bf16.mxu0 %v9331_v16  ;;  %v9398_v13 = vld [vmem:[%s13926_s3 + $0xa8] sm:$0xff]  }
  0x5e   : > { %942 = vmatmul.mubr.bf16.gmra.mrb[16].mxu1 %v10415_v60  ;;  %756 = vmatprep.mubr.bf16.mxu0 %v10421_v62  ;;  %v9426_v16 = vld [vmem:[%s13927_s4 + $0x28] sm:$0xff]  }
  0x5f   : > { %949 = vmatprep.mubr.bf16.mxu1 %v10421_v62 }
  0x65   : > { %757 = vmatmul.mubr.bf16.gmra.mrb[20].mxu0 %v10446_v5 }
  0x66   : > { %950 = vmatmul.mubr.bf16.gmra.mrb[20].mxu1 %v10446_v5  ;;  %764 = vmatprep.mubr.bf16.mxu0 %v10455_v8 }
  0x67   : > { %957 = vmatprep.mubr.bf16.mxu1 %v10455_v8 }
  0x6d   : > { %765 = vmatmul.mubr.bf16.gmra.mrb[24].mxu0 %v10477_v14 }
  0x6e   : > { %958 = vmatmul.mubr.bf16.gmra.mrb[24].mxu1 %v10477_v14  ;;  %772 = vmatprep.mubr.bf16.mxu0 %v10480_v15 }
  0x6f   : > { %965 = vmatprep.mubr.bf16.mxu1 %v10480_v15 }
  0x75   : > { %773 = vmatmul.mubr.bf16.gmra.mrb[28].mxu0 %v10490_v17 }
  0x76   : > { %966 = vmatmul.mubr.bf16.gmra.mrb[28].mxu1 %v10490_v17  ;;  %1102 = vmatprep.mubr.bf16.mxu0 %v10313_v32 }
  0x77   : > { %1295 = vmatprep.mubr.bf16.mxu1 %v10313_v32  ;;  %v9341_v32 = vld [vmem:[%s13926_s3 + $0x118] sm:$0xff]  }
  0x7d   : > { %1103 = vmatmul.mubr.bf16.vlgmr.msra.gmra.mrb[32].mxu0 %v10316_v33 }
  0x7e   : > { %1296 = vmatmul.mubr.bf16.vlgmr.msra.gmra.mrb[32].mxu1 %v10316_v33  ;;  %1110 = vmatprep.mubr.bf16.mxu0 %v10329_v36  ;;  %v9343_v33 = vld [vmem:[%s13926_s3 + $0x160] sm:$0xff]  }
  0x7f   : > { %7753 = vmatpush3.bf16.msra.mxu1 %v9323_v18  ;;  %1303 = vmatprep.mubr.bf16.mxu1 %v10329_v36  ;;  %v9345_v36 = vld [vmem:[%s13926_s3 + $0x120] sm:$0xff]  }
  0x80   : > { %7754 = vmatprep.subr.bf16.mxu1 %v9324_v19  ;;  %7977 = vmatpush3.bf16.msra.mxu0 %v9333_v20  ;;  %v10739_v18 = vld [vmem:[%s10531_s23 + $0x44] ss:$8 sps:$4 sm:$0xff]   ;;  %v9407_v19 = vld [vmem:[%s13926_s3 + $0xb0] sm:$0xff]   ;;  %v9421_v20 = vld [vmem:[%s13926_s3 + $0xf8] sm:$0xff]  }
  0x81   : > { %7978 = vmatprep.subr.bf16.mxu0 %v9334_v21  ;;  %v9431_v21 = vld [vmem:[%s13927_s4 + $0x30] sm:$0xff]  }
  0x83   : > { %7755 = vmatpush3.bf16.msra.mxu1 %v9325_v22  ;;  %v9432_v22 = vld [vmem:[%s13927_s4 + $0x78] sm:$0xff]  }
  0x84   : > { %7756 = vmatprep.subr.bf16.mxu1 %v9326_v23  ;;  %7979 = vmatpush3.bf16.msra.mxu0 %v9335_v24  ;;  %v9423_v23 = vld [vmem:[%s13926_s3 + $0xb8] sm:$0xff]  }
  0x85   : > { %1111 = vmatmul.mubr.bf16.gmra.mrb[36].mxu0 %v10340_v39  ;;  %7980 = vmatprep.subr.bf16.mxu0 %v9337_v25  ;;  %v9433_v24 = vld [vmem:[%s13927_s4 + $0x38] sm:$0xff]   ;;  %v9434_v25 = vld [vmem:[%s13926_s3 + $0x1c0] sm:$0xff]  }
  0x86   : > { %1304 = vmatmul.mubr.bf16.gmra.mrb[36].mxu1 %v10340_v39  ;;  %1118 = vmatprep.mubr.bf16.mxu0 %v10343_v40  ;;  %v9342_v39 = vld [vmem:[%s13926_s3 + $0x70] sm:$0xff]  }
  0x87   : > { %1311 = vmatprep.mubr.bf16.mxu1 %v10343_v40  ;;  %7757 = vmatpush3.bf16.msra.mxu1 %v9327_v26  ;;  %v9347_v40 = vld [vmem:[%s13926_s3 + $0x128] sm:$0xff]  }
  0x88   : > { %7758 = vmatprep.subr.bf16.mxu1 %v9328_v27  ;;  %7981 = vmatpush3.bf16.msra.mxu0 %v9339_v28  ;;  %v10767_v26 = vld [vmem:[%s10531_s23 + $0x40] ss:$8 sps:$4 sm:$0xff]   ;;  %v10770_v27 = vld [vmem:[%s10531_s23 + $0x54] ss:$8 sps:$4 sm:$0xff]   ;;  %v10777_v28 = vld [vmem:[%s10531_s23 + $0x50] ss:$8 sps:$4 sm:$0xff]  }
  0x89   : > { %7982 = vmatprep.subr.bf16.mxu0 %v9340_v29  ;;  %v10780_v29 = vld [vmem:[%s10531_s23 + $0x64] ss:$8 sps:$4 sm:$0xff]  }
  0x8b   : > { %7759 = vmatpush3.bf16.msra.mxu1 %v9329_v30  ;;  %v10787_v30 = vld [vmem:[%s10531_s23 + $0x60] ss:$8 sps:$4 sm:$0xff]  }
  0x8c   : > { %7760 = vmatprep.subr.bf16.mxu1 %v9330_v31  ;;  %7983 = vmatpush3.bf16.msra.mxu0 %v9341_v32  ;;  %v10790_v31 = vld [vmem:[%s10531_s23 + $0x74] ss:$8 sps:$4 sm:$0xff]   ;;  %v10797_v32 = vld [vmem:[%s10531_s23 + $0x70] ss:$8 sps:$4 sm:$0xff]  }
  0x8d   : > { %1119 = vmatmul.mubr.bf16.gmra.mrb[40].mxu0 %v10362_v45  ;;  %7984 = vmatprep.subr.bf16.mxu0 %v9343_v33  ;;  %v10800_v33 = vld [vmem:[%s10531_s23 + $0x84] ss:$8 sps:$4 sm:$0xff]  }
  0x8e   : > { %1312 = vmatmul.mubr.bf16.gmra.mrb[40].mxu1 %v10362_v45  ;;  %1126 = vmatprep.mubr.bf16.mxu0 %v10365_v46  ;;  %v9352_v45 = vld [vmem:[%s13926_s3 + $0x178] sm:$0xff]  }
  0x8f   : > { %1319 = vmatprep.mubr.bf16.mxu1 %v10365_v46  ;;  %7761 = vmatpush3.bf16.msra.mxu1 %v9332_v34  ;;  %v9350_v46 = vld [vmem:[%s13926_s3 + $0x38] sm:$0xff]   ;;  %v10807_v34 = vld [vmem:[%s10531_s23 + $0x80] ss:$8 sps:$4 sm:$0xff]  }
  0x90   : > { %7762 = vmatprep.subr.bf16.mxu1 %v9336_v35  ;;  %7985 = vmatpush3.bf16.msra.mxu0 %v9345_v36  ;;  %v10810_v35 = vld [vmem:[%s10531_s23 + $0x94] ss:$8 sps:$4 sm:$0xff]   ;;  %v10817_v36 = vld [vmem:[%s10531_s23 + $0x90] ss:$8 sps:$4 sm:$0xff]  }
  0x91   : > { %7986 = vmatprep.subr.bf16.mxu0 %v9346_v37  ;;  %v10820_v37 = vld [vmem:[%s10531_s23 + $0xa4] ss:$8 sps:$4 sm:$0xff]  }
  0x93   : > { %7763 = vmatpush3.bf16.msra.mxu1 %v9338_v38  ;;  %v10827_v38 = vld [vmem:[%s10531_s23 + $0xa0] ss:$8 sps:$4 sm:$0xff]  }
  0x94   : > { %7764 = vmatprep.subr.bf16.mxu1 %v9342_v39  ;;  %7987 = vmatpush3.bf16.msra.mxu0 %v9347_v40  ;;  %v10830_v39 = vld [vmem:[%s10531_s23 + $0xb4] ss:$8 sps:$4 sm:$0xff]  }
  0x95   : > { %1127 = vmatmul.mubr.bf16.gmra.mrb[44].mxu0 %v10387_v52  ;;  %7988 = vmatprep.subr.bf16.mxu0 %v9349_v41  ;;  %v10837_v41 = vld [vmem:[%s10531_s23 + $0xb0] ss:$8 sps:$4 sm:$0xff]  }
  0x96   : > { %1320 = vmatmul.mubr.bf16.gmra.mrb[44].mxu1 %v10387_v52  ;;  %1134 = vmatprep.mubr.bf16.mxu0 %v10393_v54  ;;  %v9358_v52 = vld [vmem:[%s13926_s3 + $0x80] sm:$0xff]  }
  0x97   : > { %1327 = vmatprep.mubr.bf16.mxu1 %v10393_v54  ;;  %7765 = vmatpush3.bf16.msra.mxu1 %v9344_v42  ;;  %v9365_v54 = vld [vmem:[%s13926_s3 + $0xc8] sm:$0xff]  }
  0x98   : > { %7766 = vmatprep.subr.bf16.mxu1 %v9348_v43  ;;  %7989 = vmatpush3.bf16.msra.mxu0 %v9351_v44  ;;  %v10840_v43 = vld [vmem:[%s10531_s23 + $0xc4] ss:$8 sps:$4 sm:$0xff]  }
  0x99   : > { %7990 = vmatprep.subr.bf16.mxu0 %v9352_v45 }
  0x9b   : > { %7767 = vmatpush3.bf16.msra.mxu1 %v9350_v46 }
  0x9c   : > { %7991 = vmatpush3.bf16.msra.mxu0 %v9353_v47  ;;  %7864 = vmatprep.subr.bf16.mxu1 %v9357_v48 }
  0x9d   : > { %1135 = vmatmul.mubr.bf16.gmra.mrb[48].mxu0 %v10415_v60  ;;  %8200 = vmatprep.subr.bf16.mxu0 %v9406_v49 }
  0x9e   : > { %1328 = vmatmul.mubr.bf16.gmra.mrb[48].mxu1 %v10415_v60  ;;  %1142 = vmatprep.mubr.bf16.mxu0 %v10421_v62  ;;  %v9410_v60 = vld [vmem:[%s13927_s4 + $0x8] sm:$0xff]  }
  0x9f   : > { %1335 = vmatprep.mubr.bf16.mxu1 %v10421_v62  ;;  %v10671_v62 = vld [vmem:[%s10531_s23 + $0x24] ss:$8 sps:$4 sm:$0xff]  }
  0xa5   : > { %1143 = vmatmul.mubr.bf16.gmra.mrb[52].mxu0 %v10446_v5 }
  0xa6   : > { %1336 = vmatmul.mubr.bf16.gmra.mrb[52].mxu1 %v10446_v5  ;;  %1150 = vmatprep.mubr.bf16.mxu0 %v10455_v8  ;;  %v9417_v5 = vld [vmem:[%s13927_s4 + $0x18] sm:$0xff]  }
  0xa7   : > { %1343 = vmatprep.mubr.bf16.mxu1 %v10455_v8  ;;  %v10705_v8 = vld [vmem:[%s10531_s23 + $0x34] ss:$8 sps:$4 sm:$0xff]  }
  0xad   : > { %1151 = vmatmul.mubr.bf16.gmra.mrb[56].mxu0 %v10477_v14 }
  0xae   : > { %1344 = vmatmul.mubr.bf16.gmra.mrb[56].mxu1 %v10477_v14  ;;  %1158 = vmatprep.mubr.bf16.mxu0 %v10480_v15  ;;  %v9405_v14 = vld [vmem:[%s13926_s3 + $0xf0] sm:$0xff]  }
  0xaf   : > { %1351 = vmatprep.mubr.bf16.mxu1 %v10480_v15  ;;  %v10730_v15 = vld [vmem:[%s10531_s23 + $0x30] ss:$8 sps:$4 sm:$0xff]  }
  0xb5   : > { %1159 = vmatmul.mubr.bf16.gmra.mrb[60].mxu0 %v10490_v17 }
  0xb6   : > { %1352 = vmatmul.mubr.bf16.gmra.mrb[60].mxu1 %v10490_v17  ;;  %2290 = vmatprep.mubr.bf16.mxu0 %v10627_v50  ;;  %v9430_v17 = vld [vmem:[%s13927_s4 + $0x70] sm:$0xff]  }
  0xb7   : > { %1776 = vmatprep.mubr.bf16.mxu1 %v10627_v50 }
  0xbd   : > { %2291 = vmatmul.mubr.bf16.vlgmr.msra.gmra.mrb[64].mxu0 %v10634_v51 }
  0xbe   : > { %1777 = vmatmul.mubr.bf16.vlgmr.msra.gmra.mrb[64].mxu1 %v10634_v51  ;;  %2298 = vmatprep.mubr.bf16.mxu0 %v10640_v53 }
  0xbf   : > { %7865 = vmatpush3.bf16.msra.mxu1 %v9358_v52  ;;  %1784 = vmatprep.mubr.bf16.mxu1 %v10640_v53  ;;  %v10849_v52 = vld [vmem:[%s10531_s23 + $0xc0] ss:$8 sps:$4 sm:$0xff]  }
  0xc0   : > { %7866 = vmatprep.subr.bf16.mxu1 %v9365_v54  ;;  %8201 = vmatpush3.bf16.msra.mxu0 %v9408_v55  ;;  %v10852_v55 = vld [vmem:[%s10531_s23 + $0xd4] ss:$8 sps:$4 sm:$0xff]  }
  0xc1   : > { %8202 = vmatprep.subr.bf16.mxu0 %v9409_v56 }
  0xc3   : > { %7867 = vmatpush3.bf16.msra.mxu1 %v9366_v57 }
  0xc4   : > { %7868 = vmatprep.subr.bf16.mxu1 %v9373_v58  ;;  %8203 = vmatpush3.bf16.msra.mxu0 %v9410_v60  ;;  %v9447_v60 = vld [vmem:[%s13927_s4 + $0x140] sm:$0xff]  }
  0xc5   : > { %2299 = vmatmul.mubr.bf16.gmra.mrb[68].mxu0 %v10662_v59  ;;  %8204 = vmatprep.subr.bf16.mxu0 %v9414_v61 }
  0xc6   : > { %1785 = vmatmul.mubr.bf16.gmra.mrb[68].mxu1 %v10662_v59  ;;  %2306 = vmatprep.mubr.bf16.mxu0 %v10671_v62 }
  0xc7   : > { %1792 = vmatprep.mubr.bf16.mxu1 %v10671_v62  ;;  %7869 = vmatpush3.bf16.msra.mxu1 %v9374_v63 }
  0xc8   : > { %7870 = vmatprep.subr.bf16.mxu1 %v9381_v0  ;;  %8205 = vmatpush3.bf16.msra.mxu0 %v9415_v1  ;;  %v10864_v1 = vld [vmem:[%s10531_s23 + $0xd0] ss:$8 sps:$4 sm:$0xff]  }
  0xc9   : > { %8206 = vmatprep.subr.bf16.mxu0 %v9416_v2 }
  0xcb   : > { %7871 = vmatpush3.bf16.msra.mxu1 %v9382_v3  ;;  %v10867_v3 = vld [vmem:[%s10531_s23 + $0xe4] ss:$8 sps:$4 sm:$0xff]  }
  0xcc   : > { %7872 = vmatprep.subr.bf16.mxu1 %v9389_v4  ;;  %8207 = vmatpush3.bf16.msra.mxu0 %v9417_v5 }
  0xcd   : > { %2307 = vmatmul.mubr.bf16.gmra.mrb[72].mxu0 %v10699_v6  ;;  %8208 = vmatprep.subr.bf16.mxu0 %v9422_v7 }
  0xce   : > { %1793 = vmatmul.mubr.bf16.gmra.mrb[72].mxu1 %v10699_v6  ;;  %2314 = vmatprep.mubr.bf16.mxu0 %v10705_v8 }
  0xcf   : > { %1800 = vmatprep.mubr.bf16.mxu1 %v10705_v8  ;;  %7873 = vmatpush3.bf16.msra.mxu1 %v9390_v9 }
  0xd0   : > { %7874 = vmatprep.subr.bf16.mxu1 %v9397_v10  ;;  %8209 = vmatpush3.bf16.msra.mxu0 %v9424_v11 }
  0xd1   : > { %8210 = vmatprep.subr.bf16.mxu0 %v9425_v12  ;;  %v10876_v12 = vld [vmem:[%s10531_s23 + $0xe0] ss:$8 sps:$4 sm:$0xff]  }
  0xd3   : > { %7875 = vmatpush3.bf16.msra.mxu1 %v9398_v13 }
  0xd4   : > { %7876 = vmatprep.subr.bf16.mxu1 %v9405_v14  ;;  %8211 = vmatpush3.bf16.msra.mxu0 %v9426_v16  ;;  %v10879_v14 = vld [vmem:[%s10531_s23 + $0xf4] ss:$8 sps:$4 sm:$0xff]  }
  0xd5   : > { %2315 = vmatmul.mubr.bf16.gmra.mrb[76].mxu0 %v10730_v15  ;;  %8212 = vmatprep.subr.bf16.mxu0 %v9430_v17 }
  0xd6   : > { %1801 = vmatmul.mubr.bf16.gmra.mrb[76].mxu1 %v10730_v15  ;;  %2322 = vmatprep.mubr.bf16.mxu0 %v10739_v18 }
  0xd7   : > { %1808 = vmatprep.mubr.bf16.mxu1 %v10739_v18  ;;  %7877 = vmatpush3.bf16.msra.mxu1 %v9407_v19 }
  0xd8   : > { %7878 = vmatprep.subr.bf16.mxu1 %v9421_v20  ;;  %8213 = vmatpush3.bf16.msra.mxu0 %v9431_v21 }
  0xd9   : > { %8214 = vmatprep.subr.bf16.mxu0 %v9432_v22 }
  0xdb   : > { %7879 = vmatpush3.bf16.msra.mxu1 %v9423_v23  ;;  %v10888_v23 = vld [vmem:[%s10531_s23 + $0xf0] ss:$8 sps:$4 sm:$0xff]  }
  0xdc   : > { %8215 = vmatpush3.bf16.msra.mxu0 %v9433_v24  ;;  %8088 = vmatprep.subr.bf16.mxu1 %v9434_v25 }
  0xdd   : > { %2323 = vmatmul.mubr.bf16.gmra.mrb[80].mxu0 %v10767_v26  ;;  %8424 = vmatprep.subr.bf16.mxu0 %v9447_v60  ;;  %v9449_v60 = vld [vmem:[%s13927_s4 + $0x100] sm:$0xff]  }
  0xde   : > { %1809 = vmatmul.mubr.bf16.gmra.mrb[80].mxu1 %v10767_v26  ;;  %2330 = vmatprep.mubr.bf16.mxu0 %v10770_v27 }
  0xdf   : > { %1816 = vmatprep.mubr.bf16.mxu1 %v10770_v27 }
  0xe5   : > { %2331 = vmatmul.mubr.bf16.gmra.mrb[84].mxu0 %v10777_v28 }
  0xe6   : > { %1817 = vmatmul.mubr.bf16.gmra.mrb[84].mxu1 %v10777_v28  ;;  %2338 = vmatprep.mubr.bf16.mxu0 %v10780_v29 }
  0xe7   : > { %1824 = vmatprep.mubr.bf16.mxu1 %v10780_v29 }
  0xed   : > { %2339 = vmatmul.mubr.bf16.gmra.mrb[88].mxu0 %v10787_v30 }
  0xee   : > { %1825 = vmatmul.mubr.bf16.gmra.mrb[88].mxu1 %v10787_v30  ;;  %2346 = vmatprep.mubr.bf16.mxu0 %v10790_v31 }
  0xef   : > { %1832 = vmatprep.mubr.bf16.mxu1 %v10790_v31 }
  0xf5   : > { %2347 = vmatmul.mubr.bf16.gmra.mrb[92].mxu0 %v10797_v32 }
  0xf6   : > { %1833 = vmatmul.mubr.bf16.gmra.mrb[92].mxu1 %v10797_v32  ;;  %2354 = vmatprep.mubr.bf16.mxu0 %v10800_v33 }
  0xf7   : > { %1840 = vmatprep.mubr.bf16.mxu1 %v10800_v33 }
  0xfd   : > { %2355 = vmatmul.mubr.bf16.gmra.mrb[96].mxu0 %v10807_v34 }
  0xfe   : > { %1841 = vmatmul.mubr.bf16.gmra.mrb[96].mxu1 %v10807_v34  ;;  %2362 = vmatprep.mubr.bf16.mxu0 %v10810_v35 }
  0xff   : > { %1848 = vmatprep.mubr.bf16.mxu1 %v10810_v35 }
 0x105   : > { %2363 = vmatmul.mubr.bf16.gmra.mrb[100].mxu0 %v10817_v36 }
 0x106   : > { %1849 = vmatmul.mubr.bf16.gmra.mrb[100].mxu1 %v10817_v36  ;;  %2370 = vmatprep.mubr.bf16.mxu0 %v10820_v37 }
 0x107   : > { %1856 = vmatprep.mubr.bf16.mxu1 %v10820_v37 }
 0x10d   : > { %2371 = vmatmul.mubr.bf16.gmra.mrb[104].mxu0 %v10827_v38 }
 0x10e   : > { %1857 = vmatmul.mubr.bf16.gmra.mrb[104].mxu1 %v10827_v38  ;;  %2378 = vmatprep.mubr.bf16.mxu0 %v10830_v39 }
 0x10f   : > { %1864 = vmatprep.mubr.bf16.mxu1 %v10830_v39 }
 0x111   : > { %v7576_v40 = vpop.f32.mrb[0].mxu1 }
 0x112   : > { %v7577_v42 = vpop.f32.mrb[1].mxu1 }
 0x113   : > { %v7578_v44 = vadd.f32 %v7577_v42, %v7576_v40  ;;  %v7579_v45 = vpop.f32.mrb[2].mxu1 }
 0x114   : > { %v7580_v46 = vpop.f32.mrb[3].mxu1 }
 0x115   : > { %v7581_v47 = vadd.f32 %v7580_v46, %v7579_v45  ;;  %2379 = vmatmul.mubr.bf16.gmra.mrb[108].mxu0 %v10837_v41 }
 0x116   : > { %1865 = vmatmul.mubr.bf16.gmra.mrb[108].mxu1 %v10837_v41  ;;  %2386 = vmatprep.mubr.bf16.mxu0 %v10840_v43 }
 0x117   : > { %v10845_v48 = vpack.c.bf16 %v7581_v47, %v7578_v44  ;;  %1872 = vmatprep.mubr.bf16.mxu1 %v10840_v43 }
 0x119   : > { %14157 = vst [vmem:[#allocation8_spill] sm:$0xff] %v10845_v48  ;;  %v7582_v49 = vpop.f32.mrb[4].mxu1 }
 0x11a   : > { %v7583_v54 = vpop.f32.mrb[5].mxu1 }
 0x11b   : > { %v7584_v56 = vadd.f32 %v7583_v54, %v7582_v49  ;;  %v7585_v57 = vpop.f32.mrb[6].mxu1 }
 0x11c   : > { %v7586_v58 = vpop.f32.mrb[7].mxu1 }
 0x11d   : > { %v7587_v61 = vadd.f32 %v7586_v58, %v7585_v57  ;;  %2387 = vmatmul.mubr.bf16.gmra.mrb[112].mxu0 %v10849_v52  ;;  %v9436_v58 = vld [vmem:[%s13926_s3 + $0x1c8] sm:$0xff]  }
 0x11e   : > { %1873 = vmatmul.mubr.bf16.gmra.mrb[112].mxu1 %v10849_v52  ;;  %2394 = vmatprep.mubr.bf16.mxu0 %v10852_v55 }
 0x11f   : > { %v10860_v63 = vpack.c.bf16 %v7587_v61, %v7584_v56  ;;  %1880 = vmatprep.mubr.bf16.mxu1 %v10852_v55  ;;  %v9435_v56 = vld [vmem:[%s13926_s3 + $0x180] sm:$0xff]  }
 0x121   : > { %14158 = vst [vmem:[#allocation9_spill] sm:$0xff] %v10860_v63  ;;  %v7588_v0 = vpop.f32.mrb[8].mxu1  ;;  %v9476_v63 = vld [vmem:[%s13927_s4 + $0xe8] sm:$0xff]  }
 0x122   : > { %v7589_v2 = vpop.f32.mrb[9].mxu1 }
 0x123   : > { %v7590_v4 = vadd.f32 %v7589_v2, %v7588_v0  ;;  %v7591_v5 = vpop.f32.mrb[10].mxu1  ;;  %v9437_v2 = vld [vmem:[%s13926_s3 + $0x188] sm:$0xff]  }
 0x124   : > { %v7592_v7 = vpop.f32.mrb[11].mxu1 }
 0x125   : > { %v7593_v9 = vadd.f32 %v7592_v7, %v7591_v5  ;;  %2395 = vmatmul.mubr.bf16.gmra.mrb[116].mxu0 %v10864_v1 }
 0x126   : > { %1881 = vmatmul.mubr.bf16.gmra.mrb[116].mxu1 %v10864_v1  ;;  %2402 = vmatprep.mubr.bf16.mxu0 %v10867_v3 }
 0x127   : > { %v10872_v10 = vpack.c.bf16 %v7593_v9, %v7590_v4  ;;  %1888 = vmatprep.mubr.bf16.mxu1 %v10867_v3  ;;  %v9438_v4 = vld [vmem:[%s13926_s3 + $0x1d0] sm:$0xff]  }
 0x129   : > { %14159 = vst [vmem:[#allocation10_spill] sm:$0xff] %v10872_v10  ;;  %v7594_v11 = vpop.f32.mrb[12].mxu1 }
 0x12a   : > { %v7595_v13 = vpop.f32.mrb[13].mxu1 }
 0x12b   : > { %v7596_v16 = vadd.f32 %v7595_v13, %v7594_v11  ;;  %v7597_v17 = vpop.f32.mrb[14].mxu1  ;;  %v9439_v13 = vld [vmem:[%s13926_s3 + $0x190] sm:$0xff]  }
 0x12c   : > { %v7598_v19 = vpop.f32.mrb[15].mxu1 }
 0x12d   : > { %v7599_v20 = vadd.f32 %v7598_v19, %v7597_v17  ;;  %2403 = vmatmul.mubr.bf16.gmra.mrb[120].mxu0 %v10876_v12  ;;  %v9440_v17 = vld [vmem:[%s13926_s3 + $0x1d8] sm:$0xff]   ;;  %v9453_v19 = vld [vmem:[%s13927_s4 + $0x110] sm:$0xff]  }
 0x12e   : > { %1889 = vmatmul.mubr.bf16.gmra.mrb[120].mxu1 %v10876_v12  ;;  %2410 = vmatprep.mubr.bf16.mxu0 %v10879_v14 }
 0x12f   : > { %v10884_v21 = vpack.c.bf16 %v7599_v20, %v7596_v16  ;;  %1896 = vmatprep.mubr.bf16.mxu1 %v10879_v14 }
 0x131   : > { %14160 = vst [vmem:[#allocation11_spill] sm:$0xff] %v10884_v21  ;;  %v7600_v22 = vpop.f32.mrb[16].mxu1 }
 0x132   : > { %v7601_v24 = vpop.f32.mrb[17].mxu1 }
 0x133   : > { %v7602_v25 = vadd.f32 %v7601_v24, %v7600_v22  ;;  %v7603_v40 = vpop.f32.mrb[18].mxu1  ;;  %v9454_v22 = vld [vmem:[%s13927_s4 + $0x158] sm:$0xff]  }
 0x134   : > { %v7604_v42 = vpop.f32.mrb[19].mxu1 }
 0x135   : > { %v7605_v44 = vadd.f32 %v7604_v42, %v7603_v40  ;;  %2411 = vmatmul.mubr.bf16.gmra.mrb[124].mxu0 %v10888_v23  ;;  %v9442_v40 = vld [vmem:[%s13926_s3 + $0x1e0] sm:$0xff]  }
 0x136   : > { %1897 = vmatmul.mubr.bf16.gmra.mrb[124].mxu1 %v10888_v23  ;;  %2932 = vmatprep.mubr.bf16.mxu0 %v10627_v50 }
 0x137   : > { %v10893_v45 = vpack.c.bf16 %v7605_v44, %v7602_v25  ;;  %2033 = vmatprep.mubr.bf16.mxu1 %v10627_v50  ;;  %v9450_v50 = vld [vmem:[%s13927_s4 + $0x148] sm:$0xff]   ;;  %v9441_v25 = vld [vmem:[%s13926_s3 + $0x198] sm:$0xff]  }
 0x139   : > { %14161 = vst [vmem:[#allocation12_spill] sm:$0xff] %v10893_v45  ;;  %v7606_v46 = vpop.f32.mrb[20].mxu1 }
 0x13a   : > { %v7607_v47 = vpop.f32.mrb[21].mxu1 }
 0x13b   : > { %v7608_v49 = vadd.f32 %v7607_v47, %v7606_v46  ;;  %v7609_v54 = vpop.f32.mrb[22].mxu1 }
 0x13c   : > { %v7610_v57 = vpop.f32.mrb[23].mxu1 }
 0x13d   : > { %v7611_v61 = vadd.f32 %v7610_v57, %v7609_v54  ;;  %2933 = vmatmul.mubr.bf16.vlgmr.msra.gmra.mrb[128].mxu0 %v10634_v51  ;;  %v9459_v57 = vld [vmem:[%s13927_s4 + $0x120] sm:$0xff]  }
 0x13e   : > { %2034 = vmatmul.mubr.bf16.vlgmr.msra.gmra.mrb[128].mxu1 %v10634_v51  ;;  %2940 = vmatprep.mubr.bf16.mxu0 %v10640_v53  ;;  %v9451_v51 = vld [vmem:[%s13927_s4 + $0x108] sm:$0xff]  }
 0x13f   : > { %v10911_v0 = vpack.c.bf16 %v7611_v61, %v7608_v49  ;;  %8089 = vmatpush3.bf16.msra.mxu1 %v9435_v56  ;;  %2041 = vmatprep.mubr.bf16.mxu1 %v10640_v53  ;;  %v9452_v53 = vld [vmem:[%s13927_s4 + $0x150] sm:$0xff]   ;;  %v9443_v49 = vld [vmem:[%s13926_s3 + $0x1a0] sm:$0xff]   ;;  %v9444_v56 = vld [vmem:[%s13926_s3 + $0x1e8] sm:$0xff]  }
 0x140   : > { %8090 = vmatprep.subr.bf16.mxu1 %v9436_v58  ;;  %8425 = vmatpush3.bf16.msra.mxu0 %v9449_v60  ;;  %v7512_v58 = vpop.f32.mrb[0].mxu0  ;;  %v9460_v61 = vld [vmem:[%s13927_s4 + $0x168] sm:$0xff]  }
 0x141   : > { %14162 = vst [vmem:[#allocation13_spill] sm:$0xff] %v10911_v0  ;;  %v7612_v5 = vpop.f32.mrb[24].mxu1  ;;  %8426 = vmatprep.subr.bf16.mxu0 %v9450_v50  ;;  %v7513_v50 = vpop.f32.mrb[1].mxu0 }
 0x142   : > { %v7613_v7 = vpop.f32.mrb[25].mxu1 }
 0x143   : > { %v7614_v9 = vadd.f32 %v7613_v7, %v7612_v5  ;;  %v7615_v11 = vpop.f32.mrb[26].mxu1  ;;  %8091 = vmatpush3.bf16.msra.mxu1 %v9437_v2  ;;  %v7514_v2 = vadd.f32 %v7513_v50, %v7512_v58  ;;  %v9445_v5 = vld [vmem:[%s13926_s3 + $0x1a8] sm:$0xff]   ;;  %v9446_v7 = vld [vmem:[%s13926_s3 + $0x1f0] sm:$0xff]  }
 0x144   : > { %v7616_v16 = vpop.f32.mrb[27].mxu1  ;;  %8092 = vmatprep.subr.bf16.mxu1 %v9438_v4  ;;  %8427 = vmatpush3.bf16.msra.mxu0 %v9451_v51  ;;  %v7515_v4 = vpop.f32.mrb[2].mxu0 }
 0x145   : > { %v7617_v20 = vadd.f32 %v7616_v16, %v7615_v11  ;;  %2941 = vmatmul.mubr.bf16.gmra.mrb[132].mxu0 %v10662_v59  ;;  %8428 = vmatprep.subr.bf16.mxu0 %v9452_v53  ;;  %v7516_v53 = vpop.f32.mrb[3].mxu0 }
 0x146   : > { %2042 = vmatmul.mubr.bf16.gmra.mrb[132].mxu1 %v10662_v59  ;;  %2948 = vmatprep.mubr.bf16.mxu0 %v10671_v62  ;;  %v9455_v59 = vld [vmem:[%s13927_s4 + $0x118] sm:$0xff]  }
 0x147   : > { %v10941_v24 = vpack.c.bf16 %v7617_v20, %v7614_v9  ;;  %2049 = vmatprep.mubr.bf16.mxu1 %v10671_v62  ;;  %8093 = vmatpush3.bf16.msra.mxu1 %v9439_v13  ;;  %v9457_v62 = vld [vmem:[%s13927_s4 + $0x160] sm:$0xff]   ;;  %v7517_v9 = vadd.f32 %v7516_v53, %v7515_v4  ;;  %v9448_v20 = vld [vmem:[%s13926_s3 + $0x1b0] sm:$0xff]  }
 0x148   : > { %8094 = vmatprep.subr.bf16.mxu1 %v9440_v17  ;;  %8429 = vmatpush3.bf16.msra.mxu0 %v9453_v19 }
 0x149   : > { %14163 = vst [vmem:[#allocation14_spill] sm:$0xff] %v10941_v24  ;;  %v7618_v42 = vpop.f32.mrb[28].mxu1  ;;  %8430 = vmatprep.subr.bf16.mxu0 %v9454_v22  ;;  %v10986_v16 = vpack.c.bf16 %v7517_v9, %v7514_v2 }
 0x14a   : > { %v7619_v44 = vpop.f32.mrb[29].mxu1 }
 0x14b   : > { %v7620_v46 = vadd.f32 %v7619_v44, %v7618_v42  ;;  %v7621_v47 = vpop.f32.mrb[30].mxu1  ;;  %8095 = vmatpush3.bf16.msra.mxu1 %v9441_v25  ;;  %v9456_v25 = vld [vmem:[%s13926_s3 + $0x1f8] sm:$0xff]  }
 0x14c   : > { %v7622_v54 = vpop.f32.mrb[31].mxu1  ;;  %8096 = vmatprep.subr.bf16.mxu1 %v9442_v40  ;;  %8431 = vmatpush3.bf16.msra.mxu0 %v9455_v59  ;;  %v9463_v40 = vld [vmem:[%s13927_s4 + $0x130] sm:$0xff]   ;;  %v7518_v59 = vpop.f32.mrb[4].mxu0 }
 0x14d   : > { %v7623_v60 = vadd.f32 %v7622_v54, %v7621_v47  ;;  %2949 = vmatmul.mubr.bf16.gmra.mrb[136].mxu0 %v10699_v6  ;;  %8432 = vmatprep.subr.bf16.mxu0 %v9457_v62  ;;  %v9464_v62 = vld [vmem:[%s13927_s4 + $0x178] sm:$0xff]   ;;  %v7519_v44 = vpop.f32.mrb[5].mxu0 }
 0x14e   : > { %2050 = vmatmul.mubr.bf16.gmra.mrb[136].mxu1 %v10699_v6  ;;  %2956 = vmatprep.mubr.bf16.mxu0 %v10705_v8  ;;  %v9461_v6 = vld [vmem:[%s13927_s4 + $0x128] sm:$0xff]   ;;  %v7520_v54 = vadd.f32 %v7519_v44, %v7518_v59 }
 0x14f   : > { %v10971_v51 = vpack.c.bf16 %v7623_v60, %v7620_v46  ;;  %2057 = vmatprep.mubr.bf16.mxu1 %v10705_v8  ;;  %8097 = vmatpush3.bf16.msra.mxu1 %v9443_v49  ;;  %v9462_v8 = vld [vmem:[%s13927_s4 + $0x170] sm:$0xff]   ;;  %v7521_v46 = vpop.f32.mrb[6].mxu0  ;;  %v9458_v49 = vld [vmem:[%s13926_s3 + $0x1b8] sm:$0xff]  }
 0x150   : > { %8098 = vmatprep.subr.bf16.mxu1 %v9444_v56  ;;  %8433 = vmatpush3.bf16.msra.mxu0 %v9459_v57  ;;  %v7522_v56 = vpop.f32.mrb[7].mxu0  ;;  %v9466_v57 = vld [vmem:[%s13927_s4 + $0xc0] sm:$0xff]  }
 0x151   : > { %14164 = vst [vmem:[#allocation15_spill] sm:$0xff] %v10971_v51  ;;  %v7704_v11 = vpop.f32.mrb[32].mxu1  ;;  %8434 = vmatprep.subr.bf16.mxu0 %v9460_v61  ;;  %v7523_v58 = vadd.f32 %v7522_v56, %v7521_v46  ;;  %v9472_v51 = vld [vmem:[%s13927_s4 + $0xd8] sm:$0xff]  }
 0x152   : > { %v7705_v13 = vpop.f32.mrb[33].mxu1 }
 0x153   : > { %v7706_v17 = vadd.f32 %v7705_v13, %v7704_v11  ;;  %v7707_v19 = vpop.f32.mrb[34].mxu1  ;;  %8099 = vmatpush3.bf16.msra.mxu1 %v9445_v5  ;;  %v11015_v61 = vpack.c.bf16 %v7523_v58, %v7520_v54  ;;  %v7524_v5 = vpop.f32.mrb[8].mxu0 }
 0x154   : > { %v7708_v22 = vpop.f32.mrb[35].mxu1  ;;  %8100 = vmatprep.subr.bf16.mxu1 %v9446_v7  ;;  %8435 = vmatpush3.bf16.msra.mxu0 %v9461_v6  ;;  %v7525_v7 = vpop.f32.mrb[9].mxu0 }
 0x155   : > { %v7709_v42 = vadd.f32 %v7708_v22, %v7707_v19  ;;  %2957 = vmatmul.mubr.bf16.gmra.mrb[140].mxu0 %v10730_v15  ;;  %8436 = vmatprep.subr.bf16.mxu0 %v9462_v8  ;;  %v7527_v6 = vpop.f32.mrb[10].mxu0  ;;  %v7526_v11 = vadd.f32 %v7525_v7, %v7524_v5 }
 0x156   : > { %2058 = vmatmul.mubr.bf16.gmra.mrb[140].mxu1 %v10730_v15  ;;  %2964 = vmatprep.mubr.bf16.mxu0 %v10739_v18  ;;  %v9465_v15 = vld [vmem:[%s13927_s4 + $0x138] sm:$0xff]   ;;  %v7528_v8 = vpop.f32.mrb[11].mxu0 }
 0x157   : > { %v11003_v47 = vpack.c.bf16 %v7709_v42, %v7706_v17  ;;  %2065 = vmatprep.mubr.bf16.mxu1 %v10739_v18  ;;  %8101 = vmatpush3.bf16.msra.mxu1 %v9448_v20  ;;  %v7529_v13 = vadd.f32 %v7528_v8, %v7527_v6  ;;  %v7530_v19 = vpop.f32.mrb[12].mxu0 }
 0x158   : > { %8102 = vmatprep.subr.bf16.mxu1 %v9456_v25  ;;  %8437 = vmatpush3.bf16.msra.mxu0 %v9463_v40  ;;  %v7531_v59 = vpop.f32.mrb[13].mxu0 }
 0x159   : > { %14165 = vst [vmem:[#allocation16_spill] sm:$0xff] %v11003_v47  ;;  %v7710_v60 = vpop.f32.mrb[36].mxu1  ;;  %8438 = vmatprep.subr.bf16.mxu0 %v9464_v62  ;;  %v11023_v22 = vpack.c.bf16 %v7529_v13, %v7526_v11  ;;  %v7533_v62 = vpop.f32.mrb[14].mxu0 }
 0x15a   : > { %v7711_v18 = vpop.f32.mrb[37].mxu1  ;;  %v7534_v46 = vpop.f32.mrb[15].mxu0 }
 0x15b   : > { %v7712_v50 = vadd.f32 %v7711_v18, %v7710_v60  ;;  %v7713_v2 = vpop.f32.mrb[38].mxu1  ;;  %8103 = vmatpush3.bf16.msra.mxu1 %v9458_v49  ;;  %v7535_v54 = vadd.f32 %v7534_v46, %v7533_v62 }
 0x15c   : > { %v7714_v4 = vpop.f32.mrb[39].mxu1  ;;  %8439 = vmatpush3.bf16.msra.mxu0 %v9465_v15  ;;  %8312 = vmatprep.subr.bf16.mxu1 %v9466_v57 }
 0x15d   : > { %v7715_v53 = vadd.f32 %v7714_v4, %v7713_v2  ;;  %2965 = vmatmul.mubr.bf16.gmra.mrb[144].mxu0 %v10767_v26 }
 0x15e   : > { %2066 = vmatmul.mubr.bf16.gmra.mrb[144].mxu1 %v10767_v26  ;;  %2972 = vmatprep.mubr.bf16.mxu0 %v10770_v27  ;;  %v7532_v26 = vadd.f32 %v7531_v59, %v7530_v19 }
 0x15f   : > { %v11020_v9 = vpack.c.bf16 %v7715_v53, %v7712_v50  ;;  %2073 = vmatprep.mubr.bf16.mxu1 %v10770_v27  ;;  %v7536_v27 = vpop.f32.mrb[16].mxu0 }
 0x160   : > { %v7537_v56 = vpop.f32.mrb[17].mxu0  ;;  %v11031_v60 = vpack.c.bf16 %v7535_v54, %v7532_v26 }
 0x161   : > { %14166 = vst [vmem:[#allocation17_spill] sm:$0xff] %v11020_v9  ;;  %v7716_v17 = vpop.f32.mrb[40].mxu1  ;;  %v7538_v15 = vadd.f32 %v7537_v56, %v7536_v27  ;;  %v7539_v57 = vpop.f32.mrb[18].mxu0 }
 0x162   : > { %v7717_v20 = vpop.f32.mrb[41].mxu1  ;;  %v7540_v18 = vpop.f32.mrb[19].mxu0 }
 0x163   : > { %v7718_v25 = vadd.f32 %v7717_v20, %v7716_v17  ;;  %v7719_v40 = vpop.f32.mrb[42].mxu1  ;;  %v7541_v2 = vadd.f32 %v7540_v18, %v7539_v57  ;;  %v7542_v4 = vpop.f32.mrb[20].mxu0 }
 0x164   : > { %v7720_v42 = vpop.f32.mrb[43].mxu1  ;;  %v7543_v53 = vpop.f32.mrb[21].mxu0 }
 0x165   : > { %v7721_v44 = vadd.f32 %v7720_v42, %v7719_v40  ;;  %2973 = vmatmul.mubr.bf16.gmra.mrb[148].mxu0 %v10777_v28  ;;  %v11033_v6 = vpack.c.bf16 %v7541_v2, %v7538_v15  ;;  %v7544_v11 = vadd.f32 %v7543_v53, %v7542_v4  ;;  %v7545_v8 = vpop.f32.mrb[22].mxu0 }
 0x166   : > { %2074 = vmatmul.mubr.bf16.gmra.mrb[148].mxu1 %v10777_v28  ;;  %2980 = vmatprep.mubr.bf16.mxu0 %v10780_v29  ;;  %v7546_v13 = vpop.f32.mrb[23].mxu0 }
 0x167   : > { %v11028_v49 = vpack.c.bf16 %v7721_v44, %v7718_v25  ;;  %2081 = vmatprep.mubr.bf16.mxu1 %v10780_v29  ;;  %v7548_v17 = vpop.f32.mrb[24].mxu0  ;;  %v7547_v20 = vadd.f32 %v7546_v13, %v7545_v8 }
 0x168   : > { %v7549_v25 = vpop.f32.mrb[25].mxu0 }
 0x169   : > { %14167 = vst [vmem:[#allocation18_spill] sm:$0xff] %v11028_v49  ;;  %v7722_v58 = vpop.f32.mrb[44].mxu1  ;;  %v7550_v40 = vadd.f32 %v7549_v25, %v7548_v17  ;;  %v7551_v59 = vpop.f32.mrb[26].mxu0  ;;  %v11041_v26 = vpack.c.bf16 %v7547_v20, %v7544_v11 }
 0x16a   : > { %v7723_v50 = vpop.f32.mrb[45].mxu1  ;;  %v7552_v62 = vpop.f32.mrb[27].mxu0 }
 0x16b   : > { %v7724_v5 = vadd.f32 %v7723_v50, %v7722_v58  ;;  %v7725_v28 = vpop.f32.mrb[46].mxu1  ;;  %14169 = vst [vmem:[#allocation20_spill] sm:$0xff] %v11041_v26  ;;  %v7553_v46 = vadd.f32 %v7552_v62, %v7551_v59  ;;  %v7554_v27 = vpop.f32.mrb[28].mxu0 }
 0x16c   : > { %v7726_v7 = vpop.f32.mrb[47].mxu1  ;;  %v7555_v56 = vpop.f32.mrb[29].mxu0 }
 0x16d   : > { %v7727_v29 = vadd.f32 %v7726_v7, %v7725_v28  ;;  %2981 = vmatmul.mubr.bf16.gmra.mrb[152].mxu0 %v10787_v30  ;;  %v11043_v57 = vpack.c.bf16 %v7553_v46, %v7550_v40  ;;  %v7556_v58 = vadd.f32 %v7555_v56, %v7554_v27  ;;  %v7557_v18 = vpop.f32.mrb[30].mxu0 }
 0x16e   : > { %2082 = vmatmul.mubr.bf16.gmra.mrb[152].mxu1 %v10787_v30  ;;  %2988 = vmatprep.mubr.bf16.mxu0 %v10790_v31  ;;  %v7558_v50 = vpop.f32.mrb[31].mxu0 }
 0x16f   : > { %v11038_v19 = vpack.c.bf16 %v7727_v29, %v7724_v5  ;;  %2089 = vmatprep.mubr.bf16.mxu1 %v10790_v31  ;;  %14170 = vst [vmem:[#allocation21_spill] sm:$0xff] %v11043_v57  ;;  %v7640_v2 = vpop.f32.mrb[32].mxu0  ;;  %v7559_v5 = vadd.f32 %v7558_v50, %v7557_v18 }
 0x170   : > { %v7641_v28 = vpop.f32.mrb[33].mxu0 }
 0x171   : > { %14168 = vst [vmem:[#allocation19_spill] sm:$0xff] %v11038_v19  ;;  %v7728_v42 = vpop.f32.mrb[48].mxu1  ;;  %v7642_v53 = vadd.f32 %v7641_v28, %v7640_v2  ;;  %v7643_v7 = vpop.f32.mrb[34].mxu0  ;;  %v11051_v8 = vpack.c.bf16 %v7559_v5, %v7556_v58 }
 0x172   : > { %v7729_v44 = vpop.f32.mrb[49].mxu1  ;;  %v7644_v29 = vpop.f32.mrb[35].mxu0 }
 0x173   : > { %v7730_v54 = vadd.f32 %v7729_v44, %v7728_v42  ;;  %v7731_v30 = vpop.f32.mrb[50].mxu1  ;;  %14172 = vst [vmem:[#allocation23_spill] sm:$0xff] %v11051_v8  ;;  %v7645_v17 = vadd.f32 %v7644_v29, %v7643_v7  ;;  %v7646_v20 = vpop.f32.mrb[36].mxu0 }
 0x174   : > { %v7732_v15 = vpop.f32.mrb[51].mxu1  ;;  %v7647_v40 = vpop.f32.mrb[37].mxu0 }
 0x175   : > { %v7733_v31 = vadd.f32 %v7732_v15, %v7731_v30  ;;  %2989 = vmatmul.mubr.bf16.gmra.mrb[156].mxu0 %v10797_v32  ;;  %v11053_v42 = vpack.c.bf16 %v7645_v17, %v7642_v53  ;;  %v7648_v62 = vadd.f32 %v7647_v40, %v7646_v20  ;;  %v7649_v44 = vpop.f32.mrb[38].mxu0 }
 0x176   : > { %2090 = vmatmul.mubr.bf16.gmra.mrb[156].mxu1 %v10797_v32  ;;  %2996 = vmatprep.mubr.bf16.mxu0 %v10800_v33  ;;  %v7650_v46 = vpop.f32.mrb[39].mxu0 }
 0x177   : > { %v11048_v4 = vpack.c.bf16 %v7733_v31, %v7730_v54  ;;  %2097 = vmatprep.mubr.bf16.mxu1 %v10800_v33  ;;  %14173 = vst [vmem:[#allocation24_spill] sm:$0xff] %v11053_v42  ;;  %v7652_v27 = vpop.f32.mrb[40].mxu0  ;;  %v7651_v30 = vadd.f32 %v7650_v46, %v7649_v44 }
 0x178   : > { %v7653_v56 = vpop.f32.mrb[41].mxu0 }
 0x179   : > { %14171 = vst [vmem:[#allocation22_spill] sm:$0xff] %v11048_v4  ;;  %v7734_v11 = vpop.f32.mrb[52].mxu1  ;;  %v7654_v15 = vadd.f32 %v7653_v56, %v7652_v27  ;;  %v7655_v58 = vpop.f32.mrb[42].mxu0  ;;  %v11061_v31 = vpack.c.bf16 %v7651_v30, %v7648_v62 }
 0x17a   : > { %v7735_v13 = vpop.f32.mrb[53].mxu1  ;;  %v7656_v50 = vpop.f32.mrb[43].mxu0 }
 0x17b   : > { %v7736_v25 = vadd.f32 %v7735_v13, %v7734_v11  ;;  %v7737_v32 = vpop.f32.mrb[54].mxu1  ;;  %14175 = vst [vmem:[#allocation26_spill] sm:$0xff] %v11061_v31  ;;  %v7657_v5 = vadd.f32 %v7656_v50, %v7655_v58  ;;  %v7658_v28 = vpop.f32.mrb[44].mxu0 }
 0x17c   : > { %v7738_v59 = vpop.f32.mrb[55].mxu1  ;;  %v7659_v7 = vpop.f32.mrb[45].mxu0 }
 0x17d   : > { %v7739_v33 = vadd.f32 %v7738_v59, %v7737_v32  ;;  %2997 = vmatmul.mubr.bf16.gmra.mrb[160].mxu0 %v10807_v34  ;;  %v11063_v29 = vpack.c.bf16 %v7657_v5, %v7654_v15  ;;  %v7660_v13 = vadd.f32 %v7659_v7, %v7658_v28  ;;  %v7661_v17 = vpop.f32.mrb[46].mxu0 }
 0x17e   : > { %2098 = vmatmul.mubr.bf16.gmra.mrb[160].mxu1 %v10807_v34  ;;  %3004 = vmatprep.mubr.bf16.mxu0 %v10810_v35  ;;  %v7662_v20 = vpop.f32.mrb[47].mxu0 }
 0x17f   : > { %v11058_v54 = vpack.c.bf16 %v7739_v33, %v7736_v25  ;;  %2105 = vmatprep.mubr.bf16.mxu1 %v10810_v35  ;;  %14176 = vst [vmem:[#allocation27_spill] sm:$0xff] %v11063_v29  ;;  %v7664_v25 = vpop.f32.mrb[48].mxu0  ;;  %v7663_v40 = vadd.f32 %v7662_v20, %v7661_v17 }
 0x180   : > { %v7665_v59 = vpop.f32.mrb[49].mxu0 }
 0x181   : > { %14174 = vst [vmem:[#allocation25_spill] sm:$0xff] %v11058_v54  ;;  %v7740_v18 = vpop.f32.mrb[56].mxu1  ;;  %v7666_v62 = vadd.f32 %v7665_v59, %v7664_v25  ;;  %v7667_v44 = vpop.f32.mrb[50].mxu0  ;;  %v11071_v46 = vpack.c.bf16 %v7663_v40, %v7660_v13 }
 0x182   : > { %v7741_v2 = vpop.f32.mrb[57].mxu1  ;;  %v7668_v27 = vpop.f32.mrb[51].mxu0 }
 0x183   : > { %v7742_v53 = vadd.f32 %v7741_v2, %v7740_v18  ;;  %v7743_v34 = vpop.f32.mrb[58].mxu1  ;;  %14178 = vst [vmem:[#allocation29_spill] sm:$0xff] %v11071_v46  ;;  %v7669_v56 = vadd.f32 %v7668_v27, %v7667_v44  ;;  %v7670_v15 = vpop.f32.mrb[52].mxu0  ;;  %v9480_v46 = vld [vmem:[%s13927_s4 + $0xf8] sm:$0xff]  }
 0x184   : > { %v7744_v11 = vpop.f32.mrb[59].mxu1  ;;  %v7671_v18 = vpop.f32.mrb[53].mxu0 }
 0x185   : > { %v7745_v35 = vadd.f32 %v7744_v11, %v7743_v34  ;;  %3005 = vmatmul.mubr.bf16.gmra.mrb[164].mxu0 %v10817_v36  ;;  %v11073_v2 = vpack.c.bf16 %v7669_v56, %v7666_v62  ;;  %v7672_v5 = vadd.f32 %v7671_v18, %v7670_v15  ;;  %v7673_v28 = vpop.f32.mrb[54].mxu0 }
 0x186   : > { %2106 = vmatmul.mubr.bf16.gmra.mrb[164].mxu1 %v10817_v36  ;;  %3012 = vmatprep.mubr.bf16.mxu0 %v10820_v37 }
 0x187   : > { %v11068_v32 = vpack.c.bf16 %v7745_v35, %v7742_v53  ;;  %2113 = vmatprep.mubr.bf16.mxu1 %v10820_v37  ;;  %14179 = vst [vmem:[#allocation30_spill] sm:$0xff] %v11073_v2  ;;  %v7674_v53 = vpop.f32.mrb[55].mxu0 }
 0x188   : > { %v7676_v34 = vpop.f32.mrb[56].mxu0  ;;  %v7675_v11 = vadd.f32 %v7674_v53, %v7673_v28 }
 0x189   : > { %14177 = vst [vmem:[#allocation28_spill] sm:$0xff] %v11068_v32  ;;  %v7746_v33 = vpop.f32.mrb[60].mxu1  ;;  %v7677_v13 = vpop.f32.mrb[57].mxu0 }
 0x18a   : > { %v7747_v30 = vpop.f32.mrb[61].mxu1  ;;  %v7678_v17 = vadd.f32 %v7677_v13, %v7676_v34  ;;  %v7679_v35 = vpop.f32.mrb[58].mxu0  ;;  %v11081_v25 = vpack.c.bf16 %v7675_v11, %v7672_v5 }
 0x18b   : > { %v7748_v58 = vadd.f32 %v7747_v30, %v7746_v33  ;;  %v7749_v36 = vpop.f32.mrb[62].mxu1  ;;  %v7680_v40 = vpop.f32.mrb[59].mxu0 }
 0x18c   : > { %v7750_v50 = vpop.f32.mrb[63].mxu1  ;;  %14181 = vst [vmem:[#allocation32_spill] sm:$0xff] %v11081_v25  ;;  %v7681_v62 = vadd.f32 %v7680_v40, %v7679_v35  ;;  %v7682_v44 = vpop.f32.mrb[60].mxu0 }
 0x18d   : > { %v7751_v37 = vadd.f32 %v7750_v50, %v7749_v36  ;;  %3013 = vmatmul.mubr.bf16.gmra.mrb[168].mxu0 %v10827_v38  ;;  %v7683_v27 = vpop.f32.mrb[61].mxu0 }
 0x18e   : > { %2114 = vmatmul.mubr.bf16.gmra.mrb[168].mxu1 %v10827_v38  ;;  %3020 = vmatprep.mubr.bf16.mxu0 %v10830_v39  ;;  %v11085_v56 = vpack.c.bf16 %v7681_v62, %v7678_v17  ;;  %v7684_v15 = vadd.f32 %v7683_v27, %v7682_v44 }
 0x18f   : > { %v11078_v7 = vpack.c.bf16 %v7751_v37, %v7748_v58  ;;  %2121 = vmatprep.mubr.bf16.mxu1 %v10830_v39  ;;  %v7685_v39 = vpop.f32.mrb[62].mxu0 }
 0x190   : > { %14182 = vst [vmem:[#allocation33_spill] sm:$0xff] %v11085_v56  ;;  %v7686_v36 = vpop.f32.mrb[63].mxu0 }
 0x191   : > { %14180 = vst [vmem:[#allocation31_spill] sm:$0xff] %v11078_v7  ;;  %v7768_v20 = vpop.f32.mrb[64].mxu1  ;;  %v7687_v18 = vadd.f32 %v7686_v36, %v7685_v39  ;;  %v7992_v50 = vpop.f32.mrb[64].mxu0 }
 0x192   : > { %v7769_v59 = vpop.f32.mrb[65].mxu1  ;;  %v7993_v28 = vpop.f32.mrb[65].mxu0 }
 0x193   : > { %v11083_v33 = vadd.f32 %v7769_v59, %v7768_v20  ;;  %v7771_v38 = vpop.f32.mrb[66].mxu1  ;;  %v11095_v37 = vpack.c.bf16 %v7687_v18, %v7684_v15  ;;  %v11097_v53 = vadd.f32 %v7993_v28, %v7992_v50  ;;  %v7995_v34 = vpop.f32.mrb[66].mxu0 }
 0x194   : > { %v7772_v30 = vpop.f32.mrb[67].mxu1  ;;  %v7996_v13 = vpop.f32.mrb[67].mxu0 }
 0x195   : > { %v11087_v58 = vadd.f32 %v7772_v30, %v7771_v38  ;;  %3021 = vmatmul.mubr.bf16.gmra.mrb[172].mxu0 %v10837_v41  ;;  %14183 = vst [vmem:[#allocation34_spill] sm:$0xff] %v11095_v37  ;;  %v11099_v35 = vadd.f32 %v7996_v13, %v7995_v34 }
 0x196   : > { %2122 = vmatmul.mubr.bf16.gmra.mrb[172].mxu1 %v10837_v41  ;;  %3028 = vmatprep.mubr.bf16.mxu0 %v10840_v43 }
 0x197   : > { %2129 = vmatprep.mubr.bf16.mxu1 %v10840_v43 }
 0x198   : > { %v7998_v41 = vpop.f32.mrb[68].mxu0 }
 0x199   : > { %v7774_v11 = vpop.f32.mrb[68].mxu1  ;;  %v7999_v59 = vpop.f32.mrb[69].mxu0 }
 0x19a   : > { %v7775_v17 = vpop.f32.mrb[69].mxu1  ;;  %v11103_v62 = vadd.f32 %v7999_v59, %v7998_v41  ;;  %v8001_v44 = vpop.f32.mrb[70].mxu0 }
 0x19b   : > { %v11101_v20 = vadd.f32 %v7775_v17, %v7774_v11  ;;  %v7777_v40 = vpop.f32.mrb[70].mxu1  ;;  %v8002_v27 = vpop.f32.mrb[71].mxu0 }
 0x19c   : > { %v7778_v43 = vpop.f32.mrb[71].mxu1  ;;  %v11110_v30 = vadd.f32 %v8002_v27, %v8001_v44 }
 0x19d   : > { %v11105_v38 = vadd.f32 %v7778_v43, %v7777_v40  ;;  %3029 = vmatmul.mubr.bf16.gmra.mrb[176].mxu0 %v10849_v52 }
 0x19e   : > { %2130 = vmatmul.mubr.bf16.gmra.mrb[176].mxu1 %v10849_v52  ;;  %3036 = vmatprep.mubr.bf16.mxu0 %v10852_v55 }
 0x19f   : > { %2137 = vmatprep.mubr.bf16.mxu1 %v10852_v55 }
 0x1a0   : > { %v8004_v39 = vpop.f32.mrb[72].mxu0 }
 0x1a1   : > { %v7780_v36 = vpop.f32.mrb[72].mxu1  ;;  %v8005_v18 = vpop.f32.mrb[73].mxu0 }
 0x1a2   : > { %v7781_v50 = vpop.f32.mrb[73].mxu1  ;;  %v11115_v28 = vadd.f32 %v8005_v18, %v8004_v39  ;;  %v8007_v34 = vpop.f32.mrb[74].mxu0 }
 0x1a3   : > { %v11117_v11 = vadd.f32 %v7781_v50, %v7780_v36  ;;  %v7783_v13 = vpop.f32.mrb[74].mxu1  ;;  %v8008_v52 = vpop.f32.mrb[75].mxu0 }
 0x1a4   : > { %v7784_v17 = vpop.f32.mrb[75].mxu1  ;;  %v11119_v41 = vadd.f32 %v8008_v52, %v8007_v34 }
 0x1a5   : > { %v11121_v40 = vadd.f32 %v7784_v17, %v7783_v13  ;;  %3037 = vmatmul.mubr.bf16.gmra.mrb[180].mxu0 %v10864_v1 }
 0x1a6   : > { %2138 = vmatmul.mubr.bf16.gmra.mrb[180].mxu1 %v10864_v1  ;;  %3044 = vmatprep.mubr.bf16.mxu0 %v10867_v3 }
 0x1a7   : > { %2145 = vmatprep.mubr.bf16.mxu1 %v10867_v3  ;;  %v9467_v3 = vld [vmem:[%s13927_s4 + $0x80] sm:$0xff]  }
 0x1a8   : > { %v8010_v59 = vpop.f32.mrb[76].mxu0 }
 0x1a9   : > { %v7786_v43 = vpop.f32.mrb[76].mxu1  ;;  %v8011_v44 = vpop.f32.mrb[77].mxu0 }
 0x1aa   : > { %v7787_v27 = vpop.f32.mrb[77].mxu1  ;;  %v11129_v39 = vadd.f32 %v8011_v44, %v8010_v59  ;;  %v8013_v36 = vpop.f32.mrb[78].mxu0 }
 0x1ab   : > { %v11131_v18 = vadd.f32 %v7787_v27, %v7786_v43  ;;  %v7789_v50 = vpop.f32.mrb[78].mxu1  ;;  %v8014_v34 = vpop.f32.mrb[79].mxu0 }
 0x1ac   : > { %v7790_v13 = vpop.f32.mrb[79].mxu1  ;;  %v11133_v1 = vadd.f32 %v8014_v34, %v8013_v36 }
 0x1ad   : > { %v11135_v52 = vadd.f32 %v7790_v13, %v7789_v50  ;;  %3045 = vmatmul.mubr.bf16.gmra.mrb[184].mxu0 %v10876_v12 }
 0x1ae   : > { %2146 = vmatmul.mubr.bf16.gmra.mrb[184].mxu1 %v10876_v12  ;;  %3052 = vmatprep.mubr.bf16.mxu0 %v10879_v14 }
 0x1af   : > { %2153 = vmatprep.mubr.bf16.mxu1 %v10879_v14  ;;  %v11154_v14 = vld [vmem:[%s10531_s23 + $0x4] ss:$8 sps:$4 sm:$0xff]  }
 0x1b0   : > { %v8016_v17 = vpop.f32.mrb[80].mxu0 }
 0x1b1   : > { %v7792_v59 = vpop.f32.mrb[80].mxu1  ;;  %v8017_v43 = vpop.f32.mrb[81].mxu0 }
 0x1b2   : > { %v7793_v44 = vpop.f32.mrb[81].mxu1  ;;  %v11143_v27 = vadd.f32 %v8017_v43, %v8016_v17  ;;  %v8019_v36 = vpop.f32.mrb[82].mxu0  ;;  %v9468_v17 = vld [vmem:[%s13927_s4 + $0xc8] sm:$0xff]  }
 0x1b3   : > { %v11145_v50 = vadd.f32 %v7793_v44, %v7792_v59  ;;  %v7795_v34 = vpop.f32.mrb[82].mxu1  ;;  %v8020_v13 = vpop.f32.mrb[83].mxu0 }
 0x1b4   : > { %v7796_v12 = vpop.f32.mrb[83].mxu1  ;;  %v11147_v55 = vadd.f32 %v8020_v13, %v8019_v36 }
 0x1b5   : > { %v11149_v15 = vadd.f32 %v7796_v12, %v7795_v34  ;;  %3053 = vmatmul.mubr.bf16.gmra.mrb[188].mxu0 %v10888_v23 }
 0x1b6   : > { %2154 = vmatmul.mubr.bf16.gmra.mrb[188].mxu1 %v10888_v23  ;;  %3446 = vmatprep.mubr.bf16.mxu0 %v11154_v14 }
 0x1b7   : > { %2547 = vmatprep.mubr.bf16.mxu1 %v11154_v14 }
 0x1b8   : > { %v8022_v59 = vpop.f32.mrb[84].mxu0 }
 0x1b9   : > { %v7798_v43 = vpop.f32.mrb[84].mxu1  ;;  %v8023_v44 = vpop.f32.mrb[85].mxu0 }
 0x1ba   : > { %v7799_v36 = vpop.f32.mrb[85].mxu1  ;;  %v11160_v34 = vadd.f32 %v8023_v44, %v8022_v59  ;;  %v8025_v13 = vpop.f32.mrb[86].mxu0  ;;  %v11175_v59 = vld [vmem:[%s10531_s23] ss:$8 sps:$4 sm:$0xff]   ;;  %v11182_v44 = vld [vmem:[%s10531_s23 + $0x14] ss:$8 sps:$4 sm:$0xff]  }
 0x1bb   : > { %v11162_v12 = vadd.f32 %v7799_v36, %v7798_v43  ;;  %v7801_v23 = vpop.f32.mrb[86].mxu1  ;;  %v8026_v5 = vpop.f32.mrb[87].mxu0  ;;  %v9470_v36 = vld [vmem:[%s13927_s4 + $0xd0] sm:$0xff]  }
 0x1bc   : > { %v7802_v7 = vpop.f32.mrb[87].mxu1  ;;  %v11170_v32 = vadd.f32 %v8026_v5, %v8025_v13 }
 0x1bd   : > { %v11172_v54 = vadd.f32 %v7802_v7, %v7801_v23  ;;  %3447 = vmatmul.mubr.bf16.vlgmr.msra.gmra.mrb[192].mxu0 %v11175_v59  ;;  %v9469_v7 = vld [vmem:[%s13927_s4 + $0x88] sm:$0xff]  }
 0x1be   : > { %2548 = vmatmul.mubr.bf16.vlgmr.msra.gmra.mrb[192].mxu1 %v11175_v59  ;;  %3454 = vmatprep.mubr.bf16.mxu0 %v11182_v44 }
 0x1bf   : > { %8313 = vmatpush3.bf16.msra.mxu1 %v9467_v3  ;;  %2555 = vmatprep.mubr.bf16.mxu1 %v11182_v44 }
 0x1c0   : > { %8314 = vmatprep.subr.bf16.mxu1 %v9468_v17  ;;  %v8028_v13 = vpop.f32.mrb[88].mxu0  ;;  %v9471_v17 = vld [vmem:[%s13927_s4 + $0x90] sm:$0xff]  }
 0x1c1   : > { %v7804_v23 = vpop.f32.mrb[88].mxu1  ;;  %v8029_v43 = vpop.f32.mrb[89].mxu0 }
 0x1c2   : > { %v7805_v4 = vpop.f32.mrb[89].mxu1  ;;  %v11194_v3 = vadd.f32 %v8029_v43, %v8028_v13  ;;  %v8031_v19 = vpop.f32.mrb[90].mxu0  ;;  %v11209_v13 = vld [vmem:[%s10531_s23 + $0x10] ss:$8 sps:$4 sm:$0xff]  }
 0x1c3   : > { %v11196_v49 = vadd.f32 %v7805_v4, %v7804_v23  ;;  %v7807_v9 = vpop.f32.mrb[90].mxu1  ;;  %8315 = vmatpush3.bf16.msra.mxu1 %v9469_v7  ;;  %v8032_v5 = vpop.f32.mrb[91].mxu0  ;;  %v11216_v7 = vld [vmem:[%s10531_s23 + $0x24] ss:$8 sps:$4 sm:$0xff]  }
 0x1c4   : > { %14184 = vst [vmem:[#allocation35_spill] sm:$0xff] %v11194_v3  ;;  %v7808_v47 = vpop.f32.mrb[91].mxu1  ;;  %8316 = vmatprep.subr.bf16.mxu1 %v9470_v36  ;;  %v11204_v24 = vadd.f32 %v8032_v5, %v8031_v19  ;;  %v9474_v19 = vld [vmem:[%s13927_s4 + $0xe0] sm:$0xff]  }
 0x1c5   : > { %v11206_v43 = vadd.f32 %v7808_v47, %v7807_v9  ;;  %3455 = vmatmul.mubr.bf16.gmra.mrb[196].mxu0 %v11209_v13  ;;  %v9473_v47 = vld [vmem:[%s13927_s4 + $0x98] sm:$0xff]  }
 0x1c6   : > { %14185 = vst [vmem:[#allocation36_spill] sm:$0xff] %v11204_v24  ;;  %2556 = vmatmul.mubr.bf16.gmra.mrb[196].mxu1 %v11209_v13  ;;  %3462 = vmatprep.mubr.bf16.mxu0 %v11216_v7 }
 0x1c7   : > { %2563 = vmatprep.mubr.bf16.mxu1 %v11216_v7  ;;  %8317 = vmatpush3.bf16.msra.mxu1 %v9471_v17 }
 0x1c8   : > { %8318 = vmatprep.subr.bf16.mxu1 %v9472_v51  ;;  %v8034_v5 = vpop.f32.mrb[92].mxu0  ;;  %v9475_v51 = vld [vmem:[%s13927_s4 + $0xa0] sm:$0xff]  }
 0x1c9   : > { %v7810_v36 = vpop.f32.mrb[92].mxu1  ;;  %v8035_v23 = vpop.f32.mrb[93].mxu0 }
 0x1ca   : > { %v7811_v4 = vpop.f32.mrb[93].mxu1  ;;  %v11228_v0 = vadd.f32 %v8035_v23, %v8034_v5  ;;  %v8037_v17 = vpop.f32.mrb[94].mxu0  ;;  %v11243_v23 = vld [vmem:[%s10531_s23 + $0x20] ss:$8 sps:$4 sm:$0xff]  }
 0x1cb   : > { %v11230_v45 = vadd.f32 %v7811_v4, %v7810_v36  ;;  %v7813_v21 = vpop.f32.mrb[94].mxu1  ;;  %8319 = vmatpush3.bf16.msra.mxu1 %v9473_v47  ;;  %v8038_v9 = vpop.f32.mrb[95].mxu0  ;;  %v11250_v47 = vld [vmem:[%s10531_s23 + $0x34] ss:$8 sps:$4 sm:$0xff]  }
 0x1cc   : > { %14186 = vst [vmem:[#allocation37_spill] sm:$0xff] %v11228_v0  ;;  %v7814_v10 = vpop.f32.mrb[95].mxu1  ;;  %8320 = vmatprep.subr.bf16.mxu1 %v9474_v19  ;;  %v11238_v48 = vadd.f32 %v8038_v9, %v8037_v17  ;;  %v9478_v9 = vld [vmem:[%s13927_s4 + $0xf0] sm:$0xff]  }
 0x1cd   : > { %v11240_v5 = vadd.f32 %v7814_v10, %v7813_v21  ;;  %3463 = vmatmul.mubr.bf16.gmra.mrb[200].mxu0 %v11243_v23  ;;  %v9477_v10 = vld [vmem:[%s13927_s4 + $0xa8] sm:$0xff]  }
 0x1ce   : > { %14187 = vst [vmem:[#allocation38_spill] sm:$0xff] %v11238_v48  ;;  %2564 = vmatmul.mubr.bf16.gmra.mrb[200].mxu1 %v11243_v23  ;;  %3470 = vmatprep.mubr.bf16.mxu0 %v11250_v47 }
 0x1cf   : > { %2571 = vmatprep.mubr.bf16.mxu1 %v11250_v47  ;;  %8321 = vmatpush3.bf16.msra.mxu1 %v9475_v51 }
 0x1d0   : > { %8322 = vmatprep.subr.bf16.mxu1 %v9476_v63  ;;  %v8040_v19 = vpop.f32.mrb[96].mxu0  ;;  %v9479_v63 = vld [vmem:[%s13927_s4 + $0xb0] sm:$0xff]  }
 0x1d1   : > { %v7816_v36 = vpop.f32.mrb[96].mxu1  ;;  %v8041_v17 = vpop.f32.mrb[97].mxu0 }
 0x1d2   : > { %v7817_v4 = vpop.f32.mrb[97].mxu1  ;;  %v11262_v37 = vadd.f32 %v8041_v17, %v8040_v19  ;;  %v8043_v51 = vpop.f32.mrb[98].mxu0  ;;  %v11273_v17 = vld [vmem:[%s10531_s23 + $0x30] ss:$8 sps:$4 sm:$0xff]  }
 0x1d3   : > { %v7818_v56 = vadd.f32 %v7817_v4, %v7816_v36  ;;  %v7819_v25 = vpop.f32.mrb[98].mxu1  ;;  %8323 = vmatpush3.bf16.msra.mxu1 %v9477_v10  ;;  %v8044_v21 = vpop.f32.mrb[99].mxu0  ;;  %v11280_v10 = vld [vmem:[%s10531_s23 + $0x44] ss:$8 sps:$4 sm:$0xff]  }
 0x1d4   : > { %v7820_v2 = vpop.f32.mrb[99].mxu1  ;;  %8324 = vmatprep.subr.bf16.mxu1 %v9478_v9  ;;  %v11270_v29 = vadd.f32 %v8044_v21, %v8043_v51  ;;  %14188 = vst [vmem:[#allocation39_spill] sm:$0xff] %v11280_v10 }
 0x1d5   : > { %v7821_v19 = vadd.f32 %v7820_v2, %v7819_v25  ;;  %3471 = vmatmul.mubr.bf16.gmra.mrb[204].mxu0 %v11273_v17  ;;  %v9481_v2 = vld [vmem:[%s13927_s4 + $0xb8] sm:$0xff]   ;;  %v9482_v25 = vld [vmem:[%s13927_s4 + $0x1c0] sm:$0xff]  }
 0x1d6   : > { %2572 = vmatmul.mubr.bf16.gmra.mrb[204].mxu1 %v11273_v17  ;;  %3478 = vmatprep.mubr.bf16.mxu0 %v11280_v10 }
 0x1d7   : > { %v3872_v21 = vpack.c.bf16 %v7821_v19, %v7818_v56  ;;  %2579 = vmatprep.mubr.bf16.mxu1 %v11280_v10  ;;  %8325 = vmatpush3.bf16.msra.mxu1 %v9479_v63  ;;  %v14189_v56 = vpack.c.bf16 %v11087_v58, %v11083_v33  ;;  %v11302_v10 = vld [vmem:[%s10531_s23 + $0x40] ss:$8 sps:$4 sm:$0xff]   ;;  %v11309_v58 = vld [vmem:[%s10531_s23 + $0x54] ss:$8 sps:$4 sm:$0xff]  }
 0x1d8   : > { %8326 = vmatprep.subr.bf16.mxu1 %v9480_v46  ;;  %v8046_v36 = vpop.f32.mrb[100].mxu0 }
 0x1d9   : > { %v7822_v51 = vpop.f32.mrb[100].mxu1  ;;  %9128 = vmatprep.subr.msk.bf16.mxu0 %vm3928_vm0, %v3872_v21  ;;  %v3954_v19 = vsel %vm3928_vm0, %v14189_v56, 0  ;;  %v8047_v63 = vpop.f32.mrb[101].mxu0 }
 0x1da   : > { %v7823_v4 = vpop.f32.mrb[101].mxu1  ;;  %8649 = vmatpush3.bf16.xpose.msra.mxu0 %v3954_v19  ;;  %v11297_v9 = vadd.f32 %v8047_v63, %v8046_v36  ;;  %v8049_v46 = vpop.f32.mrb[102].mxu0 }
 0x1db   : > { %v7824_v31 = vadd.f32 %v7823_v4, %v7822_v51  ;;  %v7825_v42 = vpop.f32.mrb[102].mxu1  ;;  %8327 = vmatpush3.bf16.msra.mxu1 %v9481_v2  ;;  %v8050_v8 = vpop.f32.mrb[103].mxu0 }
 0x1dc   : > { %v7826_v57 = vpop.f32.mrb[103].mxu1  ;;  %8536 = vmatprep.subr.bf16.mxu1 %v9482_v25  ;;  %v11299_v26 = vadd.f32 %v8050_v8, %v8049_v46 }
 0x1dd   : > { %v7827_v21 = vadd.f32 %v7826_v57, %v7825_v42  ;;  %3479 = vmatmul.mubr.bf16.gmra.mrb[208].mxu0 %v11302_v10  ;;  %v14190_v42 = vpack.c.bf16 %v11105_v38, %v11101_v20  ;;  %v11332_v38 = vld [vmem:[%s10531_s23 + $0x64] ss:$8 sps:$4 sm:$0xff]  }
 0x1de   : > { %2580 = vmatmul.mubr.bf16.gmra.mrb[208].mxu1 %v11302_v10  ;;  %3486 = vmatprep.mubr.bf16.mxu0 %v11309_v58  ;;  %14192 = vst [vmem:[#allocation41_spill] sm:$0xff] %v11332_v38 }
 0x1df   : > { %v3873_v2 = vpack.c.bf16 %v7827_v21, %v7824_v31  ;;  %2587 = vmatprep.mubr.bf16.mxu1 %v11309_v58  ;;  %v3957_v25 = vsel %vm3928_vm0, %v14190_v42, 0 }
 0x1e0   : > { %v8052_v57 = vpop.f32.mrb[104].mxu0 }
 0x1e1   : > { %v7828_v8 = vpop.f32.mrb[104].mxu1  ;;  %9129 = vmatprep.subr.msk.bf16.mxu0 %vm3928_vm0, %v3873_v2  ;;  %v8053_v36 = vpop.f32.mrb[105].mxu0  ;;  %v11325_v2 = vld [vmem:[%s10531_s23 + $0x50] ss:$8 sps:$4 sm:$0xff]  }
 0x1e2   : > { %v7829_v51 = vpop.f32.mrb[105].mxu1  ;;  %8651 = vmatpush3.bf16.xpose.msra.mxu0 %v3957_v25  ;;  %v11320_v56 = vadd.f32 %v8053_v36, %v8052_v57  ;;  %v8055_v19 = vpop.f32.mrb[106].mxu0  ;;  %14191 = vst [vmem:[#allocation40_spill] sm:$0xff] %v11325_v2  ;;  %v14193_v36 = vpack.c.bf16 %v11121_v40, %v11117_v11  ;;  %v11355_v40 = vld [vmem:[%s10531_s23 + $0x74] ss:$8 sps:$4 sm:$0xff]  }
 0x1e3   : > { %v7830_v31 = vadd.f32 %v7829_v51, %v7828_v8  ;;  %v7831_v63 = vpop.f32.mrb[106].mxu1  ;;  %v8056_v46 = vpop.f32.mrb[107].mxu0  ;;  %14195 = vst [vmem:[#allocation43_spill] sm:$0xff] %v11355_v40 }
 0x1e4   : > { %v7832_v21 = vpop.f32.mrb[107].mxu1  ;;  %v11322_v33 = vadd.f32 %v8056_v46, %v8055_v19  ;;  %v3960_v51 = vsel %vm3928_vm0, %v14193_v36, 0  ;;  %v14196_v36 = vpack.c.bf16 %v11135_v52, %v11131_v18  ;;  %v11378_v52 = vld [vmem:[%s10531_s23 + $0x84] ss:$8 sps:$4 sm:$0xff]  }
 0x1e5   : > { %v7833_v4 = vadd.f32 %v7832_v21, %v7831_v63  ;;  %3487 = vmatmul.mubr.bf16.gmra.mrb[212].mxu0 %v11325_v2  ;;  %14198 = vst [vmem:[#allocation45_spill] sm:$0xff] %v11378_v52 }
 0x1e6   : > { %2588 = vmatmul.mubr.bf16.gmra.mrb[212].mxu1 %v11325_v2  ;;  %3494 = vmatprep.mubr.bf16.mxu0 %v11332_v38 }
 0x1e7   : > { %v3874_v8 = vpack.c.bf16 %v7833_v4, %v7830_v31  ;;  %2595 = vmatprep.mubr.bf16.mxu1 %v11332_v38 }
 0x1e8   : > { %v8058_v42 = vpop.f32.mrb[108].mxu0 }
 0x1e9   : > { %v7834_v25 = vpop.f32.mrb[108].mxu1  ;;  %9130 = vmatprep.subr.msk.bf16.mxu0 %vm3928_vm0, %v3874_v8  ;;  %v8059_v19 = vpop.f32.mrb[109].mxu0  ;;  %v11348_v8 = vld [vmem:[%s10531_s23 + $0x60] ss:$8 sps:$4 sm:$0xff]  }
 0x1ea   : > { %v7835_v63 = vpop.f32.mrb[109].mxu1  ;;  %8653 = vmatpush3.bf16.xpose.msra.mxu0 %v3960_v51  ;;  %v11343_v46 = vadd.f32 %v8059_v19, %v8058_v42  ;;  %v8061_v21 = vpop.f32.mrb[110].mxu0  ;;  %14194 = vst [vmem:[#allocation42_spill] sm:$0xff] %v11348_v8  ;;  %v3963_v51 = vsel %vm3928_vm0, %v14196_v36, 0  ;;  %v14199_v36 = vpack.c.bf16 %v11149_v15, %v11145_v50  ;;  %v11399_v15 = vld [vmem:[%s10531_s23 + $0x94] ss:$8 sps:$4 sm:$0xff]  }
 0x1eb   : > { %v7836_v4 = vadd.f32 %v7835_v63, %v7834_v25  ;;  %v7837_v31 = vpop.f32.mrb[110].mxu1  ;;  %v8062_v20 = vpop.f32.mrb[111].mxu0  ;;  %14201 = vst [vmem:[#allocation47_spill] sm:$0xff] %v11399_v15 }
 0x1ec   : > { %v7838_v57 = vpop.f32.mrb[111].mxu1  ;;  %v11345_v38 = vadd.f32 %v8062_v20, %v8061_v21 }
 0x1ed   : > { %v7839_v2 = vadd.f32 %v7838_v57, %v7837_v31  ;;  %3495 = vmatmul.mubr.bf16.gmra.mrb[216].mxu0 %v11348_v8 }
 0x1ee   : > { %2596 = vmatmul.mubr.bf16.gmra.mrb[216].mxu1 %v11348_v8  ;;  %3502 = vmatprep.mubr.bf16.mxu0 %v11355_v40 }
 0x1ef   : > { %v3875_v25 = vpack.c.bf16 %v7839_v2, %v7836_v4  ;;  %2603 = vmatprep.mubr.bf16.mxu1 %v11355_v40 }
 0x1f0   : > { %v8064_v20 = vpop.f32.mrb[112].mxu0 }
 0x1f1   : > { %v7840_v57 = vpop.f32.mrb[112].mxu1  ;;  %9131 = vmatprep.subr.msk.bf16.mxu0 %vm3928_vm0, %v3875_v25  ;;  %v8065_v19 = vpop.f32.mrb[113].mxu0  ;;  %v11371_v25 = vld [vmem:[%s10531_s23 + $0x70] ss:$8 sps:$4 sm:$0xff]  }
 0x1f2   : > { %v7841_v63 = vpop.f32.mrb[113].mxu1  ;;  %8655 = vmatpush3.bf16.xpose.msra.mxu0 %v3963_v51  ;;  %v11366_v21 = vadd.f32 %v8065_v19, %v8064_v20  ;;  %v8067_v31 = vpop.f32.mrb[114].mxu0  ;;  %14197 = vst [vmem:[#allocation44_spill] sm:$0xff] %v11371_v25  ;;  %v3966_v51 = vsel %vm3928_vm0, %v14199_v36, 0 }
 0x1f3   : > { %v7842_v2 = vadd.f32 %v7841_v63, %v7840_v57  ;;  %v7843_v4 = vpop.f32.mrb[114].mxu1  ;;  %v8068_v11 = vpop.f32.mrb[115].mxu0 }
 0x1f4   : > { %v7844_v42 = vpop.f32.mrb[115].mxu1  ;;  %v11368_v40 = vadd.f32 %v8068_v11, %v8067_v31 }
 0x1f5   : > { %v7845_v8 = vadd.f32 %v7844_v42, %v7843_v4  ;;  %3503 = vmatmul.mubr.bf16.gmra.mrb[220].mxu0 %v11371_v25 }
 0x1f6   : > { %2604 = vmatmul.mubr.bf16.gmra.mrb[220].mxu1 %v11371_v25  ;;  %3510 = vmatprep.mubr.bf16.mxu0 %v11378_v52 }
 0x1f7   : > { %v3876_v57 = vpack.c.bf16 %v7845_v8, %v7842_v2  ;;  %2611 = vmatprep.mubr.bf16.mxu1 %v11378_v52 }
 0x1f8   : > { %v8070_v11 = vpop.f32.mrb[116].mxu0 }
 0x1f9   : > { %v7846_v42 = vpop.f32.mrb[116].mxu1  ;;  %9132 = vmatprep.subr.msk.bf16.mxu0 %vm3928_vm0, %v3876_v57  ;;  %v8071_v19 = vpop.f32.mrb[117].mxu0  ;;  %v11394_v57 = vld [vmem:[%s10531_s23 + $0x80] ss:$8 sps:$4 sm:$0xff]  }
 0x1fa   : > { %v7847_v63 = vpop.f32.mrb[117].mxu1  ;;  %8657 = vmatpush3.bf16.xpose.msra.mxu0 %v3966_v51  ;;  %v11389_v31 = vadd.f32 %v8071_v19, %v8070_v11  ;;  %v8073_v4 = vpop.f32.mrb[118].mxu0  ;;  %14200 = vst [vmem:[#allocation46_spill] sm:$0xff] %v11394_v57 }
 0x1fb   : > { %v7848_v8 = vadd.f32 %v7847_v63, %v7846_v42  ;;  %v7849_v2 = vpop.f32.mrb[118].mxu1  ;;  %v8074_v18 = vpop.f32.mrb[119].mxu0 }
 0x1fc   : > { %v7850_v20 = vpop.f32.mrb[119].mxu1  ;;  %v11391_v52 = vadd.f32 %v8074_v18, %v8073_v4 }
 0x1fd   : > { %v7851_v25 = vadd.f32 %v7850_v20, %v7849_v2  ;;  %3511 = vmatmul.mubr.bf16.gmra.mrb[224].mxu0 %v11394_v57  ;;  %v14202_v20 = vpack.c.bf16 %v11172_v54, %v11162_v12  ;;  %v11420_v54 = vld [vmem:[%s10531_s23 + $0xa4] ss:$8 sps:$4 sm:$0xff]  }
 0x1fe   : > { %2612 = vmatmul.mubr.bf16.gmra.mrb[224].mxu1 %v11394_v57  ;;  %3518 = vmatprep.mubr.bf16.mxu0 %v11399_v15  ;;  %14205 = vst [vmem:[#allocation50_spill] sm:$0xff] %v11420_v54 }
 0x1ff   : > { %v3877_v11 = vpack.c.bf16 %v7851_v25, %v7848_v8  ;;  %2619 = vmatprep.mubr.bf16.mxu1 %v11399_v15  ;;  %v3969_v36 = vsel %vm3928_vm0, %v14202_v20, 0 }
 0x200   : > { %v8076_v18 = vpop.f32.mrb[120].mxu0 }
 0x201   : > { %v7852_v42 = vpop.f32.mrb[120].mxu1  ;;  %9133 = vmatprep.subr.msk.bf16.mxu0 %vm3928_vm0, %v3877_v11  ;;  %v8077_v51 = vpop.f32.mrb[121].mxu0  ;;  %v11415_v11 = vld [vmem:[%s10531_s23 + $0x90] ss:$8 sps:$4 sm:$0xff]  }
 0x202   : > { %v7853_v19 = vpop.f32.mrb[121].mxu1  ;;  %8659 = vmatpush3.bf16.xpose.msra.mxu0 %v3969_v36  ;;  %v11410_v63 = vadd.f32 %v8077_v51, %v8076_v18  ;;  %v8079_v4 = vpop.f32.mrb[122].mxu0  ;;  %14204 = vst [vmem:[#allocation49_spill] sm:$0xff] %v11415_v11 }
 0x203   : > { %v7854_v25 = vadd.f32 %v7853_v19, %v7852_v42  ;;  %v7855_v8 = vpop.f32.mrb[122].mxu1  ;;  %v8080_v2 = vpop.f32.mrb[123].mxu0 }
 0x204   : > { %14203 = vst [vmem:[#allocation48_spill] sm:$0xff] %v11410_v63  ;;  %v7856_v50 = vpop.f32.mrb[123].mxu1  ;;  %v11412_v15 = vadd.f32 %v8080_v2, %v8079_v4 }
 0x205   : > { %v7857_v57 = vadd.f32 %v7856_v50, %v7855_v8  ;;  %3519 = vmatmul.mubr.bf16.gmra.mrb[228].mxu0 %v11415_v11  ;;  %v14206_v50 = vpack.c.bf16 %v11206_v43, %v11196_v49  ;;  %v11441_v49 = vld [vmem:[%s10531_s23 + $0xb4] ss:$8 sps:$4 sm:$0xff]  }
 0x206   : > { %2620 = vmatmul.mubr.bf16.gmra.mrb[228].mxu1 %v11415_v11  ;;  %3526 = vmatprep.mubr.bf16.mxu0 %v11420_v54  ;;  %14210 = vst [vmem:[#allocation54_spill] sm:$0xff] %v11441_v49 }
 0x207   : > { %v3878_v18 = vpack.c.bf16 %v7857_v57, %v7854_v25  ;;  %2627 = vmatprep.mubr.bf16.mxu1 %v11420_v54  ;;  %v3972_v36 = vsel %vm3928_vm0, %v14206_v50, 0 }
 0x208   : > { %v8082_v42 = vpop.f32.mrb[124].mxu0 }
 0x209   : > { %v7858_v20 = vpop.f32.mrb[124].mxu1  ;;  %9134 = vmatprep.subr.msk.bf16.mxu0 %vm3928_vm0, %v3878_v18  ;;  %v8083_v51 = vpop.f32.mrb[125].mxu0  ;;  %v11436_v18 = vld [vmem:[%s10531_s23 + $0xa0] ss:$8 sps:$4 sm:$0xff]  }
 0x20a   : > { %v7859_v19 = vpop.f32.mrb[125].mxu1  ;;  %8661 = vmatpush3.bf16.xpose.msra.mxu0 %v3972_v36  ;;  %v11431_v4 = vadd.f32 %v8083_v51, %v8082_v42  ;;  %v8085_v8 = vpop.f32.mrb[126].mxu0  ;;  %14209 = vst [vmem:[#allocation53_spill] sm:$0xff] %v11436_v18 }
 0x20b   : > { %v7860_v57 = vadd.f32 %v7859_v19, %v7858_v20  ;;  %v7861_v25 = vpop.f32.mrb[126].mxu1  ;;  %v8086_v2 = vpop.f32.mrb[127].mxu0 }
 0x20c   : > { %14207 = vst [vmem:[#allocation51_spill] sm:$0xff] %v11431_v4  ;;  %v7862_v12 = vpop.f32.mrb[127].mxu1  ;;  %v11433_v54 = vadd.f32 %v8086_v2, %v8085_v8 }
 0x20d   : > { %v7863_v11 = vadd.f32 %v7862_v12, %v7861_v25  ;;  %3527 = vmatmul.mubr.bf16.gmra.mrb[232].mxu0 %v11436_v18  ;;  %v14211_v12 = vpack.c.bf16 %v11240_v5, %v11230_v45  ;;  %v11467_v5 = vld [vmem:[%s10531_s23 + $0xb0] ss:$8 sps:$4 sm:$0xff]  }
 0x20e   : > { %14208 = vst [vmem:[#allocation52_spill] sm:$0xff] %v11433_v54  ;;  %2628 = vmatmul.mubr.bf16.gmra.mrb[232].mxu1 %v11436_v18  ;;  %3534 = vmatprep.mubr.bf16.mxu0 %v11441_v49  ;;  %14215 = vst [vmem:[#allocation57_spill] sm:$0xff] %v11467_v5 }
 0x20f   : > { %v3879_v42 = vpack.c.bf16 %v7863_v11, %v7860_v57  ;;  %2635 = vmatprep.mubr.bf16.mxu1 %v11441_v49  ;;  %v3975_v50 = vsel %vm3928_vm0, %v14211_v12, 0  ;;  %v14213_v11 = vpack.c.bf16 %v11270_v29, %v11262_v37  ;;  %v11498_v29 = vld [vmem:[%s10531_s23 + $0xd4] ss:$8 sps:$4 sm:$0xff]  }
 0x210   : > { %v11452_v36 = vpop.f32.mrb[128].mxu0  ;;  %14220 = vst [vmem:[#allocation62_spill] sm:$0xff] %v11498_v29 }
 0x211   : > { %v7880_v20 = vpop.f32.mrb[128].mxu1  ;;  %9135 = vmatprep.subr.msk.bf16.mxu0 %vm3928_vm0, %v3879_v42  ;;  %v11460_v57 = vpop.f32.mrb[129].mxu0 }
 0x212   : > { %v7881_v51 = vpop.f32.mrb[129].mxu1  ;;  %8663 = vmatpush3.bf16.xpose.msra.mxu0 %v3975_v50  ;;  %v11462_v2 = vpop.f32.mrb[130].mxu0 }
 0x213   : > { %v11454_v19 = vadd.f32 %v7881_v51, %v7880_v20  ;;  %v7883_v8 = vpop.f32.mrb[130].mxu1  ;;  %9144 = vmatprep.subr.msk.bf16.mxu0 %vm3928_vm0, %v14213_v11  ;;  %v11470_v42 = vpop.f32.mrb[131].mxu0  ;;  %v11474_v20 = vld [vmem:[%s10531_s23 + $0xc4] ss:$8 sps:$4 sm:$0xff]  }
 0x214   : > { %v7884_v25 = vpop.f32.mrb[131].mxu1  ;;  %14216 = vst [vmem:[#allocation58_spill] sm:$0xff] %v11474_v20 }
 0x215   : > { %14212 = vst [vmem:[#allocation55_spill] sm:$0xff] %v11454_v19  ;;  %v11464_v45 = vadd.f32 %v7884_v25, %v7883_v8  ;;  %3535 = vmatmul.mubr.bf16.gmra.mrb[236].mxu0 %v11467_v5 }
 0x216   : > { %2636 = vmatmul.mubr.bf16.gmra.mrb[236].mxu1 %v11467_v5  ;;  %3542 = vmatprep.mubr.bf16.mxu0 %v11474_v20 }
 0x217   : > { %14214 = vst [vmem:[#allocation56_spill] sm:$0xff] %v11464_v45  ;;  %2643 = vmatprep.mubr.bf16.mxu1 %v11474_v20  ;;  %v11493_v20 = vld [vmem:[%s10531_s23 + $0xc0] ss:$8 sps:$4 sm:$0xff]  }
 0x218   : > { %v11480_v37 = vpop.f32.mrb[132].mxu0  ;;  %14219 = vst [vmem:[#allocation61_spill] sm:$0xff] %v11493_v20 }
 0x219   : > { %v7886_v12 = vpop.f32.mrb[132].mxu1  ;;  %v11482_v50 = vpop.f32.mrb[133].mxu0 }
 0x21a   : > { %v7887_v51 = vpop.f32.mrb[133].mxu1  ;;  %v11484_v8 = vpop.f32.mrb[134].mxu0 }
 0x21b   : > { %v11486_v11 = vadd.f32 %v7887_v51, %v7886_v12  ;;  %v7889_v25 = vpop.f32.mrb[134].mxu1  ;;  %v11488_v43 = vpop.f32.mrb[135].mxu0  ;;  %v11522_v12 = vld [vmem:[%s10531_s23 + $0xe4] ss:$8 sps:$4 sm:$0xff]  }
 0x21c   : > { %v7890_v5 = vpop.f32.mrb[135].mxu1  ;;  %14224 = vst [vmem:[#allocation66_spill] sm:$0xff] %v11522_v12 }
 0x21d   : > { %14217 = vst [vmem:[#allocation59_spill] sm:$0xff] %v11486_v11  ;;  %v11490_v49 = vadd.f32 %v7890_v5, %v7889_v25  ;;  %3543 = vmatmul.mubr.bf16.gmra.mrb[240].mxu0 %v11493_v20 }
 0x21e   : > { %2644 = vmatmul.mubr.bf16.gmra.mrb[240].mxu1 %v11493_v20  ;;  %3550 = vmatprep.mubr.bf16.mxu0 %v11498_v29 }
 0x21f   : > { %14218 = vst [vmem:[#allocation60_spill] sm:$0xff] %v11490_v49  ;;  %2651 = vmatprep.mubr.bf16.mxu1 %v11498_v29  ;;  %v11517_v29 = vld [vmem:[%s10531_s23 + $0xd0] ss:$8 sps:$4 sm:$0xff]  }
 0x220   : > { %v11504_v51 = vpop.f32.mrb[136].mxu0  ;;  %14223 = vst [vmem:[#allocation65_spill] sm:$0xff] %v11517_v29 }
 0x221   : > { %v7892_v5 = vpop.f32.mrb[136].mxu1  ;;  %v11506_v25 = vpop.f32.mrb[137].mxu0 }
 0x222   : > { %v7893_v19 = vpop.f32.mrb[137].mxu1  ;;  %v11508_v45 = vpop.f32.mrb[138].mxu0 }
 0x223   : > { %v11510_v18 = vadd.f32 %v7893_v19, %v7892_v5  ;;  %v7895_v20 = vpop.f32.mrb[138].mxu1  ;;  %v11512_v0 = vpop.f32.mrb[139].mxu0  ;;  %v11546_v19 = vld [vmem:[%s10531_s23 + $0xf4] ss:$8 sps:$4 sm:$0xff]  }
 0x224   : > { %v7896_v48 = vpop.f32.mrb[139].mxu1  ;;  %14232 = vst [vmem:[#allocation74_spill] sm:$0xff] %v11546_v19 }
 0x225   : > { %14221 = vst [vmem:[#allocation63_spill] sm:$0xff] %v11510_v18  ;;  %v11514_v4 = vadd.f32 %v7896_v48, %v7895_v20  ;;  %3551 = vmatmul.mubr.bf16.gmra.mrb[244].mxu0 %v11517_v29 }
 0x226   : > { %2652 = vmatmul.mubr.bf16.gmra.mrb[244].mxu1 %v11517_v29  ;;  %3558 = vmatprep.mubr.bf16.mxu0 %v11522_v12 }
 0x227   : > { %14222 = vst [vmem:[#allocation64_spill] sm:$0xff] %v11514_v4  ;;  %2659 = vmatprep.mubr.bf16.mxu1 %v11522_v12  ;;  %v11541_v12 = vld [vmem:[%s10531_s23 + $0xe0] ss:$8 sps:$4 sm:$0xff]  }
 0x228   : > { %v11528_v5 = vpop.f32.mrb[140].mxu0  ;;  %14231 = vst [vmem:[#allocation73_spill] sm:$0xff] %v11541_v12 }
 0x229   : > { %14225 = vst [vmem:[#allocation67_spill] sm:$0xff] %v11528_v5  ;;  %v7898_v48 = vpop.f32.mrb[140].mxu1  ;;  %v11530_v20 = vpop.f32.mrb[141].mxu0 }
 0x22a   : > { %14226 = vst [vmem:[#allocation68_spill] sm:$0xff] %v11530_v20  ;;  %v7899_v11 = vpop.f32.mrb[141].mxu1  ;;  %v11532_v49 = vpop.f32.mrb[142].mxu0 }
 0x22b   : > { %14227 = vst [vmem:[#allocation69_spill] sm:$0xff] %v11532_v49  ;;  %v11534_v54 = vadd.f32 %v7899_v11, %v7898_v48  ;;  %v7901_v29 = vpop.f32.mrb[142].mxu1  ;;  %v11536_v3 = vpop.f32.mrb[143].mxu0 }
 0x22c   : > { %14229 = vst [vmem:[#allocation71_spill] sm:$0xff] %v11536_v3  ;;  %v7902_v24 = vpop.f32.mrb[143].mxu1 }
 0x22d   : > { %14228 = vst [vmem:[#allocation70_spill] sm:$0xff] %v11534_v54  ;;  %v11538_v63 = vadd.f32 %v7902_v24, %v7901_v29  ;;  %3559 = vmatmul.mubr.bf16.gmra.mrb[248].mxu0 %v11541_v12 }
 0x22e   : > { %2660 = vmatmul.mubr.bf16.gmra.mrb[248].mxu1 %v11541_v12  ;;  %3566 = vmatprep.mubr.bf16.mxu0 %v11546_v19 }
 0x22f   : > { %14230 = vst [vmem:[#allocation72_spill] sm:$0xff] %v11538_v63  ;;  %2667 = vmatprep.mubr.bf16.mxu1 %v11546_v19  ;;  %v11565_v19 = vld [vmem:[%s10531_s23 + $0xf0] ss:$8 sps:$4 sm:$0xff]  }
 0x230   : > { %v11552_v48 = vpop.f32.mrb[144].mxu0  ;;  %14237 = vst [vmem:[#allocation79_spill] sm:$0xff] %v11565_v19 }
 0x231   : > { %v7904_v24 = vpop.f32.mrb[144].mxu1  ;;  %v11554_v29 = vpop.f32.mrb[145].mxu0 }
 0x232   : > { %v7905_v18 = vpop.f32.mrb[145].mxu1  ;;  %v11556_v4 = vpop.f32.mrb[146].mxu0 }
 0x233   : > { %14233 = vst [vmem:[#allocation75_spill] sm:$0xff] %v11556_v4  ;;  %v11558_v3 = vadd.f32 %v7905_v18, %v7904_v24  ;;  %v7907_v12 = vpop.f32.mrb[146].mxu1  ;;  %v11560_v49 = vpop.f32.mrb[147].mxu0  ;;  %v14239_v18 = vpack.c.bf16 %v11099_v35, %v11097_v53  ;;  %v9485_v53 = vld [vmem:[%s13927_s4 + $0x188] sm:$0xff]  }
 0x234   : > { %14235 = vst [vmem:[#allocation77_spill] sm:$0xff] %v11560_v49  ;;  %v7908_v20 = vpop.f32.mrb[147].mxu1 }
 0x235   : > { %14234 = vst [vmem:[#allocation76_spill] sm:$0xff] %v11558_v3  ;;  %v11562_v5 = vadd.f32 %v7908_v20, %v7907_v12  ;;  %3567 = vmatmul.mubr.bf16.gmra.mrb[252].mxu0 %v11565_v19  ;;  %v4324_v3 = vsel %vm3928_vm0, %v14239_v18, 0 }
 0x236   : > { %2668 = vmatmul.mubr.bf16.gmra.mrb[252].mxu1 %v11565_v19  ;;  %8664 = vmatprep.mubr.msk.bf16.mxu0 %vm3928_vm0, %v10986_v16  ;;  %v9483_v19 = vld [vmem:[%s13927_s4 + $0x180] sm:$0xff]  }
 0x237   : > { %14236 = vst [vmem:[#allocation78_spill] sm:$0xff] %v11562_v5  ;;  %3189 = vmatprep.mubr.bf16.mxu1 %v11154_v14  ;;  %v9484_v5 = vld [vmem:[%s13927_s4 + $0x1c8] sm:$0xff]  }
 0x238   : > { %v11574_v24 = vpop.f32.mrb[148].mxu0 }
 0x239   : > { %v7910_v11 = vpop.f32.mrb[148].mxu1  ;;  %v11576_v54 = vpop.f32.mrb[149].mxu0 }
 0x23a   : > { %v7911_v12 = vpop.f32.mrb[149].mxu1  ;;  %v11578_v20 = vpop.f32.mrb[150].mxu0 }
 0x23b   : > { %14238 = vst [vmem:[#allocation80_spill] sm:$0xff] %v11578_v20  ;;  %v11580_v63 = vadd.f32 %v7911_v12, %v7910_v11  ;;  %v7913_v49 = vpop.f32.mrb[150].mxu1  ;;  %v11585_v4 = vpop.f32.mrb[151].mxu0  ;;  %v9487_v12 = vld [vmem:[%s13927_s4 + $0x190] sm:$0xff]  }
 0x23c   : > { %v7914_v14 = vpop.f32.mrb[151].mxu1 }
 0x23d   : > { %v11594_v20 = vadd.f32 %v7914_v14, %v7913_v49  ;;  %8665 = vmatmul.mubr.msk.bf16.vlgmr.msra.gmra.mrb[0].mxu0 %vm3928_vm0, %v10986_v16  ;;  %v9486_v16 = vld [vmem:[%s13927_s4 + $0x1d0] sm:$0xff]  }
 0x23e   : > { %3190 = vmatmul.mubr.bf16.vlgmr.msra.gmra.mrb[0].mxu1 %v11175_v59  ;;  %8666 = vmatprep.mubr.msk.bf16.mxu0 %vm3928_vm0, %v11015_v61 }
 0x23f   : > { %8537 = vmatpush3.bf16.msra.mxu1 %v9483_v19  ;;  %8713 = vmatpush3.bf16.xpose.msra.mxu0 %v4324_v3  ;;  %v14240_v3 = vpack.c.bf16 %v11299_v26, %v11297_v9  ;;  %v14241_v26 = vpack.c.bf16 %v11110_v30, %v11103_v62  ;;  %v9489_v62 = vld [vmem:[%s13927_s4 + $0x198] sm:$0xff]  }
 0x240   : > { %8538 = vmatprep.subr.bf16.mxu1 %v9484_v5  ;;  %3197 = vmatprep.mubr.bf16.mxu1 %v11182_v44  ;;  %v11610_v59 = vpop.f32.mrb[152].mxu0 }
 0x241   : > { %v7916_v49 = vpop.f32.mrb[152].mxu1  ;;  %9145 = vmatprep.subr.msk.bf16.mxu0 %vm3928_vm0, %v14240_v3  ;;  %v11616_v19 = vpop.f32.mrb[153].mxu0  ;;  %v4327_v9 = vsel %vm3928_vm0, %v14241_v26, 0  ;;  %v9491_v26 = vld [vmem:[%s13927_s4 + $0x1a0] sm:$0xff]  }
 0x242   : > { %v7917_v11 = vpop.f32.mrb[153].mxu1  ;;  %v11618_v18 = vpop.f32.mrb[154].mxu0 }
 0x243   : > { %v11620_v5 = vadd.f32 %v7917_v11, %v7916_v49  ;;  %8539 = vmatpush3.bf16.msra.mxu1 %v9485_v53  ;;  %v7919_v44 = vpop.f32.mrb[154].mxu1  ;;  %v11625_v14 = vpop.f32.mrb[155].mxu0  ;;  %v9488_v49 = vld [vmem:[%s13927_s4 + $0x1d8] sm:$0xff]  }
 0x244   : > { %v7920_v35 = vpop.f32.mrb[155].mxu1  ;;  %8540 = vmatprep.subr.bf16.mxu1 %v9486_v16 }
 0x245   : > { %v11634_v3 = vadd.f32 %v7920_v35, %v7919_v44  ;;  %8667 = vmatmul.mubr.msk.bf16.gmra.mrb[4].mxu0 %vm3928_vm0, %v11015_v61  ;;  %v9490_v61 = vld [vmem:[%s13927_s4 + $0x1e0] sm:$0xff]   ;;  %v14242_v35 = vpack.c.bf16 %v11322_v33, %v11320_v56  ;;  %v14243_v33 = vpack.c.bf16 %v11119_v41, %v11115_v28  ;;  %v9493_v28 = vld [vmem:[%s13927_s4 + $0x1a8] sm:$0xff]   ;;  %v14262_v41 = vld [vmem:[#allocation35_spill] sm:$0xff] }
 0x246   : > { %3198 = vmatmul.mubr.bf16.gmra.mrb[4].mxu1 %v11209_v13  ;;  %8668 = vmatprep.mubr.msk.bf16.mxu0 %vm3928_vm0, %v11023_v22 }
 0x247   : > { %8541 = vmatpush3.bf16.msra.mxu1 %v9487_v12  ;;  %8715 = vmatpush3.bf16.xpose.msra.mxu0 %v4327_v9  ;;  %v4330_v56 = vsel %vm3928_vm0, %v14243_v33, 0 }
 0x248   : > { %8542 = vmatprep.subr.bf16.mxu1 %v9488_v49  ;;  %3205 = vmatprep.mubr.bf16.mxu1 %v11216_v7  ;;  %v11650_v13 = vpop.f32.mrb[156].mxu0 }
 0x249   : > { %v7922_v53 = vpop.f32.mrb[156].mxu1  ;;  %9146 = vmatprep.subr.msk.bf16.mxu0 %vm3928_vm0, %v14242_v35  ;;  %v11656_v16 = vpop.f32.mrb[157].mxu0 }
 0x24a   : > { %v7923_v11 = vpop.f32.mrb[157].mxu1  ;;  %v11658_v44 = vpop.f32.mrb[158].mxu0 }
 0x24b   : > { %v11660_v12 = vadd.f32 %v7923_v11, %v7922_v53  ;;  %8543 = vmatpush3.bf16.msra.mxu1 %v9489_v62  ;;  %v7925_v7 = vpop.f32.mrb[158].mxu1  ;;  %v11665_v9 = vpop.f32.mrb[159].mxu0  ;;  %v9492_v53 = vld [vmem:[%s13927_s4 + $0x1e8] sm:$0xff]  }
 0x24c   : > { %v7926_v49 = vpop.f32.mrb[159].mxu1  ;;  %8544 = vmatprep.subr.bf16.mxu1 %v9490_v61  ;;  %v14244_v61 = vpack.c.bf16 %v11345_v38, %v11343_v46  ;;  %v9495_v38 = vld [vmem:[%s13927_s4 + $0x1b0] sm:$0xff]  }
 0x24d   : > { %v11674_v35 = vadd.f32 %v7926_v49, %v7925_v7  ;;  %8669 = vmatmul.mubr.msk.bf16.gmra.mrb[8].mxu0 %vm3928_vm0, %v11023_v22  ;;  %v9494_v22 = vld [vmem:[%s13927_s4 + $0x1f0] sm:$0xff]   ;;  %v11696_v7 = vadd.f32 %v11460_v57, %v11452_v36 }
 0x24e   : > { %3206 = vmatmul.mubr.bf16.gmra.mrb[8].mxu1 %v11243_v23  ;;  %8670 = vmatprep.mubr.msk.bf16.mxu0 %vm3928_vm0, %v11031_v60 }
 0x24f   : > { %8545 = vmatpush3.bf16.msra.mxu1 %v9491_v26  ;;  %8717 = vmatpush3.bf16.xpose.msra.mxu0 %v4330_v56  ;;  %v11700_v26 = vadd.f32 %v11470_v42, %v11462_v2  ;;  %v14245_v2 = vpack.c.bf16 %v11133_v1, %v11129_v39 }
 0x250   : > { %8546 = vmatprep.subr.bf16.mxu1 %v9492_v53  ;;  %3213 = vmatprep.mubr.bf16.mxu1 %v11250_v47  ;;  %v8264_v23 = vpop.f32.mrb[160].mxu0 }
 0x251   : > { %v7928_v62 = vpop.f32.mrb[160].mxu1  ;;  %9147 = vmatprep.subr.msk.bf16.mxu0 %vm3928_vm0, %v14244_v61  ;;  %v8265_v11 = vpop.f32.mrb[161].mxu0  ;;  %v5501_v36 = vpack.c.bf16 %v11700_v26, %v11696_v7  ;;  %v4333_v42 = vsel %vm3928_vm0, %v14245_v2, 0  ;;  %v14246_v61 = vld [vmem:[#allocation39_spill] sm:$0xff] }
 0x252   : > { %v7929_v47 = vpop.f32.mrb[161].mxu1  ;;  %v11702_v49 = vadd.f32 %v8265_v11, %v8264_v23  ;;  %v8267_v33 = vpop.f32.mrb[162].mxu0 }
 0x253   : > { %v7930_v56 = vadd.f32 %v7929_v47, %v7928_v62  ;;  %8547 = vmatpush3.bf16.msra.mxu1 %v9493_v28  ;;  %v7931_v53 = vpop.f32.mrb[162].mxu1  ;;  %v8268_v46 = vpop.f32.mrb[163].mxu0  ;;  %v9496_v28 = vld [vmem:[%s13927_s4 + $0x1f8] sm:$0xff]  }
 0x254   : > { %v7932_v57 = vpop.f32.mrb[163].mxu1  ;;  %8548 = vmatprep.subr.bf16.mxu1 %v9494_v22  ;;  %v11716_v23 = vadd.f32 %v8268_v46, %v8267_v33  ;;  %v9497_v22 = vld [vmem:[%s13927_s4 + $0x1b8] sm:$0xff]   ;;  %v11735_v33 = vadd.f32 %v11482_v50, %v11480_v37  ;;  %v14248_v50 = vpack.c.bf16 %v11147_v55, %v11143_v27  ;;  %v14250_v27 = vpack.c.bf16 %v11391_v52, %v11389_v31 }
 0x255   : > { %v7933_v62 = vadd.f32 %v7932_v57, %v7931_v53  ;;  %8671 = vmatmul.mubr.msk.bf16.gmra.mrb[12].mxu0 %vm3928_vm0, %v11031_v60 }
 0x256   : > { %3214 = vmatmul.mubr.bf16.gmra.mrb[12].mxu1 %v11273_v17  ;;  %8672 = vmatprep.mubr.msk.bf16.mxu0 %vm3928_vm0, %v11033_v6  ;;  %v5509_v39 = vpack.c.bf16 %v11716_v23, %v11702_v49  ;;  %v14247_v17 = vpack.c.bf16 %v11368_v40, %v11366_v21 }
 0x257   : > { %v3888_v1 = vpack.c.bf16 %v7933_v62, %v7930_v56  ;;  %8549 = vmatpush3.bf16.msra.mxu1 %v9495_v38  ;;  %8719 = vmatpush3.bf16.xpose.msra.mxu0 %v4333_v42  ;;  %v11739_v56 = vadd.f32 %v11488_v43, %v11484_v8  ;;  %v4336_v43 = vsel %vm3928_vm0, %v14248_v50, 0 }
 0x258   : > { %8550 = vmatprep.subr.bf16.mxu1 %v9496_v28  ;;  %3221 = vmatprep.mubr.bf16.mxu1 %v14246_v61  ;;  %v8270_v11 = vpop.f32.mrb[164].mxu0  ;;  %v14249_v28 = vld [vmem:[#allocation20_spill] sm:$0xff]  ;;  %v11776_v61 = vadd.f32 %v11512_v0, %v11508_v45 }
 0x259   : > { %v7934_v60 = vpop.f32.mrb[164].mxu1  ;;  %9148 = vmatprep.subr.msk.bf16.mxu0 %vm3928_vm0, %v14247_v17  ;;  %v8271_v47 = vpop.f32.mrb[165].mxu0  ;;  %v5502_v21 = vpack.c.bf16 %v11739_v56, %v11735_v33  ;;  %v14252_v45 = vld [vmem:[#allocation40_spill] sm:$0xff]  ;;  %v14285_v33 = vld [vmem:[#allocation50_spill] sm:$0xff] }
 0x25a   : > { %v7935_v53 = vpop.f32.mrb[165].mxu1  ;;  %v11741_v38 = vadd.f32 %v8271_v47, %v8270_v11  ;;  %v8273_v46 = vpop.f32.mrb[166].mxu0  ;;  %v14273_v47 = vld [vmem:[#allocation37_spill] sm:$0xff] }
 0x25b   : > { %v11743_v57 = vadd.f32 %v7935_v53, %v7934_v60  ;;  %8551 = vmatpush3.bf16.msra.mxu1 %v9497_v22  ;;  %v7937_v2 = vpop.f32.mrb[166].mxu1  ;;  %v8274_v40 = vpop.f32.mrb[167].mxu0  ;;  %v11772_v22 = vadd.f32 %v11506_v25, %v11504_v51  ;;  %v14251_v51 = vpack.c.bf16 %v11170_v32, %v11160_v34  ;;  %v14254_v34 = vld [vmem:[#allocation41_spill] sm:$0xff] }
 0x25c   : > { %9136 = vmatprep.subr.msk.bf16.mxu1 %vm3928_vm0, %v3888_v1  ;;  %v7938_v37 = vpop.f32.mrb[167].mxu1  ;;  %v11752_v8 = vadd.f32 %v8274_v40, %v8273_v46 }
 0x25d   : > { %v11754_v42 = vadd.f32 %v7938_v37, %v7937_v2  ;;  %8673 = vmatmul.mubr.msk.bf16.gmra.mrb[16].mxu0 %vm3928_vm0, %v11033_v6  ;;  %v4339_v25 = vsel %vm3928_vm0, %v14251_v51, 0  ;;  %v14253_v2 = vld [vmem:[#allocation21_spill] sm:$0xff]  ;;  %v14255_v37 = vld [vmem:[#allocation48_spill] sm:$0xff] }
 0x25e   : > { %3222 = vmatmul.mubr.bf16.gmra.mrb[16].mxu1 %v11302_v10  ;;  %8674 = vmatprep.mubr.msk.bf16.mxu0 %vm3928_vm0, %v14249_v28  ;;  %v5510_v62 = vpack.c.bf16 %v11752_v8, %v11741_v38  ;;  %v14256_v50 = vpack.c.bf16 %v11412_v15, %v14255_v37 }
 0x25f   : > { %8721 = vmatpush3.bf16.xpose.msra.mxu0 %v4336_v43  ;;  %3229 = vmatprep.mubr.bf16.mxu1 %v11309_v58 }
 0x260   : > { %9149 = vmatprep.subr.msk.bf16.mxu0 %vm3928_vm0, %v14250_v27  ;;  %v8276_v6 = vpop.f32.mrb[168].mxu0 }
 0x261   : > { %v7940_v1 = vpop.f32.mrb[168].mxu1  ;;  %v8277_v10 = vpop.f32.mrb[169].mxu0 }
 0x262   : > { %v7941_v11 = vpop.f32.mrb[169].mxu1  ;;  %v11778_v60 = vadd.f32 %v8277_v10, %v8276_v6  ;;  %v8279_v58 = vpop.f32.mrb[170].mxu0  ;;  %v14257_v6 = vld [vmem:[#allocation67_spill] sm:$0xff] }
 0x263   : > { %v11780_v17 = vadd.f32 %v7941_v11, %v7940_v1  ;;  %v7943_v52 = vpop.f32.mrb[170].mxu1  ;;  %v8280_v31 = vpop.f32.mrb[171].mxu0  ;;  %v14258_v1 = vld [vmem:[#allocation68_spill] sm:$0xff]  ;;  %v14259_v11 = vld [vmem:[#allocation69_spill] sm:$0xff] }
 0x264   : > { %v7944_v53 = vpop.f32.mrb[171].mxu1  ;;  %v11788_v46 = vadd.f32 %v8280_v31, %v8279_v58  ;;  %v11808_v10 = vadd.f32 %v14258_v1, %v14257_v6  ;;  %v14260_v58 = vld [vmem:[#allocation71_spill] sm:$0xff] }
 0x265   : > { %v11790_v0 = vadd.f32 %v7944_v53, %v7943_v52  ;;  %8675 = vmatmul.mubr.msk.bf16.gmra.mrb[20].mxu0 %vm3928_vm0, %v14249_v28  ;;  %v11812_v52 = vadd.f32 %v14260_v58, %v14259_v11  ;;  %v14266_v58 = vld [vmem:[#allocation43_spill] sm:$0xff] }
 0x266   : > { %3230 = vmatmul.mubr.bf16.gmra.mrb[20].mxu1 %v14252_v45  ;;  %8676 = vmatprep.mubr.msk.bf16.mxu0 %vm3928_vm0, %v14253_v2 }
 0x267   : > { %8723 = vmatpush3.bf16.xpose.msra.mxu0 %v4339_v25  ;;  %3237 = vmatprep.mubr.bf16.mxu1 %v14254_v34 }
 0x268   : > { %9150 = vmatprep.subr.msk.bf16.mxu0 %vm3928_vm0, %v14256_v50  ;;  %v8282_v43 = vpop.f32.mrb[172].mxu0  ;;  %v14261_v50 = vld [vmem:[#allocation36_spill] sm:$0xff] }
 0x269   : > { %v7946_v28 = vpop.f32.mrb[172].mxu1  ;;  %v8283_v27 = vpop.f32.mrb[173].mxu0  ;;  %v14263_v6 = vpack.c.bf16 %v14261_v50, %v14262_v41  ;;  %v11844_v50 = vadd.f32 %v11554_v29, %v11552_v48 }
 0x26a   : > { %v7947_v31 = vpop.f32.mrb[173].mxu1  ;;  %v11814_v53 = vadd.f32 %v8283_v27, %v8282_v43  ;;  %v8285_v51 = vpop.f32.mrb[174].mxu0  ;;  %v14264_v43 = vld [vmem:[#allocation42_spill] sm:$0xff] }
 0x26b   : > { %v11816_v25 = vadd.f32 %v7947_v31, %v7946_v28  ;;  %v7949_v15 = vpop.f32.mrb[174].mxu1  ;;  %v8286_v45 = vpop.f32.mrb[175].mxu0  ;;  %v4342_v1 = vsel %vm3928_vm0, %v14263_v6, 0  ;;  %v14265_v28 = vld [vmem:[#allocation23_spill] sm:$0xff]  ;;  %v14267_v31 = vld [vmem:[#allocation52_spill] sm:$0xff]  ;;  %v14272_v27 = vld [vmem:[#allocation38_spill] sm:$0xff] }
 0x26c   : > { %v7950_v37 = vpop.f32.mrb[175].mxu1  ;;  %v11824_v30 = vadd.f32 %v8286_v45, %v8285_v51  ;;  %v14268_v51 = vld [vmem:[#allocation51_spill] sm:$0xff]  ;;  %v14274_v48 = vpack.c.bf16 %v14272_v27, %v14273_v47  ;;  %v14277_v27 = vld [vmem:[#allocation45_spill] sm:$0xff] }
 0x26d   : > { %v11826_v11 = vadd.f32 %v7950_v37, %v7949_v15  ;;  %8677 = vmatmul.mubr.msk.bf16.gmra.mrb[24].mxu0 %vm3928_vm0, %v14253_v2  ;;  %v14269_v15 = vpack.c.bf16 %v14267_v31, %v14268_v51  ;;  %v14270_v6 = vld [vmem:[#allocation75_spill] sm:$0xff] }
 0x26e   : > { %3238 = vmatmul.mubr.bf16.gmra.mrb[24].mxu1 %v14264_v43  ;;  %8678 = vmatprep.mubr.msk.bf16.mxu0 %vm3928_vm0, %v14265_v28  ;;  %v14271_v43 = vld [vmem:[#allocation77_spill] sm:$0xff]  ;;  %v4345_v29 = vsel %vm3928_vm0, %v14274_v48, 0 }
 0x26f   : > { %8725 = vmatpush3.bf16.xpose.msra.mxu0 %v4342_v1  ;;  %3245 = vmatprep.mubr.bf16.mxu1 %v14266_v58  ;;  %v11848_v32 = vadd.f32 %v14271_v43, %v14270_v6  ;;  %v11879_v43 = vadd.f32 %v11576_v54, %v11574_v24  ;;  %v14279_v54 = vld [vmem:[#allocation46_spill] sm:$0xff] }
 0x270   : > { %9151 = vmatprep.subr.msk.bf16.mxu0 %vm3928_vm0, %v14269_v15  ;;  %v8288_v2 = vpop.f32.mrb[176].mxu0 }
 0x271   : > { %v7952_v45 = vpop.f32.mrb[176].mxu1  ;;  %v8289_v37 = vpop.f32.mrb[177].mxu0 }
 0x272   : > { %v7953_v41 = vpop.f32.mrb[177].mxu1  ;;  %v11850_v1 = vadd.f32 %v8289_v37, %v8288_v2  ;;  %v8291_v58 = vpop.f32.mrb[178].mxu0  ;;  %v14276_v2 = vld [vmem:[#allocation24_spill] sm:$0xff] }
 0x273   : > { %v11852_v55 = vadd.f32 %v7953_v41, %v7952_v45  ;;  %v7955_v31 = vpop.f32.mrb[178].mxu1  ;;  %v8292_v51 = vpop.f32.mrb[179].mxu0  ;;  %v14275_v41 = vld [vmem:[#allocation44_spill] sm:$0xff] }
 0x274   : > { %v7956_v34 = vpop.f32.mrb[179].mxu1  ;;  %v11860_v40 = vadd.f32 %v8292_v51, %v8291_v58  ;;  %v14278_v58 = vld [vmem:[#allocation80_spill] sm:$0xff] }
 0x275   : > { %v11862_v6 = vadd.f32 %v7956_v34, %v7955_v31  ;;  %8679 = vmatmul.mubr.msk.bf16.gmra.mrb[28].mxu0 %vm3928_vm0, %v14265_v28  ;;  %v11883_v31 = vadd.f32 %v11585_v4, %v14278_v58 }
 0x276   : > { %3246 = vmatmul.mubr.bf16.gmra.mrb[28].mxu1 %v14275_v41  ;;  %8728 = vmatprep.mubr.msk.bf16.mxu0 %vm3928_vm0, %v14276_v2  ;;  %v5513_v45 = vpack.c.bf16 %v11860_v40, %v11850_v1 }
 0x277   : > { %8727 = vmatpush3.bf16.xpose.msra.mxu0 %v4345_v29  ;;  %3253 = vmatprep.mubr.bf16.mxu1 %v14277_v27  ;;  %v5506_v49 = vpack.c.bf16 %v11883_v31, %v11879_v43 }
 0x278   : > { %v8294_v37 = vpop.f32.mrb[180].mxu0  ;;  %8776 = vmatprep.subr.bf16.mxu0 %v5509_v39 }
 0x279   : > { %v7958_v34 = vpop.f32.mrb[180].mxu1  ;;  %v8295_v28 = vpop.f32.mrb[181].mxu0 }
 0x27a   : > { %v7959_v51 = vpop.f32.mrb[181].mxu1  ;;  %v11885_v48 = vadd.f32 %v8295_v28, %v8294_v37  ;;  %v8297_v29 = vpop.f32.mrb[182].mxu0  ;;  %v14280_v37 = vld [vmem:[#allocation26_spill] sm:$0xff] }
 0x27b   : > { %v11887_v41 = vadd.f32 %v7959_v51, %v7958_v34  ;;  %v7961_v27 = vpop.f32.mrb[182].mxu1  ;;  %v8298_v47 = vpop.f32.mrb[183].mxu0  ;;  %v14281_v34 = vld [vmem:[#allocation47_spill] sm:$0xff]  ;;  %v11914_v51 = vadd.f32 %v11625_v14, %v11618_v18  ;;  %v14283_v18 = vld [vmem:[#allocation49_spill] sm:$0xff] }
 0x27c   : > { %v7962_v23 = vpop.f32.mrb[183].mxu1  ;;  %v8299_v39 = vadd.f32 %v8298_v47, %v8297_v29 }
 0x27d   : > { %v11891_v15 = vadd.f32 %v7962_v23, %v7961_v27 }
 0x27e   : > { %3254 = vmatmul.mubr.bf16.gmra.mrb[32].mxu1 %v14279_v54  ;;  %8729 = vmatmul.mubr.msk.bf16.vlgmr.msra.gmra.mrb[32].mxu0 %vm3928_vm0, %v14276_v2  ;;  %v5514_v4 = vpack.c.bf16 %v8299_v39, %v11885_v48  ;;  %v11910_v2 = vadd.f32 %v11616_v19, %v11610_v59  ;;  %v14282_v19 = vpack.c.bf16 %v11788_v46, %v11778_v60  ;;  %v14284_v39 = vld [vmem:[#allocation27_spill] sm:$0xff] }
 0x27f   : > { %8730 = vmatprep.mubr.msk.bf16.mxu0 %vm3928_vm0, %v14280_v37  ;;  %3261 = vmatprep.mubr.bf16.mxu1 %v14281_v34  ;;  %v14287_v54 = vpack.c.bf16 %v11824_v30, %v11814_v53  ;;  %v8263_v34 = vadd.f32 %v11665_v9, %v11658_v44  ;;  %v14288_v30 = vpack.c.bf16 %v11812_v52, %v11808_v10  ;;  %v14290_v9 = vld [vmem:[#allocation29_spill] sm:$0xff]  ;;  %v14291_v10 = vld [vmem:[#allocation54_spill] sm:$0xff] }
 0x280   : > { %v8300_v28 = vpop.f32.mrb[184].mxu0  ;;  %8777 = vmatpush3.bf16.msra.mxu0 %v5501_v36  ;;  %v5507_v36 = vpack.c.bf16 %v11914_v51, %v11910_v2 }
 0x281   : > { %v7964_v47 = vpop.f32.mrb[184].mxu1  ;;  %v8301_v58 = vpop.f32.mrb[185].mxu0  ;;  %8778 = vmatprep.subr.bf16.mxu0 %v5510_v62 }
 0x282   : > { %v7965_v48 = vpop.f32.mrb[185].mxu1  ;;  %v8302_v29 = vadd.f32 %v8301_v58, %v8300_v28  ;;  %v8303_v27 = vpop.f32.mrb[186].mxu0 }
 0x283   : > { %v11916_v23 = vadd.f32 %v7965_v48, %v7964_v47  ;;  %v7967_v7 = vpop.f32.mrb[186].mxu1  ;;  %v8304_v26 = vpop.f32.mrb[187].mxu0 }
 0x284   : > { %v7968_v38 = vpop.f32.mrb[187].mxu1  ;;  %v8305_v8 = vadd.f32 %v8304_v26, %v8303_v27  ;;  %8779 = vmatpush3.bf16.msra.mxu0 %v5502_v21  ;;  %v14286_v21 = vpack.c.bf16 %v11776_v61, %v11772_v22  ;;  %v14292_v27 = vpack.c.bf16 %v11848_v32, %v11844_v50  ;;  %v14295_v50 = vld [vmem:[#allocation57_spill] sm:$0xff] }
 0x285   : > { %v11923_v59 = vadd.f32 %v7968_v38, %v7967_v7  ;;  %8780 = vmatprep.subr.bf16.mxu0 %v14282_v19 }
 0x286   : > { %3262 = vmatmul.mubr.bf16.gmra.mrb[36].mxu1 %v14283_v18  ;;  %8731 = vmatmul.mubr.msk.bf16.gmra.mrb[36].mxu0 %vm3928_vm0, %v14280_v37  ;;  %v5515_v14 = vpack.c.bf16 %v8305_v8, %v8302_v29  ;;  %v8260_v37 = vadd.f32 %v11656_v16, %v11650_v13  ;;  %v14289_v13 = vld [vmem:[#allocation53_spill] sm:$0xff] }
 0x287   : > { %8732 = vmatprep.mubr.msk.bf16.mxu0 %vm3928_vm0, %v14284_v39  ;;  %3269 = vmatprep.mubr.bf16.mxu1 %v14285_v33  ;;  %v14296_v33 = vld [vmem:[#allocation30_spill] sm:$0xff] }
 0x288   : > { %v8306_v56 = vpop.f32.mrb[188].mxu0  ;;  %8781 = vmatpush3.bf16.msra.mxu0 %v14286_v21  ;;  %v5508_v61 = vpack.c.bf16 %v8263_v34, %v8260_v37 }
 0x289   : > { %v7970_v60 = vpop.f32.mrb[188].mxu1  ;;  %v8307_v46 = vpop.f32.mrb[189].mxu0  ;;  %8782 = vmatprep.subr.bf16.mxu0 %v14287_v54 }
 0x28a   : > { %v7971_v28 = vpop.f32.mrb[189].mxu1  ;;  %v8308_v47 = vadd.f32 %v8307_v46, %v8306_v56  ;;  %v8309_v58 = vpop.f32.mrb[190].mxu0  ;;  %v14297_v56 = vld [vmem:[#allocation58_spill] sm:$0xff] }
 0x28b   : > { %v11946_v2 = vadd.f32 %v7971_v28, %v7970_v60  ;;  %v7973_v51 = vpop.f32.mrb[190].mxu1  ;;  %v8310_v22 = vpop.f32.mrb[191].mxu0 }
 0x28c   : > { %v7974_v48 = vpop.f32.mrb[191].mxu1  ;;  %v8311_v29 = vadd.f32 %v8310_v22, %v8309_v58  ;;  %8783 = vmatpush3.bf16.msra.mxu0 %v14288_v30  ;;  %v14301_v22 = vld [vmem:[#allocation32_spill] sm:$0xff] }
 0x28d   : > { %v11951_v53 = vadd.f32 %v7974_v48, %v7973_v51  ;;  %8784 = vmatprep.subr.bf16.mxu0 %v5513_v45  ;;  %v14300_v51 = vld [vmem:[#allocation61_spill] sm:$0xff]  ;;  %v14302_v48 = vld [vmem:[#allocation62_spill] sm:$0xff] }
 0x28e   : > { %3270 = vmatmul.mubr.bf16.gmra.mrb[40].mxu1 %v14289_v13  ;;  %8733 = vmatmul.mubr.msk.bf16.gmra.mrb[40].mxu0 %vm3928_vm0, %v14284_v39  ;;  %v5516_v16 = vpack.c.bf16 %v8311_v29, %v8308_v47 }
 0x28f   : > { %8734 = vmatprep.mubr.msk.bf16.mxu0 %vm3928_vm0, %v14290_v9  ;;  %3277 = vmatprep.mubr.bf16.mxu1 %v14291_v10 }
 0x290   : > { %v8440_v52 = vpop.f32.mrb[192].mxu0  ;;  %8785 = vmatpush3.bf16.msra.mxu0 %v14292_v27 }
 0x291   : > { %v8104_v40 = vpop.f32.mrb[192].mxu1  ;;  %v8441_v1 = vpop.f32.mrb[193].mxu0  ;;  %8786 = vmatprep.subr.bf16.mxu0 %v5514_v4 }
 0x292   : > { %v8105_v45 = vpop.f32.mrb[193].mxu1  ;;  %v11967_v7 = vadd.f32 %v8441_v1, %v8440_v52  ;;  %v8443_v26 = vpop.f32.mrb[194].mxu0 }
 0x293   : > { %v11969_v38 = vadd.f32 %v8105_v45, %v8104_v40  ;;  %v8107_v8 = vpop.f32.mrb[194].mxu1  ;;  %v8444_v19 = vpop.f32.mrb[195].mxu0 }
 0x294   : > { %14293 = vst [vmem:[#allocation39_spill] sm:$0xff] %v11967_v7  ;;  %v8108_v18 = vpop.f32.mrb[195].mxu1  ;;  %v11971_v39 = vadd.f32 %v8444_v19, %v8443_v26  ;;  %8787 = vmatpush3.bf16.msra.mxu0 %v5506_v49  ;;  %v14318_v19 = vld [vmem:[#allocation56_spill] sm:$0xff] }
 0x295   : > { %v11976_v32 = vadd.f32 %v8108_v18, %v8107_v8  ;;  %8788 = vmatprep.subr.bf16.mxu0 %v5515_v14  ;;  %v14305_v8 = vld [vmem:[#allocation65_spill] sm:$0xff] }
 0x296   : > { %14294 = vst [vmem:[#allocation20_spill] sm:$0xff] %v11971_v39  ;;  %3278 = vmatmul.mubr.bf16.gmra.mrb[44].mxu1 %v14295_v50  ;;  %8735 = vmatmul.mubr.msk.bf16.gmra.mrb[44].mxu0 %vm3928_vm0, %v14290_v9  ;;  %v14306_v18 = vld [vmem:[#allocation33_spill] sm:$0xff]  ;;  %v14307_v50 = vld [vmem:[#allocation66_spill] sm:$0xff] }
 0x297   : > { %8736 = vmatprep.mubr.msk.bf16.mxu0 %vm3928_vm0, %v14296_v33  ;;  %3285 = vmatprep.mubr.bf16.mxu1 %v14297_v56 }
 0x298   : > { %v8446_v31 = vpop.f32.mrb[196].mxu0  ;;  %8789 = vmatpush3.bf16.msra.mxu0 %v5507_v36  ;;  %v14319_v36 = vld [vmem:[#allocation55_spill] sm:$0xff] }
 0x299   : > { %v8110_v49 = vpop.f32.mrb[196].mxu1  ;;  %v8447_v14 = vpop.f32.mrb[197].mxu0  ;;  %8790 = vmatprep.subr.bf16.mxu0 %v5516_v16  ;;  %v14320_v4 = vpack.c.bf16 %v14318_v19, %v14319_v36 }
 0x29a   : > { %v8111_v21 = vpop.f32.mrb[197].mxu1  ;;  %v11988_v60 = vadd.f32 %v8447_v14, %v8446_v31  ;;  %v8449_v46 = vpop.f32.mrb[198].mxu0 }
 0x29b   : > { %v11990_v54 = vadd.f32 %v8111_v21, %v8110_v49  ;;  %v8113_v37 = vpop.f32.mrb[198].mxu1  ;;  %v8450_v34 = vpop.f32.mrb[199].mxu0 }
 0x29c   : > { %14298 = vst [vmem:[#allocation40_spill] sm:$0xff] %v11988_v60  ;;  %v8114_v28 = vpop.f32.mrb[199].mxu1  ;;  %v11992_v47 = vadd.f32 %v8450_v34, %v8449_v46  ;;  %8791 = vmatpush3.bf16.msra.mxu0 %v5508_v61 }
 0x29d   : > { %v11994_v58 = vadd.f32 %v8114_v28, %v8113_v37 }
 0x29e   : > { %14299 = vst [vmem:[#allocation21_spill] sm:$0xff] %v11992_v47  ;;  %3286 = vmatmul.mubr.bf16.gmra.mrb[48].mxu1 %v14300_v51  ;;  %8737 = vmatmul.mubr.msk.bf16.gmra.mrb[48].mxu0 %vm3928_vm0, %v14296_v33 }
 0x29f   : > { %8738 = vmatprep.mubr.msk.bf16.mxu0 %vm3928_vm0, %v14301_v22  ;;  %3293 = vmatprep.mubr.bf16.mxu1 %v14302_v48 }
 0x2a0   : > { %v8452_v30 = vpop.f32.mrb[200].mxu0 }
 0x2a1   : > { %v8116_v61 = vpop.f32.mrb[200].mxu1  ;;  %v8453_v13 = vpop.f32.mrb[201].mxu0 }
 0x2a2   : > { %v8117_v16 = vpop.f32.mrb[201].mxu1  ;;  %v12006_v9 = vadd.f32 %v8453_v13, %v8452_v30  ;;  %v8455_v10 = vpop.f32.mrb[202].mxu0  ;;  %v14310_v30 = vld [vmem:[#allocation73_spill] sm:$0xff]  ;;  %v14311_v13 = vld [vmem:[#allocation34_spill] sm:$0xff] }
 0x2a3   : > { %v12008_v52 = vadd.f32 %v8117_v16, %v8116_v61  ;;  %v8119_v27 = vpop.f32.mrb[202].mxu1  ;;  %v8456_v40 = vpop.f32.mrb[203].mxu0  ;;  %v14312_v16 = vld [vmem:[#allocation74_spill] sm:$0xff] }
 0x2a4   : > { %14303 = vst [vmem:[#allocation41_spill] sm:$0xff] %v12006_v9  ;;  %v8120_v1 = vpop.f32.mrb[203].mxu1  ;;  %v12010_v45 = vadd.f32 %v8456_v40, %v8455_v10  ;;  %v9989_v9 = vld [vmem:[%s10531_s23 + $0xd0] ss:$8 sps:$4 sm:$0xff]  }
 0x2a5   : > { %v12012_v26 = vadd.f32 %v8120_v1, %v8119_v27 }
 0x2a6   : > { %14304 = vst [vmem:[#allocation48_spill] sm:$0xff] %v12010_v45  ;;  %3294 = vmatmul.mubr.bf16.gmra.mrb[52].mxu1 %v14305_v8  ;;  %8739 = vmatmul.mubr.msk.bf16.gmra.mrb[52].mxu0 %vm3928_vm0, %v14301_v22 }
 0x2a7   : > { %8740 = vmatprep.mubr.msk.bf16.mxu0 %vm3928_vm0, %v14306_v18  ;;  %3301 = vmatprep.mubr.bf16.mxu1 %v14307_v50 }
 0x2a8   : > { %v8458_v56 = vpop.f32.mrb[204].mxu0 }
 0x2a9   : > { %v8122_v31 = vpop.f32.mrb[204].mxu1  ;;  %v8459_v49 = vpop.f32.mrb[205].mxu0 }
 0x2aa   : > { %v8123_v14 = vpop.f32.mrb[205].mxu1  ;;  %v12024_v21 = vadd.f32 %v8459_v49, %v8458_v56  ;;  %v8461_v46 = vpop.f32.mrb[206].mxu0 }
 0x2ab   : > { %v12026_v37 = vadd.f32 %v8123_v14, %v8122_v31  ;;  %v8125_v34 = vpop.f32.mrb[206].mxu1  ;;  %v8462_v28 = vpop.f32.mrb[207].mxu0 }
 0x2ac   : > { %14308 = vst [vmem:[#allocation67_spill] sm:$0xff] %v12024_v21  ;;  %v8126_v51 = vpop.f32.mrb[207].mxu1  ;;  %v12028_v22 = vadd.f32 %v8462_v28, %v8461_v46  ;;  %v14315_v28 = vld [vmem:[#allocation79_spill] sm:$0xff] }
 0x2ad   : > { %v12030_v48 = vadd.f32 %v8126_v51, %v8125_v34  ;;  %v9988_v21 = vld [vmem:[%s10531_s23 + $0xd4] ss:$8 sps:$4 sm:$0xff]  }
 0x2ae   : > { %14309 = vst [vmem:[#allocation68_spill] sm:$0xff] %v12028_v22  ;;  %3302 = vmatmul.mubr.bf16.gmra.mrb[56].mxu1 %v14310_v30  ;;  %8741 = vmatmul.mubr.msk.bf16.gmra.mrb[56].mxu0 %vm3928_vm0, %v14306_v18  ;;  %v9962_v30 = vld [vmem:[%s10531_s23 + $0x4] ss:$8 sps:$4 sm:$0xff]  }
 0x2af   : > { %8742 = vmatprep.mubr.msk.bf16.mxu0 %vm3928_vm0, %v14311_v13  ;;  %3309 = vmatprep.mubr.bf16.mxu1 %v14312_v16  ;;  %v4139_v16 = vsel %vm3928_vm0, %v14320_v4, 0 }
 0x2b0   : > { %v8464_v27 = vpop.f32.mrb[208].mxu0 }
 0x2b1   : > { %v8128_v40 = vpop.f32.mrb[208].mxu1  ;;  %v8465_v1 = vpop.f32.mrb[209].mxu0 }
 0x2b2   : > { %v8129_v8 = vpop.f32.mrb[209].mxu1  ;;  %v12042_v50 = vadd.f32 %v8465_v1, %v8464_v27  ;;  %v8467_v56 = vpop.f32.mrb[210].mxu0 }
 0x2b3   : > { %v12044_v18 = vadd.f32 %v8129_v8, %v8128_v40  ;;  %v8131_v31 = vpop.f32.mrb[210].mxu1  ;;  %v8468_v49 = vpop.f32.mrb[211].mxu0 }
 0x2b4   : > { %14313 = vst [vmem:[#allocation69_spill] sm:$0xff] %v12042_v50  ;;  %v8132_v14 = vpop.f32.mrb[211].mxu1  ;;  %v12046_v46 = vadd.f32 %v8468_v49, %v8467_v56 }
 0x2b5   : > { %v12048_v34 = vadd.f32 %v8132_v14, %v8131_v31 }
 0x2b6   : > { %14314 = vst [vmem:[#allocation71_spill] sm:$0xff] %v12046_v46  ;;  %3310 = vmatmul.mubr.bf16.gmra.mrb[60].mxu1 %v14315_v28  ;;  %8743 = vmatmul.mubr.msk.bf16.gmra.mrb[60].mxu0 %vm3928_vm0, %v14311_v13 }
 0x2b7   : > { %3703 = vmatprep.mubr.bf16.mxu1 %v9962_v30  ;;  %v9963_v30 = vld [vmem:[%s10531_s23] ss:$8 sps:$4 sm:$0xff]  }
 0x2b8   : > { %v8470_v27 = vpop.f32.mrb[212].mxu0 }
 0x2b9   : > { %v8134_v40 = vpop.f32.mrb[212].mxu1  ;;  %v8471_v1 = vpop.f32.mrb[213].mxu0 }
 0x2ba   : > { %v8135_v8 = vpop.f32.mrb[213].mxu1  ;;  %v12058_v56 = vadd.f32 %v8471_v1, %v8470_v27  ;;  %v8473_v31 = vpop.f32.mrb[214].mxu0 }
 0x2bb   : > { %v12060_v49 = vadd.f32 %v8135_v8, %v8134_v40  ;;  %v8137_v13 = vpop.f32.mrb[214].mxu1  ;;  %v8474_v14 = vpop.f32.mrb[215].mxu0  ;;  %v9964_v40 = vld [vmem:[%s10531_s23 + $0x14] ss:$8 sps:$4 sm:$0xff]   ;;  %v14321_v8 = vpack.c.bf16 %v11754_v42, %v11743_v57  ;;  %v9965_v57 = vld [vmem:[%s10531_s23 + $0x10] ss:$8 sps:$4 sm:$0xff]  }
 0x2bc   : > { %14316 = vst [vmem:[#allocation36_spill] sm:$0xff] %v12058_v56  ;;  %v8138_v28 = vpop.f32.mrb[215].mxu1  ;;  %v12062_v51 = vadd.f32 %v8474_v14, %v8473_v31  ;;  %v14324_v42 = vld [vmem:[#allocation60_spill] sm:$0xff] }
 0x2bd   : > { %v12064_v61 = vadd.f32 %v8138_v28, %v8137_v13 }
 0x2be   : > { %14317 = vst [vmem:[#allocation35_spill] sm:$0xff] %v12062_v51  ;;  %3704 = vmatmul.mubr.bf16.vlgmr.msra.gmra.mrb[64].mxu1 %v9963_v30 }
 0x2bf   : > { %8681 = vmatpush3.bf16.xpose.msra.mxu1 %v4139_v16  ;;  %3711 = vmatprep.mubr.bf16.mxu1 %v9964_v40 }
 0x2c0   : > { %9137 = vmatprep.subr.msk.bf16.mxu1 %vm3928_vm0, %v14321_v8  ;;  %v8476_v31 = vpop.f32.mrb[216].mxu0  ;;  %v14325_v8 = vld [vmem:[#allocation59_spill] sm:$0xff] }
 0x2c1   : > { %v8140_v13 = vpop.f32.mrb[216].mxu1  ;;  %v8477_v36 = vpop.f32.mrb[217].mxu0  ;;  %v14326_v10 = vpack.c.bf16 %v14324_v42, %v14325_v8 }
 0x2c2   : > { %v8141_v4 = vpop.f32.mrb[217].mxu1  ;;  %v12080_v19 = vadd.f32 %v8477_v36, %v8476_v31  ;;  %v8479_v14 = vpop.f32.mrb[218].mxu0 }
 0x2c3   : > { %v12082_v16 = vadd.f32 %v8141_v4, %v8140_v13  ;;  %v8143_v28 = vpop.f32.mrb[218].mxu1  ;;  %v8480_v30 = vpop.f32.mrb[219].mxu0  ;;  %v4142_v33 = vsel %vm3928_vm0, %v14326_v10, 0  ;;  %v9966_v13 = vld [vmem:[%s10531_s23 + $0x24] ss:$8 sps:$4 sm:$0xff]   ;;  %v14327_v4 = vpack.c.bf16 %v11790_v0, %v11780_v17 }
 0x2c4   : > { %14322 = vst [vmem:[#allocation42_spill] sm:$0xff] %v12080_v19  ;;  %v8144_v40 = vpop.f32.mrb[219].mxu1  ;;  %v12084_v27 = vadd.f32 %v8480_v30, %v8479_v14  ;;  %v9967_v17 = vld [vmem:[%s10531_s23 + $0x20] ss:$8 sps:$4 sm:$0xff]  }
 0x2c5   : > { %v12086_v1 = vadd.f32 %v8144_v40, %v8143_v28  ;;  %v14330_v0 = vld [vmem:[#allocation64_spill] sm:$0xff] }
 0x2c6   : > { %14323 = vst [vmem:[#allocation23_spill] sm:$0xff] %v12084_v27  ;;  %3712 = vmatmul.mubr.bf16.gmra.mrb[68].mxu1 %v9965_v57 }
 0x2c7   : > { %8683 = vmatpush3.bf16.xpose.msra.mxu1 %v4142_v33  ;;  %3719 = vmatprep.mubr.bf16.mxu1 %v9966_v13 }
 0x2c8   : > { %9138 = vmatprep.subr.msk.bf16.mxu1 %vm3928_vm0, %v14327_v4  ;;  %v8482_v14 = vpop.f32.mrb[220].mxu0  ;;  %v14331_v4 = vld [vmem:[#allocation63_spill] sm:$0xff] }
 0x2c9   : > { %v8146_v28 = vpop.f32.mrb[220].mxu1  ;;  %v8483_v30 = vpop.f32.mrb[221].mxu0  ;;  %v14332_v29 = vpack.c.bf16 %v14330_v0, %v14331_v4 }
 0x2ca   : > { %v8147_v10 = vpop.f32.mrb[221].mxu1  ;;  %v12102_v40 = vadd.f32 %v8483_v30, %v8482_v14  ;;  %v8485_v57 = vpop.f32.mrb[222].mxu0  ;;  %v9969_v30 = vld [vmem:[%s10531_s23 + $0x30] ss:$8 sps:$4 sm:$0xff]  }
 0x2cb   : > { %v12104_v33 = vadd.f32 %v8147_v10, %v8146_v28  ;;  %v8149_v42 = vpop.f32.mrb[222].mxu1  ;;  %v8486_v8 = vpop.f32.mrb[223].mxu0  ;;  %v4145_v43 = vsel %vm3928_vm0, %v14332_v29, 0  ;;  %v9968_v28 = vld [vmem:[%s10531_s23 + $0x34] ss:$8 sps:$4 sm:$0xff]   ;;  %v14333_v10 = vpack.c.bf16 %v11826_v11, %v11816_v25  ;;  %v14334_v25 = vld [vmem:[#allocation72_spill] sm:$0xff] }
 0x2cc   : > { %14328 = vst [vmem:[#allocation43_spill] sm:$0xff] %v12102_v40  ;;  %v8150_v13 = vpop.f32.mrb[223].mxu1  ;;  %v12106_v31 = vadd.f32 %v8486_v8, %v8485_v57  ;;  %v14335_v11 = vld [vmem:[#allocation70_spill] sm:$0xff] }
 0x2cd   : > { %v12108_v36 = vadd.f32 %v8150_v13, %v8149_v42 }
 0x2ce   : > { %14329 = vst [vmem:[#allocation52_spill] sm:$0xff] %v12106_v31  ;;  %3720 = vmatmul.mubr.bf16.gmra.mrb[72].mxu1 %v9967_v17 }
 0x2cf   : > { %8685 = vmatpush3.bf16.xpose.msra.mxu1 %v4145_v43  ;;  %3727 = vmatprep.mubr.bf16.mxu1 %v9968_v28 }
 0x2d0   : > { %9139 = vmatprep.subr.msk.bf16.mxu1 %vm3928_vm0, %v14333_v10  ;;  %v8488_v57 = vpop.f32.mrb[224].mxu0  ;;  %v14336_v10 = vpack.c.bf16 %v14334_v25, %v14335_v11 }
 0x2d1   : > { %v8152_v42 = vpop.f32.mrb[224].mxu1  ;;  %v8489_v8 = vpop.f32.mrb[225].mxu0 }
 0x2d2   : > { %v8153_v29 = vpop.f32.mrb[225].mxu1  ;;  %v8490_v13 = vadd.f32 %v8489_v8, %v8488_v57  ;;  %v8491_v17 = vpop.f32.mrb[226].mxu0  ;;  %v4148_v62 = vsel %vm3928_vm0, %v14336_v10, 0  ;;  %v14337_v8 = vpack.c.bf16 %v11862_v6, %v11852_v55  ;;  %v9971_v55 = vld [vmem:[%s10531_s23 + $0x40] ss:$8 sps:$4 sm:$0xff]   ;;  %v14340_v6 = vld [vmem:[#allocation78_spill] sm:$0xff] }
 0x2d3   : > { %v12124_v0 = vadd.f32 %v8153_v29, %v8152_v42  ;;  %v8155_v43 = vpop.f32.mrb[226].mxu1  ;;  %v8492_v4 = vpop.f32.mrb[227].mxu0  ;;  %v9970_v42 = vld [vmem:[%s10531_s23 + $0x44] ss:$8 sps:$4 sm:$0xff]  }
 0x2d4   : > { %v8156_v28 = vpop.f32.mrb[227].mxu1  ;;  %v8493_v14 = vadd.f32 %v8492_v4, %v8491_v17 }
 0x2d5   : > { %v12126_v44 = vadd.f32 %v8156_v28, %v8155_v43 }
 0x2d6   : > { %3728 = vmatmul.mubr.bf16.gmra.mrb[76].mxu1 %v9969_v30  ;;  %v5541_v24 = vpack.c.bf16 %v8493_v14, %v8490_v13 }
 0x2d7   : > { %v3920_v57 = vpack.c.bf16 %v12126_v44, %v12124_v0  ;;  %8687 = vmatpush3.bf16.xpose.msra.mxu1 %v4148_v62  ;;  %3735 = vmatprep.mubr.bf16.mxu1 %v9970_v42  ;;  %v9979_v44 = vld [vmem:[%s10531_s23 + $0x80] ss:$8 sps:$4 sm:$0xff]  }
 0x2d8   : > { %9140 = vmatprep.subr.msk.bf16.mxu1 %vm3928_vm0, %v14337_v8  ;;  %v8494_v29 = vpop.f32.mrb[228].mxu0  ;;  %8904 = vmatprep.subr.bf16.mxu0 %v5541_v24  ;;  %v14341_v24 = vld [vmem:[#allocation76_spill] sm:$0xff] }
 0x2d9   : > { %v8158_v30 = vpop.f32.mrb[228].mxu1  ;;  %v8495_v17 = vpop.f32.mrb[229].mxu0  ;;  %v14342_v42 = vpack.c.bf16 %v14340_v6, %v14341_v24 }
 0x2da   : > { %v8159_v43 = vpop.f32.mrb[229].mxu1  ;;  %v12140_v4 = vadd.f32 %v8495_v17, %v8494_v29  ;;  %v8497_v14 = vpop.f32.mrb[230].mxu0  ;;  %v9972_v17 = vld [vmem:[%s10531_s23 + $0x54] ss:$8 sps:$4 sm:$0xff]  }
 0x2db   : > { %v12142_v13 = vadd.f32 %v8159_v43, %v8158_v30  ;;  %v8161_v62 = vpop.f32.mrb[230].mxu1  ;;  %v8498_v28 = vpop.f32.mrb[231].mxu0  ;;  %v4151_v8 = vsel %vm3928_vm0, %v14342_v42, 0  ;;  %v14343_v43 = vpack.c.bf16 %v11891_v15, %v11887_v41  ;;  %v9973_v15 = vld [vmem:[%s10531_s23 + $0x50] ss:$8 sps:$4 sm:$0xff]   ;;  %v14346_v41 = vpack.c.bf16 %v11594_v20, %v11580_v63 }
 0x2dc   : > { %14338 = vst [vmem:[#allocation51_spill] sm:$0xff] %v12140_v4  ;;  %v8162_v25 = vpop.f32.mrb[231].mxu1  ;;  %v12144_v11 = vadd.f32 %v8498_v28, %v8497_v14  ;;  %v9991_v4 = vld [vmem:[%s10531_s23 + $0xe0] ss:$8 sps:$4 sm:$0xff]  }
 0x2dd   : > { %v12146_v10 = vadd.f32 %v8162_v25, %v8161_v62 }
 0x2de   : > { %14339 = vst [vmem:[#allocation75_spill] sm:$0xff] %v12144_v11  ;;  %3736 = vmatmul.mubr.bf16.gmra.mrb[80].mxu1 %v9971_v55 }
 0x2df   : > { %8689 = vmatpush3.bf16.xpose.msra.mxu1 %v4151_v8  ;;  %3743 = vmatprep.mubr.bf16.mxu1 %v9972_v17 }
 0x2e0   : > { %9141 = vmatprep.subr.msk.bf16.mxu1 %vm3928_vm0, %v14343_v43  ;;  %v8500_v14 = vpop.f32.mrb[232].mxu0  ;;  %v4154_v43 = vsel %vm3928_vm0, %v14346_v41, 0 }
 0x2e1   : > { %v8164_v62 = vpop.f32.mrb[232].mxu1  ;;  %v8501_v28 = vpop.f32.mrb[233].mxu0 }
 0x2e2   : > { %v8165_v25 = vpop.f32.mrb[233].mxu1  ;;  %v12162_v55 = vadd.f32 %v8501_v28, %v8500_v14  ;;  %v8503_v6 = vpop.f32.mrb[234].mxu0  ;;  %v9974_v28 = vld [vmem:[%s10531_s23 + $0x64] ss:$8 sps:$4 sm:$0xff]  }
 0x2e3   : > { %v12164_v24 = vadd.f32 %v8165_v25, %v8164_v62  ;;  %v8167_v42 = vpop.f32.mrb[234].mxu1  ;;  %v8504_v8 = vpop.f32.mrb[235].mxu0 }
 0x2e4   : > { %14344 = vst [vmem:[#allocation77_spill] sm:$0xff] %v12162_v55  ;;  %v8168_v29 = vpop.f32.mrb[235].mxu1  ;;  %v12166_v30 = vadd.f32 %v8504_v8, %v8503_v6  ;;  %v9990_v55 = vld [vmem:[%s10531_s23 + $0xe4] ss:$8 sps:$4 sm:$0xff]  }
 0x2e5   : > { %v12168_v17 = vadd.f32 %v8168_v29, %v8167_v42  ;;  %v14347_v29 = vpack.c.bf16 %v11923_v59, %v11916_v23  ;;  %v9975_v23 = vld [vmem:[%s10531_s23 + $0x60] ss:$8 sps:$4 sm:$0xff]   ;;  %v14350_v59 = vpack.c.bf16 %v11634_v3, %v11620_v5 }
 0x2e6   : > { %14345 = vst [vmem:[#allocation38_spill] sm:$0xff] %v12166_v30  ;;  %3744 = vmatmul.mubr.bf16.gmra.mrb[84].mxu1 %v9973_v15 }
 0x2e7   : > { %8691 = vmatpush3.bf16.xpose.msra.mxu1 %v4154_v43  ;;  %3751 = vmatprep.mubr.bf16.mxu1 %v9974_v28 }
 0x2e8   : > { %9142 = vmatprep.subr.msk.bf16.mxu1 %vm3928_vm0, %v14347_v29  ;;  %v8506_v25 = vpop.f32.mrb[236].mxu0  ;;  %v4157_v29 = vsel %vm3928_vm0, %v14350_v59, 0 }
 0x2e9   : > { %v8170_v6 = vpop.f32.mrb[236].mxu1  ;;  %v8507_v63 = vpop.f32.mrb[237].mxu0 }
 0x2ea   : > { %v8171_v20 = vpop.f32.mrb[237].mxu1  ;;  %v12184_v42 = vadd.f32 %v8507_v63, %v8506_v25  ;;  %v8509_v8 = vpop.f32.mrb[238].mxu0  ;;  %v9976_v63 = vld [vmem:[%s10531_s23 + $0x74] ss:$8 sps:$4 sm:$0xff]  }
 0x2eb   : > { %v12186_v15 = vadd.f32 %v8171_v20, %v8170_v6  ;;  %v8173_v41 = vpop.f32.mrb[238].mxu1  ;;  %v8510_v43 = vpop.f32.mrb[239].mxu0 }
 0x2ec   : > { %14348 = vst [vmem:[#allocation37_spill] sm:$0xff] %v12184_v42  ;;  %v8174_v14 = vpop.f32.mrb[239].mxu1  ;;  %v12188_v62 = vadd.f32 %v8510_v43, %v8509_v8 }
 0x2ed   : > { %v12190_v28 = vadd.f32 %v8174_v14, %v8173_v41  ;;  %v14351_v14 = vpack.c.bf16 %v11951_v53, %v11946_v2  ;;  %v9977_v2 = vld [vmem:[%s10531_s23 + $0x70] ss:$8 sps:$4 sm:$0xff]   ;;  %v14354_v53 = vpack.c.bf16 %v11674_v35, %v11660_v12 }
 0x2ee   : > { %14349 = vst [vmem:[#allocation44_spill] sm:$0xff] %v12188_v62  ;;  %3752 = vmatmul.mubr.bf16.gmra.mrb[88].mxu1 %v9975_v23 }
 0x2ef   : > { %8693 = vmatpush3.bf16.xpose.msra.mxu1 %v4157_v29  ;;  %3759 = vmatprep.mubr.bf16.mxu1 %v9976_v63 }
 0x2f0   : > { %9143 = vmatprep.subr.msk.bf16.mxu1 %vm3928_vm0, %v14351_v14  ;;  %v8512_v20 = vpop.f32.mrb[240].mxu0  ;;  %v4160_v14 = vsel %vm3928_vm0, %v14354_v53, 0 }
 0x2f1   : > { %v8176_v8 = vpop.f32.mrb[240].mxu1  ;;  %v8513_v5 = vpop.f32.mrb[241].mxu0 }
 0x2f2   : > { %v8177_v3 = vpop.f32.mrb[241].mxu1  ;;  %v12206_v41 = vadd.f32 %v8513_v5, %v8512_v20  ;;  %v8515_v43 = vpop.f32.mrb[242].mxu0  ;;  %v9978_v5 = vld [vmem:[%s10531_s23 + $0x84] ss:$8 sps:$4 sm:$0xff]  }
 0x2f3   : > { %v12208_v23 = vadd.f32 %v8177_v3, %v8176_v8  ;;  %v8179_v59 = vpop.f32.mrb[242].mxu1  ;;  %v8516_v29 = vpop.f32.mrb[243].mxu0 }
 0x2f4   : > { %14352 = vst [vmem:[#allocation24_spill] sm:$0xff] %v12206_v41  ;;  %v8180_v25 = vpop.f32.mrb[243].mxu1  ;;  %v12210_v6 = vadd.f32 %v8516_v29, %v8515_v43  ;;  %v9987_v41 = vld [vmem:[%s10531_s23 + $0xc0] ss:$8 sps:$4 sm:$0xff]  }
 0x2f5   : > { %v12212_v63 = vadd.f32 %v8180_v25, %v8179_v59 }
 0x2f6   : > { %14353 = vst [vmem:[#allocation45_spill] sm:$0xff] %v12210_v6  ;;  %3760 = vmatmul.mubr.bf16.gmra.mrb[92].mxu1 %v9977_v2 }
 0x2f7   : > { %8695 = vmatpush3.bf16.xpose.msra.mxu1 %v4160_v14  ;;  %3767 = vmatprep.mubr.bf16.mxu1 %v9978_v5 }
 0x2f8   : > { %9152 = vmatprep.subr.msk.bf16.mxu1 %vm3928_vm0, %v3920_v57  ;;  %v8518_v25 = vpop.f32.mrb[244].mxu0  ;;  %v9981_v57 = vld [vmem:[%s10531_s23 + $0x90] ss:$8 sps:$4 sm:$0xff]  }
 0x2f9   : > { %v8182_v12 = vpop.f32.mrb[244].mxu1  ;;  %v8519_v35 = vpop.f32.mrb[245].mxu0 }
 0x2fa   : > { %v8183_v3 = vpop.f32.mrb[245].mxu1  ;;  %v12228_v43 = vadd.f32 %v8519_v35, %v8518_v25  ;;  %v8521_v59 = vpop.f32.mrb[246].mxu0  ;;  %v9980_v25 = vld [vmem:[%s10531_s23 + $0x94] ss:$8 sps:$4 sm:$0xff]  }
 0x2fb   : > { %v12230_v29 = vadd.f32 %v8183_v3, %v8182_v12  ;;  %v8185_v2 = vpop.f32.mrb[246].mxu1  ;;  %v8522_v53 = vpop.f32.mrb[247].mxu0 }
 0x2fc   : > { %14355 = vst [vmem:[#allocation80_spill] sm:$0xff] %v12228_v43  ;;  %v8186_v14 = vpop.f32.mrb[247].mxu1  ;;  %v12232_v20 = vadd.f32 %v8522_v53, %v8521_v59  ;;  %v9986_v43 = vld [vmem:[%s10531_s23 + $0xc4] ss:$8 sps:$4 sm:$0xff]  }
 0x2fd   : > { %v12234_v5 = vadd.f32 %v8186_v14, %v8185_v2 }
 0x2fe   : > { %14356 = vst [vmem:[#allocation46_spill] sm:$0xff] %v12232_v20  ;;  %3768 = vmatmul.mubr.bf16.gmra.mrb[96].mxu1 %v9979_v44 }
 0x2ff   : > { %3775 = vmatprep.mubr.bf16.mxu1 %v9980_v25 }
 0x300   : > { %v8524_v12 = vpop.f32.mrb[248].mxu0 }
 0x301   : > { %v8188_v35 = vpop.f32.mrb[248].mxu1  ;;  %v8525_v3 = vpop.f32.mrb[249].mxu0 }
 0x302   : > { %v8189_v8 = vpop.f32.mrb[249].mxu1  ;;  %v12242_v59 = vadd.f32 %v8525_v3, %v8524_v12  ;;  %v8527_v2 = vpop.f32.mrb[250].mxu0  ;;  %v9982_v3 = vld [vmem:[%s10531_s23 + $0xa4] ss:$8 sps:$4 sm:$0xff]   ;;  %v9983_v12 = vld [vmem:[%s10531_s23 + $0xa0] ss:$8 sps:$4 sm:$0xff]  }
 0x303   : > { %v12244_v53 = vadd.f32 %v8189_v8, %v8188_v35  ;;  %v8191_v14 = vpop.f32.mrb[250].mxu1  ;;  %v8528_v44 = vpop.f32.mrb[251].mxu0 }
 0x304   : > { %14357 = vst [vmem:[#allocation26_spill] sm:$0xff] %v12242_v59  ;;  %v8192_v40 = vpop.f32.mrb[251].mxu1  ;;  %v12246_v0 = vadd.f32 %v8528_v44, %v8527_v2 }
 0x305   : > { %v12248_v31 = vadd.f32 %v8192_v40, %v8191_v14 }
 0x306   : > { %14358 = vst [vmem:[#allocation47_spill] sm:$0xff] %v12246_v0  ;;  %3776 = vmatmul.mubr.bf16.gmra.mrb[100].mxu1 %v9981_v57 }
 0x307   : > { %3783 = vmatprep.mubr.bf16.mxu1 %v9982_v3 }
 0x308   : > { %v8530_v8 = vpop.f32.mrb[252].mxu0 }
 0x309   : > { %v8194_v35 = vpop.f32.mrb[252].mxu1  ;;  %v8531_v19 = vpop.f32.mrb[253].mxu0 }
 0x30a   : > { %v8195_v27 = vpop.f32.mrb[253].mxu1  ;;  %v12256_v2 = vadd.f32 %v8531_v19, %v8530_v8  ;;  %v8533_v40 = vpop.f32.mrb[254].mxu0  ;;  %v9984_v19 = vld [vmem:[%s10531_s23 + $0xb4] ss:$8 sps:$4 sm:$0xff]  }
 0x30b   : > { %v12258_v14 = vadd.f32 %v8195_v27, %v8194_v35  ;;  %v8197_v57 = vpop.f32.mrb[254].mxu1  ;;  %v8534_v44 = vpop.f32.mrb[255].mxu0 }
 0x30c   : > { %14359 = vst [vmem:[#allocation49_spill] sm:$0xff] %v12256_v2  ;;  %v8198_v56 = vpop.f32.mrb[255].mxu1  ;;  %v12260_v25 = vadd.f32 %v8534_v44, %v8533_v40 }
 0x30d   : > { %v12262_v59 = vadd.f32 %v8198_v56, %v8197_v57 }
 0x30e   : > { %14360 = vst [vmem:[#allocation27_spill] sm:$0xff] %v12260_v25  ;;  %3784 = vmatmul.mubr.bf16.gmra.mrb[104].mxu1 %v9983_v12  ;;  %v9985_v25 = vld [vmem:[%s10531_s23 + $0xb0] ss:$8 sps:$4 sm:$0xff]  }
 0x30f   : > { %3791 = vmatprep.mubr.bf16.mxu1 %v9984_v19 }
 0x310   : > { %v12270_v27 = vpop.f32.mrb[0].mxu0 }
 0x311   : > { %v8328_v8 = vpop.f32.mrb[0].mxu1  ;;  %v12272_v35 = vpop.f32.mrb[1].mxu0 }
 0x312   : > { %v8329_v40 = vpop.f32.mrb[1].mxu1  ;;  %v12274_v56 = vpop.f32.mrb[2].mxu0  ;;  %v4669_v12 = vmax.f32 %v12270_v27, %v12272_v35 }
 0x313   : > { %v12278_v57 = vadd.f32 %v8329_v40, %v8328_v8  ;;  %v8331_v44 = vpop.f32.mrb[2].mxu1  ;;  %v12280_v3 = vpop.f32.mrb[3].mxu0 }
 0x314   : > { %v8332_v0 = vpop.f32.mrb[3].mxu1  ;;  %4670 = vmax.xlane.f32.xlu0 %v4669_v12  ;;  %v4672_v19 = vmax.f32 %v12274_v56, %v12280_v3 }
 0x315   : > { %v12284_v2 = vadd.f32 %v8332_v0, %v8331_v44 }
 0x316   : > { %3792 = vmatmul.mubr.bf16.gmra.mrb[108].mxu1 %v9985_v25 }
 0x317   : > { %3799 = vmatprep.mubr.bf16.mxu1 %v9986_v43 }
 0x318   : > { %4673 = vmax.xlane.f32.xlu0 %v4672_v19  ;;  %v12290_v8 = vpop.f32.mrb[4].mxu0 }
 0x319   : > { %v8334_v40 = vpop.f32.mrb[4].mxu1  ;;  %v12292_v20 = vpop.f32.mrb[5].mxu0 }
 0x31a   : > { %v8335_v12 = vpop.f32.mrb[5].mxu1  ;;  %v12294_v50 = vpop.f32.mrb[6].mxu0  ;;  %v4675_v0 = vmax.f32 %v12290_v8, %v12292_v20 }
 0x31b   : > { %v12298_v25 = vadd.f32 %v8335_v12, %v8334_v40  ;;  %v8337_v44 = vpop.f32.mrb[6].mxu1  ;;  %v12300_v51 = vpop.f32.mrb[7].mxu0 }
 0x31c   : > { %v8338_v46 = vpop.f32.mrb[7].mxu1  ;;  %4676 = vmax.xlane.f32.xlu1 %v4675_v0  ;;  %v4678_v43 = vmax.f32 %v12294_v50, %v12300_v51 }
 0x31d   : > { %v12304_v19 = vadd.f32 %v8338_v46, %v8337_v44 }
 0x31e   : > { %3800 = vmatmul.mubr.bf16.gmra.mrb[112].mxu1 %v9987_v41 }
 0x31f   : > { %3807 = vmatprep.mubr.bf16.mxu1 %v9988_v21 }
 0x320   : > { %4679 = vmax.xlane.f32.xlu1 %v4678_v43  ;;  %v12310_v40 = vpop.f32.mrb[8].mxu0 }
 0x321   : > { %v8340_v12 = vpop.f32.mrb[8].mxu1  ;;  %v12312_v22 = vpop.f32.mrb[9].mxu0 }
 0x322   : > { %v8341_v0 = vpop.f32.mrb[9].mxu1  ;;  %v12314_v42 = vpop.f32.mrb[10].mxu0  ;;  %v4681_v46 = vmax.f32 %v12310_v40, %v12312_v22 }
 0x323   : > { %14361 = vst [vmem:[#allocation50_spill] sm:$0xff] %v12314_v42  ;;  %v12318_v41 = vadd.f32 %v8341_v0, %v8340_v12  ;;  %v8343_v44 = vpop.f32.mrb[10].mxu1  ;;  %v12320_v6 = vpop.f32.mrb[11].mxu0 }
 0x324   : > { %14362 = vst [vmem:[#allocation53_spill] sm:$0xff] %v12320_v6  ;;  %v8344_v62 = vpop.f32.mrb[11].mxu1  ;;  %4682 = vmax.xlane.f32.xlu0 %v4681_v46  ;;  %v4684_v21 = vmax.f32 %v12314_v42, %v12320_v6  ;;  %v14371_v6 = vld [vmem:[#allocation8_spill] sm:$0xff]  ;;  %v14374_v42 = vpack.c.bf16 %v11976_v32, %v11969_v38 }
 0x325   : > { %v12324_v43 = vadd.f32 %v8344_v62, %v8343_v44 }
 0x326   : > { %3808 = vmatmul.mubr.bf16.gmra.mrb[116].mxu1 %v9989_v9  ;;  %4685 = vmax.xlane.f32.xlu1 %v4684_v21 }
 0x327   : > { %3815 = vmatprep.mubr.bf16.mxu1 %v9990_v55 }
 0x328   : > { %v12330_v12 = vpop.f32.mrb[12].mxu0 }
 0x329   : > { %14363 = vst [vmem:[#allocation29_spill] sm:$0xff] %v12330_v12  ;;  %v8346_v0 = vpop.f32.mrb[12].mxu1  ;;  %v12332_v30 = vpop.f32.mrb[13].mxu0 }
 0x32a   : > { %14364 = vst [vmem:[#allocation54_spill] sm:$0xff] %v12332_v30  ;;  %v8347_v46 = vpop.f32.mrb[13].mxu1  ;;  %v12334_v60 = vpop.f32.mrb[14].mxu0  ;;  %v4687_v62 = vmax.f32 %v12330_v12, %v12332_v30  ;;  %v9992_v30 = vld [vmem:[%s10531_s23 + $0xf4] ss:$8 sps:$4 sm:$0xff]  }
 0x32b   : > { %14365 = vst [vmem:[#allocation57_spill] sm:$0xff] %v12334_v60  ;;  %v12338_v9 = vadd.f32 %v8347_v46, %v8346_v0  ;;  %v8349_v44 = vpop.f32.mrb[14].mxu1  ;;  %v12340_v21 = vpop.f32.mrb[15].mxu0 }
 0x32c   : > { %14366 = vst [vmem:[#allocation30_spill] sm:$0xff] %v12340_v21  ;;  %v8350_v45 = vpop.f32.mrb[15].mxu1  ;;  %4688 = vmax.xlane.f32.xlu0 %v4687_v62  ;;  %v4690_v55 = vmax.f32 %v12334_v60, %v12340_v21  ;;  %v9993_v60 = vld [vmem:[%s10531_s23 + $0xf0] ss:$8 sps:$4 sm:$0xff]   ;;  %s10091_s23 = smov [#allocation2]  }
 0x32d   : > { %v12344_v47 = vadd.f32 %v8350_v45, %v8349_v44  ;;  %s9998_s12 = sshll.u32 %s10091_s23, 4  ;;  %s9999_s12 = int_to_ptr.vmem [resolvable:$false] %s9998_s12 }
 0x32e   : > { %3816 = vmatmul.mubr.bf16.gmra.mrb[120].mxu1 %v9991_v4  ;;  %4691 = vmax.xlane.f32.xlu1 %v4690_v55  ;;  %s10000_s16 = scalar_lea.vmem %s9999_s12, 8192  ;;  %p10001_p4 = scmp.lt.s32.totalorder %s13863_s21, %s9999_s12 }
 0x32f   : > { %3823 = vmatprep.mubr.bf16.mxu1 %v9992_v30  ;;  %p10002_p5 = scmp.lt.s32.totalorder %s10000_s16, %s9994_s13 }
 0x330   : > { %v12350_v0 = vpop.f32.mrb[16].mxu0 }
 0x331   : > { %14367 = vst [vmem:[#allocation58_spill] sm:$0xff] %v12350_v0  ;;  %v8352_v46 = vpop.f32.mrb[16].mxu1  ;;  %v12352_v12 = vpop.f32.mrb[17].mxu0  ;;  %p10003_p6 = por %p10002_p5, %p10001_p4 }
 0x332   : > { %14368 = vst [vmem:[#allocation61_spill] sm:$0xff] %v12352_v12  ;;  %v8353_v62 = vpop.f32.mrb[17].mxu1  ;;  %v12354_v7 = vpop.f32.mrb[18].mxu0  ;;  %v4693_v45 = vmax.f32 %v12350_v0, %v12352_v12 }
 0x333   : > { %14369 = vst [vmem:[#allocation32_spill] sm:$0xff] %v12354_v7  ;;  %v12358_v44 = vadd.f32 %v8353_v62, %v8352_v46  ;;  %v8355_v4 = vpop.f32.mrb[18].mxu1  ;;  %v12360_v55 = vpop.f32.mrb[19].mxu0  ;;  %p10004_p7 = pnand %p10003_p6, %p9997_p2 }
 0x334   : > { %14370 = vst [vmem:[#allocation62_spill] sm:$0xff] %v12360_v55  ;;  %v8356_v11 = vpop.f32.mrb[19].mxu1  ;;  %4694 = vmax.xlane.f32.xlu0 %v4693_v45  ;;  %v4696_v30 = vmax.f32 %v12354_v7, %v12360_v55 }
 0x335   : > { %v12364_v21 = vadd.f32 %v8356_v11, %v8355_v4 }
 0x336   : > { %3824 = vmatmul.mubr.bf16.gmra.mrb[124].mxu1 %v9993_v60  ;;  %4697 = vmax.xlane.f32.xlu1 %v4696_v30 }
 0x337   : > { %8696 = vmatprep.mubr.msk.bf16.mxu1 %vm3928_vm0, %v14371_v6 }
 0x338   : > { %v12371_v46 = vpop.f32.mrb[20].mxu0 }
 0x339   : > { %v8358_v62 = vpop.f32.mrb[20].mxu1  ;;  %v12373_v12 = vpop.f32.mrb[21].mxu0 }
 0x33a   : > { %14372 = vst [vmem:[#allocation65_spill] sm:$0xff] %v12373_v12  ;;  %v8359_v45 = vpop.f32.mrb[21].mxu1  ;;  %v12375_v0 = vpop.f32.mrb[22].mxu0  ;;  %v4699_v11 = vmax.f32 %v12371_v46, %v12373_v12  ;;  %v4509_v12 = vsel %vm3928_vm0, %v14374_v42, 0 }
 0x33b   : > { %v12379_v4 = vadd.f32 %v8359_v45, %v8358_v62  ;;  %v8361_v60 = vpop.f32.mrb[22].mxu1  ;;  %v12381_v30 = vpop.f32.mrb[23].mxu0  ;;  %v14375_v45 = vld [vmem:[#allocation9_spill] sm:$0xff] }
 0x33c   : > { %14373 = vst [vmem:[#allocation33_spill] sm:$0xff] %v12381_v30  ;;  %v8362_v39 = vpop.f32.mrb[23].mxu1  ;;  %4700 = vmax.xlane.f32.xlu0 %v4699_v11  ;;  %v4702_v55 = vmax.f32 %v12375_v0, %v12381_v30 }
 0x33d   : > { %v12385_v7 = vadd.f32 %v8362_v39, %v8361_v60  ;;  %v14376_v39 = vpack.c.bf16 %v12146_v10, %v12142_v13 }
 0x33e   : > { %8697 = vmatmul.mubr.msk.bf16.vlgmr.msra.gmra.mrb[128].mxu1 %vm3928_vm0, %v14371_v6  ;;  %4703 = vmax.xlane.f32.xlu1 %v4702_v55 }
 0x33f   : > { %8745 = vmatpush3.bf16.xpose.msra.mxu1 %v4509_v12  ;;  %8698 = vmatprep.mubr.msk.bf16.mxu1 %vm3928_vm0, %v14375_v45 }
 0x340   : > { %9153 = vmatprep.subr.msk.bf16.mxu1 %vm3928_vm0, %v14376_v39  ;;  %v12401_v11 = vpop.f32.mrb[24].mxu0  ;;  %v14379_v39 = vpack.c.bf16 %v11994_v58, %v11990_v54 }
 0x341   : > { %v8364_v6 = vpop.f32.mrb[24].mxu1  ;;  %v12403_v60 = vpop.f32.mrb[25].mxu0 }
 0x342   : > { %14377 = vst [vmem:[#allocation66_spill] sm:$0xff] %v12403_v60  ;;  %v8365_v38 = vpop.f32.mrb[25].mxu1  ;;  %v12405_v32 = vpop.f32.mrb[26].mxu0  ;;  %v4705_v42 = vmax.f32 %v12401_v11, %v12403_v60  ;;  %v4512_v60 = vsel %vm3928_vm0, %v14379_v39, 0 }
 0x343   : > { %v12409_v12 = vadd.f32 %v8365_v38, %v8364_v6  ;;  %v8367_v55 = vpop.f32.mrb[26].mxu1  ;;  %v12411_v62 = vpop.f32.mrb[27].mxu0  ;;  %v14380_v38 = vld [vmem:[#allocation10_spill] sm:$0xff] }
 0x344   : > { %14378 = vst [vmem:[#allocation73_spill] sm:$0xff] %v12411_v62  ;;  %v8368_v30 = vpop.f32.mrb[27].mxu1  ;;  %4706 = vmax.xlane.f32.xlu0 %v4705_v42  ;;  %v4708_v13 = vmax.f32 %v12405_v32, %v12411_v62 }
 0x345   : > { %v12415_v10 = vadd.f32 %v8368_v30, %v8367_v55  ;;  %v14381_v30 = vpack.c.bf16 %v12168_v17, %v12164_v24 }
 0x346   : > { %8699 = vmatmul.mubr.msk.bf16.gmra.mrb[132].mxu1 %vm3928_vm0, %v14375_v45  ;;  %4709 = vmax.xlane.f32.xlu1 %v4708_v13 }
 0x347   : > { %8747 = vmatpush3.bf16.xpose.msra.mxu1 %v4512_v60  ;;  %8700 = vmatprep.mubr.msk.bf16.mxu1 %vm3928_vm0, %v14380_v38 }
 0x348   : > { %9154 = vmatprep.subr.msk.bf16.mxu1 %vm3928_vm0, %v14381_v30  ;;  %v12431_v42 = vpop.f32.mrb[28].mxu0  ;;  %v14384_v30 = vpack.c.bf16 %v12012_v26, %v12008_v52 }
 0x349   : > { %v8370_v45 = vpop.f32.mrb[28].mxu1  ;;  %v12433_v55 = vpop.f32.mrb[29].mxu0 }
 0x34a   : > { %14382 = vst [vmem:[#allocation34_spill] sm:$0xff] %v12433_v55  ;;  %v8371_v54 = vpop.f32.mrb[29].mxu1  ;;  %v12435_v58 = vpop.f32.mrb[30].mxu0  ;;  %v4711_v13 = vmax.f32 %v12431_v42, %v12433_v55  ;;  %v4515_v55 = vsel %vm3928_vm0, %v14384_v30, 0 }
 0x34b   : > { %v12439_v60 = vadd.f32 %v8371_v54, %v8370_v45  ;;  %v8373_v39 = vpop.f32.mrb[30].mxu1  ;;  %v12441_v6 = vpop.f32.mrb[31].mxu0  ;;  %v14385_v54 = vld [vmem:[#allocation11_spill] sm:$0xff] }
 0x34c   : > { %14383 = vst [vmem:[#allocation74_spill] sm:$0xff] %v12441_v6  ;;  %v8374_v62 = vpop.f32.mrb[31].mxu1  ;;  %4712 = vmax.xlane.f32.xlu0 %v4711_v13  ;;  %v4714_v24 = vmax.f32 %v12435_v58, %v12441_v6 }
 0x34d   : > { %v12445_v17 = vadd.f32 %v8374_v62, %v8373_v39  ;;  %v14386_v62 = vpack.c.bf16 %v12190_v28, %v12186_v15 }
 0x34e   : > { %8701 = vmatmul.mubr.msk.bf16.gmra.mrb[136].mxu1 %vm3928_vm0, %v14380_v38  ;;  %4715 = vmax.xlane.f32.xlu1 %v4714_v24 }
 0x34f   : > { %8749 = vmatpush3.bf16.xpose.msra.mxu1 %v4515_v55  ;;  %8702 = vmatprep.mubr.msk.bf16.mxu1 %vm3928_vm0, %v14385_v54  ;;  %v14392_v55 = vld [vmem:[#allocation12_spill] sm:$0xff] }
 0x350   : > { %9155 = vmatprep.subr.msk.bf16.mxu1 %vm3928_vm0, %v14386_v62  ;;  %v14391_v62 = vpack.c.bf16 %v12030_v48, %v12026_v37 }
 0x351   : > { %v8376_v13 = vpop.f32.mrb[32].mxu1  ;;  %v12461_v38 = vpop.f32.mrb[32].mxu0 }
 0x352   : > { %14387 = vst [vmem:[#allocation79_spill] sm:$0xff] %v12461_v38  ;;  %v8377_v39 = vpop.f32.mrb[33].mxu1  ;;  %v12463_v52 = vpop.f32.mrb[33].mxu0 }
 0x353   : > { %14388 = vst [vmem:[#allocation56_spill] sm:$0xff] %v12463_v52  ;;  %v12465_v26 = vadd.f32 %v8377_v39, %v8376_v13  ;;  %v8379_v24 = vpop.f32.mrb[34].mxu1  ;;  %v12467_v30 = vpop.f32.mrb[34].mxu0  ;;  %v4518_v13 = vsel %vm3928_vm0, %v14391_v62, 0 }
 0x354   : > { %14389 = vst [vmem:[#allocation55_spill] sm:$0xff] %v12467_v30  ;;  %v8380_v45 = vpop.f32.mrb[35].mxu1  ;;  %v12471_v6 = vpop.f32.mrb[35].mxu0 }
 0x355   : > { %14390 = vst [vmem:[#allocation60_spill] sm:$0xff] %v12471_v6  ;;  %v12473_v15 = vadd.f32 %v8380_v45, %v8379_v24  ;;  %v14393_v45 = vpack.c.bf16 %v12212_v63, %v12208_v23 }
 0x356   : > { %8703 = vmatmul.mubr.msk.bf16.gmra.mrb[140].mxu1 %vm3928_vm0, %v14385_v54 }
 0x357   : > { %8751 = vmatpush3.bf16.xpose.msra.mxu1 %v4518_v13  ;;  %8704 = vmatprep.mubr.msk.bf16.mxu1 %vm3928_vm0, %v14392_v55  ;;  %v14398_v13 = vld [vmem:[#allocation13_spill] sm:$0xff] }
 0x358   : > { %9156 = vmatprep.subr.msk.bf16.mxu1 %vm3928_vm0, %v14393_v45  ;;  %v14397_v45 = vpack.c.bf16 %v12048_v34, %v12044_v18 }
 0x359   : > { %v8382_v24 = vpop.f32.mrb[36].mxu1  ;;  %v12491_v28 = vpop.f32.mrb[36].mxu0 }
 0x35a   : > { %v8383_v54 = vpop.f32.mrb[37].mxu1  ;;  %v12493_v6 = vpop.f32.mrb[37].mxu0 }
 0x35b   : > { %14394 = vst [vmem:[#allocation59_spill] sm:$0xff] %v12493_v6  ;;  %v12495_v37 = vadd.f32 %v8383_v54, %v8382_v24  ;;  %v8385_v48 = vpop.f32.mrb[38].mxu1  ;;  %v12497_v62 = vpop.f32.mrb[38].mxu0  ;;  %v4521_v24 = vsel %vm3928_vm0, %v14397_v45, 0 }
 0x35c   : > { %14395 = vst [vmem:[#allocation64_spill] sm:$0xff] %v12497_v62  ;;  %v8386_v39 = vpop.f32.mrb[39].mxu1  ;;  %v12501_v30 = vpop.f32.mrb[39].mxu0 }
 0x35d   : > { %14396 = vst [vmem:[#allocation63_spill] sm:$0xff] %v12501_v30  ;;  %v12503_v23 = vadd.f32 %v8386_v39, %v8385_v48  ;;  %v14399_v39 = vpack.c.bf16 %v12234_v5, %v12230_v29 }
 0x35e   : > { %8705 = vmatmul.mubr.msk.bf16.gmra.mrb[144].mxu1 %vm3928_vm0, %v14392_v55 }
 0x35f   : > { %8753 = vmatpush3.bf16.xpose.msra.mxu1 %v4521_v24  ;;  %8706 = vmatprep.mubr.msk.bf16.mxu1 %vm3928_vm0, %v14398_v13  ;;  %v14405_v24 = vld [vmem:[#allocation14_spill] sm:$0xff] }
 0x360   : > { %9157 = vmatprep.subr.msk.bf16.mxu1 %vm3928_vm0, %v14399_v39  ;;  %v14404_v39 = vpack.c.bf16 %v12064_v61, %v12060_v49 }
 0x361   : > { %v8388_v48 = vpop.f32.mrb[40].mxu1  ;;  %v12521_v63 = vpop.f32.mrb[40].mxu0 }
 0x362   : > { %14400 = vst [vmem:[#allocation72_spill] sm:$0xff] %v12521_v63  ;;  %v8389_v55 = vpop.f32.mrb[41].mxu1  ;;  %v12523_v30 = vpop.f32.mrb[41].mxu0 }
 0x363   : > { %14401 = vst [vmem:[#allocation70_spill] sm:$0xff] %v12523_v30  ;;  %v12525_v18 = vadd.f32 %v8389_v55, %v8388_v48  ;;  %v8391_v34 = vpop.f32.mrb[42].mxu1  ;;  %v12527_v45 = vpop.f32.mrb[42].mxu0  ;;  %v4524_v48 = vsel %vm3928_vm0, %v14404_v39, 0  ;;  %v14410_v30 = vld [vmem:[#allocation15_spill] sm:$0xff] }
 0x364   : > { %14402 = vst [vmem:[#allocation78_spill] sm:$0xff] %v12527_v45  ;;  %v8392_v54 = vpop.f32.mrb[43].mxu1  ;;  %v12531_v62 = vpop.f32.mrb[43].mxu0 }
 0x365   : > { %14403 = vst [vmem:[#allocation76_spill] sm:$0xff] %v12531_v62  ;;  %v12533_v29 = vadd.f32 %v8392_v54, %v8391_v34  ;;  %v14406_v54 = vpack.c.bf16 %v12248_v31, %v12244_v53 }
 0x366   : > { %8707 = vmatmul.mubr.msk.bf16.gmra.mrb[148].mxu1 %vm3928_vm0, %v14398_v13 }
 0x367   : > { %8755 = vmatpush3.bf16.xpose.msra.mxu1 %v4524_v48  ;;  %8708 = vmatprep.mubr.msk.bf16.mxu1 %vm3928_vm0, %v14405_v24 }
 0x368   : > { %9158 = vmatprep.subr.msk.bf16.mxu1 %vm3928_vm0, %v14406_v54  ;;  %v14409_v54 = vpack.c.bf16 %v12086_v1, %v12082_v16 }
 0x369   : > { %v8394_v34 = vpop.f32.mrb[44].mxu1  ;;  %v12551_v5 = vpop.f32.mrb[44].mxu0 }
 0x36a   : > { %v8395_v13 = vpop.f32.mrb[45].mxu1  ;;  %v12553_v62 = vpop.f32.mrb[45].mxu0 }
 0x36b   : > { %14407 = vst [vmem:[#allocation8_spill] sm:$0xff] %v12553_v62  ;;  %v12555_v61 = vadd.f32 %v8395_v13, %v8394_v34  ;;  %v8397_v49 = vpop.f32.mrb[46].mxu1  ;;  %v12557_v39 = vpop.f32.mrb[46].mxu0  ;;  %v4527_v34 = vsel %vm3928_vm0, %v14409_v54, 0 }
 0x36c   : > { %v8398_v55 = vpop.f32.mrb[47].mxu1  ;;  %v12561_v45 = vpop.f32.mrb[47].mxu0 }
 0x36d   : > { %14408 = vst [vmem:[#allocation9_spill] sm:$0xff] %v12561_v45  ;;  %v8399_v31 = vadd.f32 %v8398_v55, %v8397_v49  ;;  %v14411_v55 = vpack.c.bf16 %v12262_v59, %v12258_v14  ;;  %v14416_v14 = vpack.c.bf16 %v12108_v36, %v12104_v33 }
 0x36e   : > { %8709 = vmatmul.mubr.msk.bf16.gmra.mrb[152].mxu1 %vm3928_vm0, %v14405_v24 }
 0x36f   : > { %v5528_v13 = vpack.c.bf16 %v8399_v31, %v12555_v61  ;;  %8757 = vmatpush3.bf16.xpose.msra.mxu1 %v4527_v34  ;;  %8710 = vmatprep.mubr.msk.bf16.mxu1 %vm3928_vm0, %v14410_v30  ;;  %v14418_v61 = vpack.c.bf16 %v12473_v15, %v12465_v26 }
 0x370   : > { %9159 = vmatprep.subr.msk.bf16.mxu1 %vm3928_vm0, %v14411_v55  ;;  %v4530_v55 = vsel %vm3928_vm0, %v14416_v14, 0 }
 0x371   : > { %v8400_v49 = vpop.f32.mrb[48].mxu1  ;;  %v12578_v53 = vpop.f32.mrb[48].mxu0 }
 0x372   : > { %14412 = vst [vmem:[#allocation10_spill] sm:$0xff] %v12578_v53  ;;  %v8401_v24 = vpop.f32.mrb[49].mxu1  ;;  %v12580_v48 = vpop.f32.mrb[49].mxu0 }
 0x373   : > { %14413 = vst [vmem:[#allocation11_spill] sm:$0xff] %v12580_v48  ;;  %v8402_v1 = vadd.f32 %v8401_v24, %v8400_v49  ;;  %v8403_v16 = vpop.f32.mrb[50].mxu1  ;;  %v12582_v54 = vpop.f32.mrb[50].mxu0  ;;  %v14417_v24 = vld [vmem:[#allocation16_spill] sm:$0xff] }
 0x374   : > { %14414 = vst [vmem:[#allocation12_spill] sm:$0xff] %v12582_v54  ;;  %v8404_v31 = vpop.f32.mrb[51].mxu1  ;;  %v12586_v34 = vpop.f32.mrb[51].mxu0 }
 0x375   : > { %14415 = vst [vmem:[#allocation13_spill] sm:$0xff] %v12586_v34  ;;  %v8405_v45 = vadd.f32 %v8404_v31, %v8403_v16 }
 0x376   : > { %8711 = vmatmul.mubr.msk.bf16.gmra.mrb[156].mxu1 %vm3928_vm0, %v14410_v30 }
 0x377   : > { %v5529_v49 = vpack.c.bf16 %v8405_v45, %v8402_v1  ;;  %8759 = vmatpush3.bf16.xpose.msra.mxu1 %v4530_v55  ;;  %8760 = vmatprep.mubr.msk.bf16.mxu1 %vm3928_vm0, %v14417_v24  ;;  %v14421_v55 = vpack.c.bf16 %v12503_v23, %v12495_v37  ;;  %v14425_v37 = vpack.c.bf16 %v12533_v29, %v12525_v18 }
 0x378   : > { %8840 = vmatprep.subr.bf16.mxu1 %v14418_v61  ;;  %v14419_v61 = vpack.c.bf16 %v12284_v2, %v12278_v57 }
 0x379   : > { %v8406_v16 = vpop.f32.mrb[52].mxu1  ;;  %v12601_v31 = vpop.f32.mrb[52].mxu0 }
 0x37a   : > { %v8407_v59 = vpop.f32.mrb[53].mxu1  ;;  %v12603_v34 = vpop.f32.mrb[53].mxu0 }
 0x37b   : > { %v8408_v30 = vadd.f32 %v8407_v59, %v8406_v16  ;;  %v8409_v54 = vpop.f32.mrb[54].mxu1  ;;  %v12605_v36 = vpop.f32.mrb[54].mxu0  ;;  %v14420_v59 = vld [vmem:[#allocation17_spill] sm:$0xff] }
 0x37c   : > { %v8410_v45 = vpop.f32.mrb[55].mxu1  ;;  %v12609_v1 = vpop.f32.mrb[55].mxu0 }
 0x37d   : > { %v8411_v14 = vadd.f32 %v8410_v45, %v8409_v54 }
 0x37e   : > { %8761 = vmatmul.mubr.msk.bf16.vlgmr.msra.gmra.mrb[160].mxu1 %vm3928_vm0, %v14417_v24  ;;  %v14424_v24 = vpack.c.bf16 %v12304_v19, %v12298_v25  ;;  %v14427_v19 = vpack.c.bf16 %v12324_v43, %v12318_v41 }
 0x37f   : > { %v5530_v15 = vpack.c.bf16 %v8411_v14, %v8408_v30  ;;  %8841 = vmatpush3.bf16.msra.mxu1 %v14419_v61  ;;  %8762 = vmatprep.mubr.msk.bf16.mxu1 %vm3928_vm0, %v14420_v59 }
 0x380   : > { %8842 = vmatprep.subr.bf16.mxu1 %v14421_v55  ;;  %v14459_v55 = vld [vmem:[#allocation30_spill] sm:$0xff] }
 0x381   : > { %v8412_v16 = vpop.f32.mrb[56].mxu1  ;;  %v12623_v54 = vpop.f32.mrb[56].mxu0 }
 0x382   : > { %14422 = vst [vmem:[#allocation14_spill] sm:$0xff] %v12623_v54  ;;  %v8413_v45 = vpop.f32.mrb[57].mxu1  ;;  %v12625_v26 = vpop.f32.mrb[57].mxu0 }
 0x383   : > { %14423 = vst [vmem:[#allocation15_spill] sm:$0xff] %v12625_v26  ;;  %v8414_v33 = vadd.f32 %v8413_v45, %v8412_v16  ;;  %8843 = vmatpush3.bf16.msra.mxu1 %v14424_v24  ;;  %v8415_v2 = vpop.f32.mrb[58].mxu1  ;;  %v12630_v57 = vpop.f32.mrb[58].mxu0  ;;  %v14428_v16 = vld [vmem:[#allocation18_spill] sm:$0xff] }
 0x384   : > { %8844 = vmatprep.subr.bf16.mxu1 %v14425_v37  ;;  %v8416_v23 = vpop.f32.mrb[59].mxu1  ;;  %v12637_v14 = vpop.f32.mrb[59].mxu0  ;;  %v14429_v37 = vpack.c.bf16 %v12344_v47, %v12338_v9  ;;  %v14430_v47 = vpack.c.bf16 %v12364_v21, %v12358_v44  ;;  %v14431_v9 = vld [vmem:[#allocation19_spill] sm:$0xff]  ;;  %v14433_v44 = vpack.c.bf16 %v12415_v10, %v12409_v12  ;;  %v14438_v10 = vld [vmem:[#allocation25_spill] sm:$0xff] }
 0x385   : > { %14426 = vst [vmem:[#allocation16_spill] sm:$0xff] %v12637_v14  ;;  %v8417_v61 = vadd.f32 %v8416_v23, %v8415_v2  ;;  %v14447_v12 = vld [vmem:[#allocation53_spill] sm:$0xff] }
 0x386   : > { %8763 = vmatmul.mubr.msk.bf16.gmra.mrb[164].mxu1 %vm3928_vm0, %v14420_v59 }
 0x387   : > { %v5531_v25 = vpack.c.bf16 %v8417_v61, %v8414_v33  ;;  %8845 = vmatpush3.bf16.msra.mxu1 %v14427_v19  ;;  %8764 = vmatprep.mubr.msk.bf16.mxu1 %vm3928_vm0, %v14428_v16 }
 0x388   : > { %8846 = vmatprep.subr.bf16.mxu1 %v5528_v13 }
 0x389   : > { %v8418_v18 = vpop.f32.mrb[60].mxu1  ;;  %v12648_v29 = vpop.f32.mrb[60].mxu0 }
 0x38a   : > { %v8419_v45 = vpop.f32.mrb[61].mxu1  ;;  %v12650_v24 = vpop.f32.mrb[61].mxu0 }
 0x38b   : > { %v8420_v2 = vadd.f32 %v8419_v45, %v8418_v18  ;;  %8847 = vmatpush3.bf16.msra.mxu1 %v14429_v37  ;;  %v8421_v33 = vpop.f32.mrb[62].mxu1  ;;  %v12655_v59 = vpop.f32.mrb[62].mxu0  ;;  %v14432_v37 = vpack.c.bf16 %v12385_v7, %v12379_v4 }
 0x38c   : > { %8848 = vmatprep.subr.bf16.mxu1 %v5529_v49  ;;  %v8422_v43 = vpop.f32.mrb[63].mxu1  ;;  %v12659_v13 = vpop.f32.mrb[63].mxu0 }
 0x38d   : > { %v8423_v23 = vadd.f32 %v8422_v43, %v8421_v33  ;;  %v14436_v43 = vpack.c.bf16 %v12445_v17, %v12439_v60 }
 0x38e   : > { %8765 = vmatmul.mubr.msk.bf16.gmra.mrb[168].mxu1 %vm3928_vm0, %v14428_v16 }
 0x38f   : > { %v5532_v19 = vpack.c.bf16 %v8423_v23, %v8420_v2  ;;  %8849 = vmatpush3.bf16.msra.mxu1 %v14430_v47  ;;  %8766 = vmatprep.mubr.msk.bf16.mxu1 %vm3928_vm0, %v14431_v9 }
 0x390   : > { %8850 = vmatprep.subr.bf16.mxu1 %v5530_v15  ;;  %v14434_v15 = vld [vmem:[#allocation22_spill] sm:$0xff] }
 0x391   : > { %v8552_v49 = vpop.f32.mrb[64].mxu1 }
 0x392   : > { %v8553_v18 = vpop.f32.mrb[65].mxu1 }
 0x393   : > { %v12670_v45 = vadd.f32 %v8553_v18, %v8552_v49  ;;  %8851 = vmatpush3.bf16.msra.mxu1 %v14432_v37  ;;  %v8555_v33 = vpop.f32.mrb[66].mxu1 }
 0x394   : > { %8852 = vmatprep.subr.bf16.mxu1 %v5531_v25  ;;  %v8556_v16 = vpop.f32.mrb[67].mxu1 }
 0x395   : > { %v12675_v2 = vadd.f32 %v8556_v16, %v8555_v33 }
 0x396   : > { %8767 = vmatmul.mubr.msk.bf16.gmra.mrb[172].mxu1 %vm3928_vm0, %v14431_v9 }
 0x397   : > { %8853 = vmatpush3.bf16.msra.mxu1 %v14433_v44  ;;  %8768 = vmatprep.mubr.msk.bf16.mxu1 %vm3928_vm0, %v14434_v15 }
 0x398   : > { %8854 = vmatprep.subr.bf16.mxu1 %v5532_v19 }
 0x399   : > { %v8558_v7 = vpop.f32.mrb[68].mxu1 }
 0x39a   : > { %v8559_v4 = vpop.f32.mrb[69].mxu1 }
 0x39b   : > { %v12686_v25 = vadd.f32 %v8559_v4, %v8558_v7  ;;  %8855 = vmatpush3.bf16.msra.mxu1 %v14436_v43  ;;  %v8561_v23 = vpop.f32.mrb[70].mxu1 }
 0x39c   : > { %v8562_v47 = vpop.f32.mrb[71].mxu1 }
 0x39d   : > { %14435 = vst [vmem:[#allocation17_spill] sm:$0xff] %v12686_v25  ;;  %v12691_v9 = vadd.f32 %v8562_v47, %v8561_v23 }
 0x39e   : > { %8769 = vmatmul.mubr.msk.bf16.gmra.mrb[176].mxu1 %vm3928_vm0, %v14434_v15 }
 0x39f   : > { %14437 = vst [vmem:[#allocation18_spill] sm:$0xff] %v12691_v9  ;;  %8770 = vmatprep.mubr.msk.bf16.mxu1 %vm3928_vm0, %v14438_v10 }
 0x3a1   : > { %v8564_v19 = vpop.f32.mrb[72].mxu1  ;;  %v4671_v49 = vpop.xlane.xlu0 %4670 }
 0x3a2   : > { %v8565_v18 = vpop.f32.mrb[73].mxu1  ;;  %v4861_v37 = vsub.f32 %v12270_v27, %v4671_v49  ;;  %v4862_v60 = vsub.f32 %v12272_v35, %v4671_v49  ;;  %v14441_v35 = vld [vmem:[#allocation28_spill] sm:$0xff] }
 0x3a3   : > { %v12701_v17 = vadd.f32 %v8565_v18, %v8564_v19  ;;  %v8567_v33 = vpop.f32.mrb[74].mxu1 }
 0x3a4   : > { %v4989_v16 = vmul.f32 1.442695, %v4861_v37  ;;  %v4991_v44 = vmul.f32 1.442695, %v4862_v60  ;;  %v8568_v7 = vpop.f32.mrb[75].mxu1 }
 0x3a5   : > { %14439 = vst [vmem:[#allocation19_spill] sm:$0xff] %v12701_v17  ;;  %v12703_v15 = vadd.f32 %v8568_v7, %v8567_v33  ;;  %v4674_v4 = vpop.xlane.xlu0 %4673  ;;  %v14510_v17 = vld [vmem:[#allocation43_spill] sm:$0xff] }
 0x3a6   : > { %9546 = vpow2.f32 %v4989_v16  ;;  %8771 = vmatmul.mubr.msk.bf16.gmra.mrb[180].mxu1 %vm3928_vm0, %v14438_v10  ;;  %v4863_v43 = vsub.f32 %v12274_v56, %v4674_v4  ;;  %v4864_v23 = vsub.f32 %v12280_v3, %v4674_v4 }
 0x3a7   : > { %14440 = vst [vmem:[#allocation22_spill] sm:$0xff] %v12703_v15  ;;  %9548 = vpow2.f32 %v4991_v44  ;;  %8772 = vmatprep.mubr.msk.bf16.mxu1 %vm3928_vm0, %v14441_v35 }
 0x3a8   : > { %v4993_v47 = vmul.f32 1.442695, %v4863_v43  ;;  %v4995_v19 = vmul.f32 1.442695, %v4864_v23  ;;  %v14444_v23 = vld [vmem:[#allocation31_spill] sm:$0xff] }
 0x3a9   : > { %v8570_v49 = vpop.f32.mrb[76].mxu1  ;;  %v4677_v18 = vpop.xlane.xlu1 %4676 }
 0x3aa   : > { %9550 = vpow2.f32 %v4993_v47  ;;  %v8571_v37 = vpop.f32.mrb[77].mxu1  ;;  %v4865_v60 = vsub.f32 %v12290_v8, %v4677_v18  ;;  %v4866_v10 = vsub.f32 %v12292_v20, %v4677_v18  ;;  %v14446_v20 = vld [vmem:[#allocation50_spill] sm:$0xff] }
 0x3ab   : > { %9552 = vpow2.f32 %v4995_v19  ;;  %v12715_v56 = vadd.f32 %v8571_v37, %v8570_v49  ;;  %v8573_v3 = vpop.f32.mrb[78].mxu1 }
 0x3ac   : > { %v4997_v33 = vmul.f32 1.442695, %v4865_v60  ;;  %v4999_v16 = vmul.f32 1.442695, %v4866_v10  ;;  %v8574_v44 = vpop.f32.mrb[79].mxu1 }
 0x3ad   : > { %14442 = vst [vmem:[#allocation25_spill] sm:$0xff] %v12715_v56  ;;  %v12717_v7 = vadd.f32 %v8574_v44, %v8573_v3  ;;  %v4680_v4 = vpop.xlane.xlu1 %4679 }
 0x3ae   : > { %9554 = vpow2.f32 %v4997_v33  ;;  %8773 = vmatmul.mubr.msk.bf16.gmra.mrb[184].mxu1 %vm3928_vm0, %v14441_v35  ;;  %v4867_v43 = vsub.f32 %v12294_v50, %v4680_v4  ;;  %v4868_v8 = vsub.f32 %v12300_v51, %v4680_v4 }
 0x3af   : > { %14443 = vst [vmem:[#allocation28_spill] sm:$0xff] %v12717_v7  ;;  %9556 = vpow2.f32 %v4999_v16  ;;  %8774 = vmatprep.mubr.msk.bf16.mxu1 %vm3928_vm0, %v14444_v23 }
 0x3b0   : > { %v9547_v47 = vpop.eup %9546  ;;  %v5001_v19 = vmul.f32 1.442695, %v4867_v43  ;;  %v5003_v49 = vmul.f32 1.442695, %v4868_v8 }
 0x3b1   : > { %v9549_v18 = vpop.eup %9548  ;;  %v8576_v37 = vpop.f32.mrb[80].mxu1 }
 0x3b2   : > { %v4683_v60 = vpop.xlane.xlu0 %4682  ;;  %9558 = vpow2.f32 %v5001_v19  ;;  %v8577_v10 = vpop.f32.mrb[81].mxu1  ;;  %v12729_v51 = vadd.f32 %v9549_v18, %v9547_v47 }
 0x3b3   : > { %v4869_v35 = vsub.f32 %v12310_v40, %v4683_v60  ;;  %v4870_v50 = vsub.f32 %v12312_v22, %v4683_v60  ;;  %9560 = vpow2.f32 %v5003_v49  ;;  %v12731_v3 = vadd.f32 %v8577_v10, %v8576_v37  ;;  %v8579_v33 = vpop.f32.mrb[82].mxu1  ;;  %v4686_v16 = vpop.xlane.xlu1 %4685 }
 0x3b4   : > { %v9551_v44 = vpop.eup %9550  ;;  %v8580_v8 = vpop.f32.mrb[83].mxu1  ;;  %v4871_v27 = vsub.f32 %v14446_v20, %v4686_v16  ;;  %v4872_v19 = vsub.f32 %v14447_v12, %v4686_v16 }
 0x3b5   : > { %14445 = vst [vmem:[#allocation31_spill] sm:$0xff] %v12731_v3  ;;  %v5005_v4 = vmul.f32 1.442695, %v4869_v35  ;;  %v5007_v43 = vmul.f32 1.442695, %v4870_v50  ;;  %v9553_v21 = vpop.eup %9552  ;;  %v5437_v61 = vpack.c.bf16 %v9551_v44, %v9547_v47  ;;  %v12735_v40 = vadd.f32 %v8580_v8, %v8579_v33  ;;  %v14450_v50 = vld [vmem:[#allocation39_spill] sm:$0xff] }
 0x3b6   : > { %v5009_v22 = vmul.f32 1.442695, %v4871_v27  ;;  %v5011_v60 = vmul.f32 1.442695, %v4872_v19  ;;  %8775 = vmatmul.mubr.msk.bf16.gmra.mrb[188].mxu1 %vm3928_vm0, %v14444_v23  ;;  %v5438_v49 = vpack.c.bf16 %v9553_v21, %v9549_v18  ;;  %v12741_v10 = vadd.f32 %v9553_v21, %v9551_v44  ;;  %v14449_v27 = vld [vmem:[#allocation20_spill] sm:$0xff]  ;;  %v14452_v18 = vld [vmem:[#allocation29_spill] sm:$0xff] }
 0x3b7   : > { %14448 = vst [vmem:[#allocation50_spill] sm:$0xff] %v12735_v40  ;;  %9562 = vpow2.f32 %v5005_v4  ;;  %v14451_v33 = vpack.c.bf16 %v14449_v27, %v14450_v50  ;;  %v14453_v4 = vld [vmem:[#allocation54_spill] sm:$0xff]  ;;  %v14455_v44 = vld [vmem:[#allocation75_spill] sm:$0xff]  ;;  %v14458_v50 = vld [vmem:[#allocation57_spill] sm:$0xff] }
 0x3b8   : > { %9564 = vpow2.f32 %v5007_v43  ;;  %v9555_v20 = vpop.eup %9554  ;;  %5597 = vmatprep.mubr.bf16.mxu0 %v5438_v49  ;;  %v14456_v19 = vld [vmem:[#allocation51_spill] sm:$0xff]  ;;  %v14461_v3 = vld [vmem:[#allocation21_spill] sm:$0xff] }
 0x3b9   : > { %9566 = vpow2.f32 %v5009_v22  ;;  %v9557_v12 = vpop.eup %9556  ;;  %v8582_v47 = vpop.f32.mrb[84].mxu1  ;;  %5598 = vmatmul.mubr.bf16.vlgmr.msra.gmra.mrb[64].mxu0 %v5437_v61  ;;  %v14457_v22 = vpack.c.bf16 %v14455_v44, %v14456_v19  ;;  %v14462_v44 = vld [vmem:[#allocation40_spill] sm:$0xff] }
 0x3ba   : > { %9568 = vpow2.f32 %v5011_v60  ;;  %v4689_v35 = vpop.xlane.xlu0 %4688  ;;  %8905 = vmatpush3.bf16.msra.mxu0 %v14451_v33  ;;  %v8583_v23 = vpop.f32.mrb[85].mxu1  ;;  %v12748_v8 = vadd.f32 %v9557_v12, %v9555_v20  ;;  %v14463_v19 = vpack.c.bf16 %v14461_v3, %v14462_v44 }
 0x3bb   : > { %v4873_v16 = vsub.f32 %v14452_v18, %v4689_v35  ;;  %v4874_v43 = vsub.f32 %v14453_v4, %v4689_v35  ;;  %v12750_v21 = vadd.f32 %v8583_v23, %v8582_v47  ;;  %8906 = vmatprep.subr.bf16.mxu0 %v14457_v22  ;;  %v8585_v60 = vpop.f32.mrb[86].mxu1  ;;  %v4692_v61 = vpop.xlane.xlu1 %4691 }
 0x3bc   : > { %v9559_v49 = vpop.eup %9558  ;;  %v8586_v27 = vpop.f32.mrb[87].mxu1  ;;  %v4875_v33 = vsub.f32 %v14458_v50, %v4692_v61  ;;  %v4876_v18 = vsub.f32 %v14459_v55, %v4692_v61  ;;  %v14465_v50 = vld [vmem:[#allocation77_spill] sm:$0xff] }
 0x3bd   : > { %14454 = vst [vmem:[#allocation53_spill] sm:$0xff] %v12750_v21  ;;  %v5013_v37 = vmul.f32 1.442695, %v4873_v16  ;;  %v5015_v41 = vmul.f32 1.442695, %v4874_v43  ;;  %v9561_v30 = vpop.eup %9560  ;;  %v5439_v35 = vpack.c.bf16 %v9559_v49, %v9555_v20  ;;  %v12757_v4 = vadd.f32 %v8586_v27, %v8585_v60  ;;  %v14464_v43 = vld [vmem:[#allocation38_spill] sm:$0xff] }
 0x3be   : > { %v5017_v47 = vmul.f32 1.442695, %v4875_v33  ;;  %v5019_v23 = vmul.f32 1.442695, %v4876_v18  ;;  %8907 = vmatpush3.bf16.msra.mxu0 %v14463_v19  ;;  %v5440_v22 = vpack.c.bf16 %v9561_v30, %v9557_v12  ;;  %v14466_v40 = vpack.c.bf16 %v14464_v43, %v14465_v50  ;;  %v14467_v12 = vld [vmem:[#allocation48_spill] sm:$0xff]  ;;  %v14470_v18 = vld [vmem:[#allocation58_spill] sm:$0xff] }
 0x3bf   : > { %14460 = vst [vmem:[#allocation20_spill] sm:$0xff] %v12757_v4  ;;  %9570 = vpow2.f32 %v5013_v37  ;;  %v12767_v55 = vadd.f32 %v9561_v30, %v9559_v49  ;;  %v14471_v19 = vld [vmem:[#allocation61_spill] sm:$0xff] }
 0x3c0   : > { %9572 = vpow2.f32 %v5015_v41  ;;  %8908 = vmatprep.subr.bf16.mxu0 %v14466_v40  ;;  %5605 = vmatprep.mubr.bf16.mxu0 %v5440_v22  ;;  %v14468_v41 = vld [vmem:[#allocation41_spill] sm:$0xff] }
 0x3c1   : > { %v9563_v20 = vpop.eup %9562  ;;  %9574 = vpow2.f32 %v5017_v47  ;;  %v8588_v60 = vpop.f32.mrb[88].mxu1  ;;  %5606 = vmatmul.mubr.bf16.gmra.mrb[68].mxu0 %v5439_v35  ;;  %v14469_v27 = vpack.c.bf16 %v14467_v12, %v14468_v41  ;;  %v14474_v43 = vld [vmem:[#allocation37_spill] sm:$0xff] }
 0x3c2   : > { %v9565_v37 = vpop.eup %9564  ;;  %9576 = vpow2.f32 %v5019_v23  ;;  %v4695_v3 = vpop.xlane.xlu0 %4694  ;;  %v14473_v23 = vld [vmem:[#allocation44_spill] sm:$0xff] }
 0x3c3   : > { %v9567_v61 = vpop.eup %9566  ;;  %8909 = vmatpush3.bf16.msra.mxu0 %v14469_v27  ;;  %v8589_v33 = vpop.f32.mrb[89].mxu1  ;;  %v4877_v44 = vsub.f32 %v14470_v18, %v4695_v3  ;;  %v4878_v40 = vsub.f32 %v14471_v19, %v4695_v3  ;;  %v12774_v30 = vadd.f32 %v9565_v37, %v9563_v20  ;;  %v14475_v35 = vpack.c.bf16 %v14473_v23, %v14474_v43  ;;  %v14476_v27 = vld [vmem:[#allocation32_spill] sm:$0xff]  ;;  %v14477_v18 = vld [vmem:[#allocation62_spill] sm:$0xff]  ;;  %v14480_v23 = vld [vmem:[#allocation67_spill] sm:$0xff] }
 0x3c4   : > { %v9569_v49 = vpop.eup %9568  ;;  %v5441_v47 = vpack.c.bf16 %v9567_v61, %v9563_v20  ;;  %v12776_v22 = vadd.f32 %v8589_v33, %v8588_v60  ;;  %v8591_v50 = vpop.f32.mrb[90].mxu1  ;;  %v14479_v33 = vld [vmem:[#allocation68_spill] sm:$0xff] }
 0x3c5   : > { %8910 = vmatprep.subr.bf16.mxu0 %v14475_v35  ;;  %v4698_v16 = vpop.xlane.xlu1 %4697  ;;  %v5021_v21 = vmul.f32 1.442695, %v4877_v44  ;;  %v5023_v12 = vmul.f32 1.442695, %v4878_v40  ;;  %v8592_v41 = vpop.f32.mrb[91].mxu1  ;;  %v5442_v19 = vpack.c.bf16 %v9569_v49, %v9565_v37  ;;  %v12785_v7 = vadd.f32 %v9569_v49, %v9567_v61  ;;  %v14482_v40 = vld [vmem:[#allocation45_spill] sm:$0xff] }
 0x3c6   : > { %14472 = vst [vmem:[#allocation39_spill] sm:$0xff] %v12776_v22  ;;  %v4879_v4 = vsub.f32 %v14476_v27, %v4698_v16  ;;  %v4880_v56 = vsub.f32 %v14477_v18, %v4698_v16  ;;  %v12783_v3 = vadd.f32 %v8592_v41, %v8591_v50  ;;  %v14481_v43 = vpack.c.bf16 %v14479_v33, %v14480_v23  ;;  %v14483_v35 = vld [vmem:[#allocation24_spill] sm:$0xff]  ;;  %v14485_v61 = vld [vmem:[#allocation71_spill] sm:$0xff]  ;;  %v14486_v49 = vld [vmem:[#allocation69_spill] sm:$0xff] }
 0x3c7   : > { %9578 = vpow2.f32 %v5021_v21  ;;  %5613 = vmatprep.mubr.bf16.mxu0 %v5442_v19  ;;  %v14484_v16 = vpack.c.bf16 %v14482_v40, %v14483_v35  ;;  %v14487_v41 = vpack.c.bf16 %v14485_v61, %v14486_v49  ;;  %v14488_v18 = vld [vmem:[#allocation65_spill] sm:$0xff]  ;;  %v14491_v40 = vld [vmem:[#allocation80_spill] sm:$0xff] }
 0x3c8   : > { %14478 = vst [vmem:[#allocation29_spill] sm:$0xff] %v12783_v3  ;;  %v5025_v20 = vmul.f32 1.442695, %v4879_v4  ;;  %v5027_v60 = vmul.f32 1.442695, %v4880_v56  ;;  %8911 = vmatpush3.bf16.msra.mxu0 %v14481_v43  ;;  %9580 = vpow2.f32 %v5023_v12 }
 0x3c9   : > { %8912 = vmatprep.subr.bf16.mxu0 %v14484_v16  ;;  %v9571_v50 = vpop.eup %9570  ;;  %v8594_v21 = vpop.f32.mrb[92].mxu1  ;;  %5614 = vmatmul.mubr.bf16.gmra.mrb[72].mxu0 %v5441_v47 }
 0x3ca   : > { %9582 = vpow2.f32 %v5025_v20  ;;  %v9573_v37 = vpop.eup %9572  ;;  %v4701_v56 = vpop.xlane.xlu0 %4700 }
 0x3cb   : > { %9584 = vpow2.f32 %v5027_v60  ;;  %v9575_v4 = vpop.eup %9574  ;;  %v8595_v12 = vpop.f32.mrb[93].mxu1  ;;  %v4881_v27 = vsub.f32 %v12371_v46, %v4701_v56  ;;  %v4882_v19 = vsub.f32 %v14488_v18, %v4701_v56  ;;  %v12800_v33 = vadd.f32 %v9573_v37, %v9571_v50  ;;  %v14490_v60 = vld [vmem:[#allocation46_spill] sm:$0xff]  ;;  %v14493_v46 = vld [vmem:[#allocation33_spill] sm:$0xff] }
 0x3cc   : > { %8913 = vmatpush3.bf16.msra.mxu0 %v14487_v41  ;;  %v9577_v23 = vpop.eup %9576  ;;  %v5443_v43 = vpack.c.bf16 %v9575_v4, %v9571_v50  ;;  %v12802_v20 = vadd.f32 %v8595_v12, %v8594_v21  ;;  %v14492_v47 = vpack.c.bf16 %v14490_v60, %v14491_v40  ;;  %v8597_v35 = vpop.f32.mrb[94].mxu1  ;;  %v14495_v12 = vld [vmem:[#allocation35_spill] sm:$0xff]  ;;  %v14496_v60 = vld [vmem:[#allocation36_spill] sm:$0xff] }
 0x3cd   : > { %v4704_v16 = vpop.xlane.xlu1 %4703  ;;  %v5029_v44 = vmul.f32 1.442695, %v4881_v27  ;;  %v5031_v61 = vmul.f32 1.442695, %v4882_v19  ;;  %v8598_v49 = vpop.f32.mrb[95].mxu1  ;;  %v5444_v18 = vpack.c.bf16 %v9577_v23, %v9573_v37  ;;  %v12811_v3 = vadd.f32 %v9577_v23, %v9575_v4  ;;  %v14499_v19 = vld [vmem:[#allocation26_spill] sm:$0xff] }
 0x3ce   : > { %14489 = vst [vmem:[#allocation54_spill] sm:$0xff] %v12802_v20  ;;  %8914 = vmatprep.subr.bf16.mxu0 %v14492_v47  ;;  %v4883_v41 = vsub.f32 %v12375_v0, %v4704_v16  ;;  %v4884_v22 = vsub.f32 %v14493_v46, %v4704_v16  ;;  %v12809_v56 = vadd.f32 %v8598_v49, %v8597_v35  ;;  %v14498_v0 = vld [vmem:[#allocation47_spill] sm:$0xff]  ;;  %v14502_v16 = vld [vmem:[#allocation42_spill] sm:$0xff] }
 0x3cf   : > { %9586 = vpow2.f32 %v5029_v44  ;;  %v14497_v40 = vpack.c.bf16 %v14495_v12, %v14496_v60  ;;  %5621 = vmatprep.mubr.bf16.mxu0 %v5444_v18  ;;  %v14500_v47 = vpack.c.bf16 %v14498_v0, %v14499_v19  ;;  %v14501_v23 = vld [vmem:[#allocation23_spill] sm:$0xff]  ;;  %v14504_v46 = vld [vmem:[#allocation66_spill] sm:$0xff] }
 0x3d0   : > { %14494 = vst [vmem:[#allocation75_spill] sm:$0xff] %v12809_v56  ;;  %v5033_v50 = vmul.f32 1.442695, %v4883_v41  ;;  %v5035_v21 = vmul.f32 1.442695, %v4884_v22  ;;  %9588 = vpow2.f32 %v5031_v61  ;;  %v14503_v49 = vpack.c.bf16 %v14501_v23, %v14502_v16  ;;  %v14505_v0 = vld [vmem:[#allocation27_spill] sm:$0xff] }
 0x3d1   : > { %8915 = vmatpush3.bf16.msra.mxu0 %v14497_v40  ;;  %v9579_v35 = vpop.eup %9578  ;;  %v8600_v44 = vpop.f32.mrb[96].mxu1 }
 0x3d2   : > { %8916 = vmatprep.subr.bf16.mxu0 %v14500_v47  ;;  %9590 = vpow2.f32 %v5033_v50  ;;  %v9581_v37 = vpop.eup %9580  ;;  %5622 = vmatmul.mubr.bf16.gmra.mrb[76].mxu0 %v5443_v43  ;;  %v4707_v22 = vpop.xlane.xlu0 %4706 }
 0x3d3   : > { %9592 = vpow2.f32 %v5035_v21  ;;  %v8601_v61 = vpop.f32.mrb[97].mxu1  ;;  %v4885_v41 = vsub.f32 %v12401_v11, %v4707_v22  ;;  %v4886_v18 = vsub.f32 %v14504_v46, %v4707_v22  ;;  %v12826_v12 = vadd.f32 %v9581_v37, %v9579_v35  ;;  %v14506_v21 = vld [vmem:[#allocation49_spill] sm:$0xff]  ;;  %v4710_v47 = vpop.xlane.xlu1 %4709 }
 0x3d4   : > { %v9583_v4 = vpop.eup %9582  ;;  %v8602_v50 = vadd.f32 %v8601_v61, %v8600_v44  ;;  %v14507_v19 = vpack.c.bf16 %v14505_v0, %v14506_v21  ;;  %v8603_v43 = vpop.f32.mrb[98].mxu1  ;;  %v4887_v16 = vsub.f32 %v12405_v32, %v4710_v47  ;;  %v14509_v61 = vld [vmem:[#allocation52_spill] sm:$0xff] }
 0x3d5   : > { %8917 = vmatpush3.bf16.msra.mxu0 %v14503_v49  ;;  %v9585_v60 = vpop.eup %9584  ;;  %v5445_v40 = vpack.c.bf16 %v9583_v4, %v9579_v35  ;;  %v5037_v27 = vmul.f32 1.442695, %v4885_v41  ;;  %v5039_v20 = vmul.f32 1.442695, %v4886_v18  ;;  %v8604_v23 = vpop.f32.mrb[99].mxu1  ;;  %v14508_v49 = vld [vmem:[#allocation73_spill] sm:$0xff]  ;;  %v14511_v0 = vpack.c.bf16 %v14509_v61, %v14510_v17 }
 0x3d6   : > { %8918 = vmatprep.subr.bf16.mxu0 %v14507_v19  ;;  %v4888_v11 = vsub.f32 %v14508_v49, %v4710_v47  ;;  %v8605_v56 = vadd.f32 %v8604_v23, %v8603_v43  ;;  %v5446_v22 = vpack.c.bf16 %v9585_v60, %v9581_v37  ;;  %v12833_v46 = vadd.f32 %v9585_v60, %v9583_v4  ;;  %v14512_v19 = vld [vmem:[#allocation34_spill] sm:$0xff] }
 0x3d7   : > { %9594 = vpow2.f32 %v5037_v27  ;;  %v5041_v35 = vmul.f32 1.442695, %v4887_v16 }
 0x3d8   : > { %v5043_v44 = vmul.f32 1.442695, %v4888_v11  ;;  %9596 = vpow2.f32 %v5039_v20  ;;  %v5557_v21 = vpack.c.bf16 %v8605_v56, %v8602_v50  ;;  %5629 = vmatprep.mubr.bf16.mxu0 %v5446_v22  ;;  %v14514_v22 = vld [vmem:[#allocation74_spill] sm:$0xff] }
 0x3d9   : > { %8919 = vmatpush3.bf16.msra.mxu0 %v14511_v0  ;;  %v9587_v41 = vpop.eup %9586  ;;  %9598 = vpow2.f32 %v5041_v35  ;;  %v8606_v32 = vpop.f32.mrb[100].mxu1 }
 0x3da   : > { %v9589_v18 = vpop.eup %9588  ;;  %9600 = vpow2.f32 %v5043_v44  ;;  %5630 = vmatmul.mubr.bf16.gmra.mrb[80].mxu0 %v5445_v40  ;;  %8968 = vmatprep.subr.bf16.mxu1 %v5557_v21  ;;  %v4713_v37 = vpop.xlane.xlu0 %4712 }
 0x3db   : > { %v8607_v60 = vpop.f32.mrb[101].mxu1  ;;  %v4889_v27 = vsub.f32 %v12431_v42, %v4713_v37  ;;  %v4890_v43 = vsub.f32 %v14512_v19, %v4713_v37  ;;  %v12840_v47 = vadd.f32 %v9589_v18, %v9587_v41  ;;  %v4716_v23 = vpop.xlane.xlu1 %4715 }
 0x3dc   : > { %v9591_v4 = vpop.eup %9590  ;;  %v12842_v56 = vadd.f32 %v8607_v60, %v8606_v32  ;;  %v8609_v50 = vpop.f32.mrb[102].mxu1  ;;  %v4891_v40 = vsub.f32 %v12435_v58, %v4716_v23  ;;  %v4892_v35 = vsub.f32 %v14514_v22, %v4716_v23 }
 0x3dd   : > { %v9593_v17 = vpop.eup %9592  ;;  %v5447_v20 = vpack.c.bf16 %v9591_v4, %v9587_v41  ;;  %v5045_v16 = vmul.f32 1.442695, %v4889_v27  ;;  %v5047_v49 = vmul.f32 1.442695, %v4890_v43  ;;  %v8610_v11 = vpop.f32.mrb[103].mxu1 }
 0x3de   : > { %14513 = vst [vmem:[#allocation51_spill] sm:$0xff] %v12842_v56  ;;  %v12846_v44 = vadd.f32 %v8610_v11, %v8609_v50  ;;  %v5448_v42 = vpack.c.bf16 %v9593_v17, %v9589_v18  ;;  %v12848_v61 = vadd.f32 %v9593_v17, %v9591_v4  ;;  %v5049_v0 = vmul.f32 1.442695, %v4891_v40 }
 0x3df   : > { %9602 = vpow2.f32 %v5045_v16  ;;  %v5051_v21 = vmul.f32 1.442695, %v4892_v35 }
 0x3e0   : > { %14515 = vst [vmem:[#allocation57_spill] sm:$0xff] %v12846_v44  ;;  %9604 = vpow2.f32 %v5047_v49  ;;  %5637 = vmatprep.mubr.bf16.mxu0 %v5448_v42  ;;  %v14553_v44 = vld [vmem:[#allocation60_spill] sm:$0xff] }
 0x3e1   : > { %v9595_v32 = vpop.eup %9594  ;;  %9606 = vpow2.f32 %v5049_v0  ;;  %v8612_v58 = vpop.f32.mrb[104].mxu1 }
 0x3e2   : > { %v9597_v37 = vpop.eup %9596  ;;  %9608 = vpow2.f32 %v5051_v21  ;;  %5638 = vmatmul.mubr.bf16.gmra.mrb[84].mxu0 %v5447_v20  ;;  %v8613_v27 = vpop.f32.mrb[105].mxu1 }
 0x3e3   : > { %v9599_v60 = vpop.eup %9598  ;;  %v12852_v19 = vadd.f32 %v9597_v37, %v9595_v32  ;;  %v12854_v43 = vadd.f32 %v8613_v27, %v8612_v58  ;;  %v8615_v17 = vpop.f32.mrb[106].mxu1 }
 0x3e4   : > { %v9601_v18 = vpop.eup %9600  ;;  %v5449_v4 = vpack.c.bf16 %v9599_v60, %v9595_v32  ;;  %v8616_v50 = vpop.f32.mrb[107].mxu1 }
 0x3e5   : > { %14516 = vst [vmem:[#allocation30_spill] sm:$0xff] %v12854_v43  ;;  %v5450_v23 = vpack.c.bf16 %v9601_v18, %v9597_v37  ;;  %v12856_v16 = vadd.f32 %v9601_v18, %v9599_v60  ;;  %v12858_v49 = vadd.f32 %v8616_v50, %v8615_v17 }
 0x3e7   : > { %14517 = vst [vmem:[#allocation21_spill] sm:$0xff] %v12858_v49  ;;  %5645 = vmatprep.mubr.bf16.mxu0 %v5450_v23 }
 0x3e9   : > { %v9603_v20 = vpop.eup %9602  ;;  %v8618_v22 = vpop.f32.mrb[108].mxu1 }
 0x3ea   : > { %v9605_v40 = vpop.eup %9604  ;;  %5646 = vmatmul.mubr.bf16.gmra.mrb[88].mxu0 %v5449_v4  ;;  %v8619_v42 = vpop.f32.mrb[109].mxu1 }
 0x3eb   : > { %v9607_v35 = vpop.eup %9606  ;;  %v12862_v0 = vadd.f32 %v9605_v40, %v9603_v20  ;;  %v12864_v58 = vadd.f32 %v8619_v42, %v8618_v22  ;;  %v8621_v37 = vpop.f32.mrb[110].mxu1 }
 0x3ec   : > { %v9609_v21 = vpop.eup %9608  ;;  %v5451_v32 = vpack.c.bf16 %v9607_v35, %v9603_v20  ;;  %v8622_v60 = vpop.f32.mrb[111].mxu1 }
 0x3ed   : > { %14518 = vst [vmem:[#allocation40_spill] sm:$0xff] %v12864_v58  ;;  %v5452_v27 = vpack.c.bf16 %v9609_v21, %v9605_v40  ;;  %v12866_v18 = vadd.f32 %v9609_v21, %v9607_v35  ;;  %v12868_v17 = vadd.f32 %v8622_v60, %v8621_v37 }
 0x3ef   : > { %14519 = vst [vmem:[#allocation38_spill] sm:$0xff] %v12868_v17  ;;  %5653 = vmatprep.mubr.bf16.mxu0 %v5452_v27 }
 0x3f1   : > { %v8624_v4 = vpop.f32.mrb[112].mxu1 }
 0x3f2   : > { %5654 = vmatmul.mubr.bf16.gmra.mrb[92].mxu0 %v5451_v32  ;;  %v8625_v23 = vpop.f32.mrb[113].mxu1 }
 0x3f3   : > { %v12872_v11 = vadd.f32 %v8625_v23, %v8624_v4  ;;  %v8627_v41 = vpop.f32.mrb[114].mxu1 }
 0x3f4   : > { %v8628_v20 = vpop.f32.mrb[115].mxu1 }
 0x3f5   : > { %14520 = vst [vmem:[#allocation77_spill] sm:$0xff] %v12872_v11  ;;  %v12874_v22 = vadd.f32 %v8628_v20, %v8627_v41 }
 0x3f7   : > { %14521 = vst [vmem:[#allocation48_spill] sm:$0xff] %v12874_v22 }
 0x3f9   : > { %v8630_v35 = vpop.f32.mrb[116].mxu1 }
 0x3fa   : > { %v8631_v42 = vpop.f32.mrb[117].mxu1 }
 0x3fb   : > { %v12878_v21 = vadd.f32 %v8631_v42, %v8630_v35  ;;  %v8633_v37 = vpop.f32.mrb[118].mxu1 }
 0x3fc   : > { %v8634_v60 = vpop.f32.mrb[119].mxu1 }
 0x3fd   : > { %14522 = vst [vmem:[#allocation41_spill] sm:$0xff] %v12878_v21  ;;  %v12880_v27 = vadd.f32 %v8634_v60, %v8633_v37 }
 0x3ff   : > { %14523 = vst [vmem:[#allocation58_spill] sm:$0xff] %v12880_v27 }
 0x401   : > { %v8636_v4 = vpop.f32.mrb[120].mxu1 }
 0x402   : > { %v8637_v23 = vpop.f32.mrb[121].mxu1 }
 0x403   : > { %v12884_v50 = vadd.f32 %v8637_v23, %v8636_v4  ;;  %v8639_v41 = vpop.f32.mrb[122].mxu1 }
 0x404   : > { %v8640_v20 = vpop.f32.mrb[123].mxu1 }
 0x405   : > { %14524 = vst [vmem:[#allocation61_spill] sm:$0xff] %v12884_v50  ;;  %v12886_v58 = vadd.f32 %v8640_v20, %v8639_v41 }
 0x407   : > { %14525 = vst [vmem:[#allocation44_spill] sm:$0xff] %v12886_v58 }
 0x409   : > { %v8642_v35 = vpop.f32.mrb[124].mxu1 }
 0x40a   : > { %v8643_v42 = vpop.f32.mrb[125].mxu1 }
 0x40b   : > { %v12890_v11 = vadd.f32 %v8643_v42, %v8642_v35  ;;  %v8645_v37 = vpop.f32.mrb[126].mxu1 }
 0x40c   : > { %v8646_v60 = vpop.f32.mrb[127].mxu1 }
 0x40d   : > { %14526 = vst [vmem:[#allocation37_spill] sm:$0xff] %v12890_v11  ;;  %v12892_v22 = vadd.f32 %v8646_v60, %v8645_v37 }
 0x40f   : > { %14527 = vst [vmem:[#allocation32_spill] sm:$0xff] %v12892_v22 }
 0x411   : > { %v12896_v4 = vpop.f32.mrb[128].mxu1 }
 0x412   : > { %v12898_v23 = vpop.f32.mrb[129].mxu1 }
 0x413   : > { %v12900_v41 = vpop.f32.mrb[130].mxu1  ;;  %v4717_v20 = vmax.f32 %v12896_v4, %v12898_v23 }
 0x414   : > { %v12904_v40 = vpop.f32.mrb[131].mxu1 }
 0x415   : > { %4718 = vmax.xlane.f32.xlu0 %v4717_v20  ;;  %v4720_v35 = vmax.f32 %v12900_v41, %v12904_v40 }
 0x417   : > { %4721 = vmax.xlane.f32.xlu1 %v4720_v35 }
 0x419   : > { %v12908_v42 = vpop.f32.mrb[132].mxu1 }
 0x41a   : > { %v12910_v37 = vpop.f32.mrb[133].mxu1 }
 0x41b   : > { %v12912_v60 = vpop.f32.mrb[134].mxu1  ;;  %v4723_v32 = vmax.f32 %v12908_v42, %v12910_v37 }
 0x41c   : > { %v12916_v11 = vpop.f32.mrb[135].mxu1 }
 0x41d   : > { %4724 = vmax.xlane.f32.xlu0 %v4723_v32  ;;  %v4726_v22 = vmax.f32 %v12912_v60, %v12916_v11 }
 0x41f   : > { %4727 = vmax.xlane.f32.xlu1 %v4726_v22 }
 0x421   : > { %v12920_v20 = vpop.f32.mrb[136].mxu1 }
 0x422   : > { %v12922_v50 = vpop.f32.mrb[137].mxu1 }
 0x423   : > { %v12924_v35 = vpop.f32.mrb[138].mxu1  ;;  %v4729_v58 = vmax.f32 %v12920_v20, %v12922_v50 }
 0x424   : > { %v12928_v21 = vpop.f32.mrb[139].mxu1 }
 0x425   : > { %4730 = vmax.xlane.f32.xlu0 %v4729_v58  ;;  %v4732_v27 = vmax.f32 %v12924_v35, %v12928_v21 }
 0x427   : > { %4733 = vmax.xlane.f32.xlu1 %v4732_v27 }
 0x429   : > { %v12932_v32 = vpop.f32.mrb[140].mxu1 }
 0x42a   : > { %14528 = vst [vmem:[#allocation62_spill] sm:$0xff] %v12932_v32  ;;  %v12934_v17 = vpop.f32.mrb[141].mxu1 }
 0x42b   : > { %14529 = vst [vmem:[#allocation68_spill] sm:$0xff] %v12934_v17  ;;  %v12936_v22 = vpop.f32.mrb[142].mxu1  ;;  %v4735_v15 = vmax.f32 %v12932_v32, %v12934_v17 }
 0x42c   : > { %14530 = vst [vmem:[#allocation67_spill] sm:$0xff] %v12936_v22  ;;  %v12940_v43 = vpop.f32.mrb[143].mxu1 }
 0x42d   : > { %14531 = vst [vmem:[#allocation45_spill] sm:$0xff] %v12940_v43  ;;  %4736 = vmax.xlane.f32.xlu0 %v4735_v15  ;;  %v4738_v49 = vmax.f32 %v12936_v22, %v12940_v43 }
 0x42f   : > { %4739 = vmax.xlane.f32.xlu1 %v4738_v49 }
 0x431   : > { %v12944_v58 = vpop.f32.mrb[144].mxu1 }
 0x432   : > { %14532 = vst [vmem:[#allocation24_spill] sm:$0xff] %v12944_v58  ;;  %v12946_v25 = vpop.f32.mrb[145].mxu1 }
 0x433   : > { %14533 = vst [vmem:[#allocation71_spill] sm:$0xff] %v12946_v25  ;;  %v12948_v27 = vpop.f32.mrb[146].mxu1  ;;  %v4741_v9 = vmax.f32 %v12944_v58, %v12946_v25 }
 0x434   : > { %14534 = vst [vmem:[#allocation69_spill] sm:$0xff] %v12948_v27  ;;  %v12952_v56 = vpop.f32.mrb[147].mxu1 }
 0x435   : > { %14535 = vst [vmem:[#allocation65_spill] sm:$0xff] %v12952_v56  ;;  %4742 = vmax.xlane.f32.xlu0 %v4741_v9  ;;  %v4744_v17 = vmax.f32 %v12948_v27, %v12952_v56 }
 0x437   : > { %4745 = vmax.xlane.f32.xlu1 %v4744_v17 }
 0x439   : > { %v12956_v15 = vpop.f32.mrb[148].mxu1 }
 0x43a   : > { %14536 = vst [vmem:[#allocation46_spill] sm:$0xff] %v12956_v15  ;;  %v12958_v43 = vpop.f32.mrb[149].mxu1 }
 0x43b   : > { %14537 = vst [vmem:[#allocation80_spill] sm:$0xff] %v12958_v43  ;;  %v12960_v49 = vpop.f32.mrb[150].mxu1  ;;  %v4747_v22 = vmax.f32 %v12956_v15, %v12958_v43 }
 0x43c   : > { %14538 = vst [vmem:[#allocation33_spill] sm:$0xff] %v12960_v49  ;;  %v12964_v32 = vpop.f32.mrb[151].mxu1 }
 0x43d   : > { %14539 = vst [vmem:[#allocation35_spill] sm:$0xff] %v12964_v32  ;;  %4748 = vmax.xlane.f32.xlu0 %v4747_v22  ;;  %v4750_v25 = vmax.f32 %v12960_v49, %v12964_v32 }
 0x43f   : > { %4751 = vmax.xlane.f32.xlu1 %v4750_v25 }
 0x441   : > { %v12968_v9 = vpop.f32.mrb[152].mxu1 }
 0x442   : > { %14540 = vst [vmem:[#allocation36_spill] sm:$0xff] %v12968_v9  ;;  %v12970_v56 = vpop.f32.mrb[153].mxu1 }
 0x443   : > { %14541 = vst [vmem:[#allocation47_spill] sm:$0xff] %v12970_v56  ;;  %v12972_v17 = vpop.f32.mrb[154].mxu1  ;;  %v4753_v27 = vmax.f32 %v12968_v9, %v12970_v56  ;;  %v14552_v9 = vld [vmem:[#allocation55_spill] sm:$0xff] }
 0x444   : > { %14542 = vst [vmem:[#allocation26_spill] sm:$0xff] %v12972_v17  ;;  %v12976_v58 = vpop.f32.mrb[155].mxu1 }
 0x445   : > { %14543 = vst [vmem:[#allocation23_spill] sm:$0xff] %v12976_v58  ;;  %4754 = vmax.xlane.f32.xlu0 %v4753_v27  ;;  %v4756_v43 = vmax.f32 %v12972_v17, %v12976_v58 }
 0x447   : > { %4757 = vmax.xlane.f32.xlu1 %v4756_v43  ;;  %v14549_v43 = vmax.f32 %v12461_v38, %v12463_v52  ;;  %v14557_v52 = vld [vmem:[#allocation64_spill] sm:$0xff]  ;;  %v14558_v38 = vld [vmem:[#allocation63_spill] sm:$0xff] }
 0x449   : > { %v12980_v22 = vpop.f32.mrb[156].mxu1 }
 0x44a   : > { %14544 = vst [vmem:[#allocation42_spill] sm:$0xff] %v12980_v22  ;;  %v12982_v32 = vpop.f32.mrb[157].mxu1 }
 0x44b   : > { %14545 = vst [vmem:[#allocation66_spill] sm:$0xff] %v12982_v32  ;;  %v12984_v25 = vpop.f32.mrb[158].mxu1  ;;  %v4759_v49 = vmax.f32 %v12980_v22, %v12982_v32  ;;  %v14554_v32 = vmax.f32 %v14552_v9, %v14553_v44  ;;  %v14565_v9 = vld [vmem:[#allocation78_spill] sm:$0xff] }
 0x44c   : > { %14546 = vst [vmem:[#allocation27_spill] sm:$0xff] %v12984_v25  ;;  %v12988_v15 = vpop.f32.mrb[159].mxu1 }
 0x44d   : > { %14547 = vst [vmem:[#allocation49_spill] sm:$0xff] %v12988_v15  ;;  %4760 = vmax.xlane.f32.xlu0 %v4759_v49  ;;  %v4762_v56 = vmax.f32 %v12984_v25, %v12988_v15  ;;  %v14559_v15 = vmax.f32 %v14557_v52, %v14558_v38 }
 0x44f   : > { %4763 = vmax.xlane.f32.xlu1 %v4762_v56  ;;  %v14556_v56 = vmax.f32 %v12491_v28, %v12493_v6  ;;  %v14566_v6 = vld [vmem:[#allocation76_spill] sm:$0xff] }
 0x451   : > { %v12992_v27 = vpop.f32.mrb[160].mxu1  ;;  %4766 = vmax.xlane.f32.xlu0 %v14549_v43 }
 0x452   : > { %14548 = vst [vmem:[#allocation73_spill] sm:$0xff] %v12992_v27  ;;  %v12997_v58 = vpop.f32.mrb[161].mxu1 }
 0x453   : > { %14550 = vst [vmem:[#allocation52_spill] sm:$0xff] %v12997_v58  ;;  %v12999_v17 = vpop.f32.mrb[162].mxu1  ;;  %4769 = vmax.xlane.f32.xlu1 %v14554_v32  ;;  %v4813_v49 = vmax.f32 %v12992_v27, %v12997_v58  ;;  %v14561_v32 = vld [vmem:[#allocation70_spill] sm:$0xff] }
 0x454   : > { %14551 = vst [vmem:[#allocation43_spill] sm:$0xff] %v12999_v17  ;;  %v13006_v22 = vpop.f32.mrb[163].mxu1  ;;  %v14562_v44 = vmax.f32 %v12521_v63, %v14561_v32  ;;  %v14570_v32 = vld [vmem:[#allocation9_spill] sm:$0xff] }
 0x455   : > { %14555 = vst [vmem:[#allocation34_spill] sm:$0xff] %v13006_v22  ;;  %4772 = vmax.xlane.f32.xlu0 %v14556_v56  ;;  %v4816_v43 = vmax.f32 %v12999_v17, %v13006_v22  ;;  %v14567_v56 = vmax.f32 %v14565_v9, %v14566_v6  ;;  %v14571_v63 = vmax.f32 %v12557_v39, %v14570_v32  ;;  %v14576_v6 = vld [vmem:[#allocation12_spill] sm:$0xff] }
 0x457   : > { %4775 = vmax.xlane.f32.xlu1 %v14559_v15  ;;  %v14569_v15 = vmax.f32 %v12551_v5, %v12553_v62  ;;  %v14577_v62 = vld [vmem:[#allocation13_spill] sm:$0xff] }
 0x459   : > { %v13016_v25 = vpop.f32.mrb[164].mxu1  ;;  %4778 = vmax.xlane.f32.xlu0 %v14562_v44 }
 0x45a   : > { %14560 = vst [vmem:[#allocation74_spill] sm:$0xff] %v13016_v25  ;;  %v13021_v58 = vpop.f32.mrb[165].mxu1 }
 0x45b   : > { %14563 = vst [vmem:[#allocation64_spill] sm:$0xff] %v13021_v58  ;;  %v13023_v27 = vpop.f32.mrb[166].mxu1  ;;  %4781 = vmax.xlane.f32.xlu1 %v14567_v56  ;;  %v4819_v22 = vmax.f32 %v13016_v25, %v13021_v58  ;;  %v14573_v56 = vmax.f32 %v12578_v53, %v12580_v48  ;;  %v14581_v48 = vmax.f32 %v12605_v36, %v12609_v1 }
 0x45c   : > { %14564 = vst [vmem:[#allocation81_spill] sm:$0xff] %v13023_v27  ;;  %v13030_v17 = vpop.f32.mrb[167].mxu1 }
 0x45d   : > { %14568 = vst [vmem:[#allocation78_spill] sm:$0xff] %v13030_v17  ;;  %4784 = vmax.xlane.f32.xlu0 %v14569_v15  ;;  %v4822_v44 = vmax.f32 %v13023_v27, %v13030_v17  ;;  %v14578_v15 = vmax.f32 %v14576_v6, %v14577_v62 }
 0x45f   : > { %4787 = vmax.xlane.f32.xlu1 %v14571_v63  ;;  %v14580_v63 = vmax.f32 %v12601_v31, %v12603_v34 }
 0x461   : > { %v13040_v38 = vpop.f32.mrb[168].mxu1  ;;  %4790 = vmax.xlane.f32.xlu0 %v14573_v56 }
 0x462   : > { %14572 = vst [vmem:[#allocation9_spill] sm:$0xff] %v13040_v38  ;;  %v13045_v58 = vpop.f32.mrb[169].mxu1 }
 0x463   : > { %14574 = vst [vmem:[#allocation82_spill] sm:$0xff] %v13045_v58  ;;  %v13047_v25 = vpop.f32.mrb[170].mxu1  ;;  %4793 = vmax.xlane.f32.xlu1 %v14578_v15  ;;  %v4825_v17 = vmax.f32 %v13040_v38, %v13045_v58  ;;  %v14583_v15 = vmax.f32 %v12623_v54, %v12625_v26  ;;  %v14589_v26 = vmax.f32 %v12655_v59, %v12659_v13 }
 0x464   : > { %14575 = vst [vmem:[#allocation83_spill] sm:$0xff] %v13047_v25  ;;  %v13054_v27 = vpop.f32.mrb[171].mxu1 }
 0x465   : > { %14579 = vst [vmem:[#allocation12_spill] sm:$0xff] %v13054_v27  ;;  %4796 = vmax.xlane.f32.xlu0 %v14580_v63  ;;  %v4828_v56 = vmax.f32 %v13047_v25, %v13054_v27  ;;  %v14586_v63 = vmax.f32 %v12630_v57, %v12637_v14 }
 0x467   : > { %4799 = vmax.xlane.f32.xlu1 %v14581_v48  ;;  %v14588_v48 = vmax.f32 %v12648_v29, %v12650_v24 }
 0x469   : > { %v13064_v53 = vpop.f32.mrb[172].mxu1  ;;  %4802 = vmax.xlane.f32.xlu0 %v14583_v15 }
 0x46a   : > { %14582 = vst [vmem:[#allocation13_spill] sm:$0xff] %v13064_v53  ;;  %v13069_v58 = vpop.f32.mrb[173].mxu1 }
 0x46b   : > { %14584 = vst [vmem:[#allocation84_spill] sm:$0xff] %v13069_v58  ;;  %v13071_v38 = vpop.f32.mrb[174].mxu1  ;;  %4805 = vmax.xlane.f32.xlu1 %v14586_v63  ;;  %v4831_v27 = vmax.f32 %v13064_v53, %v13069_v58 }
 0x46c   : > { %14585 = vst [vmem:[#allocation85_spill] sm:$0xff] %v13071_v38  ;;  %v13078_v25 = vpop.f32.mrb[175].mxu1 }
 0x46d   : > { %14587 = vst [vmem:[#allocation86_spill] sm:$0xff] %v13078_v25  ;;  %4808 = vmax.xlane.f32.xlu0 %v14588_v48  ;;  %v4834_v15 = vmax.f32 %v13071_v38, %v13078_v25 }
 0x46f   : > { %4811 = vmax.xlane.f32.xlu1 %v14589_v26 }
 0x471   : > { %v13088_v54 = vpop.f32.mrb[176].mxu1  ;;  %4814 = vmax.xlane.f32.xlu0 %v4813_v49 }
 0x472   : > { %v13090_v63 = vpop.f32.mrb[177].mxu1 }
 0x473   : > { %v13092_v14 = vpop.f32.mrb[178].mxu1  ;;  %4817 = vmax.xlane.f32.xlu1 %v4816_v43  ;;  %v4837_v58 = vmax.f32 %v13088_v54, %v13090_v63 }
 0x474   : > { %v13096_v53 = vpop.f32.mrb[179].mxu1 }
 0x475   : > { %14590 = vst [vmem:[#allocation87_spill] sm:$0xff] %v13096_v53  ;;  %4820 = vmax.xlane.f32.xlu0 %v4819_v22  ;;  %v4840_v48 = vmax.f32 %v13092_v14, %v13096_v53 }
 0x477   : > { %4823 = vmax.xlane.f32.xlu1 %v4822_v44 }
 0x479   : > { %v13100_v25 = vpop.f32.mrb[180].mxu1  ;;  %4826 = vmax.xlane.f32.xlu0 %v4825_v17 }
 0x47a   : > { %14591 = vst [vmem:[#allocation88_spill] sm:$0xff] %v13100_v25  ;;  %v13102_v26 = vpop.f32.mrb[181].mxu1 }
 0x47b   : > { %14592 = vst [vmem:[#allocation89_spill] sm:$0xff] %v13102_v26  ;;  %v13104_v49 = vpop.f32.mrb[182].mxu1  ;;  %4829 = vmax.xlane.f32.xlu1 %v4828_v56  ;;  %v4843_v43 = vmax.f32 %v13100_v25, %v13102_v26 }
 0x47c   : > { %14593 = vst [vmem:[#allocation90_spill] sm:$0xff] %v13104_v49  ;;  %v13108_v38 = vpop.f32.mrb[183].mxu1 }
 0x47d   : > { %14594 = vst [vmem:[#allocation91_spill] sm:$0xff] %v13108_v38  ;;  %4832 = vmax.xlane.f32.xlu0 %v4831_v27  ;;  %v4846_v22 = vmax.f32 %v13104_v49, %v13108_v38 }
 0x47f   : > { %4835 = vmax.xlane.f32.xlu1 %v4834_v15 }
 0x481   : > { %v13112_v53 = vpop.f32.mrb[184].mxu1  ;;  %5246 = vadd.xlane.f32.xlu0 %v12729_v51 }
 0x482   : > { %14595 = vst [vmem:[#allocation92_spill] sm:$0xff] %v13112_v53  ;;  %v13115_v17 = vpop.f32.mrb[185].mxu1 }
 0x483   : > { %14596 = vst [vmem:[#allocation93_spill] sm:$0xff] %v13115_v17  ;;  %v13117_v44 = vpop.f32.mrb[186].mxu1  ;;  %5249 = vadd.xlane.f32.xlu1 %v12741_v10  ;;  %v4849_v56 = vmax.f32 %v13112_v53, %v13115_v17 }
 0x484   : > { %14597 = vst [vmem:[#allocation94_spill] sm:$0xff] %v13117_v44  ;;  %v13122_v26 = vpop.f32.mrb[187].mxu1 }
 0x485   : > { %14598 = vst [vmem:[#allocation95_spill] sm:$0xff] %v13122_v26  ;;  %4838 = vmax.xlane.f32.xlu0 %v4837_v58  ;;  %v4852_v27 = vmax.f32 %v13117_v44, %v13122_v26 }
 0x487   : > { %4841 = vmax.xlane.f32.xlu1 %v4840_v48 }
 0x489   : > { %v13126_v15 = vpop.f32.mrb[188].mxu1  ;;  %5252 = vadd.xlane.f32.xlu0 %v12748_v8 }
 0x48a   : > { %14599 = vst [vmem:[#allocation96_spill] sm:$0xff] %v13126_v15  ;;  %v13129_v51 = vpop.f32.mrb[189].mxu1 }
 0x48b   : > { %14600 = vst [vmem:[#allocation97_spill] sm:$0xff] %v13129_v51  ;;  %v13131_v38 = vpop.f32.mrb[190].mxu1  ;;  %5255 = vadd.xlane.f32.xlu1 %v12767_v55  ;;  %v4855_v10 = vmax.f32 %v13126_v15, %v13129_v51 }
 0x48c   : > { %v13136_v17 = vpop.f32.mrb[191].mxu1  ;;  %v8792_v58 = vpop.f32.mrb[64].mxu0 }
 0x48d   : > { %14601 = vst [vmem:[#allocation98_spill] sm:$0xff] %v13136_v17  ;;  %4844 = vmax.xlane.f32.xlu0 %v4843_v43  ;;  %v8793_v53 = vpop.f32.mrb[65].mxu0  ;;  %v4858_v48 = vmax.f32 %v13131_v38, %v13136_v17 }
 0x48e   : > { %v13140_v26 = vadd.f32 %v8793_v53, %v8792_v58  ;;  %v8795_v8 = vpop.f32.mrb[66].mxu0 }
 0x48f   : > { %v8796_v44 = vpop.f32.mrb[67].mxu0  ;;  %4847 = vmax.xlane.f32.xlu1 %v4846_v22 }
 0x490   : > { %v13142_v49 = vadd.f32 %v8796_v44, %v8795_v8 }
 0x491   : > { %5258 = vadd.xlane.f32.xlu0 %v12774_v30 }
 0x493   : > { %5261 = vadd.xlane.f32.xlu1 %v12785_v7 }
 0x494   : > { %v8798_v55 = vpop.f32.mrb[68].mxu0 }
 0x495   : > { %4850 = vmax.xlane.f32.xlu0 %v4849_v56  ;;  %v8799_v51 = vpop.f32.mrb[69].mxu0 }
 0x496   : > { %v13146_v15 = vadd.f32 %v8799_v51, %v8798_v55  ;;  %v8801_v43 = vpop.f32.mrb[70].mxu0 }
 0x497   : > { %v8802_v25 = vpop.f32.mrb[71].mxu0  ;;  %4853 = vmax.xlane.f32.xlu1 %v4852_v27 }
 0x498   : > { %v13148_v17 = vadd.f32 %v8802_v25, %v8801_v43  ;;  %v9500_v25 = vld [vmem:[%s13928_s5 + $0x4] ss:$8 sps:$4 sm:$0xff]  }
 0x499   : > { %4856 = vmax.xlane.f32.xlu0 %v4855_v10  ;;  %6209 = vmatprep.subr.bf16.mxu0 %v9500_v25 }
 0x49b   : > { %4859 = vmax.xlane.f32.xlu1 %v4858_v48 }
 0x49c   : > { %v8804_v53 = vpop.f32.mrb[72].mxu0 }
 0x49d   : > { %5264 = vadd.xlane.f32.xlu0 %v12800_v33  ;;  %v8805_v22 = vpop.f32.mrb[73].mxu0 }
 0x49e   : > { %v13151_v44 = vadd.f32 %v8805_v22, %v8804_v53  ;;  %v8807_v30 = vpop.f32.mrb[74].mxu0 }
 0x49f   : > { %v8808_v7 = vpop.f32.mrb[75].mxu0  ;;  %5267 = vadd.xlane.f32.xlu1 %v12811_v3 }
 0x4a0   : > { %v13154_v56 = vadd.f32 %v8808_v7, %v8807_v30 }
 0x4a1   : > { %5270 = vadd.xlane.f32.xlu0 %v12826_v12 }
 0x4a2   : > { %v4719_v27 = vpop.xlane.xlu0 %4718 }
 0x4a3   : > { %v4893_v51 = vsub.f32 %v12896_v4, %v4719_v27  ;;  %v4894_v33 = vsub.f32 %v12898_v23, %v4719_v27  ;;  %5273 = vadd.xlane.f32.xlu1 %v12833_v46 }
 0x4a4   : > { %v4722_v10 = vpop.xlane.xlu1 %4721 }
 0x4a5   : > { %v8810_v58 = vpop.f32.mrb[76].mxu0  ;;  %v5053_v48 = vmul.f32 1.442695, %v4893_v51  ;;  %v5055_v3 = vmul.f32 1.442695, %v4894_v33  ;;  %v4895_v8 = vsub.f32 %v12900_v41, %v4722_v10  ;;  %v4896_v12 = vsub.f32 %v12904_v40, %v4722_v10  ;;  %5276 = vadd.xlane.f32.xlu0 %v12840_v47 }
 0x4a6   : > { %v8811_v55 = vpop.f32.mrb[77].mxu0 }
 0x4a7   : > { %v13166_v43 = vadd.f32 %v8811_v55, %v8810_v58  ;;  %v8813_v53 = vpop.f32.mrb[78].mxu0  ;;  %9610 = vpow2.f32 %v5053_v48  ;;  %v5057_v4 = vmul.f32 1.442695, %v4895_v8  ;;  %v5059_v23 = vmul.f32 1.442695, %v4896_v12  ;;  %5279 = vadd.xlane.f32.xlu1 %v12848_v61 }
 0x4a8   : > { %v8814_v22 = vpop.f32.mrb[79].mxu0  ;;  %9612 = vpow2.f32 %v5055_v3 }
 0x4a9   : > { %v13169_v46 = vadd.f32 %v8814_v22, %v8813_v53  ;;  %9614 = vpow2.f32 %v5057_v4  ;;  %5282 = vadd.xlane.f32.xlu0 %v12852_v19 }
 0x4aa   : > { %9616 = vpow2.f32 %v5059_v23  ;;  %v4725_v40 = vpop.xlane.xlu0 %4724 }
 0x4ab   : > { %v4897_v47 = vsub.f32 %v12908_v42, %v4725_v40  ;;  %v4898_v41 = vsub.f32 %v12910_v37, %v4725_v40  ;;  %5285 = vadd.xlane.f32.xlu1 %v12856_v16 }
 0x4ac   : > { %v4728_v30 = vpop.xlane.xlu1 %4727 }
 0x4ad   : > { %v8816_v7 = vpop.f32.mrb[80].mxu0  ;;  %v5061_v25 = vmul.f32 1.442695, %v4897_v47  ;;  %v5063_v27 = vmul.f32 1.442695, %v4898_v41  ;;  %v4899_v61 = vsub.f32 %v12912_v60, %v4728_v30  ;;  %v4900_v51 = vsub.f32 %v12916_v11, %v4728_v30  ;;  %5288 = vadd.xlane.f32.xlu0 %v12862_v0 }
 0x4ae   : > { %v8817_v33 = vpop.f32.mrb[81].mxu0 }
 0x4af   : > { %v13178_v19 = vadd.f32 %v8817_v33, %v8816_v7  ;;  %v8819_v10 = vpop.f32.mrb[82].mxu0  ;;  %9618 = vpow2.f32 %v5061_v25  ;;  %v5065_v42 = vmul.f32 1.442695, %v4899_v61  ;;  %v5067_v58 = vmul.f32 1.442695, %v4900_v51  ;;  %5291 = vadd.xlane.f32.xlu1 %v12866_v18 }
 0x4b0   : > { %v8820_v37 = vpop.f32.mrb[83].mxu0  ;;  %9620 = vpow2.f32 %v5063_v27 }
 0x4b1   : > { %v13181_v16 = vadd.f32 %v8820_v37, %v8819_v10  ;;  %v9611_v48 = vpop.eup %9610  ;;  %9622 = vpow2.f32 %v5065_v42  ;;  %v14604_v37 = vld [vmem:[#allocation51_spill] sm:$0xff] }
 0x4b2   : > { %v9613_v60 = vpop.eup %9612  ;;  %9624 = vpow2.f32 %v5067_v58  ;;  %v4731_v11 = vpop.xlane.xlu0 %4730  ;;  %v14603_v58 = vld [vmem:[#allocation57_spill] sm:$0xff] }
 0x4b3   : > { %v9615_v3 = vpop.eup %9614  ;;  %v4901_v0 = vsub.f32 %v12920_v20, %v4731_v11  ;;  %v4902_v8 = vsub.f32 %v12922_v50, %v4731_v11  ;;  %v5293_v12 = vadd.f32 %v9613_v60, %v9611_v48 }
 0x4b4   : > { %v9617_v55 = vpop.eup %9616  ;;  %v5453_v53 = vpack.c.bf16 %v9615_v3, %v9611_v48  ;;  %v4734_v4 = vpop.xlane.xlu1 %4733  ;;  %v14605_v48 = vpack.c.bf16 %v14603_v58, %v14604_v37 }
 0x4b5   : > { %v8822_v23 = vpop.f32.mrb[84].mxu0  ;;  %v5069_v22 = vmul.f32 1.442695, %v4901_v0  ;;  %v5071_v18 = vmul.f32 1.442695, %v4902_v8  ;;  %v4903_v40 = vsub.f32 %v12924_v35, %v4734_v4  ;;  %v4904_v47 = vsub.f32 %v12928_v21, %v4734_v4  ;;  %5294 = vadd.xlane.f32.xlu0 %v5293_v12 }
 0x4b6   : > { %v8823_v41 = vpop.f32.mrb[85].mxu0  ;;  %v5454_v25 = vpack.c.bf16 %v9617_v55, %v9613_v60  ;;  %v5296_v20 = vadd.f32 %v9617_v55, %v9615_v3  ;;  %v14602_v35 = vpack.c.bf16 %v12675_v2, %v12670_v45  ;;  %v14606_v60 = vld [vmem:[#allocation62_spill] sm:$0xff]  ;;  %v14607_v3 = vld [vmem:[#allocation68_spill] sm:$0xff]  ;;  %v14609_v2 = vld [vmem:[#allocation45_spill] sm:$0xff] }
 0x4b7   : > { %v13187_v30 = vadd.f32 %v8823_v41, %v8822_v23  ;;  %v8825_v7 = vpop.f32.mrb[86].mxu0  ;;  %9626 = vpow2.f32 %v5069_v22  ;;  %v5073_v50 = vmul.f32 1.442695, %v4903_v40  ;;  %v5075_v27 = vmul.f32 1.442695, %v4904_v47  ;;  %v14610_v41 = vld [vmem:[#allocation18_spill] sm:$0xff] }
 0x4b8   : > { %v8826_v61 = vpop.f32.mrb[87].mxu0  ;;  %9628 = vpow2.f32 %v5071_v18  ;;  %5694 = vmatprep.mubr.bf16.mxu1 %v5454_v25  ;;  %5297 = vadd.xlane.f32.xlu1 %v5296_v20  ;;  %v14608_v18 = vld [vmem:[#allocation67_spill] sm:$0xff] }
 0x4b9   : > { %v13189_v51 = vadd.f32 %v8826_v61, %v8825_v7  ;;  %v9619_v33 = vpop.eup %9618  ;;  %9630 = vpow2.f32 %v5073_v50  ;;  %5695 = vmatmul.mubr.bf16.vlgmr.msra.gmra.mrb[192].mxu1 %v5453_v53  ;;  %v14611_v7 = vld [vmem:[#allocation17_spill] sm:$0xff] }
 0x4ba   : > { %v9621_v21 = vpop.eup %9620  ;;  %9632 = vpow2.f32 %v5075_v27  ;;  %8969 = vmatpush3.bf16.msra.mxu1 %v14602_v35  ;;  %v4737_v10 = vpop.xlane.xlu0 %4736  ;;  %v14612_v25 = vpack.c.bf16 %v14610_v41, %v14611_v7  ;;  %v14614_v35 = vld [vmem:[#allocation30_spill] sm:$0xff] }
 0x4bb   : > { %v9623_v42 = vpop.eup %9622  ;;  %8970 = vmatprep.subr.bf16.mxu1 %v14605_v48  ;;  %v4905_v11 = vsub.f32 %v14606_v60, %v4737_v10  ;;  %v4906_v0 = vsub.f32 %v14607_v3, %v4737_v10  ;;  %v5299_v8 = vadd.f32 %v9621_v21, %v9619_v33 }
 0x4bc   : > { %v9625_v12 = vpop.eup %9624  ;;  %v5455_v55 = vpack.c.bf16 %v9623_v42, %v9619_v33  ;;  %v4740_v53 = vpop.xlane.xlu1 %4739  ;;  %v14613_v33 = vld [vmem:[#allocation21_spill] sm:$0xff] }
 0x4bd   : > { %v8828_v4 = vpop.f32.mrb[88].mxu0  ;;  %v5077_v23 = vmul.f32 1.442695, %v4905_v11  ;;  %v5079_v22 = vmul.f32 1.442695, %v4906_v0  ;;  %v4907_v45 = vsub.f32 %v14608_v18, %v4740_v53  ;;  %v4908_v40 = vsub.f32 %v14609_v2, %v4740_v53  ;;  %5300 = vadd.xlane.f32.xlu0 %v5299_v8  ;;  %v14619_v53 = vld [vmem:[#allocation38_spill] sm:$0xff] }
 0x4be   : > { %v8829_v47 = vpop.f32.mrb[89].mxu0  ;;  %8971 = vmatpush3.bf16.msra.mxu1 %v14612_v25  ;;  %v5456_v27 = vpack.c.bf16 %v9625_v12, %v9621_v21  ;;  %v5302_v61 = vadd.f32 %v9625_v12, %v9623_v42  ;;  %v14615_v10 = vpack.c.bf16 %v14613_v33, %v14614_v35  ;;  %v14616_v21 = vld [vmem:[#allocation22_spill] sm:$0xff]  ;;  %v14617_v42 = vld [vmem:[#allocation19_spill] sm:$0xff]  ;;  %v14625_v33 = vld [vmem:[#allocation65_spill] sm:$0xff] }
 0x4bf   : > { %v13204_v20 = vadd.f32 %v8829_v47, %v8828_v4  ;;  %v8831_v50 = vpop.f32.mrb[90].mxu0  ;;  %9634 = vpow2.f32 %v5077_v23  ;;  %v5081_v58 = vmul.f32 1.442695, %v4907_v45  ;;  %v5083_v37 = vmul.f32 1.442695, %v4908_v40  ;;  %v14620_v4 = vld [vmem:[#allocation40_spill] sm:$0xff] }
 0x4c0   : > { %8972 = vmatprep.subr.bf16.mxu1 %v14615_v10  ;;  %v8832_v48 = vpop.f32.mrb[91].mxu0  ;;  %9636 = vpow2.f32 %v5079_v22  ;;  %5702 = vmatprep.mubr.bf16.mxu1 %v5456_v27  ;;  %v14618_v0 = vpack.c.bf16 %v14616_v21, %v14617_v42  ;;  %v14621_v23 = vpack.c.bf16 %v14619_v53, %v14620_v4  ;;  %v14622_v22 = vld [vmem:[#allocation24_spill] sm:$0xff]  ;;  %v14623_v45 = vld [vmem:[#allocation71_spill] sm:$0xff]  ;;  %v14624_v27 = vld [vmem:[#allocation69_spill] sm:$0xff] }
 0x4c1   : > { %5303 = vadd.xlane.f32.xlu1 %v5302_v61  ;;  %v13209_v60 = vadd.f32 %v8832_v48, %v8831_v50  ;;  %v9627_v11 = vpop.eup %9626  ;;  %9638 = vpow2.f32 %v5081_v58  ;;  %5703 = vmatmul.mubr.bf16.gmra.mrb[196].mxu1 %v5455_v55  ;;  %v14626_v58 = vld [vmem:[#allocation28_spill] sm:$0xff]  ;;  %v14630_v53 = vld [vmem:[#allocation77_spill] sm:$0xff] }
 0x4c2   : > { %v9629_v3 = vpop.eup %9628  ;;  %9640 = vpow2.f32 %v5083_v37  ;;  %8973 = vmatpush3.bf16.msra.mxu1 %v14618_v0  ;;  %v4743_v8 = vpop.xlane.xlu0 %4742  ;;  %v14627_v37 = vld [vmem:[#allocation25_spill] sm:$0xff] }
 0x4c3   : > { %v9631_v12 = vpop.eup %9630  ;;  %8974 = vmatprep.subr.bf16.mxu1 %v14621_v23  ;;  %v4909_v18 = vsub.f32 %v14622_v22, %v4743_v8  ;;  %v4910_v2 = vsub.f32 %v14623_v45, %v4743_v8  ;;  %v5305_v40 = vadd.f32 %v9629_v3, %v9627_v11  ;;  %v14628_v48 = vpack.c.bf16 %v14626_v58, %v14627_v37 }
 0x4c4   : > { %v9633_v47 = vpop.eup %9632  ;;  %v5457_v41 = vpack.c.bf16 %v9631_v12, %v9627_v11  ;;  %v4746_v55 = vpop.xlane.xlu1 %4745  ;;  %v14629_v11 = vld [vmem:[#allocation48_spill] sm:$0xff] }
 0x4c5   : > { %v8834_v7 = vpop.f32.mrb[92].mxu0  ;;  %v5085_v25 = vmul.f32 1.442695, %v4909_v18  ;;  %v5087_v50 = vmul.f32 1.442695, %v4910_v2  ;;  %v4911_v61 = vsub.f32 %v14624_v27, %v4746_v55  ;;  %v4912_v35 = vsub.f32 %v14625_v33, %v4746_v55  ;;  %5306 = vadd.xlane.f32.xlu0 %v5305_v40  ;;  %v14636_v27 = vld [vmem:[#allocation41_spill] sm:$0xff] }
 0x4c6   : > { %v8835_v10 = vpop.f32.mrb[93].mxu0  ;;  %8975 = vmatpush3.bf16.msra.mxu1 %v14628_v48  ;;  %v5458_v0 = vpack.c.bf16 %v9633_v47, %v9629_v3  ;;  %v5308_v8 = vadd.f32 %v9633_v47, %v9631_v12  ;;  %v14631_v4 = vpack.c.bf16 %v14629_v11, %v14630_v53  ;;  %v14632_v3 = vld [vmem:[#allocation50_spill] sm:$0xff]  ;;  %v14633_v12 = vld [vmem:[#allocation31_spill] sm:$0xff] }
 0x4c7   : > { %v13224_v21 = vadd.f32 %v8835_v10, %v8834_v7  ;;  %v8837_v42 = vpop.f32.mrb[94].mxu0  ;;  %9642 = vpow2.f32 %v5085_v25  ;;  %v5089_v23 = vmul.f32 1.442695, %v4911_v61  ;;  %v5091_v22 = vmul.f32 1.442695, %v4912_v35  ;;  %v14635_v25 = vld [vmem:[#allocation58_spill] sm:$0xff] }
 0x4c8   : > { %8976 = vmatprep.subr.bf16.mxu1 %v14631_v4  ;;  %v8838_v18 = vpop.f32.mrb[95].mxu0  ;;  %9644 = vpow2.f32 %v5087_v50  ;;  %5710 = vmatprep.mubr.bf16.mxu1 %v5458_v0  ;;  %v14634_v47 = vpack.c.bf16 %v14632_v3, %v14633_v12  ;;  %v14637_v61 = vpack.c.bf16 %v14635_v25, %v14636_v27  ;;  %v14638_v50 = vld [vmem:[#allocation46_spill] sm:$0xff]  ;;  %v14639_v35 = vld [vmem:[#allocation80_spill] sm:$0xff]  ;;  %v14641_v53 = vld [vmem:[#allocation35_spill] sm:$0xff] }
 0x4c9   : > { %5309 = vadd.xlane.f32.xlu1 %v5308_v8  ;;  %v13229_v45 = vadd.f32 %v8838_v18, %v8837_v42  ;;  %v9635_v2 = vpop.eup %9634  ;;  %9646 = vpow2.f32 %v5089_v23  ;;  %5711 = vmatmul.mubr.bf16.gmra.mrb[200].mxu1 %v5457_v41  ;;  %v14640_v8 = vld [vmem:[#allocation33_spill] sm:$0xff]  ;;  %v14642_v23 = vld [vmem:[#allocation20_spill] sm:$0xff] }
 0x4ca   : > { %v9637_v40 = vpop.eup %9636  ;;  %9648 = vpow2.f32 %v5091_v22  ;;  %8977 = vmatpush3.bf16.msra.mxu1 %v14634_v47  ;;  %v4749_v55 = vpop.xlane.xlu0 %4748  ;;  %v14643_v22 = vld [vmem:[#allocation53_spill] sm:$0xff]  ;;  %v14645_v47 = vld [vmem:[#allocation44_spill] sm:$0xff] }
 0x4cb   : > { %v9639_v7 = vpop.eup %9638  ;;  %8978 = vmatprep.subr.bf16.mxu1 %v14637_v61  ;;  %v4913_v33 = vsub.f32 %v14638_v50, %v4749_v55  ;;  %v4914_v10 = vsub.f32 %v14639_v35, %v4749_v55  ;;  %v5311_v58 = vadd.f32 %v9637_v40, %v9635_v2  ;;  %v14644_v18 = vpack.c.bf16 %v14642_v23, %v14643_v22  ;;  %v14646_v55 = vld [vmem:[#allocation61_spill] sm:$0xff]  ;;  %v14649_v35 = vld [vmem:[#allocation39_spill] sm:$0xff] }
 0x4cc   : > { %v9641_v37 = vpop.eup %9640  ;;  %v5459_v48 = vpack.c.bf16 %v9639_v7, %v9635_v2  ;;  %v4752_v41 = vpop.xlane.xlu1 %4751  ;;  %v14647_v25 = vpack.c.bf16 %v14645_v47, %v14646_v55  ;;  %v14657_v47 = vld [vmem:[#allocation23_spill] sm:$0xff] }
 0x4cd   : > { %v5093_v42 = vmul.f32 1.442695, %v4913_v33  ;;  %v5095_v0 = vmul.f32 1.442695, %v4914_v10  ;;  %v4915_v11 = vsub.f32 %v14640_v8, %v4752_v41  ;;  %v4916_v4 = vsub.f32 %v14641_v53, %v4752_v41  ;;  %5312 = vadd.xlane.f32.xlu0 %v5311_v58  ;;  %v14648_v33 = vld [vmem:[#allocation29_spill] sm:$0xff]  ;;  %v14651_v58 = vld [vmem:[#allocation32_spill] sm:$0xff] }
 0x4ce   : > { %8979 = vmatpush3.bf16.msra.mxu1 %v14644_v18  ;;  %v5460_v3 = vpack.c.bf16 %v9641_v37, %v9637_v40  ;;  %v5314_v12 = vadd.f32 %v9641_v37, %v9639_v7  ;;  %v14650_v10 = vpack.c.bf16 %v14648_v33, %v14649_v35  ;;  %v14652_v37 = vld [vmem:[#allocation37_spill] sm:$0xff] }
 0x4cf   : > { %9650 = vpow2.f32 %v5093_v42  ;;  %8980 = vmatprep.subr.bf16.mxu1 %v14647_v25  ;;  %v5097_v2 = vmul.f32 1.442695, %v4915_v11  ;;  %v5099_v27 = vmul.f32 1.442695, %v4916_v4  ;;  %v14653_v41 = vpack.c.bf16 %v14651_v58, %v14652_v37  ;;  %v14654_v42 = vld [vmem:[#allocation36_spill] sm:$0xff]  ;;  %v14658_v25 = vld [vmem:[#allocation75_spill] sm:$0xff] }
 0x4d0   : > { %9652 = vpow2.f32 %v5095_v0  ;;  %5718 = vmatprep.mubr.bf16.mxu1 %v5460_v3  ;;  %5315 = vadd.xlane.f32.xlu1 %v5314_v12  ;;  %v14655_v0 = vld [vmem:[#allocation47_spill] sm:$0xff]  ;;  %v14656_v3 = vld [vmem:[#allocation26_spill] sm:$0xff] }
 0x4d1   : > { %v9643_v61 = vpop.eup %9642  ;;  %9654 = vpow2.f32 %v5097_v2  ;;  %5719 = vmatmul.mubr.bf16.gmra.mrb[204].mxu1 %v5459_v48  ;;  %v14659_v2 = vld [vmem:[#allocation54_spill] sm:$0xff] }
 0x4d2   : > { %v9645_v50 = vpop.eup %9644  ;;  %9656 = vpow2.f32 %v5099_v27  ;;  %8981 = vmatpush3.bf16.msra.mxu1 %v14650_v10  ;;  %v4755_v40 = vpop.xlane.xlu0 %4754  ;;  %v14660_v27 = vpack.c.bf16 %v14658_v25, %v14659_v2 }
 0x4d3   : > { %v9647_v7 = vpop.eup %9646  ;;  %8982 = vmatprep.subr.bf16.mxu1 %v14653_v41  ;;  %v4917_v8 = vsub.f32 %v14654_v42, %v4755_v40  ;;  %v4918_v11 = vsub.f32 %v14655_v0, %v4755_v40  ;;  %v5317_v53 = vadd.f32 %v9645_v50, %v9643_v61  ;;  %v14661_v42 = vld [vmem:[#allocation42_spill] sm:$0xff] }
 0x4d4   : > { %v9649_v4 = vpop.eup %9648  ;;  %v5461_v23 = vpack.c.bf16 %v9647_v7, %v9643_v61  ;;  %v4758_v48 = vpop.xlane.xlu1 %4757  ;;  %v14662_v0 = vld [vmem:[#allocation66_spill] sm:$0xff] }
 0x4d5   : > { %v5101_v22 = vmul.f32 1.442695, %v4917_v8  ;;  %v5103_v18 = vmul.f32 1.442695, %v4918_v11  ;;  %v4919_v12 = vsub.f32 %v14656_v3, %v4758_v48  ;;  %v4920_v55 = vsub.f32 %v14657_v47, %v4758_v48  ;;  %5318 = vadd.xlane.f32.xlu0 %v5317_v53 }
 0x4d6   : > { %8983 = vmatpush3.bf16.msra.mxu1 %v14660_v27  ;;  %v5462_v33 = vpack.c.bf16 %v9649_v4, %v9645_v50  ;;  %v5320_v35 = vadd.f32 %v9649_v4, %v9647_v7 }
 0x4d7   : > { %9658 = vpow2.f32 %v5101_v22  ;;  %v5105_v10 = vmul.f32 1.442695, %v4919_v12  ;;  %v5107_v40 = vmul.f32 1.442695, %v4920_v55  ;;  %v14664_v12 = vld [vmem:[#allocation49_spill] sm:$0xff] }
 0x4d8   : > { %9660 = vpow2.f32 %v5103_v18  ;;  %5726 = vmatprep.mubr.bf16.mxu1 %v5462_v33  ;;  %5321 = vadd.xlane.f32.xlu1 %v5320_v35  ;;  %v14663_v18 = vld [vmem:[#allocation27_spill] sm:$0xff] }
 0x4d9   : > { %v9651_v61 = vpop.eup %9650  ;;  %9662 = vpow2.f32 %v5105_v10  ;;  %5727 = vmatmul.mubr.bf16.gmra.mrb[208].mxu1 %v5461_v23  ;;  %v14665_v33 = vld [vmem:[#allocation79_spill] sm:$0xff]  ;;  %v14666_v10 = vld [vmem:[#allocation56_spill] sm:$0xff] }
 0x4da   : > { %v9653_v58 = vpop.eup %9652  ;;  %9664 = vpow2.f32 %v5107_v40  ;;  %v4761_v37 = vpop.xlane.xlu0 %4760 }
 0x4db   : > { %v9655_v41 = vpop.eup %9654  ;;  %v4921_v8 = vsub.f32 %v14661_v42, %v4761_v37  ;;  %v4922_v11 = vsub.f32 %v14662_v0, %v4761_v37  ;;  %v5323_v53 = vadd.f32 %v9653_v58, %v9651_v61 }
 0x4dc   : > { %v9657_v50 = vpop.eup %9656  ;;  %v5463_v7 = vpack.c.bf16 %v9655_v41, %v9651_v61  ;;  %v4764_v4 = vpop.xlane.xlu1 %4763 }
 0x4dd   : > { %v5109_v48 = vmul.f32 1.442695, %v4921_v8  ;;  %v5111_v22 = vmul.f32 1.442695, %v4922_v11  ;;  %v4923_v3 = vsub.f32 %v14663_v18, %v4764_v4  ;;  %v4924_v47 = vsub.f32 %v14664_v12, %v4764_v4  ;;  %5324 = vadd.xlane.f32.xlu0 %v5323_v53  ;;  %v14667_v8 = vld [vmem:[#allocation55_spill] sm:$0xff] }
 0x4de   : > { %v5464_v23 = vpack.c.bf16 %v9657_v50, %v9653_v58  ;;  %v4767_v55 = vpop.xlane.xlu0 %4766  ;;  %v5326_v25 = vadd.f32 %v9657_v50, %v9655_v41  ;;  %v14668_v58 = vld [vmem:[#allocation60_spill] sm:$0xff] }
 0x4df   : > { %9666 = vpow2.f32 %v5109_v48  ;;  %v5113_v2 = vmul.f32 1.442695, %v4923_v3  ;;  %v5115_v27 = vmul.f32 1.442695, %v4924_v47  ;;  %v4925_v35 = vsub.f32 %v14665_v33, %v4767_v55  ;;  %v14669_v47 = vld [vmem:[#allocation59_spill] sm:$0xff] }
 0x4e0   : > { %9668 = vpow2.f32 %v5111_v22  ;;  %5734 = vmatprep.mubr.bf16.mxu1 %v5464_v23  ;;  %v4926_v40 = vsub.f32 %v14666_v10, %v4767_v55  ;;  %5327 = vadd.xlane.f32.xlu1 %v5326_v25  ;;  %v4770_v61 = vpop.xlane.xlu1 %4769 }
 0x4e1   : > { %v9659_v37 = vpop.eup %9658  ;;  %9670 = vpow2.f32 %v5113_v2  ;;  %v5117_v42 = vmul.f32 1.442695, %v4925_v35  ;;  %5735 = vmatmul.mubr.bf16.gmra.mrb[212].mxu1 %v5463_v7  ;;  %v4927_v0 = vsub.f32 %v14667_v8, %v4770_v61  ;;  %v4928_v11 = vsub.f32 %v14668_v58, %v4770_v61  ;;  %v14671_v8 = vld [vmem:[#allocation72_spill] sm:$0xff] }
 0x4e2   : > { %v9661_v41 = vpop.eup %9660  ;;  %9672 = vpow2.f32 %v5115_v27  ;;  %v5119_v53 = vmul.f32 1.442695, %v4926_v40  ;;  %v4773_v50 = vpop.xlane.xlu0 %4772  ;;  %v14670_v27 = vld [vmem:[#allocation63_spill] sm:$0xff] }
 0x4e3   : > { %v9663_v4 = vpop.eup %9662  ;;  %9674 = vpow2.f32 %v5117_v42  ;;  %v5121_v48 = vmul.f32 1.442695, %v4927_v0  ;;  %v5123_v22 = vmul.f32 1.442695, %v4928_v11  ;;  %v4929_v18 = vsub.f32 %v12491_v28, %v4773_v50 }
 0x4e4   : > { %v9665_v3 = vpop.eup %9664  ;;  %v5465_v12 = vpack.c.bf16 %v9663_v4, %v9659_v37  ;;  %9676 = vpow2.f32 %v5119_v53  ;;  %v4930_v23 = vsub.f32 %v14669_v47, %v4773_v50  ;;  %v4776_v7 = vpop.xlane.xlu1 %4775  ;;  %v5329_v55 = vadd.f32 %v9661_v41, %v9659_v37  ;;  %v14672_v37 = vld [vmem:[#allocation70_spill] sm:$0xff] }
 0x4e5   : > { %9678 = vpow2.f32 %v5121_v48  ;;  %v5125_v25 = vmul.f32 1.442695, %v4929_v18  ;;  %v4931_v2 = vsub.f32 %v14557_v52, %v4776_v7  ;;  %v4932_v33 = vsub.f32 %v14670_v27, %v4776_v7 }
 0x4e6   : > { %9680 = vpow2.f32 %v5123_v22  ;;  %v5127_v35 = vmul.f32 1.442695, %v4930_v23  ;;  %5330 = vadd.xlane.f32.xlu0 %v5329_v55  ;;  %v5466_v10 = vpack.c.bf16 %v9665_v3, %v9661_v41  ;;  %v4779_v40 = vpop.xlane.xlu0 %4778  ;;  %v5332_v61 = vadd.f32 %v9665_v3, %v9663_v4  ;;  %v14673_v41 = vld [vmem:[#allocation76_spill] sm:$0xff] }
 0x4e7   : > { %9682 = vpow2.f32 %v5125_v25  ;;  %v5129_v28 = vmul.f32 1.442695, %v4931_v2  ;;  %v5131_v42 = vmul.f32 1.442695, %v4932_v33  ;;  %v4933_v0 = vsub.f32 %v14671_v8, %v4779_v40  ;;  %v14674_v2 = vld [vmem:[#allocation8_spill] sm:$0xff] }
 0x4e8   : > { %9684 = vpow2.f32 %v5127_v35  ;;  %5742 = vmatprep.mubr.bf16.mxu1 %v5466_v10  ;;  %v4934_v58 = vsub.f32 %v14672_v37, %v4779_v40  ;;  %5333 = vadd.xlane.f32.xlu1 %v5332_v61  ;;  %v4782_v11 = vpop.xlane.xlu1 %4781 }
 0x4e9   : > { %v9667_v52 = vpop.eup %9666  ;;  %9686 = vpow2.f32 %v5129_v28  ;;  %v5133_v53 = vmul.f32 1.442695, %v4933_v0  ;;  %5743 = vmatmul.mubr.bf16.gmra.mrb[216].mxu1 %v5465_v12  ;;  %v4935_v50 = vsub.f32 %v14565_v9, %v4782_v11  ;;  %v4936_v48 = vsub.f32 %v14673_v41, %v4782_v11  ;;  %v14675_v11 = vld [vmem:[#allocation10_spill] sm:$0xff] }
 0x4ea   : > { %v9669_v4 = vpop.eup %9668  ;;  %9688 = vpow2.f32 %v5131_v42  ;;  %v5135_v22 = vmul.f32 1.442695, %v4934_v58  ;;  %v4785_v18 = vpop.xlane.xlu0 %4784 }
 0x4eb   : > { %v9671_v3 = vpop.eup %9670  ;;  %9690 = vpow2.f32 %v5133_v53  ;;  %v5137_v47 = vmul.f32 1.442695, %v4935_v50  ;;  %v5139_v23 = vmul.f32 1.442695, %v4936_v48  ;;  %v4937_v7 = vsub.f32 %v12551_v5, %v4785_v18 }
 0x4ec   : > { %v9673_v55 = vpop.eup %9672  ;;  %v5467_v25 = vpack.c.bf16 %v9671_v3, %v9667_v52  ;;  %9692 = vpow2.f32 %v5135_v22  ;;  %v4938_v27 = vsub.f32 %v14674_v2, %v4785_v18  ;;  %v4788_v12 = vpop.xlane.xlu1 %4787  ;;  %v5335_v33 = vadd.f32 %v9669_v4, %v9667_v52 }
 0x4ed   : > { %v9675_v9 = vpop.eup %9674  ;;  %9694 = vpow2.f32 %v5137_v47  ;;  %v5141_v35 = vmul.f32 1.442695, %v4937_v7  ;;  %v4939_v10 = vsub.f32 %v12557_v39, %v4788_v12  ;;  %v4940_v40 = vsub.f32 %v14570_v32, %v4788_v12  ;;  %v14676_v39 = vld [vmem:[#allocation11_spill] sm:$0xff] }
 0x4ee   : > { %v9677_v61 = vpop.eup %9676  ;;  %9696 = vpow2.f32 %v5139_v23  ;;  %v5143_v28 = vmul.f32 1.442695, %v4938_v27  ;;  %5336 = vadd.xlane.f32.xlu0 %v5335_v33  ;;  %v5468_v42 = vpack.c.bf16 %v9673_v55, %v9669_v4  ;;  %v4791_v5 = vpop.xlane.xlu0 %4790  ;;  %v5338_v8 = vadd.f32 %v9673_v55, %v9671_v3  ;;  %v9498_v27 = vld [vmem:[%s13928_s5] ss:$8 sps:$4 sm:$0xff]  }
 0x4ef   : > { %v9679_v0 = vpop.eup %9678  ;;  %9698 = vpow2.f32 %v5141_v35  ;;  %v5145_v37 = vmul.f32 1.442695, %v4939_v10  ;;  %v5147_v58 = vmul.f32 1.442695, %v4940_v40  ;;  %v4941_v52 = vsub.f32 %v14675_v11, %v4791_v5  ;;  %v9501_v11 = vld [vmem:[%s13928_s5 + $0x10] ss:$8 sps:$4 sm:$0xff]  }
 0x4f0   : > { %v9681_v53 = vpop.eup %9680  ;;  %v5469_v50 = vpack.c.bf16 %v9679_v0, %v9675_v9  ;;  %9700 = vpow2.f32 %v5143_v28  ;;  %5750 = vmatprep.mubr.bf16.mxu1 %v5468_v42  ;;  %v4942_v41 = vsub.f32 %v14676_v39, %v4791_v5  ;;  %5339 = vadd.xlane.f32.xlu1 %v5338_v8  ;;  %v4794_v32 = vpop.xlane.xlu1 %4793  ;;  %v5341_v48 = vadd.f32 %v9677_v61, %v9675_v9  ;;  %v9506_v39 = vld [vmem:[%s13928_s5 + $0x24] ss:$8 sps:$4 sm:$0xff]  }
 0x4f1   : > { %v13282_v22 = vpop.eup %9682  ;;  %9702 = vpow2.f32 %v5145_v37  ;;  %v5149_v4 = vmul.f32 1.442695, %v4941_v52  ;;  %5751 = vmatmul.mubr.bf16.gmra.mrb[220].mxu1 %v5467_v25  ;;  %v4943_v18 = vsub.f32 %v14576_v6, %v4794_v32  ;;  %v4944_v3 = vsub.f32 %v14577_v62, %v4794_v32  ;;  %v9503_v62 = vld [vmem:[%s13928_s5 + $0x14] ss:$8 sps:$4 sm:$0xff]  }
 0x4f2   : > { %v9685_v47 = vpop.eup %9684  ;;  %9704 = vpow2.f32 %v5147_v58  ;;  %v5151_v23 = vmul.f32 1.442695, %v4942_v41  ;;  %5342 = vadd.xlane.f32.xlu0 %v5341_v48  ;;  %v5470_v7 = vpack.c.bf16 %v9681_v53, %v9677_v61  ;;  %v4797_v55 = vpop.xlane.xlu0 %4796  ;;  %v5344_v2 = vadd.f32 %v9681_v53, %v9679_v0  ;;  %v14678_v48 = vld [vmem:[#allocation15_spill] sm:$0xff] }
 0x4f3   : > { %v13289_v12 = vpop.eup %9686  ;;  %9706 = vpow2.f32 %v5149_v4  ;;  %v5153_v33 = vmul.f32 1.442695, %v4943_v18  ;;  %v5155_v25 = vmul.f32 1.442695, %v4944_v3  ;;  %v4945_v6 = vsub.f32 %v12601_v31, %v4797_v55 }
 0x4f4   : > { %v9689_v9 = vpop.eup %9688  ;;  %v5471_v35 = vpack.c.bf16 %v13289_v12, %v13282_v22  ;;  %9708 = vpow2.f32 %v5151_v23  ;;  %5791 = vmatprep.mubr.bf16.mxu0 %v5470_v7  ;;  %v4946_v10 = vsub.f32 %v12603_v34, %v4797_v55  ;;  %5345 = vadd.xlane.f32.xlu1 %v5344_v2  ;;  %v4800_v40 = vpop.xlane.xlu1 %4799  ;;  %v5347_v61 = vadd.f32 %v9685_v47, %v13282_v22  ;;  %v14679_v55 = vld [vmem:[#allocation16_spill] sm:$0xff] }
 0x4f5   : > { %v13299_v28 = vpop.eup %9690  ;;  %9710 = vpow2.f32 %v5153_v33  ;;  %v5157_v31 = vmul.f32 1.442695, %v4945_v6  ;;  %5792 = vmatmul.mubr.bf16.vlgmr.msra.gmra.mrb[96].mxu0 %v5469_v50  ;;  %v4947_v42 = vsub.f32 %v12605_v36, %v4800_v40  ;;  %v4948_v5 = vsub.f32 %v12609_v1, %v4800_v40  ;;  %v14677_v50 = vld [vmem:[#allocation14_spill] sm:$0xff] }
 0x4f6   : > { %v9693_v8 = vpop.eup %9692  ;;  %9712 = vpow2.f32 %v5155_v25  ;;  %v5159_v0 = vmul.f32 1.442695, %v4946_v10  ;;  %5348 = vadd.xlane.f32.xlu0 %v5347_v61  ;;  %v5472_v37 = vpack.c.bf16 %v9689_v9, %v9685_v47  ;;  %v4803_v58 = vpop.xlane.xlu0 %4802  ;;  %v5350_v34 = vadd.f32 %v9689_v9, %v13289_v12  ;;  %6210 = vmatpush1.bf16.msra.mxu0 %v9498_v27  ;;  %v14680_v12 = vld [vmem:[#allocation73_spill] sm:$0xff] }
 0x4f7   : > { %v13307_v52 = vpop.eup %9694  ;;  %9714 = vpow2.f32 %v5157_v31  ;;  %v5161_v53 = vmul.f32 1.442695, %v4947_v42  ;;  %v5163_v36 = vmul.f32 1.442695, %v4948_v5  ;;  %v4949_v1 = vsub.f32 %v14677_v50, %v4803_v58  ;;  %6211 = vmatprep.subr.bf16.mxu0 %v9503_v62 }
 0x4f8   : > { %v9697_v41 = vpop.eup %9696  ;;  %v5473_v32 = vpack.c.bf16 %v13307_v52, %v13299_v28  ;;  %9716 = vpow2.f32 %v5159_v0  ;;  %5799 = vmatprep.mubr.bf16.mxu0 %v5472_v37  ;;  %v4950_v4 = vsub.f32 %v14678_v48, %v4803_v58  ;;  %5351 = vadd.xlane.f32.xlu1 %v5350_v34  ;;  %v4806_v18 = vpop.xlane.xlu1 %4805  ;;  %v5353_v3 = vadd.f32 %v9693_v8, %v13299_v28 }
 0x4f9   : > { %v13317_v47 = vpop.eup %9698  ;;  %9718 = vpow2.f32 %v5161_v53  ;;  %v5165_v23 = vmul.f32 1.442695, %v4949_v1  ;;  %v4951_v7 = vsub.f32 %v12630_v57, %v4806_v18  ;;  %v4952_v2 = vsub.f32 %v14679_v55, %v4806_v18  ;;  %v9504_v57 = vld [vmem:[%s13928_s5 + $0x20] ss:$8 sps:$4 sm:$0xff]  }
 0x4fa   : > { %v13321_v27 = vpop.eup %9700  ;;  %9720 = vpow2.f32 %v5163_v36  ;;  %v5167_v33 = vmul.f32 1.442695, %v4950_v4  ;;  %5354 = vadd.xlane.f32.xlu0 %v5353_v3  ;;  %v4809_v25 = vpop.xlane.xlu0 %4808  ;;  %v5356_v6 = vadd.f32 %v9697_v41, %v13307_v52  ;;  %v5474_v62 = vpack.c.bf16 %v9697_v41, %v9693_v8  ;;  %6212 = vmatpush1.bf16.msra.mxu0 %v9501_v11  ;;  %v14681_v4 = vld [vmem:[#allocation52_spill] sm:$0xff] }
 0x4fb   : > { %v13324_v9 = vpop.eup %9702  ;;  %9722 = vpow2.f32 %v5165_v23  ;;  %v5169_v10 = vmul.f32 1.442695, %v4951_v7  ;;  %v5171_v40 = vmul.f32 1.442695, %v4952_v2  ;;  %v4953_v61 = vsub.f32 %v12648_v29, %v4809_v25  ;;  %6213 = vmatprep.subr.bf16.mxu0 %v9506_v39  ;;  %v9509_v29 = vld [vmem:[%s13928_s5 + $0x34] ss:$8 sps:$4 sm:$0xff]  }
 0x4fc   : > { %v13330_v31 = vpop.eup %9704  ;;  %v5475_v42 = vpack.c.bf16 %v13324_v9, %v13317_v47  ;;  %9724 = vpow2.f32 %v5167_v33  ;;  %v4954_v5 = vsub.f32 %v12650_v24, %v4809_v25  ;;  %5357 = vadd.xlane.f32.xlu1 %v5356_v6  ;;  %v5359_v8 = vadd.f32 %v13321_v27, %v13317_v47  ;;  %v4812_v0 = vpop.xlane.xlu1 %4811  ;;  %v9512_v7 = vld [vmem:[%s13928_s5 + $0x44] ss:$8 sps:$4 sm:$0xff]   ;;  %v14683_v25 = vld [vmem:[#allocation34_spill] sm:$0xff] }
 0x4fd   : > { %v13340_v37 = vpop.eup %9706  ;;  %9726 = vpow2.f32 %v5169_v10  ;;  %v5173_v58 = vmul.f32 1.442695, %v4953_v61  ;;  %5800 = vmatmul.mubr.bf16.gmra.mrb[100].mxu0 %v5471_v35  ;;  %v4955_v34 = vsub.f32 %v12655_v59, %v4812_v0  ;;  %v4956_v24 = vsub.f32 %v12659_v13, %v4812_v0  ;;  %v9507_v35 = vld [vmem:[%s13928_s5 + $0x30] ss:$8 sps:$4 sm:$0xff]  }
 0x4fe   : > { %v13347_v11 = vpop.eup %9708  ;;  %9728 = vpow2.f32 %v5171_v40  ;;  %v5175_v53 = vmul.f32 1.442695, %v4954_v5  ;;  %5807 = vmatprep.mubr.bf16.mxu0 %v5474_v62  ;;  %5360 = vadd.xlane.f32.xlu0 %v5359_v8  ;;  %v4815_v36 = vpop.xlane.xlu0 %4814  ;;  %v5362_v50 = vadd.f32 %v13330_v31, %v13324_v9  ;;  %v5476_v1 = vpack.c.bf16 %v13330_v31, %v13321_v27  ;;  %v14682_v27 = vld [vmem:[#allocation43_spill] sm:$0xff]  ;;  %v14684_v0 = vld [vmem:[#allocation74_spill] sm:$0xff] }
 0x4ff   : > { %v13353_v39 = vpop.eup %9710  ;;  %9730 = vpow2.f32 %v5173_v58  ;;  %v5177_v22 = vmul.f32 1.442695, %v4955_v34  ;;  %v5179_v59 = vmul.f32 1.442695, %v4956_v24  ;;  %v4957_v13 = vsub.f32 %v14680_v12, %v4815_v36  ;;  %6214 = vmatpush1.bf16.msra.mxu0 %v9504_v57  ;;  %v14685_v24 = vld [vmem:[#allocation64_spill] sm:$0xff]  ;;  %v14686_v12 = vld [vmem:[#allocation81_spill] sm:$0xff] }
 0x500   : > { %v13359_v41 = vpop.eup %9712  ;;  %v5477_v48 = vpack.c.bf16 %v13353_v39, %v13340_v37  ;;  %9732 = vpow2.f32 %v5175_v53  ;;  %v4958_v18 = vsub.f32 %v14681_v4, %v4815_v36  ;;  %5363 = vadd.xlane.f32.xlu1 %v5362_v50  ;;  %v5365_v3 = vadd.f32 %v13347_v11, %v13340_v37  ;;  %v4818_v23 = vpop.xlane.xlu1 %4817  ;;  %6215 = vmatprep.subr.bf16.mxu0 %v9509_v29 }
 0x501   : > { %v13369_v55 = vpop.eup %9714  ;;  %9734 = vpow2.f32 %v5177_v22  ;;  %v5181_v2 = vmul.f32 1.442695, %v4957_v13  ;;  %v4959_v33 = vsub.f32 %v14682_v27, %v4818_v23  ;;  %v4960_v6 = vsub.f32 %v14683_v25, %v4818_v23 }
 0x502   : > { %v13373_v62 = vpop.eup %9716  ;;  %9736 = vpow2.f32 %v5179_v59  ;;  %v5183_v10 = vmul.f32 1.442695, %v4958_v18  ;;  %5366 = vadd.xlane.f32.xlu0 %v5365_v3  ;;  %v4821_v40 = vpop.xlane.xlu0 %4820  ;;  %v5368_v61 = vadd.f32 %v13359_v41, %v13353_v39  ;;  %v5478_v57 = vpack.c.bf16 %v13359_v41, %v13347_v11 }
 0x503   : > { %v13379_v31 = vpop.eup %9718  ;;  %9738 = vpow2.f32 %v5181_v2  ;;  %v5185_v5 = vmul.f32 1.442695, %v4959_v33  ;;  %v5187_v8 = vmul.f32 1.442695, %v4960_v6  ;;  %v4961_v29 = vsub.f32 %v14684_v0, %v4821_v40  ;;  %6216 = vmatpush1.bf16.msra.mxu0 %v9507_v35  ;;  %v14687_v35 = vld [vmem:[#allocation78_spill] sm:$0xff]  ;;  %v14690_v0 = vld [vmem:[#allocation83_spill] sm:$0xff] }
 0x504   : > { %v13382_v58 = vpop.eup %9720  ;;  %v5479_v34 = vpack.c.bf16 %v13379_v31, %v13369_v55  ;;  %9740 = vpow2.f32 %v5183_v10  ;;  %v4962_v53 = vsub.f32 %v14685_v24, %v4821_v40  ;;  %5369 = vadd.xlane.f32.xlu1 %v5368_v61  ;;  %v5371_v36 = vadd.f32 %v13373_v62, %v13369_v55  ;;  %v4824_v50 = vpop.xlane.xlu1 %4823  ;;  %6386 = vmatprep.subr.bf16.mxu0 %v9512_v7  ;;  %v14689_v6 = vld [vmem:[#allocation82_spill] sm:$0xff]  ;;  %v14691_v24 = vld [vmem:[#allocation12_spill] sm:$0xff] }
 0x505   : > { %v13389_v22 = vpop.eup %9722  ;;  %9742 = vpow2.f32 %v5185_v5  ;;  %v5189_v59 = vmul.f32 1.442695, %v4961_v29  ;;  %5808 = vmatmul.mubr.bf16.gmra.mrb[104].mxu0 %v5473_v32  ;;  %v4963_v13 = vsub.f32 %v14686_v12, %v4824_v50  ;;  %v4964_v4 = vsub.f32 %v14687_v35, %v4824_v50  ;;  %v14688_v32 = vld [vmem:[#allocation9_spill] sm:$0xff] }
 0x506   : > { %v13396_v18 = vpop.eup %9724  ;;  %9744 = vpow2.f32 %v5187_v8  ;;  %v5191_v3 = vmul.f32 1.442695, %v4962_v53  ;;  %5815 = vmatprep.mubr.bf16.mxu0 %v5476_v1  ;;  %5372 = vadd.xlane.f32.xlu0 %v5371_v36  ;;  %v4827_v23 = vpop.xlane.xlu0 %4826  ;;  %v5374_v7 = vadd.f32 %v13382_v58, %v13379_v31  ;;  %v5480_v2 = vpack.c.bf16 %v13382_v58, %v13373_v62 }
 0x507   : > { %v13402_v27 = vpop.eup %9726  ;;  %9746 = vpow2.f32 %v5189_v59  ;;  %v5193_v28 = vmul.f32 1.442695, %v4963_v13  ;;  %v5195_v52 = vmul.f32 1.442695, %v4964_v4  ;;  %v4965_v33 = vsub.f32 %v14688_v32, %v4827_v23  ;;  %v14693_v32 = vld [vmem:[#allocation84_spill] sm:$0xff] }
 0x508   : > { %v13405_v25 = vpop.eup %9728  ;;  %v5481_v1 = vpack.c.bf16 %v13402_v27, %v13389_v22  ;;  %9748 = vpow2.f32 %v5191_v3  ;;  %v4966_v10 = vsub.f32 %v14689_v6, %v4827_v23  ;;  %5375 = vadd.xlane.f32.xlu1 %v5374_v7  ;;  %v5377_v40 = vadd.f32 %v13396_v18, %v13389_v22  ;;  %v4830_v61 = vpop.xlane.xlu1 %4829  ;;  %v14692_v23 = vld [vmem:[#allocation13_spill] sm:$0xff] }
 0x509   : > { %v13412_v5 = vpop.eup %9730  ;;  %9750 = vpow2.f32 %v5193_v28  ;;  %v5197_v8 = vmul.f32 1.442695, %v4965_v33  ;;  %v4967_v29 = vsub.f32 %v14690_v0, %v4830_v61  ;;  %v4968_v53 = vsub.f32 %v14691_v24, %v4830_v61 }
 0x50a   : > { %v13416_v36 = vpop.eup %9732  ;;  %9752 = vpow2.f32 %v5195_v52  ;;  %v5199_v50 = vmul.f32 1.442695, %v4966_v10  ;;  %5378 = vadd.xlane.f32.xlu0 %v5377_v40  ;;  %v4833_v59 = vpop.xlane.xlu0 %4832  ;;  %v5380_v12 = vadd.f32 %v13405_v25, %v13402_v27  ;;  %v5482_v13 = vpack.c.bf16 %v13405_v25, %v13396_v18 }
 0x50b   : > { %v13422_v35 = vpop.eup %9734  ;;  %9754 = vpow2.f32 %v5197_v8  ;;  %v5201_v4 = vmul.f32 1.442695, %v4967_v29  ;;  %v5203_v3 = vmul.f32 1.442695, %v4968_v53  ;;  %v4969_v7 = vsub.f32 %v14692_v23, %v4833_v59  ;;  %v14694_v8 = vld [vmem:[#allocation85_spill] sm:$0xff]  ;;  %v14695_v29 = vld [vmem:[#allocation86_spill] sm:$0xff] }
 0x50c   : > { %v13425_v28 = vpop.eup %9736  ;;  %v5483_v52 = vpack.c.bf16 %v13422_v35, %v13412_v5  ;;  %9756 = vpow2.f32 %v5199_v50  ;;  %v4970_v33 = vsub.f32 %v14693_v32, %v4833_v59  ;;  %5381 = vadd.xlane.f32.xlu1 %v5380_v12  ;;  %v5383_v6 = vadd.f32 %v13416_v36, %v13412_v5  ;;  %v4836_v10 = vpop.xlane.xlu1 %4835 }
 0x50d   : > { %v9739_v40 = vpop.eup %9738  ;;  %9758 = vpow2.f32 %v5201_v4  ;;  %v5205_v61 = vmul.f32 1.442695, %v4969_v7  ;;  %5816 = vmatmul.mubr.bf16.gmra.mrb[108].mxu0 %v5475_v42  ;;  %v4971_v0 = vsub.f32 %v14694_v8, %v4836_v10  ;;  %v4972_v24 = vsub.f32 %v14695_v29, %v4836_v10 }
 0x50e   : > { %v9741_v53 = vpop.eup %9740  ;;  %9760 = vpow2.f32 %v5203_v3  ;;  %v5207_v50 = vmul.f32 1.442695, %v4970_v33  ;;  %5823 = vmatprep.mubr.bf16.mxu0 %v5478_v57  ;;  %5384 = vadd.xlane.f32.xlu0 %v5383_v6  ;;  %v5247_v59 = vpop.xlane.xlu0 %5246  ;;  %v5386_v12 = vadd.f32 %v13425_v28, %v13422_v35  ;;  %v5484_v47 = vpack.c.bf16 %v13425_v28, %v13416_v36 }
 0x50f   : > { %v9743_v9 = vpop.eup %9742  ;;  %9762 = vpow2.f32 %v5205_v61  ;;  %v5209_v42 = vmul.f32 1.442695, %v4971_v0  ;;  %v5211_v4 = vmul.f32 1.442695, %v4972_v24  ;;  %v5389_v23 = vadd.f32 %v9741_v53, %v9739_v40 }
 0x510   : > { %v9745_v7 = vpop.eup %9744  ;;  %v5485_v3 = vpack.c.bf16 %v9743_v9, %v9739_v40  ;;  %9764 = vpow2.f32 %v5207_v50  ;;  %5387 = vadd.xlane.f32.xlu1 %v5386_v12  ;;  %v5250_v32 = vpop.xlane.xlu1 %5249 }
 0x511   : > { %v9747_v11 = vpop.eup %9746  ;;  %9766 = vpow2.f32 %v5209_v42  ;;  %v5486_v41 = vpack.c.bf16 %v9745_v7, %v9741_v53  ;;  %v5392_v57 = vadd.f32 %v9745_v7, %v9743_v9 }
 0x512   : > { %v9749_v33 = vpop.eup %9748  ;;  %9768 = vpow2.f32 %v5211_v4  ;;  %5390 = vadd.xlane.f32.xlu0 %v5389_v23  ;;  %v4839_v6 = vpop.xlane.xlu0 %4838 }
 0x513   : > { %v9751_v10 = vpop.eup %9750  ;;  %9770 = vrcp.f32 %v5247_v59  ;;  %v4973_v61 = vsub.f32 %v13088_v54, %v4839_v6  ;;  %v4974_v8 = vsub.f32 %v13090_v63, %v4839_v6  ;;  %5888 = vmatprep.mubr.bf16.mxu1 %v5486_v41  ;;  %v5395_v0 = vadd.f32 %v9749_v33, %v9747_v11  ;;  %v14696_v59 = vld [vmem:[#allocation87_spill] sm:$0xff] }
 0x514   : > { %v9753_v40 = vpop.eup %9752  ;;  %v5487_v29 = vpack.c.bf16 %v9751_v10, %v9747_v11  ;;  %9772 = vrcp.f32 %v5250_v32  ;;  %5393 = vadd.xlane.f32.xlu1 %v5392_v57  ;;  %5889 = vmatmul.mubr.bf16.vlgmr.msra.gmra.mrb[224].mxu1 %v5485_v3  ;;  %v4842_v24 = vpop.xlane.xlu1 %4841 }
 0x515   : > { %v13446_v53 = vpop.eup %9754  ;;  %v5213_v50 = vmul.f32 1.442695, %v4973_v61  ;;  %v5215_v12 = vmul.f32 1.442695, %v4974_v8  ;;  %5824 = vmatmul.mubr.bf16.gmra.mrb[112].mxu0 %v5477_v48  ;;  %v4975_v54 = vsub.f32 %v13092_v14, %v4842_v24  ;;  %v4976_v63 = vsub.f32 %v14696_v59, %v4842_v24 }
 0x516   : > { %v9757_v9 = vpop.eup %9756  ;;  %5831 = vmatprep.mubr.bf16.mxu0 %v5480_v2  ;;  %5396 = vadd.xlane.f32.xlu0 %v5395_v0  ;;  %v5253_v42 = vpop.xlane.xlu0 %5252  ;;  %v5488_v4 = vpack.c.bf16 %v9753_v40, %v9749_v33  ;;  %v5398_v23 = vadd.f32 %v9753_v40, %v9751_v10  ;;  %v14697_v33 = vld [vmem:[#allocation88_spill] sm:$0xff]  ;;  %v14698_v10 = vld [vmem:[#allocation89_spill] sm:$0xff] }
 0x517   : > { %v13456_v7 = vpop.eup %9758  ;;  %9774 = vpow2.f32 %v5213_v50  ;;  %v5217_v3 = vmul.f32 1.442695, %v4975_v54  ;;  %v5219_v32 = vmul.f32 1.442695, %v4976_v63  ;;  %v5401_v37 = vadd.f32 %v9757_v9, %v13446_v53  ;;  %v14699_v54 = vld [vmem:[#allocation90_spill] sm:$0xff]  ;;  %v14700_v63 = vld [vmem:[#allocation91_spill] sm:$0xff] }
 0x518   : > { %v9761_v39 = vpop.eup %9760  ;;  %v5489_v14 = vpack.c.bf16 %v13456_v7, %v13446_v53  ;;  %9776 = vpow2.f32 %v5215_v12  ;;  %5896 = vmatprep.mubr.bf16.mxu1 %v5488_v4  ;;  %5399 = vadd.xlane.f32.xlu1 %v5398_v23  ;;  %v5256_v48 = vpop.xlane.xlu1 %5255 }
 0x519   : > { %v13461_v62 = vpop.eup %9762  ;;  %9778 = vpow2.f32 %v5217_v3  ;;  %v5404_v58 = vadd.f32 %v9761_v39, %v13456_v7  ;;  %v5490_v2 = vpack.c.bf16 %v9761_v39, %v9757_v9  ;;  %v14702_v39 = vld [vmem:[#allocation93_spill] sm:$0xff] }
 0x51a   : > { %v9765_v11 = vpop.eup %9764  ;;  %9780 = vpow2.f32 %v5219_v32  ;;  %5402 = vadd.xlane.f32.xlu0 %v5401_v37  ;;  %v4845_v41 = vpop.xlane.xlu0 %4844 }
 0x51b   : > { %v13464_v57 = vpop.eup %9766  ;;  %9782 = vrcp.f32 %v5253_v42  ;;  %v4977_v6 = vsub.f32 %v14697_v33, %v4845_v41  ;;  %v4978_v61 = vsub.f32 %v14698_v10, %v4845_v41  ;;  %v5407_v8 = vadd.f32 %v9765_v11, %v13461_v62 }
 0x51c   : > { %v9769_v0 = vpop.eup %9768  ;;  %v5491_v40 = vpack.c.bf16 %v13464_v57, %v13461_v62  ;;  %9784 = vrcp.f32 %v5256_v48  ;;  %5405 = vadd.xlane.f32.xlu1 %v5404_v58  ;;  %5897 = vmatmul.mubr.bf16.gmra.mrb[228].mxu1 %v5487_v29  ;;  %v4848_v24 = vpop.xlane.xlu1 %4847 }
 0x51d   : > { %v9771_v53 = vpop.eup %9770  ;;  %v5221_v50 = vmul.f32 1.442695, %v4977_v6  ;;  %v5223_v12 = vmul.f32 1.442695, %v4978_v61  ;;  %5832 = vmatmul.mubr.bf16.gmra.mrb[116].mxu0 %v5479_v34  ;;  %5904 = vmatprep.mubr.bf16.mxu1 %v5490_v2  ;;  %v4979_v59 = vsub.f32 %v14699_v54, %v4848_v24  ;;  %v4980_v9 = vsub.f32 %v14700_v63, %v4848_v24  ;;  %v14703_v61 = vld [vmem:[#allocation94_spill] sm:$0xff]  ;;  %v14706_v63 = vld [vmem:[#allocation97_spill] sm:$0xff] }
 0x51e   : > { %v9773_v42 = vpop.eup %9772  ;;  %v13477_v4 = vmul.f32 %v9771_v53, %v13140_v26  ;;  %5839 = vmatprep.mubr.bf16.mxu0 %v5482_v13  ;;  %5408 = vadd.xlane.f32.xlu0 %v5407_v8  ;;  %v5259_v29 = vpop.xlane.xlu0 %5258  ;;  %v5410_v23 = vadd.f32 %v9769_v0, %v13464_v57  ;;  %v5492_v7 = vpack.c.bf16 %v9769_v0, %v9765_v11  ;;  %v14704_v0 = vld [vmem:[#allocation95_spill] sm:$0xff] }
 0x51f   : > { %v13484_v55 = vmul.f32 %v9773_v42, %v13142_v49  ;;  %9786 = vpow2.f32 %v5221_v50  ;;  %v5225_v31 = vmul.f32 1.442695, %v4979_v59  ;;  %v5227_v34 = vmul.f32 1.442695, %v4980_v9  ;;  %v14701_v49 = vld [vmem:[#allocation92_spill] sm:$0xff] }
 0x520   : > { %9788 = vpow2.f32 %v5223_v12  ;;  %5411 = vadd.xlane.f32.xlu1 %v5410_v23  ;;  %v5262_v3 = vpop.xlane.xlu1 %5261  ;;  %v14705_v59 = vld [vmem:[#allocation96_spill] sm:$0xff] }
 0x521   : > { %v13486_v26 = vpop.eup %9774  ;;  %v6081_v18 = vpack.c.bf16 %v13484_v55, %v13477_v4  ;;  %9790 = vpow2.f32 %v5225_v31  ;;  %v9513_v4 = vld [vmem:[%s13928_s5 + $0x50] ss:$8 sps:$4 sm:$0xff]  }
 0x522   : > { %v13490_v25 = vpop.eup %9776  ;;  %9792 = vpow2.f32 %v5227_v34  ;;  %v4851_v13 = vpop.xlane.xlu0 %4850 }
 0x523   : > { %v13492_v32 = vpop.eup %9778  ;;  %9794 = vrcp.f32 %v5259_v29  ;;  %v4981_v37 = vsub.f32 %v14701_v49, %v4851_v13  ;;  %v4982_v48 = vsub.f32 %v14702_v39, %v4851_v13  ;;  %v5413_v58 = vadd.f32 %v13490_v25, %v13486_v26 }
 0x524   : > { %v9781_v2 = vpop.eup %9780  ;;  %v5493_v11 = vpack.c.bf16 %v13492_v32, %v13486_v26  ;;  %9796 = vrcp.f32 %v5262_v3  ;;  %5905 = vmatmul.mubr.bf16.gmra.mrb[232].mxu1 %v5489_v14  ;;  %v4854_v41 = vpop.xlane.xlu1 %4853 }
 0x525   : > { %v9783_v33 = vpop.eup %9782  ;;  %v5229_v6 = vmul.f32 1.442695, %v4981_v37  ;;  %v5231_v10 = vmul.f32 1.442695, %v4982_v48  ;;  %5840 = vmatmul.mubr.bf16.gmra.mrb[120].mxu0 %v5481_v1  ;;  %5414 = vadd.xlane.f32.xlu0 %v5413_v58  ;;  %v4983_v8 = vsub.f32 %v14703_v61, %v4854_v41  ;;  %v4984_v24 = vsub.f32 %v14704_v0, %v4854_v41 }
 0x526   : > { %v9785_v53 = vpop.eup %9784  ;;  %v13506_v50 = vmul.f32 %v9783_v33, %v13146_v15  ;;  %5847 = vmatprep.mubr.bf16.mxu0 %v5484_v47  ;;  %5912 = vmatprep.mubr.bf16.mxu1 %v5492_v7  ;;  %v4857_v14 = vpop.xlane.xlu0 %4856  ;;  %v5416_v12 = vadd.f32 %v9781_v2, %v13492_v32  ;;  %v5494_v22 = vpack.c.bf16 %v9781_v2, %v13490_v25 }
 0x527   : > { %v13514_v27 = vmul.f32 %v9785_v53, %v13148_v17  ;;  %9798 = vpow2.f32 %v5229_v6  ;;  %v5233_v1 = vmul.f32 1.442695, %v4983_v8  ;;  %v5235_v54 = vmul.f32 1.442695, %v4984_v24  ;;  %v14707_v17 = vld [vmem:[#allocation98_spill] sm:$0xff] }
 0x528   : > { %9800 = vpow2.f32 %v5231_v10  ;;  %v4985_v15 = vsub.f32 %v14705_v59, %v4857_v14  ;;  %v4986_v9 = vsub.f32 %v14706_v63, %v4857_v14  ;;  %5417 = vadd.xlane.f32.xlu1 %v5416_v12  ;;  %v4860_v36 = vpop.xlane.xlu1 %4859  ;;  %v10090_v6 = vmov 0   ;;  %v9515_v53 = vld [vmem:[%s13928_s5 + $0x54] ss:$8 sps:$4 sm:$0xff]  }
 0x529   : > { %v13518_v28 = vpop.eup %9786  ;;  %v6082_v47 = vpack.c.bf16 %v13514_v27, %v13506_v50  ;;  %9802 = vpow2.f32 %v5233_v1  ;;  %v4987_v42 = vsub.f32 %v13131_v38, %v4860_v36  ;;  %v4988_v29 = vsub.f32 %v14707_v17, %v4860_v36  ;;  %v9524_v50 = vld [vmem:[%s13928_s5 + $0x84] ss:$8 sps:$4 sm:$0xff]  }
 0x52a   : > { %v9789_v23 = vpop.eup %9788  ;;  %9804 = vpow2.f32 %v5235_v54  ;;  %v5237_v7 = vmul.f32 1.442695, %v4985_v15  ;;  %v5239_v31 = vmul.f32 1.442695, %v4986_v9  ;;  %v5265_v34 = vpop.xlane.xlu0 %5264 }
 0x52b   : > { %v13524_v3 = vpop.eup %9790  ;;  %v5241_v25 = vmul.f32 1.442695, %v4987_v42  ;;  %v5243_v13 = vmul.f32 1.442695, %v4988_v29  ;;  %9806 = vrcp.f32 %v5265_v34  ;;  %v5419_v49 = vadd.f32 %v9789_v23, %v13518_v28  ;;  %v9518_v42 = vld [vmem:[%s13928_s5 + $0x64] ss:$8 sps:$4 sm:$0xff]  }
 0x52c   : > { %v9793_v37 = vpop.eup %9792  ;;  %v5495_v39 = vpack.c.bf16 %v13524_v3, %v13518_v28  ;;  %9808 = vpow2.f32 %v5237_v7  ;;  %5913 = vmatmul.mubr.bf16.gmra.mrb[236].mxu1 %v5491_v40  ;;  %v5268_v38 = vpop.xlane.xlu1 %5267  ;;  %v9516_v7 = vld [vmem:[%s13928_s5 + $0x60] ss:$8 sps:$4 sm:$0xff]  }
 0x52d   : > { %v9795_v48 = vpop.eup %9794  ;;  %9810 = vpow2.f32 %v5239_v31  ;;  %5848 = vmatmul.mubr.bf16.gmra.mrb[124].mxu0 %v5483_v52  ;;  %5420 = vadd.xlane.f32.xlu0 %v5419_v49  ;;  %v5422_v58 = vadd.f32 %v9793_v37, %v13524_v3  ;;  %v5496_v2 = vpack.c.bf16 %v9793_v37, %v9789_v23  ;;  %v9519_v37 = vld [vmem:[%s13928_s5 + $0x70] ss:$8 sps:$4 sm:$0xff]  }
 0x52e   : > { %v9797_v41 = vpop.eup %9796  ;;  %9812 = vpow2.f32 %v5241_v25  ;;  %5920 = vmatprep.mubr.bf16.mxu1 %v5494_v22  ;;  %v5271_v33 = vpop.xlane.xlu0 %5270  ;;  %6241 = vmatprep.mubr.bf16.mxu0 %v10090_v6  ;;  %v13538_v62 = vmul.f32 %v9795_v48, %v13151_v44  ;;  %v9521_v25 = vld [vmem:[%s13928_s5 + $0x74] ss:$8 sps:$4 sm:$0xff]  }
 0x52f   : > { %v13541_v57 = vmul.f32 %v9797_v41, %v13154_v56  ;;  %9814 = vpow2.f32 %v5243_v13  ;;  %5423 = vadd.xlane.f32.xlu1 %v5422_v58  ;;  %v9510_v56 = vld [vmem:[%s13928_s5 + $0x40] ss:$8 sps:$4 sm:$0xff]  }
 0x530   : > { %9816 = vrcp.f32 %v5268_v38  ;;  %v5274_v5 = vpop.xlane.xlu1 %5273 }
 0x531   : > { %v13543_v35 = vpop.eup %9798  ;;  %v6083_v52 = vpack.c.bf16 %v13541_v57, %v13538_v62  ;;  %9818 = vrcp.f32 %v5271_v33 }
 0x532   : > { %v9801_v40 = vpop.eup %9800  ;;  %9820 = vrcp.f32 %v5274_v5  ;;  %v5277_v10 = vpop.xlane.xlu0 %5276 }
 0x533   : > { %v13547_v61 = vpop.eup %9802  ;;  %9822 = vrcp.f32 %v5277_v10  ;;  %v5425_v44 = vadd.f32 %v9801_v40, %v13543_v35 }
 0x534   : > { %v9805_v8 = vpop.eup %9804  ;;  %v5497_v0 = vpack.c.bf16 %v13547_v61, %v13543_v35  ;;  %5921 = vmatmul.mubr.bf16.gmra.mrb[240].mxu1 %v5493_v11  ;;  %v5280_v24 = vpop.xlane.xlu1 %5279 }
 0x535   : > { %v9807_v14 = vpop.eup %9806  ;;  %7431 = vmatmul.mubr.msk.bf16.vlgmr.msra.gmra.mrb[128].mxu0 %vm3928_vm0, %v6081_v18  ;;  %5426 = vadd.xlane.f32.xlu0 %v5425_v44  ;;  %9824 = vrcp.f32 %v5280_v24  ;;  %v5428_v12 = vadd.f32 %v9805_v8, %v13547_v61  ;;  %v5498_v22 = vpack.c.bf16 %v9805_v8, %v9801_v40 }
 0x536   : > { %v13566_v1 = vpop.eup %9808  ;;  %5928 = vmatprep.mubr.bf16.mxu1 %v5496_v2  ;;  %v5283_v26 = vpop.xlane.xlu0 %5282  ;;  %6251 = vmatprep.mubr.bf16.mxu0 %v10090_v6  ;;  %v6023_v29 = vmul.f32 %v9807_v14, %v13166_v43 }
 0x537   : > { %v9811_v32 = vpop.eup %9810  ;;  %9826 = vrcp.f32 %v5283_v26  ;;  %5429 = vadd.xlane.f32.xlu1 %v5428_v12  ;;  %6387 = vmatpush1.bf16.msra.mxu0 %v9510_v56  ;;  %v9527_v12 = vld [vmem:[%s13928_s5 + $0x94] ss:$8 sps:$4 sm:$0xff]  }
 0x538   : > { %v9813_v55 = vpop.eup %9812  ;;  %v5431_v18 = vadd.f32 %v9811_v32, %v13566_v1  ;;  %v5286_v11 = vpop.xlane.xlu1 %5285  ;;  %6388 = vmatprep.subr.bf16.mxu0 %v9515_v53 }
 0x539   : > { %v9815_v54 = vpop.eup %9814  ;;  %v5499_v59 = vpack.c.bf16 %v9813_v55, %v13566_v1  ;;  %9828 = vrcp.f32 %v5286_v11 }
 0x53a   : > { %v9817_v15 = vpop.eup %9816  ;;  %5432 = vadd.xlane.f32.xlu0 %v5431_v18  ;;  %v5289_v63 = vpop.xlane.xlu0 %5288  ;;  %v5434_v9 = vadd.f32 %v9815_v54, %v9813_v55  ;;  %v5500_v36 = vpack.c.bf16 %v9815_v54, %v9811_v32  ;;  %v9530_v54 = vld [vmem:[%s13928_s5 + $0xa4] ss:$8 sps:$4 sm:$0xff]  }
 0x53b   : > { %v9819_v17 = vpop.eup %9818  ;;  %v6024_v23 = vmul.f32 %v9817_v15, %v13169_v46  ;;  %9830 = vrcp.f32 %v5289_v63  ;;  %6389 = vmatpush1.bf16.msra.mxu0 %v9513_v4  ;;  %v9525_v4 = vld [vmem:[%s13928_s5 + $0x90] ss:$8 sps:$4 sm:$0xff]  }
 0x53c   : > { %v9821_v31 = vpop.eup %9820  ;;  %5435 = vadd.xlane.f32.xlu1 %v5434_v9  ;;  %5929 = vmatmul.mubr.bf16.gmra.mrb[244].mxu1 %v5495_v39  ;;  %v5292_v34 = vpop.xlane.xlu1 %5291  ;;  %v6025_v46 = vmul.f32 %v9819_v17, %v13178_v19 }
 0x53d   : > { %v9823_v43 = vpop.eup %9822  ;;  %v6084_v13 = vpack.c.bf16 %v6024_v23, %v6023_v29  ;;  %v6026_v49 = vmul.f32 %v9821_v31, %v13181_v16  ;;  %7432 = vmatmul.mubr.msk.bf16.gmra.mrb[132].mxu0 %vm3928_vm0, %v6082_v47  ;;  %5936 = vmatprep.mubr.bf16.mxu1 %v5498_v22  ;;  %9832 = vrcp.f32 %v5292_v34  ;;  %v9533_v23 = vld [vmem:[%s13928_s5 + $0xb4] ss:$8 sps:$4 sm:$0xff]  }
 0x53e   : > { %6261 = vmatprep.mubr.bf16.mxu0 %v10090_v6  ;;  %6390 = vmatprep.subr.bf16.mxu0 %v9518_v42  ;;  %v6027_v19 = vmul.f32 %v9823_v43, %v13187_v30 }
 0x53f   : > { %v9825_v28 = vpop.eup %9824  ;;  %v6085_v3 = vpack.c.bf16 %v6026_v49, %v6025_v46  ;;  %6391 = vmatpush1.bf16.msra.mxu0 %v9516_v7 }
 0x540   : > { %v6028_v16 = vmul.f32 %v9825_v28, %v13189_v51  ;;  %6392 = vmatprep.subr.bf16.mxu0 %v9521_v25 }
 0x541   : > { %v9827_v27 = vpop.eup %9826 }
 0x542   : > { %v6086_v47 = vpack.c.bf16 %v6028_v16, %v6027_v19  ;;  %v6029_v38 = vmul.f32 %v9827_v27, %v13204_v20 }
 0x543   : > { %v9829_v39 = vpop.eup %9828  ;;  %6393 = vmatpush1.bf16.msra.mxu0 %v9519_v37 }
 0x544   : > { %v6030_v48 = vmul.f32 %v9829_v39, %v13209_v60  ;;  %5937 = vmatmul.mubr.bf16.gmra.mrb[248].mxu1 %v5497_v0  ;;  %6563 = vmatprep.subr.bf16.mxu0 %v9524_v50  ;;  %v9522_v0 = vld [vmem:[%s13928_s5 + $0x80] ss:$8 sps:$4 sm:$0xff]  }
 0x545   : > { %v9831_v30 = vpop.eup %9830  ;;  %7433 = vmatmul.mubr.msk.bf16.gmra.mrb[136].mxu0 %vm3928_vm0, %v6083_v52  ;;  %5944 = vmatprep.mubr.bf16.mxu1 %v5500_v36  ;;  %v9528_v36 = vld [vmem:[%s13928_s5 + $0xa0] ss:$8 sps:$4 sm:$0xff]  }
 0x546   : > { %v6087_v51 = vpack.c.bf16 %v6030_v48, %v6029_v38  ;;  %6271 = vmatprep.mubr.bf16.mxu0 %v10090_v6  ;;  %v6031_v20 = vmul.f32 %v9831_v30, %v13224_v21  ;;  %v5295_v21 = vpop.xlane.xlu0 %5294 }
 0x547   : > { %v9833_v58 = vpop.eup %9832  ;;  %9834 = vrcp.f32 %v5295_v21 }
 0x548   : > { %v6032_v60 = vmul.f32 %v9833_v58, %v13229_v45  ;;  %v5298_v45 = vpop.xlane.xlu1 %5297 }
 0x549   : > { %9836 = vrcp.f32 %v5298_v45 }
 0x54a   : > { %v6088_v2 = vpack.c.bf16 %v6032_v60, %v6031_v20  ;;  %v5301_v41 = vpop.xlane.xlu0 %5300 }
 0x54b   : > { %9838 = vrcp.f32 %v5301_v41 }
 0x54c   : > { %5945 = vmatmul.mubr.bf16.gmra.mrb[252].mxu1 %v5499_v59 }
 0x54d   : > { %7434 = vmatmul.mubr.msk.bf16.gmra.mrb[140].mxu0 %vm3928_vm0, %v6084_v13  ;;  %v9531_v13 = vld [vmem:[%s13928_s5 + $0xb0] ss:$8 sps:$4 sm:$0xff]  }
 0x54e   : > { %6281 = vmatprep.mubr.bf16.mxu0 %v10090_v6  ;;  %v5304_v33 = vpop.xlane.xlu1 %5303 }
 0x54f   : > { %9840 = vrcp.f32 %v5304_v33 }
 0x551   : > { %v9835_v40 = vpop.eup %9834 }
 0x552   : > { %v5307_v8 = vpop.xlane.xlu0 %5306 }
 0x553   : > { %v9837_v61 = vpop.eup %9836  ;;  %9842 = vrcp.f32 %v5307_v8 }
 0x555   : > { %7435 = vmatmul.mubr.msk.bf16.gmra.mrb[144].mxu0 %vm3928_vm0, %v6085_v3  ;;  %v9839_v55 = vpop.eup %9838  ;;  %v9536_v3 = vld [vmem:[%s13928_s5 + $0xc4] ss:$8 sps:$4 sm:$0xff]  }
 0x556   : > { %6291 = vmatprep.mubr.bf16.mxu0 %v10090_v6  ;;  %v5310_v24 = vpop.xlane.xlu1 %5309 }
 0x557   : > { %9844 = vrcp.f32 %v5310_v24 }
 0x559   : > { %v9841_v59 = vpop.eup %9840 }
 0x55a   : > { %v5313_v18 = vpop.xlane.xlu0 %5312 }
 0x55b   : > { %9846 = vrcp.f32 %v5313_v18 }
 0x55d   : > { %7436 = vmatmul.mubr.msk.bf16.gmra.mrb[148].mxu0 %vm3928_vm0, %v6086_v47  ;;  %v5316_v15 = vpop.xlane.xlu1 %5315  ;;  %v9843_v46 = vpop.eup %9842 }
 0x55e   : > { %6301 = vmatprep.mubr.bf16.mxu0 %v10090_v6  ;;  %9848 = vrcp.f32 %v5316_v15 }
 0x561   : > { %v9845_v37 = vpop.eup %9844 }
 0x562   : > { %v5319_v42 = vpop.xlane.xlu0 %5318 }
 0x563   : > { %9850 = vrcp.f32 %v5319_v42 }
 0x565   : > { %7437 = vmatmul.mubr.msk.bf16.gmra.mrb[152].mxu0 %vm3928_vm0, %v6087_v51  ;;  %v5322_v7 = vpop.xlane.xlu1 %5321  ;;  %v9847_v20 = vpop.eup %9846 }
 0x566   : > { %6311 = vmatprep.mubr.bf16.mxu0 %v10090_v6  ;;  %9852 = vrcp.f32 %v5322_v7 }
 0x568   : > { %v9849_v21 = vpop.eup %9848 }
 0x56a   : > { %v5325_v49 = vpop.xlane.xlu0 %5324 }
 0x56b   : > { %9854 = vrcp.f32 %v5325_v49 }
 0x56d   : > { %7438 = vmatmul.mubr.msk.bf16.gmra.mrb[156].mxu0 %vm3928_vm0, %v6088_v2  ;;  %v5328_v19 = vpop.xlane.xlu1 %5327 }
 0x56e   : > { %6418 = vmatprep.mubr.bf16.mxu0 %v10090_v6  ;;  %9856 = vrcp.f32 %v5328_v19 }
 0x573   : > { %v5331_v27 = vpop.xlane.xlu0 %5330 }
 0x574   : > { %9858 = vrcp.f32 %v5331_v27 }
 0x575   : > { %v5334_v38 = vpop.xlane.xlu1 %5333 }
 0x576   : > { %9860 = vrcp.f32 %v5334_v38 }
 0x57b   : > { %v5337_v60 = vpop.xlane.xlu0 %5336 }
 0x57c   : > { %9862 = vrcp.f32 %v5337_v60 }
 0x57d   : > { %v5340_v45 = vpop.xlane.xlu1 %5339 }
 0x57e   : > { %9864 = vrcp.f32 %v5340_v45 }
 0x58c   : > { %v8856_v62 = vpop.f32.mrb[192].mxu1 }
 0x58d   : > { %v8857_v57 = vpop.f32.mrb[193].mxu1 }
 0x58e   : > { %v8858_v5 = vadd.f32 %v8857_v57, %v8856_v62  ;;  %v8859_v35 = vpop.f32.mrb[194].mxu1 }
 0x58f   : > { %v8860_v52 = vpop.f32.mrb[195].mxu1 }
 0x590   : > { %v8861_v10 = vadd.f32 %v8860_v52, %v8859_v35  ;;  %v6033_v44 = vmul.f32 %v9835_v40, %v8858_v5  ;;  %v5343_v35 = vpop.xlane.xlu0 %5342 }
 0x591   : > { %9866 = vrcp.f32 %v5343_v35 }
 0x592   : > { %v6034_v56 = vmul.f32 %v9837_v61, %v8861_v10  ;;  %v5346_v10 = vpop.xlane.xlu1 %5345 }
 0x593   : > { %9868 = vrcp.f32 %v5346_v10 }
 0x594   : > { %v6089_v53 = vpack.c.bf16 %v6034_v56, %v6033_v44  ;;  %v8862_v14 = vpop.f32.mrb[196].mxu1  ;;  %v9851_v44 = vpop.eup %9850 }
 0x595   : > { %v8863_v22 = vpop.f32.mrb[197].mxu1  ;;  %v9853_v8 = vpop.eup %9852 }
 0x596   : > { %v8864_v1 = vadd.f32 %v8863_v22, %v8862_v14  ;;  %v8865_v26 = vpop.f32.mrb[198].mxu1  ;;  %7447 = vmatmul.mubr.msk.bf16.vlgmr.msra.gmra.mrb[128].mxu0 %vm3928_vm0, %v6089_v53  ;;  %v5349_v53 = vpop.xlane.xlu0 %5348 }
 0x597   : > { %v8866_v32 = vpop.f32.mrb[199].mxu1  ;;  %6564 = vmatpush1.bf16.msra.mxu0 %v9522_v0  ;;  %6428 = vmatprep.mubr.bf16.mxu0 %v10090_v6  ;;  %v5352_v22 = vpop.xlane.xlu1 %5351  ;;  %9870 = vrcp.f32 %v5349_v53 }
 0x598   : > { %v8867_v11 = vadd.f32 %v8866_v32, %v8865_v26  ;;  %6565 = vmatprep.subr.bf16.mxu0 %v9527_v12  ;;  %v6035_v63 = vmul.f32 %v9839_v55, %v8864_v1  ;;  %v9855_v55 = vpop.eup %9854  ;;  %9872 = vrcp.f32 %v5352_v22 }
 0x59a   : > { %v6036_v9 = vmul.f32 %v9841_v59, %v8867_v11  ;;  %v9857_v11 = vpop.eup %9856 }
 0x59b   : > { %6566 = vmatpush1.bf16.msra.mxu0 %v9525_v4  ;;  %v9859_v7 = vpop.eup %9858 }
 0x59c   : > { %v6090_v17 = vpack.c.bf16 %v6036_v9, %v6035_v63  ;;  %v8868_v29 = vpop.f32.mrb[200].mxu1  ;;  %6567 = vmatprep.subr.bf16.mxu0 %v9530_v54  ;;  %v5355_v54 = vpop.xlane.xlu0 %5354 }
 0x59d   : > { %v8869_v31 = vpop.f32.mrb[201].mxu1  ;;  %v5358_v63 = vpop.xlane.xlu1 %5357  ;;  %9874 = vrcp.f32 %v5355_v54 }
 0x59e   : > { %v8870_v34 = vadd.f32 %v8869_v31, %v8868_v29  ;;  %v8871_v25 = vpop.f32.mrb[202].mxu1  ;;  %7448 = vmatmul.mubr.msk.bf16.gmra.mrb[132].mxu0 %vm3928_vm0, %v6090_v17  ;;  %9876 = vrcp.f32 %v5358_v63 }
 0x59f   : > { %v8872_v43 = vpop.f32.mrb[203].mxu1  ;;  %6438 = vmatprep.mubr.bf16.mxu0 %v10090_v6  ;;  %6568 = vmatpush1.bf16.msra.mxu0 %v9528_v36 }
 0x5a0   : > { %v8873_v28 = vadd.f32 %v8872_v43, %v8871_v25  ;;  %6569 = vmatprep.subr.bf16.mxu0 %v9533_v23  ;;  %v6037_v16 = vmul.f32 %v9843_v46, %v8870_v34  ;;  %v13661_v31 = vpop.xlane.xlu0 %5360  ;;  %v9861_v25 = vpop.eup %9860 }
 0x5a1   : > { %v13663_v43 = vpop.xlane.xlu1 %5363  ;;  %9878 = vrcp.f32 %v13661_v31 }
 0x5a2   : > { %v6038_v50 = vmul.f32 %v9845_v37, %v8873_v28  ;;  %9880 = vrcp.f32 %v13663_v43  ;;  %v9543_v43 = vld [vmem:[%s13928_s5 + $0xf0] ss:$8 sps:$4 sm:$0xff]  }
 0x5a3   : > { %6570 = vmatpush1.bf16.msra.mxu0 %v9531_v13 }
 0x5a4   : > { %v6091_v47 = vpack.c.bf16 %v6038_v50, %v6037_v16  ;;  %v8874_v39 = vpop.f32.mrb[204].mxu1  ;;  %6740 = vmatprep.subr.bf16.mxu0 %v9536_v3  ;;  %v13665_v37 = vpop.xlane.xlu0 %5366 }
 0x5a5   : > { %v8875_v48 = vpop.f32.mrb[205].mxu1  ;;  %v13668_v50 = vpop.xlane.xlu1 %5369  ;;  %9882 = vrcp.f32 %v13665_v37 }
 0x5a6   : > { %v8876_v30 = vadd.f32 %v8875_v48, %v8874_v39  ;;  %v8877_v51 = vpop.f32.mrb[206].mxu1  ;;  %7449 = vmatmul.mubr.msk.bf16.gmra.mrb[136].mxu0 %vm3928_vm0, %v6091_v47  ;;  %v9863_v47 = vpop.eup %9862 }
 0x5a7   : > { %v8878_v58 = vpop.f32.mrb[207].mxu1  ;;  %6448 = vmatprep.mubr.bf16.mxu0 %v10090_v6  ;;  %v9865_v48 = vpop.eup %9864 }
 0x5a8   : > { %v8879_v2 = vadd.f32 %v8878_v58, %v8877_v51  ;;  %v6039_v41 = vmul.f32 %v9847_v20, %v8876_v30  ;;  %v13671_v45 = vpop.xlane.xlu0 %5372 }
 0x5aa   : > { %v6040_v33 = vmul.f32 %v9849_v21, %v8879_v2  ;;  %v9867_v21 = vpop.eup %9866 }
 0x5ac   : > { %v6092_v62 = vpack.c.bf16 %v6040_v33, %v6039_v41  ;;  %v8880_v57 = vpop.f32.mrb[208].mxu1 }
 0x5ad   : > { %v8881_v5 = vpop.f32.mrb[209].mxu1 }
 0x5ae   : > { %v8882_v52 = vadd.f32 %v8881_v5, %v8880_v57  ;;  %v8883_v40 = vpop.f32.mrb[210].mxu1  ;;  %7450 = vmatmul.mubr.msk.bf16.gmra.mrb[140].mxu0 %vm3928_vm0, %v6092_v62  ;;  %v9869_v62 = vpop.eup %9868 }
 0x5af   : > { %v8884_v61 = vpop.f32.mrb[211].mxu1  ;;  %6458 = vmatprep.mubr.bf16.mxu0 %v10090_v6  ;;  %v13673_v57 = vpop.xlane.xlu1 %5375 }
 0x5b0   : > { %v8885_v56 = vadd.f32 %v8884_v61, %v8883_v40  ;;  %v6041_v0 = vmul.f32 %v9851_v44, %v8882_v52  ;;  %v13677_v61 = vpop.xlane.xlu0 %5378  ;;  %v9871_v53 = vpop.eup %9870 }
 0x5b1   : > { %v9873_v22 = vpop.eup %9872 }
 0x5b2   : > { %v6042_v24 = vmul.f32 %v9853_v8, %v8885_v56 }
 0x5b3   : > { %v13679_v8 = vpop.xlane.xlu1 %5381 }
 0x5b4   : > { %v6093_v14 = vpack.c.bf16 %v6042_v24, %v6041_v0  ;;  %v8886_v12 = vpop.f32.mrb[212].mxu1  ;;  %v9534_v24 = vld [vmem:[%s13928_s5 + $0xc0] ss:$8 sps:$4 sm:$0xff]  }
 0x5b5   : > { %v8887_v1 = vpop.f32.mrb[213].mxu1 }
 0x5b6   : > { %v8888_v26 = vadd.f32 %v8887_v1, %v8886_v12  ;;  %v8889_v32 = vpop.f32.mrb[214].mxu1  ;;  %7451 = vmatmul.mubr.msk.bf16.gmra.mrb[144].mxu0 %vm3928_vm0, %v6093_v14  ;;  %v9539_v12 = vld [vmem:[%s13928_s5 + $0xd4] ss:$8 sps:$4 sm:$0xff]  }
 0x5b7   : > { %v8890_v4 = vpop.f32.mrb[215].mxu1  ;;  %6468 = vmatprep.mubr.bf16.mxu0 %v10090_v6  ;;  %v13697_v54 = vpop.xlane.xlu1 %5387 }
 0x5b8   : > { %v8891_v18 = vadd.f32 %v8890_v4, %v8889_v32  ;;  %v6043_v59 = vmul.f32 %v9855_v55, %v8888_v26  ;;  %v9537_v32 = vld [vmem:[%s13928_s5 + $0xd0] ss:$8 sps:$4 sm:$0xff]   ;;  %v13692_v4 = vpop.xlane.xlu0 %5384 }
 0x5ba   : > { %v6044_v15 = vmul.f32 %v9857_v11, %v8891_v18  ;;  %v9542_v11 = vld [vmem:[%s13928_s5 + $0xe4] ss:$8 sps:$4 sm:$0xff]  }
 0x5bc   : > { %v6094_v9 = vpack.c.bf16 %v6044_v15, %v6043_v59  ;;  %v8892_v36 = vpop.f32.mrb[216].mxu1 }
 0x5bd   : > { %v8893_v42 = vpop.f32.mrb[217].mxu1 }
 0x5be   : > { %v8894_v17 = vadd.f32 %v8893_v42, %v8892_v36  ;;  %v8895_v29 = vpop.f32.mrb[218].mxu1  ;;  %7452 = vmatmul.mubr.msk.bf16.gmra.mrb[148].mxu0 %vm3928_vm0, %v6094_v9  ;;  %v9540_v36 = vld [vmem:[%s13928_s5 + $0xe0] ss:$8 sps:$4 sm:$0xff]   ;;  %v9875_v42 = vpop.eup %9874 }
 0x5bf   : > { %v8896_v23 = vpop.f32.mrb[219].mxu1  ;;  %6478 = vmatprep.mubr.bf16.mxu0 %v10090_v6 }
 0x5c0   : > { %v8897_v34 = vadd.f32 %v8896_v23, %v8895_v29  ;;  %v6045_v13 = vmul.f32 %v9859_v7, %v8894_v17  ;;  %v9545_v29 = vld [vmem:[%s13928_s5 + $0xf4] ss:$8 sps:$4 sm:$0xff]   ;;  %v9877_v23 = vpop.eup %9876  ;;  %v5391_v7 = vpop.xlane.xlu0 %5390 }
 0x5c1   : > { %9884 = vrcp.f32 %v5391_v7 }
 0x5c2   : > { %v6046_v46 = vmul.f32 %v9861_v25, %v8897_v34  ;;  %v5394_v25 = vpop.xlane.xlu1 %5393 }
 0x5c3   : > { %9886 = vrcp.f32 %v5394_v25 }
 0x5c4   : > { %v6095_v49 = vpack.c.bf16 %v6046_v46, %v6045_v13  ;;  %v8898_v28 = vpop.f32.mrb[220].mxu1  ;;  %9888 = vrcp.f32 %v13668_v50 }
 0x5c5   : > { %v8899_v3 = vpop.f32.mrb[221].mxu1  ;;  %9890 = vrcp.f32 %v13671_v45 }
 0x5c6   : > { %v8900_v19 = vadd.f32 %v8899_v3, %v8898_v28  ;;  %v8901_v16 = vpop.f32.mrb[222].mxu1  ;;  %7453 = vmatmul.mubr.msk.bf16.gmra.mrb[152].mxu0 %vm3928_vm0, %v6095_v49  ;;  %v5400_v37 = vpop.xlane.xlu1 %5399 }
 0x5c7   : > { %v8902_v27 = vpop.f32.mrb[223].mxu1  ;;  %6488 = vmatprep.mubr.bf16.mxu0 %v10090_v6 }
 0x5c8   : > { %v8903_v39 = vadd.f32 %v8902_v27, %v8901_v16  ;;  %v8920_v38 = vpop.f32.mrb[96].mxu0  ;;  %v6047_v51 = vmul.f32 %v9863_v47, %v8900_v19  ;;  %v9879_v16 = vpop.eup %9878 }
 0x5c9   : > { %v8921_v30 = vpop.f32.mrb[97].mxu0  ;;  %v9881_v47 = vpop.eup %9880 }
 0x5ca   : > { %v6048_v58 = vmul.f32 %v9865_v48, %v8903_v39  ;;  %v8922_v20 = vadd.f32 %v8921_v30, %v8920_v38  ;;  %v8923_v60 = vpop.f32.mrb[98].mxu0  ;;  %v5397_v39 = vpop.xlane.xlu0 %5396 }
 0x5cb   : > { %v8924_v2 = vpop.f32.mrb[99].mxu0  ;;  %9892 = vrcp.f32 %v5397_v39 }
 0x5cc   : > { %v6096_v41 = vpack.c.bf16 %v6048_v58, %v6047_v51  ;;  %v8925_v33 = vadd.f32 %v8924_v2, %v8923_v60  ;;  %v6049_v5 = vmul.f32 %v9867_v21, %v8922_v20  ;;  %v9883_v21 = vpop.eup %9882  ;;  %9894 = vrcp.f32 %v5400_v37 }
 0x5cd   : > { %9896 = vrcp.f32 %v13673_v57 }
 0x5ce   : > { %v6050_v35 = vmul.f32 %v9869_v62, %v8925_v33  ;;  %7454 = vmatmul.mubr.msk.bf16.gmra.mrb[156].mxu0 %vm3928_vm0, %v6096_v41  ;;  %9898 = vrcp.f32 %v13677_v61 }
 0x5cf   : > { %6595 = vmatprep.mubr.bf16.mxu0 %v10090_v6 }
 0x5d0   : > { %v6097_v52 = vpack.c.bf16 %v6050_v35, %v6049_v5  ;;  %v8926_v40 = vpop.f32.mrb[100].mxu0  ;;  %v9885_v5 = vpop.eup %9884 }
 0x5d1   : > { %v8927_v10 = vpop.f32.mrb[101].mxu0 }
 0x5d2   : > { %v8928_v44 = vadd.f32 %v8927_v10, %v8926_v40  ;;  %v8929_v56 = vpop.f32.mrb[102].mxu0  ;;  %v9887_v40 = vpop.eup %9886 }
 0x5d3   : > { %v8930_v0 = vpop.f32.mrb[103].mxu0  ;;  %v9889_v45 = vpop.eup %9888 }
 0x5d4   : > { %v8931_v14 = vadd.f32 %v8930_v0, %v8929_v56  ;;  %v6051_v1 = vmul.f32 %v9871_v53, %v8928_v44  ;;  %v5403_v0 = vpop.xlane.xlu0 %5402 }
 0x5d5   : > { %9900 = vrcp.f32 %v5403_v0 }
 0x5d6   : > { %v6052_v26 = vmul.f32 %v9873_v22, %v8931_v14  ;;  %7463 = vmatmul.mubr.msk.bf16.vlgmr.msra.gmra.mrb[128].mxu0 %vm3928_vm0, %v6097_v52  ;;  %v5406_v14 = vpop.xlane.xlu1 %5405 }
 0x5d7   : > { %6741 = vmatpush1.bf16.msra.mxu0 %v9534_v24  ;;  %6605 = vmatprep.mubr.bf16.mxu0 %v10090_v6  ;;  %9902 = vrcp.f32 %v5406_v14 }
 0x5d8   : > { %v6098_v55 = vpack.c.bf16 %v6052_v26, %v6051_v1  ;;  %v8932_v18 = vpop.f32.mrb[104].mxu0  ;;  %6742 = vmatprep.subr.bf16.mxu0 %v9539_v12  ;;  %9904 = vrcp.f32 %v13679_v8 }
 0x5d9   : > { %v8933_v59 = vpop.f32.mrb[105].mxu0  ;;  %9906 = vrcp.f32 %v13692_v4 }
 0x5da   : > { %v8934_v15 = vadd.f32 %v8933_v59, %v8932_v18  ;;  %v8935_v63 = vpop.f32.mrb[106].mxu0 }
 0x5db   : > { %v8936_v9 = vpop.f32.mrb[107].mxu0  ;;  %6743 = vmatpush1.bf16.msra.mxu0 %v9537_v32 }
 0x5dc   : > { %v8937_v17 = vadd.f32 %v8936_v9, %v8935_v63  ;;  %6744 = vmatprep.subr.bf16.mxu0 %v9542_v11  ;;  %v6053_v31 = vmul.f32 %v9875_v42, %v8934_v15  ;;  %v9891_v11 = vpop.eup %9890 }
 0x5dd   : > { %v9893_v9 = vpop.eup %9892 }
 0x5de   : > { %v6054_v34 = vmul.f32 %v9877_v23, %v8937_v17  ;;  %7464 = vmatmul.mubr.msk.bf16.gmra.mrb[132].mxu0 %vm3928_vm0, %v6098_v55  ;;  %v9895_v17 = vpop.eup %9894 }
 0x5df   : > { %6615 = vmatprep.mubr.bf16.mxu0 %v10090_v6  ;;  %6745 = vmatpush1.bf16.msra.mxu0 %v9540_v36  ;;  %v9897_v61 = vpop.eup %9896 }
 0x5e0   : > { %v6099_v13 = vpack.c.bf16 %v6054_v34, %v6053_v31  ;;  %v8938_v46 = vpop.f32.mrb[108].mxu0  ;;  %6746 = vmatprep.subr.bf16.mxu0 %v9545_v29  ;;  %v5409_v31 = vpop.xlane.xlu0 %5408 }
 0x5e1   : > { %v8939_v49 = vpop.f32.mrb[109].mxu0  ;;  %9908 = vrcp.f32 %v5409_v31 }
 0x5e2   : > { %v8940_v28 = vadd.f32 %v8939_v49, %v8938_v46  ;;  %v8941_v3 = vpop.f32.mrb[110].mxu0 }
 0x5e3   : > { %v8942_v19 = vpop.f32.mrb[111].mxu0  ;;  %6747 = vmatpush1.bf16.msra.mxu0 %v9543_v43  ;;  %v5412_v43 = vpop.xlane.xlu1 %5411 }
 0x5e4   : > { %v8943_v27 = vadd.f32 %v8942_v19, %v8941_v3  ;;  %v6055_v38 = vmul.f32 %v9879_v16, %v8940_v28  ;;  %9910 = vrcp.f32 %v5412_v43 }
 0x5e5   : > { %9912 = vrcp.f32 %v13697_v54 }
 0x5e6   : > { %v6056_v48 = vmul.f32 %v9881_v47, %v8943_v27  ;;  %7465 = vmatmul.mubr.msk.bf16.gmra.mrb[136].mxu0 %vm3928_vm0, %v6099_v13  ;;  %v9899_v27 = vpop.eup %9898 }
 0x5e7   : > { %v8984_v30 = vpop.f32.mrb[224].mxu1  ;;  %6625 = vmatprep.mubr.bf16.mxu0 %v10090_v6 }
 0x5e8   : > { %v6100_v51 = vpack.c.bf16 %v6056_v48, %v6055_v38  ;;  %v8944_v58 = vpop.f32.mrb[112].mxu0  ;;  %v8985_v20 = vpop.f32.mrb[225].mxu1 }
 0x5e9   : > { %v8945_v50 = vpop.f32.mrb[113].mxu0  ;;  %v8986_v60 = vadd.f32 %v8985_v20, %v8984_v30  ;;  %v8987_v2 = vpop.f32.mrb[226].mxu1 }
 0x5ea   : > { %v8946_v41 = vadd.f32 %v8945_v50, %v8944_v58  ;;  %v8947_v33 = vpop.f32.mrb[114].mxu0  ;;  %v8988_v62 = vpop.f32.mrb[227].mxu1 }
 0x5eb   : > { %v8948_v35 = vpop.f32.mrb[115].mxu0  ;;  %v8989_v52 = vadd.f32 %v8988_v62, %v8987_v2  ;;  %v13718_v44 = vmul.f32 %v9885_v5, %v8986_v60  ;;  %v9901_v48 = vpop.eup %9900 }
 0x5ec   : > { %v8949_v10 = vadd.f32 %v8948_v35, %v8947_v33  ;;  %v6057_v24 = vmul.f32 %v9883_v21, %v8946_v41  ;;  %v5415_v60 = vpop.xlane.xlu0 %5414  ;;  %v5418_v41 = vpop.xlane.xlu1 %5417 }
 0x5ed   : > { %v13720_v56 = vmul.f32 %v9887_v40, %v8989_v52  ;;  %9914 = vrcp.f32 %v5415_v60 }
 0x5ee   : > { %v6058_v53 = vmul.f32 %v9889_v45, %v8949_v10  ;;  %7466 = vmatmul.mubr.msk.bf16.gmra.mrb[140].mxu0 %vm3928_vm0, %v6100_v51  ;;  %v9903_v51 = vpop.eup %9902  ;;  %9916 = vrcp.f32 %v5418_v41 }
 0x5ef   : > { %v6105_v12 = vpack.c.bf16 %v13720_v56, %v13718_v44  ;;  %v8990_v22 = vpop.f32.mrb[228].mxu1  ;;  %6635 = vmatprep.mubr.bf16.mxu0 %v10090_v6  ;;  %v9905_v4 = vpop.eup %9904 }
 0x5f0   : > { %v6101_v57 = vpack.c.bf16 %v6058_v53, %v6057_v24  ;;  %v8950_v1 = vpop.f32.mrb[116].mxu0  ;;  %v8991_v26 = vpop.f32.mrb[229].mxu1 }
 0x5f1   : > { %v8951_v32 = vpop.f32.mrb[117].mxu0  ;;  %v8992_v55 = vadd.f32 %v8991_v26, %v8990_v22  ;;  %v8993_v18 = vpop.f32.mrb[230].mxu1 }
 0x5f2   : > { %v8952_v59 = vadd.f32 %v8951_v32, %v8950_v1  ;;  %v8953_v15 = vpop.f32.mrb[118].mxu0  ;;  %v8994_v63 = vpop.f32.mrb[231].mxu1 }
 0x5f3   : > { %v8954_v36 = vpop.f32.mrb[119].mxu0  ;;  %v8995_v42 = vadd.f32 %v8994_v63, %v8993_v18  ;;  %v13728_v23 = vmul.f32 %v9893_v9, %v8992_v55  ;;  %v9907_v45 = vpop.eup %9906 }
 0x5f4   : > { %v8955_v29 = vadd.f32 %v8954_v36, %v8953_v15  ;;  %v6059_v34 = vmul.f32 %v9891_v11, %v8952_v59  ;;  %v9909_v14 = vpop.eup %9908  ;;  %v5421_v11 = vpop.xlane.xlu0 %5420 }
 0x5f5   : > { %v13730_v7 = vmul.f32 %v9895_v17, %v8995_v42  ;;  %v9911_v1 = vpop.eup %9910  ;;  %v5424_v63 = vpop.xlane.xlu1 %5423  ;;  %9918 = vrcp.f32 %v5421_v11 }
 0x5f6   : > { %v6060_v25 = vmul.f32 %v9897_v61, %v8955_v29  ;;  %7467 = vmatmul.mubr.msk.bf16.gmra.mrb[144].mxu0 %vm3928_vm0, %v6101_v57  ;;  %v9913_v32 = vpop.eup %9912  ;;  %9920 = vrcp.f32 %v5424_v63 }
 0x5f7   : > { %v6106_v13 = vpack.c.bf16 %v13730_v7, %v13728_v23  ;;  %v8996_v46 = vpop.f32.mrb[232].mxu1  ;;  %6645 = vmatprep.mubr.bf16.mxu0 %v10090_v6  ;;  %v6951_v7 = vlaneseq }
 0x5f8   : > { %v6102_v8 = vpack.c.bf16 %v6060_v25, %v6059_v34  ;;  %v8956_v49 = vpop.f32.mrb[120].mxu0  ;;  %v8997_v28 = vpop.f32.mrb[233].mxu1 }
 0x5f9   : > { %v8957_v3 = vpop.f32.mrb[121].mxu0  ;;  %v8998_v19 = vadd.f32 %v8997_v28, %v8996_v46  ;;  %v8999_v16 = vpop.f32.mrb[234].mxu1 }
 0x5fa   : > { %v8958_v47 = vadd.f32 %v8957_v3, %v8956_v49  ;;  %v8959_v39 = vpop.f32.mrb[122].mxu0  ;;  %v9000_v38 = vpop.f32.mrb[235].mxu1 }
 0x5fb   : > { %v8960_v37 = vpop.f32.mrb[123].mxu0  ;;  %v9001_v30 = vadd.f32 %v9000_v38, %v8999_v16  ;;  %v13738_v20 = vmul.f32 %v9901_v48, %v8998_v19  ;;  %v9915_v34 = vpop.eup %9914 }
 0x5fc   : > { %v8961_v58 = vadd.f32 %v8960_v37, %v8959_v39  ;;  %v6061_v2 = vmul.f32 %v9899_v27, %v8958_v47  ;;  %v9917_v43 = vpop.eup %9916  ;;  %v5427_v49 = vpop.xlane.xlu0 %5426 }
 0x5fd   : > { %v13740_v50 = vmul.f32 %v9903_v51, %v9001_v30  ;;  %v5430_v28 = vpop.xlane.xlu1 %5429  ;;  %9922 = vrcp.f32 %v5427_v49 }
 0x5fe   : > { %v6062_v21 = vmul.f32 %v9905_v4, %v8961_v58  ;;  %7468 = vmatmul.mubr.msk.bf16.gmra.mrb[148].mxu0 %vm3928_vm0, %v6102_v8  ;;  %9924 = vrcp.f32 %v5430_v28 }
 0x5ff   : > { %v6107_v33 = vpack.c.bf16 %v13740_v50, %v13738_v20  ;;  %v9002_v62 = vpop.f32.mrb[236].mxu1  ;;  %6655 = vmatprep.mubr.bf16.mxu0 %v10090_v6  ;;  %v9919_v38 = vpop.eup %9918  ;;  %v6949_v50 = vld [vmem:[%s13929_s6] sm:$0x3] }
 0x600   : > { %v6103_v54 = vpack.c.bf16 %v6062_v21, %v6061_v2  ;;  %v8962_v5 = vpop.f32.mrb[124].mxu0  ;;  %v9003_v35 = vpop.f32.mrb[237].mxu1 }
 0x601   : > { %v8963_v52 = vpop.f32.mrb[125].mxu0  ;;  %v9004_v40 = vadd.f32 %v9003_v35, %v9002_v62  ;;  %v9005_v10 = vpop.f32.mrb[238].mxu1 }
 0x602   : > { %v8964_v0 = vadd.f32 %v8963_v52, %v8962_v5  ;;  %v8965_v24 = vpop.f32.mrb[126].mxu0  ;;  %v9006_v53 = vpop.f32.mrb[239].mxu1 }
 0x603   : > { %v8966_v22 = vpop.f32.mrb[127].mxu0  ;;  %v9007_v57 = vadd.f32 %v9006_v53, %v9005_v10  ;;  %v13746_v55 = vmul.f32 %v9909_v14, %v9004_v40  ;;  %v9921_v37 = vpop.eup %9920 }
 0x604   : > { %v8967_v26 = vadd.f32 %v8966_v22, %v8965_v24  ;;  %v6063_v59 = vmul.f32 %v9907_v45, %v8964_v0  ;;  %v5433_v58 = vpop.xlane.xlu0 %5432  ;;  %v5436_v4 = vpop.xlane.xlu1 %5435 }
 0x605   : > { %v13748_v18 = vmul.f32 %v9911_v1, %v9007_v57  ;;  %9926 = vrcp.f32 %v5433_v58 }
 0x606   : > { %v6064_v15 = vmul.f32 %v9913_v32, %v8967_v26  ;;  %7469 = vmatmul.mubr.msk.bf16.gmra.mrb[152].mxu0 %vm3928_vm0, %v6103_v54  ;;  %9928 = vrcp.f32 %v5436_v4 }
 0x607   : > { %v6108_v9 = vpack.c.bf16 %v13748_v18, %v13746_v55  ;;  %v9008_v36 = vpop.f32.mrb[240].mxu1  ;;  %6665 = vmatprep.mubr.bf16.mxu0 %v10090_v6  ;;  %v9923_v5 = vpop.eup %9922 }
 0x608   : > { %v6104_v42 = vpack.c.bf16 %v6064_v15, %v6063_v59  ;;  %v9009_v17 = vpop.f32.mrb[241].mxu1  ;;  %v9925_v52 = vpop.eup %9924 }
 0x609   : > { %v9010_v29 = vadd.f32 %v9009_v17, %v9008_v36  ;;  %v9011_v61 = vpop.f32.mrb[242].mxu1 }
 0x60a   : > { %v9012_v31 = vpop.f32.mrb[243].mxu1 }
 0x60b   : > { %v9013_v25 = vadd.f32 %v9012_v31, %v9011_v61  ;;  %v6073_v46 = vmul.f32 %v9915_v34, %v9010_v29 }
 0x60d   : > { %v6074_v8 = vmul.f32 %v9917_v43, %v9013_v25 }
 0x60e   : > { %7470 = vmatmul.mubr.msk.bf16.gmra.mrb[156].mxu0 %vm3928_vm0, %v6104_v42 }
 0x60f   : > { %v6109_v3 = vpack.c.bf16 %v6074_v8, %v6073_v46  ;;  %v9014_v19 = vpop.f32.mrb[244].mxu1  ;;  %6772 = vmatprep.mubr.bf16.mxu0 %v10090_v6  ;;  %v9927_v53 = vpop.eup %9926 }
 0x610   : > { %v9015_v16 = vpop.f32.mrb[245].mxu1  ;;  %v9929_v22 = vpop.eup %9928 }
 0x611   : > { %v9016_v27 = vadd.f32 %v9015_v16, %v9014_v19  ;;  %v9017_v47 = vpop.f32.mrb[246].mxu1 }
 0x612   : > { %v9018_v39 = vpop.f32.mrb[247].mxu1 }
 0x613   : > { %v9019_v48 = vadd.f32 %v9018_v39, %v9017_v47  ;;  %v6075_v30 = vmul.f32 %v9919_v38, %v9016_v27 }
 0x615   : > { %v6076_v51 = vmul.f32 %v9921_v37, %v9019_v48 }
 0x616   : > { %7479 = vmatmul.mubr.msk.bf16.vlgmr.msra.gmra.mrb[128].mxu0 %vm3928_vm0, %v6105_v12 }
 0x617   : > { %v6110_v60 = vpack.c.bf16 %v6076_v51, %v6075_v30  ;;  %v9020_v2 = vpop.f32.mrb[248].mxu1  ;;  %6782 = vmatprep.mubr.bf16.mxu0 %v10090_v6 }
 0x618   : > { %v9021_v21 = vpop.f32.mrb[249].mxu1 }
 0x619   : > { %v9022_v41 = vadd.f32 %v9021_v21, %v9020_v2  ;;  %v9023_v62 = vpop.f32.mrb[250].mxu1 }
 0x61a   : > { %v9024_v54 = vpop.f32.mrb[251].mxu1 }
 0x61b   : > { %v9025_v35 = vadd.f32 %v9024_v54, %v9023_v62  ;;  %v6077_v40 = vmul.f32 %v9923_v5, %v9022_v41 }
 0x61d   : > { %v6078_v10 = vmul.f32 %v9925_v52, %v9025_v35 }
 0x61e   : > { %7480 = vmatmul.mubr.msk.bf16.gmra.mrb[132].mxu0 %vm3928_vm0, %v6106_v13  ;;  %v6952_v13 = vshrl.u32 %v6951_v7, 7 }
 0x61f   : > { %v6111_v44 = vpack.c.bf16 %v6078_v10, %v6077_v40  ;;  %v9026_v56 = vpop.f32.mrb[252].mxu1  ;;  %6792 = vmatprep.mubr.bf16.mxu0 %v10090_v6 }
 0x620   : > { %v9027_v12 = vpop.f32.mrb[253].mxu1  ;;  %v6953_v20 = vsub.s32 0, %v6952_v13 }
 0x621   : > { %v9028_v45 = vadd.f32 %v9027_v12, %v9026_v56  ;;  %v9029_v0 = vpop.f32.mrb[254].mxu1 }
 0x622   : > { %v9030_v24 = vpop.f32.mrb[255].mxu1  ;;  %v13789_v26 = vrot.slane %v6949_v50, %v6953_v20 }
 0x623   : > { %v9031_v14 = vadd.f32 %v9030_v24, %v9029_v0  ;;  %v6079_v57 = vmul.f32 %v9927_v53, %v9028_v45 }
 0x625   : > { %v6080_v1 = vmul.f32 %v9929_v22, %v9031_v14 }
 0x626   : > { %7481 = vmatmul.mubr.msk.bf16.gmra.mrb[136].mxu0 %vm3928_vm0, %v6107_v33  ;;  %v6957_v33 = vsub.s32 1, %v6952_v13 }
 0x627   : > { %v6112_v23 = vpack.c.bf16 %v6080_v1, %v6079_v57  ;;  %6802 = vmatprep.mubr.bf16.mxu0 %v10090_v6 }
 0x628   : > { %v13791_v32 = vrot.slane %v6949_v50, %v6957_v33 }
 0x62e   : > { %7482 = vmatmul.mubr.msk.bf16.gmra.mrb[140].mxu0 %vm3928_vm0, %v6108_v9 }
 0x62f   : > { %6812 = vmatprep.mubr.bf16.mxu0 %v10090_v6 }
 0x636   : > { %7483 = vmatmul.mubr.msk.bf16.gmra.mrb[144].mxu0 %vm3928_vm0, %v6109_v3 }
 0x637   : > { %6822 = vmatprep.mubr.bf16.mxu0 %v10090_v6 }
 0x63e   : > { %7484 = vmatmul.mubr.msk.bf16.gmra.mrb[148].mxu0 %vm3928_vm0, %v6110_v60 }
 0x63f   : > { %6832 = vmatprep.mubr.bf16.mxu0 %v10090_v6 }
 0x646   : > { %7485 = vmatmul.mubr.msk.bf16.gmra.mrb[152].mxu0 %vm3928_vm0, %v6111_v44 }
 0x647   : > { %6842 = vmatprep.mubr.bf16.mxu0 %v10090_v6 }
 0x64e   : > { %7486 = vmatmul.mubr.msk.bf16.gmra.mrb[156].mxu0 %vm3928_vm0, %v6112_v23 }
 0x6e9   : > { %v6774_v55 = vpop.f32.mrb[128].mxu0 }
 0x6ea   : > { %v6961_v6 = vadd.f32 %v13789_v26, %v6774_v55  ;;  %v6776_v18 = vpop.f32.mrb[129].mxu0 }
 0x6eb   : > { %v6962_v11 = vadd.f32 %v13791_v32, %v6776_v18  ;;  %v6778_v59 = vpop.f32.mrb[130].mxu0 }
 0x6ec   : > { %6993 = vst [vmem:[%s13795_s17] sm:$0xff] %v6961_v6  ;;  %v6963_v15 = vadd.f32 %v13789_v26, %v6778_v59  ;;  %v6780_v63 = vpop.f32.mrb[131].mxu0 }
 0x6ed   : > { %6994 = vst [vmem:[%s13795_s17 + $0x8] sm:$0xff] %v6962_v11  ;;  %v6964_v9 = vadd.f32 %v13791_v32, %v6780_v63 }
 0x6ee   : > { %6995 = vst [vmem:[%s13795_s17 + $0x10] sm:$0xff] %v6963_v15 }
 0x6ef   : > { %6996 = vst [vmem:[%s13795_s17 + $0x18] sm:$0xff] %v6964_v9 }
 0x6f1   : > { %v6784_v36 = vpop.f32.mrb[132].mxu0 }
 0x6f2   : > { %v6965_v42 = vadd.f32 %v13789_v26, %v6784_v36  ;;  %v6786_v17 = vpop.f32.mrb[133].mxu0 }
 0x6f3   : > { %v6966_v29 = vadd.f32 %v13791_v32, %v6786_v17  ;;  %v6788_v61 = vpop.f32.mrb[134].mxu0 }
 0x6f4   : > { %6997 = vst [vmem:[%s13795_s17 + $0x20] sm:$0xff] %v6965_v42  ;;  %v6967_v31 = vadd.f32 %v13789_v26, %v6788_v61  ;;  %v6790_v34 = vpop.f32.mrb[135].mxu0 }
 0x6f5   : > { %6998 = vst [vmem:[%s13795_s17 + $0x28] sm:$0xff] %v6966_v29  ;;  %v6968_v25 = vadd.f32 %v13791_v32, %v6790_v34 }
 0x6f6   : > { %6999 = vst [vmem:[%s13795_s17 + $0x30] sm:$0xff] %v6967_v31 }
 0x6f7   : > { %7000 = vst [vmem:[%s13795_s17 + $0x38] sm:$0xff] %v6968_v25 }
 0x6f9   : > { %v6794_v43 = vpop.f32.mrb[136].mxu0 }
 0x6fa   : > { %v6969_v46 = vadd.f32 %v13789_v26, %v6794_v43  ;;  %v6796_v8 = vpop.f32.mrb[137].mxu0 }
 0x6fb   : > { %v6970_v49 = vadd.f32 %v13791_v32, %v6796_v8  ;;  %v6798_v28 = vpop.f32.mrb[138].mxu0 }
 0x6fc   : > { %7001 = vst [vmem:[%s13795_s17 + $0x40] sm:$0xff] %v6969_v46  ;;  %v6971_v3 = vadd.f32 %v13789_v26, %v6798_v28  ;;  %v6800_v19 = vpop.f32.mrb[139].mxu0 }
 0x6fd   : > { %7002 = vst [vmem:[%s13795_s17 + $0x48] sm:$0xff] %v6970_v49  ;;  %v6972_v16 = vadd.f32 %v13791_v32, %v6800_v19 }
 0x6fe   : > { %7003 = vst [vmem:[%s13795_s17 + $0x50] sm:$0xff] %v6971_v3 }
 0x6ff   : > { %7004 = vst [vmem:[%s13795_s17 + $0x58] sm:$0xff] %v6972_v16 }
 0x701   : > { %v6804_v27 = vpop.f32.mrb[140].mxu0 }
 0x702   : > { %v6973_v47 = vadd.f32 %v13789_v26, %v6804_v27  ;;  %v6806_v39 = vpop.f32.mrb[141].mxu0 }
 0x703   : > { %v6974_v38 = vadd.f32 %v13791_v32, %v6806_v39  ;;  %v6808_v48 = vpop.f32.mrb[142].mxu0 }
 0x704   : > { %7005 = vst [vmem:[%s13795_s17 + $0x60] sm:$0xff] %v6973_v47  ;;  %v6975_v37 = vadd.f32 %v13789_v26, %v6808_v48  ;;  %v6810_v30 = vpop.f32.mrb[143].mxu0 }
 0x705   : > { %7006 = vst [vmem:[%s13795_s17 + $0x68] sm:$0xff] %v6974_v38  ;;  %v6976_v51 = vadd.f32 %v13791_v32, %v6810_v30 }
 0x706   : > { %7007 = vst [vmem:[%s13795_s17 + $0x70] sm:$0xff] %v6975_v37 }
 0x707   : > { %7008 = vst [vmem:[%s13795_s17 + $0x78] sm:$0xff] %v6976_v51 }
 0x709   : > { %v6814_v58 = vpop.f32.mrb[144].mxu0 }
 0x70a   : > { %v6977_v4 = vadd.f32 %v13789_v26, %v6814_v58  ;;  %v6816_v60 = vpop.f32.mrb[145].mxu0 }
 0x70b   : > { %v6978_v2 = vadd.f32 %v13791_v32, %v6816_v60  ;;  %v6818_v21 = vpop.f32.mrb[146].mxu0 }
 0x70c   : > { %7009 = vst [vmem:[%s13795_s17 + $0x80] sm:$0xff] %v6977_v4  ;;  %v6979_v41 = vadd.f32 %v13789_v26, %v6818_v21  ;;  %v6820_v62 = vpop.f32.mrb[147].mxu0 }
 0x70d   : > { %7010 = vst [vmem:[%s13795_s17 + $0x88] sm:$0xff] %v6978_v2  ;;  %v6980_v54 = vadd.f32 %v13791_v32, %v6820_v62 }
 0x70e   : > { %7011 = vst [vmem:[%s13795_s17 + $0x90] sm:$0xff] %v6979_v41 }
 0x70f   : > { %7012 = vst [vmem:[%s13795_s17 + $0x98] sm:$0xff] %v6980_v54 }
 0x711   : > { %v6824_v5 = vpop.f32.mrb[148].mxu0 }
 0x712   : > { %v6981_v35 = vadd.f32 %v13789_v26, %v6824_v5  ;;  %v6826_v52 = vpop.f32.mrb[149].mxu0 }
 0x713   : > { %v6982_v40 = vadd.f32 %v13791_v32, %v6826_v52  ;;  %v6828_v10 = vpop.f32.mrb[150].mxu0 }
 0x714   : > { %7013 = vst [vmem:[%s13795_s17 + $0xa0] sm:$0xff] %v6981_v35  ;;  %v6983_v44 = vadd.f32 %v13789_v26, %v6828_v10  ;;  %v6830_v56 = vpop.f32.mrb[151].mxu0 }
 0x715   : > { %7014 = vst [vmem:[%s13795_s17 + $0xa8] sm:$0xff] %v6982_v40  ;;  %v6984_v12 = vadd.f32 %v13791_v32, %v6830_v56 }
 0x716   : > { %7015 = vst [vmem:[%s13795_s17 + $0xb0] sm:$0xff] %v6983_v44 }
 0x717   : > { %7016 = vst [vmem:[%s13795_s17 + $0xb8] sm:$0xff] %v6984_v12 }
 0x719   : > { %v6834_v45 = vpop.f32.mrb[152].mxu0 }
 0x71a   : > { %v6985_v0 = vadd.f32 %v13789_v26, %v6834_v45  ;;  %v6836_v24 = vpop.f32.mrb[153].mxu0 }
 0x71b   : > { %v6986_v53 = vadd.f32 %v13791_v32, %v6836_v24  ;;  %v6838_v14 = vpop.f32.mrb[154].mxu0 }
 0x71c   : > { %7017 = vst [vmem:[%s13795_s17 + $0xc0] sm:$0xff] %v6985_v0  ;;  %v6987_v22 = vadd.f32 %v13789_v26, %v6838_v14  ;;  %v6840_v57 = vpop.f32.mrb[155].mxu0 }
 0x71d   : > { %7018 = vst [vmem:[%s13795_s17 + $0xc8] sm:$0xff] %v6986_v53  ;;  %v6988_v1 = vadd.f32 %v13791_v32, %v6840_v57 }
 0x71e   : > { %7019 = vst [vmem:[%s13795_s17 + $0xd0] sm:$0xff] %v6987_v22 }
 0x71f   : > { %7020 = vst [vmem:[%s13795_s17 + $0xd8] sm:$0xff] %v6988_v1 }
 0x721   : > { %v6844_v23 = vpop.f32.mrb[156].mxu0 }
 0x722   : > { %v6989_v7 = vadd.f32 %v13789_v26, %v6844_v23  ;;  %v6846_v13 = vpop.f32.mrb[157].mxu0 }
 0x723   : > { %v6990_v20 = vadd.f32 %v13791_v32, %v6846_v13  ;;  %v6848_v50 = vpop.f32.mrb[158].mxu0 }
 0x724   : > { %7021 = vst [vmem:[%s13795_s17 + $0xe0] sm:$0xff] %v6989_v7  ;;  %v6991_v33 = vadd.f32 %v13789_v26, %v6848_v50  ;;  %v6850_v55 = vpop.f32.mrb[159].mxu0 }
 0x725   : > { %7022 = vst [vmem:[%s13795_s17 + $0xe8] sm:$0xff] %v6990_v20  ;;  %v6992_v6 = vadd.f32 %v13791_v32, %v6850_v55 }
 0x726   : > { %7023 = vst [vmem:[%s13795_s17 + $0xf0] sm:$0xff] %v6991_v33 }
 0x727   : > { %7024 = vst [vmem:[%s13795_s17 + $0xf8] sm:$0xff] %v6992_v6 }
 0x728   : > { %10007 = shalt.err (!%p10004_p7)
}
 0x729   : > { %s10008_s20 = scalar_lea.hbm %s13861_s11, 4096  ;;  %s10012_s18 = scalar_lea.hbm %s13930_s7, 16384 }
 0x72a   : > { %p10009_p9 = scmp.ne.s32.totalorder %s13861_s11, %s10008_s20  ;;  %p10013_p12 = scmp.lt.u32.totalorder %s13861_s11, %s13930_s7 }
 0x72b   : > { %p10014_p13 = scmp.lt.u32.totalorder %s10012_s18, %s10008_s20  ;;  %p10016_p1 = scmp.lt.u32.totalorder %s10008_s20, %s13861_s11 }
 0x72c   : > { %p10010_p10 = pnand %p10009_p9, %p10185_p3 }
 0x72d   : > { %p10015_p0 = por %p10014_p13, %p10013_p12 }
 0x72e   : > { %p10011_p11 = pneg %p10010_p10 }
 0x72f   : > { %p10017_p2 = por %p10016_p1, %p10015_p0 }
 0x731   : > { %p10018_p4 = pnand %p10017_p2, %p10011_p11 }
 0x733   : > { %10021 = shalt.err (!%p10018_p4)
}
 0x734   : > { %s10092_s27 = smov 256   ;;  %s10093_s28 = smov 16  }
 0x735   : > { %9160 = dma.vmem_to_hbm [thread:$0]  (%p10185_p3), %s13863_s21, 4096, %s13861_s11, %s13871_s10, %s10092_s27, %s10092_s27, %s10093_s28  }
 0x736 PF: > { %p9166_p5 = scmp.ge.s32.totalorder %s10088_s8, 2  ;;  %s7057_s13 = sand.u32 1, %s10060_s24  }
 0x737   : > { %s7058_s23 = scalar_lea.sflag [#allocation3], %s7057_s13 }
 0x738   : > { %p9163_p6 = pnand %p9166_p5, %p10194_p8 }
 0x73a   : > { %10055 = dma.done.wait (!%p9163_p6), %s7058_s23, 4096  }
 0x73b   : > { %10057 = vsyncadd (!%p9163_p6), %s7058_s23, 4294963200  ;;  %s20_s8 = sadd.s32 1, %s10088_s8   ;;  %s14708_s28 = sld [smem:[#allocation5_spill]] }
 0x73c   : > { %p17_p7 = scmp.ge.s32.totalorder %s20_s8, 6   ;;  %s14709_s14 = sld [smem:[#allocation6_spill]] }
 0x73d   : > { %s14710_s30 = sld [smem:[#allocation7_spill]]  ;;  %s14711_s24 = smov %s10064_s25 }
 0x73e   : > { %s14712_s25 = smov %s10068_s26  ;;  %s14713_s26 = smov %s10203_s19 }
 0x73f   : > { %s14714_s27 = smov %s10080_s29  ;;  %19 = sbr.rel (!%p17_p7) target bundleno = 5 (0x5), region = 86 }
 0x742   : > { %s14715_s29 = smov %s14709_s14 }
 0x746   :  { %7063 = vsyncpa [#allocation3], 1 }
 0x747   :  { %7065 = vsyncpa [#allocation3 + $0x1], 1 }

</bundles_post_ra>
